<compile_context>
chip_gen: v6e
topology: v6e:2x2x1
jax: 0.10.0
libtpu: 0.0.40
codegen_flags: <defaults>
</compile_context>

<pallas_src>
import functools

import jax
import jax.numpy as jnp
from jax.experimental import pallas as pl
from jax.experimental.pallas import tpu as pltpu


def _round_up(x, m):
    return (x + m - 1) // m * m


# ----------------------------------------------------------------------------
# Pallas kernels
# ----------------------------------------------------------------------------
def _conv3x3_kernel(*refs, H, W, WP, fuse_input_bn_relu):
    """3x3 'same' conv over one NHWC image + per-channel batch stats.

    The zero-haloed input is kept as a flat 2-D buffer
        xs[r*WP + c + 1, ci] == xpad[r, c, ci]          (WP = W + 2)
    so tap (dy, dx) is the contiguous slice xs[dy*WP+dx : dy*WP+dx + H*WP] and
    each tap is one plain 2-D matmul (no strided-slice reshapes).
    Optionally applies relu(x*scale + shift) (the previous stage's BN+ReLU) to
    the input tile before the matmuls.
    """
    if fuse_input_bn_relu:
        (x_ref, scale_ref, shift_ref, w_ref,
         o_ref, ssum_ref, ssq_ref, xs_ref, acc_ref) = refs
    else:
        (x_ref, w_ref, o_ref, ssum_ref, ssq_ref, xs_ref, acc_ref) = refs
        scale_ref = shift_ref = None

    HWP = H * WP

    # Zero the halo and the stats accumulators once; the interior footprint is
    # identical every grid step, so the halo stays zero across iterations.
    @pl.when(pl.program_id(0) == 0)
    def _():
        xs_ref[...] = jnp.zeros_like(xs_ref)
        ssum_ref[...] = jnp.zeros_like(ssum_ref)
        ssq_ref[...] = jnp.zeros_like(ssq_ref)

    x = x_ref[0]                                        # (H, W, Cin) f32
    if fuse_input_bn_relu:
        # Previous-stage BatchNorm + ReLU, fused into this conv's input path.
        x = jnp.maximum(x * scale_ref[...] + shift_ref[...], 0.0)

    # Scatter input rows into the zero-haloed flat buffer:
    # input row i -> padded row i+1, padded cols 1..W.
    for i in range(H):
        start = (i + 1) * WP + 2
        xs_ref[start:start + W, :] = x[i]

    # 9 shifted matmuls on contiguous slices (bf16 operands, f32 accumulate).
    for t in range(9):
        dy, dx = t // 3, t % 3
        s = dy * WP + dx
        lhs = xs_ref[s:s + HWP, :].astype(jnp.bfloat16)
        contrib = jnp.dot(lhs, w_ref[t], preferred_element_type=jnp.float32)
        if t == 0:
            acc_ref[...] = contrib
        else:
            acc_ref[...] += contrib

    # Extract the W valid columns of every row (drop the halo columns).
    for h in range(H):
        a = h * WP + 1
        o_ref[0, h] = acc_ref[a:a + W, :]

    # Per-channel batch statistics for the *following* BatchNorm, folded into
    # this pass and accumulated across the batch grid axis.
    y = o_ref[0]                                        # (H, W, Cout) f32
    ssum_ref[...] += jnp.sum(jnp.sum(y, axis=0), axis=0, keepdims=True)
    ssq_ref[...] += jnp.sum(jnp.sum(y * y, axis=0), axis=0, keepdims=True)


def _bn_relu_kernel(x_ref, scale_ref, shift_ref, o_ref):
    """Final fused y = relu(x * scale + shift); scale/shift are per-channel."""
    o_ref[0] = jnp.maximum(x_ref[0] * scale_ref[...] + shift_ref[...], 0.0)


# ----------------------------------------------------------------------------
# pallas_call wrappers
# ----------------------------------------------------------------------------
def conv3x3_bn_pallas(x_nhwc, w_taps, scale=None, shift=None):
    """3x3 same conv (+ optional fused input BN+ReLU) + per-channel stats.

    x_nhwc : (N, H, W, Cin) f32
    w_taps : (9, Cin, Cout) f32, tap-major (dy*3+dx).  Conv bias is dropped:
             it cancels exactly under the train-mode BN that follows.
    scale/shift : optional (Cin,) — if given, relu(x*scale+shift) is applied to
             the input tile inside the kernel (previous stage's BN+ReLU).
    Returns (y, ssum, ssq): y (N,H,W,Cout) f32 raw conv output; ssum/ssq
             (1, Cout) per-channel sum and sum-of-squares of y over N*H*W.
    """
    N, H, W, Cin = x_nhwc.shape
    Cout = w_taps.shape[-1]
    WP = W + 2
    HWP = H * WP
    L = _round_up(HWP + 2 * WP + 2, 8)            # flat padded buffer length
    fuse = scale is not None

    kernel = functools.partial(_conv3x3_kernel, H=H, W=W, WP=WP,
                               fuse_input_bn_relu=fuse)

    in_specs = [pl.BlockSpec((1, H, W, Cin), lambda n: (n, 0, 0, 0))]
    inputs = [x_nhwc]
    if fuse:
        in_specs += [pl.BlockSpec((1, Cin), lambda n: (0, 0)),
                     pl.BlockSpec((1, Cin), lambda n: (0, 0))]
        inputs += [scale.reshape(1, Cin).astype(jnp.float32),
                   shift.reshape(1, Cin).astype(jnp.float32)]
    # Weights: bf16 feed for the MXU; constant block across the grid.
    in_specs += [pl.BlockSpec((9, Cin, Cout), lambda n: (0, 0, 0))]
    inputs += [w_taps.astype(jnp.bfloat16)]

    out_shape = (jax.ShapeDtypeStruct((N, H, W, Cout), jnp.float32),
                 jax.ShapeDtypeStruct((1, Cout), jnp.float32),
                 jax.ShapeDtypeStruct((1, Cout), jnp.float32))
    out_specs = [pl.BlockSpec((1, H, W, Cout), lambda n: (n, 0, 0, 0)),
                 pl.BlockSpec((1, Cout), lambda n: (0, 0)),
                 pl.BlockSpec((1, Cout), lambda n: (0, 0))]

    # VMEM budget: double-buffered in/out blocks + scratch, with headroom.
    block_bytes = (H * W * Cin * 4 + 2 * Cin * 4 + 9 * Cin * Cout * 2
                   + H * W * Cout * 4 + 2 * Cout * 4)
    scratch_bytes = L * Cin * 4 + HWP * Cout * 4
    vmem_limit = int(min(100 * 2**20,
                         max(32 * 2**20,
                             2 * block_bytes + scratch_bytes + (4 << 20))))

    y, ssum, ssq = pl.pallas_call(
        kernel,
        out_shape=out_shape,
        grid_spec=pltpu.PrefetchScalarGridSpec(
            num_scalar_prefetch=0,
            grid=(N,),
            in_specs=in_specs,
            out_specs=out_specs,
            scratch_shapes=[pltpu.VMEM((L, Cin), jnp.float32),      # padded input
                            pltpu.VMEM((HWP, Cout), jnp.float32)],  # f32 accumulator
        ),
        # "arbitrary": the stats outputs accumulate across the batch grid axis.
        compiler_params=pltpu.CompilerParams(
            dimension_semantics=("arbitrary",),
            vmem_limit_bytes=vmem_limit),
    )(*inputs)
    return y, ssum, ssq


def bn_relu_pallas(x_nhwc, scale, shift):
    """Final-stage fused BN+ReLU.  x_nhwc: (N,H,W,C); scale/shift: (C,)."""
    N, H, W, C = x_nhwc.shape
    vmem_limit = int(min(100 * 2**20,
                         max(32 * 2**20, 4 * H * W * C * 4 + (4 << 20))))
    return pl.pallas_call(
        _bn_relu_kernel,
        out_shape=jax.ShapeDtypeStruct((N, H, W, C), jnp.float32),
        grid_spec=pltpu.PrefetchScalarGridSpec(
            num_scalar_prefetch=0,
            grid=(N,),
            in_specs=[pl.BlockSpec((1, H, W, C), lambda n: (n, 0, 0, 0)),
                      pl.BlockSpec((1, C), lambda n: (0, 0)),
                      pl.BlockSpec((1, C), lambda n: (0, 0))],
            out_specs=pl.BlockSpec((1, H, W, C), lambda n: (n, 0, 0, 0)),
        ),
        compiler_params=pltpu.CompilerParams(
            dimension_semantics=("parallel",),
            vmem_limit_bytes=vmem_limit),
    )(x_nhwc, scale.reshape(1, C), shift.reshape(1, C))


# ----------------------------------------------------------------------------
# DoubleConv forward (use_resnet=False path)
# ----------------------------------------------------------------------------
def _bn_scale_shift(ssum, ssq, gamma, beta, count, eps=1e-5):
    """Train-mode BatchNorm scale/shift from accumulated sum / sum-of-squares."""
    mean = ssum[0] / count
    var = jnp.maximum(ssq[0] / count - mean * mean, 0.0)   # biased variance
    scale = gamma * jax.lax.rsqrt(var + eps)
    shift = beta - mean * scale
    return scale, shift


def double_conv_forward(x_nchw, params):
    # NCHW -> NHWC
    x = jnp.transpose(x_nchw, (0, 2, 3, 1)).astype(jnp.float32)
    N, H, W, _ = x.shape
    count = N * H * W

    # conv1 (BN1 batch-stat reduction folded into the same pass)
    y, s1, q1 = conv3x3_bn_pallas(x, params["w1"])
    scale1, shift1 = _bn_scale_shift(s1, q1, params["gamma1"], params["beta1"],
                                     count)

    # BN1+ReLU fused into conv2's input path; BN2 stats folded into conv2.
    z, s2, q2 = conv3x3_bn_pallas(y, params["w2"], scale1, shift1)
    scale2, shift2 = _bn_scale_shift(s2, q2, params["gamma2"], params["beta2"],
                                     count)

    # final BN2 + ReLU
    out = bn_relu_pallas(z, scale2, shift2)

    # NHWC -> NCHW to match the PyTorch output convention
    return jnp.transpose(out, (0, 3, 1, 2))


def init_params(key, in_ch, out_ch):
    k1, k2 = jax.random.split(key, 2)

    # PyTorch conv weight layout (Cout, Cin, 3, 3) -> tap-major (9, Cin, Cout)
    def to_taps(w_oihw):
        return jnp.transpose(w_oihw, (2, 3, 1, 0)).reshape(
            9, w_oihw.shape[1], w_oihw.shape[0])

    w1 = 0.1 * jax.random.normal(k1, (out_ch, in_ch, 3, 3), jnp.float32)
    w2 = 0.1 * jax.random.normal(k2, (out_ch, out_ch, 3, 3), jnp.float32)
    # NOTE: conv biases are omitted — each conv is immediately followed by a
    # train-mode BatchNorm, and BN(conv(x)+b) == BN(conv(x)) exactly.
    return {
        "w1": to_taps(w1),
        "w2": to_taps(w2),
        # BatchNorm2d affine params (PyTorch init: gamma=1, beta=0)
        "gamma1": jnp.ones((out_ch,), jnp.float32),
        "beta1": jnp.zeros((out_ch,), jnp.float32),
        "gamma2": jnp.ones((out_ch,), jnp.float32),
        "beta2": jnp.zeros((out_ch,), jnp.float32),
    }


if __name__ == "__main__":
    key = jax.random.PRNGKey(0)
    kx, kp = jax.random.split(key)

    N, C_in, C_out, H, W = 2, 4, 8, 16, 16
    x = jax.random.normal(kx, (N, C_in, H, W), jnp.float32)   # NCHW like PyTorch
    params = init_params(kp, C_in, C_out)

    out = jax.jit(double_conv_forward)(x, params)
    out = jax.block_until_ready(out)
    assert out.shape == (N, C_out, H, W), out.shape
    assert bool(jnp.all(out >= 0.0))   # final ReLU
    print("KERNEL_OK")
</pallas_src>

<mosaic_0001>
module attributes {stable_mosaic.version = 11 : i64} {
  func.func @_conv3x3_kernel(%arg0: i32, %arg1: memref<1x16x16x4xf32, #tpu.memory_space<vmem>>, %arg2: memref<9x4x8xbf16, #tpu.memory_space<vmem>>, %arg3: memref<1x16x16x8xf32, #tpu.memory_space<vmem>>, %arg4: memref<1x8xf32, #tpu.memory_space<vmem>>, %arg5: memref<1x8xf32, #tpu.memory_space<vmem>>, %arg6: memref<328x4xf32, #tpu.memory_space<vmem>>, %arg7: memref<288x8xf32, #tpu.memory_space<vmem>>) attributes {dimension_semantics = [#tpu.dimension_semantics<arbitrary>], iteration_bounds = array<i64: 2>, scalar_prefetch = 0 : i64, scratch_operands = 2 : i64, tpu.core_type = #tpu.core_type<tc>, window_params = [{transform_indices = @transform_0, window_bounds = array<i64: 1, 16, 16, 4>}, {pipeline_mode = #tpu.pipeline_mode<synchronous>, transform_indices = @transform_1, window_bounds = array<i64: 9, 4, 8>}, {transform_indices = @transform_2, window_bounds = array<i64: 1, 16, 16, 8>}, {pipeline_mode = #tpu.pipeline_mode<synchronous>, transform_indices = @transform_3, window_bounds = array<i64: 1, 8>}, {pipeline_mode = #tpu.pipeline_mode<synchronous>, transform_indices = @transform_4, window_bounds = array<i64: 1, 8>}]} {
    %c0_i32 = arith.constant 0 : i32
    %0 = arith.cmpi eq, %arg0, %c0_i32 : i32
    %1 = arith.extui %0 : i1 to i32
    %c0_i32_0 = arith.constant 0 : i32
    %2 = arith.cmpi ne, %1, %c0_i32_0 : i32
    scf.if %2 {
      %cst_187 = arith.constant 0.000000e+00 : f32
      %202 = vector.broadcast %cst_187 : f32 to vector<328x4xf32>
      %c0_188 = arith.constant 0 : index
      %c0_189 = arith.constant 0 : index
      %203 = vector.load %arg6[%c0_188, %c0_189] : memref<328x4xf32, #tpu.memory_space<vmem>>, vector<328x4xf32>
      tpu.vector_store %arg6[%c0_188, %c0_189], %202 {strides = array<i32>} : memref<328x4xf32, #tpu.memory_space<vmem>>, vector<328x4xf32>,
      %cst_190 = arith.constant 0.000000e+00 : f32
      %204 = vector.broadcast %cst_190 : f32 to vector<1x8xf32>
      %c0_191 = arith.constant 0 : index
      %c0_192 = arith.constant 0 : index
      %205 = vector.load %arg4[%c0_191, %c0_192] : memref<1x8xf32, #tpu.memory_space<vmem>>, vector<1x8xf32>
      tpu.vector_store %arg4[%c0_191, %c0_192], %204 {strides = array<i32>} : memref<1x8xf32, #tpu.memory_space<vmem>>, vector<1x8xf32>,
      %cst_193 = arith.constant 0.000000e+00 : f32
      %206 = vector.broadcast %cst_193 : f32 to vector<1x8xf32>
      %c0_194 = arith.constant 0 : index
      %c0_195 = arith.constant 0 : index
      %207 = vector.load %arg5[%c0_194, %c0_195] : memref<1x8xf32, #tpu.memory_space<vmem>>, vector<1x8xf32>
      tpu.vector_store %arg5[%c0_194, %c0_195], %206 {strides = array<i32>} : memref<1x8xf32, #tpu.memory_space<vmem>>, vector<1x8xf32>,
    } else {
    }
    %c0 = arith.constant 0 : index
    %c0_1 = arith.constant 0 : index
    %c0_2 = arith.constant 0 : index
    %c0_3 = arith.constant 0 : index
    %3 = vector.load %arg1[%c0, %c0_1, %c0_2, %c0_3] : memref<1x16x16x4xf32, #tpu.memory_space<vmem>>, vector<1x16x16x4xf32>
    %4 = vector.shape_cast %3 : vector<1x16x16x4xf32> to vector<16x16x4xf32>
    %5 = vector.extract_strided_slice %4 {offsets = [0, 0, 0], sizes = [1, 16, 4], strides = [1, 1, 1]} : vector<16x16x4xf32> to vector<1x16x4xf32>
    %6 = vector.shape_cast %5 : vector<1x16x4xf32> to vector<16x4xf32>
    %c20 = arith.constant 20 : index
    %c0_4 = arith.constant 0 : index
    %7 = vector.load %arg6[%c20, %c0_4] : memref<328x4xf32, #tpu.memory_space<vmem>>, vector<16x4xf32>
    tpu.vector_store %arg6[%c20, %c0_4], %6 {strides = array<i32>} : memref<328x4xf32, #tpu.memory_space<vmem>>, vector<16x4xf32>,
    %8 = vector.extract_strided_slice %4 {offsets = [1, 0, 0], sizes = [1, 16, 4], strides = [1, 1, 1]} : vector<16x16x4xf32> to vector<1x16x4xf32>
    %9 = vector.shape_cast %8 : vector<1x16x4xf32> to vector<16x4xf32>
    %c38 = arith.constant 38 : index
    %c0_5 = arith.constant 0 : index
    %10 = vector.load %arg6[%c38, %c0_5] : memref<328x4xf32, #tpu.memory_space<vmem>>, vector<16x4xf32>
    tpu.vector_store %arg6[%c38, %c0_5], %9 {strides = array<i32>} : memref<328x4xf32, #tpu.memory_space<vmem>>, vector<16x4xf32>,
    %11 = vector.extract_strided_slice %4 {offsets = [2, 0, 0], sizes = [1, 16, 4], strides = [1, 1, 1]} : vector<16x16x4xf32> to vector<1x16x4xf32>
    %12 = vector.shape_cast %11 : vector<1x16x4xf32> to vector<16x4xf32>
    %c56 = arith.constant 56 : index
    %c0_6 = arith.constant 0 : index
    %13 = vector.load %arg6[%c56, %c0_6] : memref<328x4xf32, #tpu.memory_space<vmem>>, vector<16x4xf32>
    tpu.vector_store %arg6[%c56, %c0_6], %12 {strides = array<i32>} : memref<328x4xf32, #tpu.memory_space<vmem>>, vector<16x4xf32>,
    %14 = vector.extract_strided_slice %4 {offsets = [3, 0, 0], sizes = [1, 16, 4], strides = [1, 1, 1]} : vector<16x16x4xf32> to vector<1x16x4xf32>
    %15 = vector.shape_cast %14 : vector<1x16x4xf32> to vector<16x4xf32>
    %c74 = arith.constant 74 : index
    %c0_7 = arith.constant 0 : index
    %16 = vector.load %arg6[%c74, %c0_7] : memref<328x4xf32, #tpu.memory_space<vmem>>, vector<16x4xf32>
    tpu.vector_store %arg6[%c74, %c0_7], %15 {strides = array<i32>} : memref<328x4xf32, #tpu.memory_space<vmem>>, vector<16x4xf32>,
    %17 = vector.extract_strided_slice %4 {offsets = [4, 0, 0], sizes = [1, 16, 4], strides = [1, 1, 1]} : vector<16x16x4xf32> to vector<1x16x4xf32>
    %18 = vector.shape_cast %17 : vector<1x16x4xf32> to vector<16x4xf32>
    %c92 = arith.constant 92 : index
    %c0_8 = arith.constant 0 : index
    %19 = vector.load %arg6[%c92, %c0_8] : memref<328x4xf32, #tpu.memory_space<vmem>>, vector<16x4xf32>
    tpu.vector_store %arg6[%c92, %c0_8], %18 {strides = array<i32>} : memref<328x4xf32, #tpu.memory_space<vmem>>, vector<16x4xf32>,
    %20 = vector.extract_strided_slice %4 {offsets = [5, 0, 0], sizes = [1, 16, 4], strides = [1, 1, 1]} : vector<16x16x4xf32> to vector<1x16x4xf32>
    %21 = vector.shape_cast %20 : vector<1x16x4xf32> to vector<16x4xf32>
    %c110 = arith.constant 110 : index
    %c0_9 = arith.constant 0 : index
    %22 = vector.load %arg6[%c110, %c0_9] : memref<328x4xf32, #tpu.memory_space<vmem>>, vector<16x4xf32>
    tpu.vector_store %arg6[%c110, %c0_9], %21 {strides = array<i32>} : memref<328x4xf32, #tpu.memory_space<vmem>>, vector<16x4xf32>,
    %23 = vector.extract_strided_slice %4 {offsets = [6, 0, 0], sizes = [1, 16, 4], strides = [1, 1, 1]} : vector<16x16x4xf32> to vector<1x16x4xf32>
    %24 = vector.shape_cast %23 : vector<1x16x4xf32> to vector<16x4xf32>
    %c128 = arith.constant 128 : index
    %c0_10 = arith.constant 0 : index
    %25 = vector.load %arg6[%c128, %c0_10] : memref<328x4xf32, #tpu.memory_space<vmem>>, vector<16x4xf32>
    tpu.vector_store %arg6[%c128, %c0_10], %24 {strides = array<i32>} : memref<328x4xf32, #tpu.memory_space<vmem>>, vector<16x4xf32>,
    %26 = vector.extract_strided_slice %4 {offsets = [7, 0, 0], sizes = [1, 16, 4], strides = [1, 1, 1]} : vector<16x16x4xf32> to vector<1x16x4xf32>
    %27 = vector.shape_cast %26 : vector<1x16x4xf32> to vector<16x4xf32>
    %c146 = arith.constant 146 : index
    %c0_11 = arith.constant 0 : index
    %28 = vector.load %arg6[%c146, %c0_11] : memref<328x4xf32, #tpu.memory_space<vmem>>, vector<16x4xf32>
    tpu.vector_store %arg6[%c146, %c0_11], %27 {strides = array<i32>} : memref<328x4xf32, #tpu.memory_space<vmem>>, vector<16x4xf32>,
    %29 = vector.extract_strided_slice %4 {offsets = [8, 0, 0], sizes = [1, 16, 4], strides = [1, 1, 1]} : vector<16x16x4xf32> to vector<1x16x4xf32>
    %30 = vector.shape_cast %29 : vector<1x16x4xf32> to vector<16x4xf32>
    %c164 = arith.constant 164 : index
    %c0_12 = arith.constant 0 : index
    %31 = vector.load %arg6[%c164, %c0_12] : memref<328x4xf32, #tpu.memory_space<vmem>>, vector<16x4xf32>
    tpu.vector_store %arg6[%c164, %c0_12], %30 {strides = array<i32>} : memref<328x4xf32, #tpu.memory_space<vmem>>, vector<16x4xf32>,
    %32 = vector.extract_strided_slice %4 {offsets = [9, 0, 0], sizes = [1, 16, 4], strides = [1, 1, 1]} : vector<16x16x4xf32> to vector<1x16x4xf32>
    %33 = vector.shape_cast %32 : vector<1x16x4xf32> to vector<16x4xf32>
    %c182 = arith.constant 182 : index
    %c0_13 = arith.constant 0 : index
    %34 = vector.load %arg6[%c182, %c0_13] : memref<328x4xf32, #tpu.memory_space<vmem>>, vector<16x4xf32>
    tpu.vector_store %arg6[%c182, %c0_13], %33 {strides = array<i32>} : memref<328x4xf32, #tpu.memory_space<vmem>>, vector<16x4xf32>,
    %35 = vector.extract_strided_slice %4 {offsets = [10, 0, 0], sizes = [1, 16, 4], strides = [1, 1, 1]} : vector<16x16x4xf32> to vector<1x16x4xf32>
    %36 = vector.shape_cast %35 : vector<1x16x4xf32> to vector<16x4xf32>
    %c200 = arith.constant 200 : index
    %c0_14 = arith.constant 0 : index
    %37 = vector.load %arg6[%c200, %c0_14] : memref<328x4xf32, #tpu.memory_space<vmem>>, vector<16x4xf32>
    tpu.vector_store %arg6[%c200, %c0_14], %36 {strides = array<i32>} : memref<328x4xf32, #tpu.memory_space<vmem>>, vector<16x4xf32>,
    %38 = vector.extract_strided_slice %4 {offsets = [11, 0, 0], sizes = [1, 16, 4], strides = [1, 1, 1]} : vector<16x16x4xf32> to vector<1x16x4xf32>
    %39 = vector.shape_cast %38 : vector<1x16x4xf32> to vector<16x4xf32>
    %c218 = arith.constant 218 : index
    %c0_15 = arith.constant 0 : index
    %40 = vector.load %arg6[%c218, %c0_15] : memref<328x4xf32, #tpu.memory_space<vmem>>, vector<16x4xf32>
    tpu.vector_store %arg6[%c218, %c0_15], %39 {strides = array<i32>} : memref<328x4xf32, #tpu.memory_space<vmem>>, vector<16x4xf32>,
    %41 = vector.extract_strided_slice %4 {offsets = [12, 0, 0], sizes = [1, 16, 4], strides = [1, 1, 1]} : vector<16x16x4xf32> to vector<1x16x4xf32>
    %42 = vector.shape_cast %41 : vector<1x16x4xf32> to vector<16x4xf32>
    %c236 = arith.constant 236 : index
    %c0_16 = arith.constant 0 : index
    %43 = vector.load %arg6[%c236, %c0_16] : memref<328x4xf32, #tpu.memory_space<vmem>>, vector<16x4xf32>
    tpu.vector_store %arg6[%c236, %c0_16], %42 {strides = array<i32>} : memref<328x4xf32, #tpu.memory_space<vmem>>, vector<16x4xf32>,
    %44 = vector.extract_strided_slice %4 {offsets = [13, 0, 0], sizes = [1, 16, 4], strides = [1, 1, 1]} : vector<16x16x4xf32> to vector<1x16x4xf32>
    %45 = vector.shape_cast %44 : vector<1x16x4xf32> to vector<16x4xf32>
    %c254 = arith.constant 254 : index
    %c0_17 = arith.constant 0 : index
    %46 = vector.load %arg6[%c254, %c0_17] : memref<328x4xf32, #tpu.memory_space<vmem>>, vector<16x4xf32>
    tpu.vector_store %arg6[%c254, %c0_17], %45 {strides = array<i32>} : memref<328x4xf32, #tpu.memory_space<vmem>>, vector<16x4xf32>,
    %47 = vector.extract_strided_slice %4 {offsets = [14, 0, 0], sizes = [1, 16, 4], strides = [1, 1, 1]} : vector<16x16x4xf32> to vector<1x16x4xf32>
    %48 = vector.shape_cast %47 : vector<1x16x4xf32> to vector<16x4xf32>
    %c272 = arith.constant 272 : index
    %c0_18 = arith.constant 0 : index
    %49 = vector.load %arg6[%c272, %c0_18] : memref<328x4xf32, #tpu.memory_space<vmem>>, vector<16x4xf32>
    tpu.vector_store %arg6[%c272, %c0_18], %48 {strides = array<i32>} : memref<328x4xf32, #tpu.memory_space<vmem>>, vector<16x4xf32>,
    %50 = vector.extract_strided_slice %4 {offsets = [15, 0, 0], sizes = [1, 16, 4], strides = [1, 1, 1]} : vector<16x16x4xf32> to vector<1x16x4xf32>
    %51 = vector.shape_cast %50 : vector<1x16x4xf32> to vector<16x4xf32>
    %c290 = arith.constant 290 : index
    %c0_19 = arith.constant 0 : index
    %52 = vector.load %arg6[%c290, %c0_19] : memref<328x4xf32, #tpu.memory_space<vmem>>, vector<16x4xf32>
    tpu.vector_store %arg6[%c290, %c0_19], %51 {strides = array<i32>} : memref<328x4xf32, #tpu.memory_space<vmem>>, vector<16x4xf32>,
    %c0_20 = arith.constant 0 : index
    %c0_21 = arith.constant 0 : index
    %53 = vector.load %arg6[%c0_20, %c0_21] : memref<328x4xf32, #tpu.memory_space<vmem>>, vector<288x4xf32>
    %54 = arith.truncf %53 : vector<288x4xf32> to vector<288x4xbf16>
    %c0_22 = arith.constant 0 : index
    %c0_23 = arith.constant 0 : index
    %c0_24 = arith.constant 0 : index
    %55 = vector.load %arg2[%c0_22, %c0_23, %c0_24] : memref<9x4x8xbf16, #tpu.memory_space<vmem>>, vector<1x4x8xbf16>
    %56 = vector.shape_cast %55 : vector<1x4x8xbf16> to vector<4x8xbf16>
    %cst = arith.constant dense<0.000000e+00> : vector<288x8xf32>
    %57 = tpu.matmul %54, %56, %cst {dimension_numbers = #tpu.dot_dimension_numbers<[1], [0], [0], [1], [0, 0, 1, 1], [], []>} : vector<288x4xbf16>, vector<4x8xbf16>, vector<288x8xf32> -> vector<288x8xf32>
    %c0_25 = arith.constant 0 : index
    %c0_26 = arith.constant 0 : index
    %58 = vector.load %arg7[%c0_25, %c0_26] : memref<288x8xf32, #tpu.memory_space<vmem>>, vector<288x8xf32>
    tpu.vector_store %arg7[%c0_25, %c0_26], %57 {strides = array<i32>} : memref<288x8xf32, #tpu.memory_space<vmem>>, vector<288x8xf32>,
    %c1 = arith.constant 1 : index
    %c0_27 = arith.constant 0 : index
    %59 = vector.load %arg6[%c1, %c0_27] : memref<328x4xf32, #tpu.memory_space<vmem>>, vector<288x4xf32>
    %60 = arith.truncf %59 : vector<288x4xf32> to vector<288x4xbf16>
    %c1_28 = arith.constant 1 : index
    %c0_29 = arith.constant 0 : index
    %c0_30 = arith.constant 0 : index
    %61 = vector.load %arg2[%c1_28, %c0_29, %c0_30] : memref<9x4x8xbf16, #tpu.memory_space<vmem>>, vector<1x4x8xbf16>
    %62 = vector.shape_cast %61 : vector<1x4x8xbf16> to vector<4x8xbf16>
    %cst_31 = arith.constant dense<0.000000e+00> : vector<288x8xf32>
    %63 = tpu.matmul %60, %62, %cst_31 {dimension_numbers = #tpu.dot_dimension_numbers<[1], [0], [0], [1], [0, 0, 1, 1], [], []>} : vector<288x4xbf16>, vector<4x8xbf16>, vector<288x8xf32> -> vector<288x8xf32>
    %c0_32 = arith.constant 0 : index
    %c0_33 = arith.constant 0 : index
    %64 = vector.load %arg7[%c0_32, %c0_33] : memref<288x8xf32, #tpu.memory_space<vmem>>, vector<288x8xf32>
    %65 = arith.addf %64, %63 : vector<288x8xf32>
    %c0_34 = arith.constant 0 : index
    %c0_35 = arith.constant 0 : index
    %66 = vector.load %arg7[%c0_34, %c0_35] : memref<288x8xf32, #tpu.memory_space<vmem>>, vector<288x8xf32>
    tpu.vector_store %arg7[%c0_34, %c0_35], %65 {strides = array<i32>} : memref<288x8xf32, #tpu.memory_space<vmem>>, vector<288x8xf32>,
    %c2 = arith.constant 2 : index
    %c0_36 = arith.constant 0 : index
    %67 = vector.load %arg6[%c2, %c0_36] : memref<328x4xf32, #tpu.memory_space<vmem>>, vector<288x4xf32>
    %68 = arith.truncf %67 : vector<288x4xf32> to vector<288x4xbf16>
    %c2_37 = arith.constant 2 : index
    %c0_38 = arith.constant 0 : index
    %c0_39 = arith.constant 0 : index
    %69 = vector.load %arg2[%c2_37, %c0_38, %c0_39] : memref<9x4x8xbf16, #tpu.memory_space<vmem>>, vector<1x4x8xbf16>
    %70 = vector.shape_cast %69 : vector<1x4x8xbf16> to vector<4x8xbf16>
    %cst_40 = arith.constant dense<0.000000e+00> : vector<288x8xf32>
    %71 = tpu.matmul %68, %70, %cst_40 {dimension_numbers = #tpu.dot_dimension_numbers<[1], [0], [0], [1], [0, 0, 1, 1], [], []>} : vector<288x4xbf16>, vector<4x8xbf16>, vector<288x8xf32> -> vector<288x8xf32>
    %c0_41 = arith.constant 0 : index
    %c0_42 = arith.constant 0 : index
    %72 = vector.load %arg7[%c0_41, %c0_42] : memref<288x8xf32, #tpu.memory_space<vmem>>, vector<288x8xf32>
    %73 = arith.addf %72, %71 : vector<288x8xf32>
    %c0_43 = arith.constant 0 : index
    %c0_44 = arith.constant 0 : index
    %74 = vector.load %arg7[%c0_43, %c0_44] : memref<288x8xf32, #tpu.memory_space<vmem>>, vector<288x8xf32>
    tpu.vector_store %arg7[%c0_43, %c0_44], %73 {strides = array<i32>} : memref<288x8xf32, #tpu.memory_space<vmem>>, vector<288x8xf32>,
    %c18 = arith.constant 18 : index
    %c0_45 = arith.constant 0 : index
    %75 = vector.load %arg6[%c18, %c0_45] : memref<328x4xf32, #tpu.memory_space<vmem>>, vector<288x4xf32>
    %76 = arith.truncf %75 : vector<288x4xf32> to vector<288x4xbf16>
    %c3 = arith.constant 3 : index
    %c0_46 = arith.constant 0 : index
    %c0_47 = arith.constant 0 : index
    %77 = vector.load %arg2[%c3, %c0_46, %c0_47] : memref<9x4x8xbf16, #tpu.memory_space<vmem>>, vector<1x4x8xbf16>
    %78 = vector.shape_cast %77 : vector<1x4x8xbf16> to vector<4x8xbf16>
    %cst_48 = arith.constant dense<0.000000e+00> : vector<288x8xf32>
    %79 = tpu.matmul %76, %78, %cst_48 {dimension_numbers = #tpu.dot_dimension_numbers<[1], [0], [0], [1], [0, 0, 1, 1], [], []>} : vector<288x4xbf16>, vector<4x8xbf16>, vector<288x8xf32> -> vector<288x8xf32>
    %c0_49 = arith.constant 0 : index
    %c0_50 = arith.constant 0 : index
    %80 = vector.load %arg7[%c0_49, %c0_50] : memref<288x8xf32, #tpu.memory_space<vmem>>, vector<288x8xf32>
    %81 = arith.addf %80, %79 : vector<288x8xf32>
    %c0_51 = arith.constant 0 : index
    %c0_52 = arith.constant 0 : index
    %82 = vector.load %arg7[%c0_51, %c0_52] : memref<288x8xf32, #tpu.memory_space<vmem>>, vector<288x8xf32>
    tpu.vector_store %arg7[%c0_51, %c0_52], %81 {strides = array<i32>} : memref<288x8xf32, #tpu.memory_space<vmem>>, vector<288x8xf32>,
    %c19 = arith.constant 19 : index
    %c0_53 = arith.constant 0 : index
    %83 = vector.load %arg6[%c19, %c0_53] : memref<328x4xf32, #tpu.memory_space<vmem>>, vector<288x4xf32>
    %84 = arith.truncf %83 : vector<288x4xf32> to vector<288x4xbf16>
    %c4 = arith.constant 4 : index
    %c0_54 = arith.constant 0 : index
    %c0_55 = arith.constant 0 : index
    %85 = vector.load %arg2[%c4, %c0_54, %c0_55] : memref<9x4x8xbf16, #tpu.memory_space<vmem>>, vector<1x4x8xbf16>
    %86 = vector.shape_cast %85 : vector<1x4x8xbf16> to vector<4x8xbf16>
    %cst_56 = arith.constant dense<0.000000e+00> : vector<288x8xf32>
    %87 = tpu.matmul %84, %86, %cst_56 {dimension_numbers = #tpu.dot_dimension_numbers<[1], [0], [0], [1], [0, 0, 1, 1], [], []>} : vector<288x4xbf16>, vector<4x8xbf16>, vector<288x8xf32> -> vector<288x8xf32>
    %c0_57 = arith.constant 0 : index
    %c0_58 = arith.constant 0 : index
    %88 = vector.load %arg7[%c0_57, %c0_58] : memref<288x8xf32, #tpu.memory_space<vmem>>, vector<288x8xf32>
    %89 = arith.addf %88, %87 : vector<288x8xf32>
    %c0_59 = arith.constant 0 : index
    %c0_60 = arith.constant 0 : index
    %90 = vector.load %arg7[%c0_59, %c0_60] : memref<288x8xf32, #tpu.memory_space<vmem>>, vector<288x8xf32>
    tpu.vector_store %arg7[%c0_59, %c0_60], %89 {strides = array<i32>} : memref<288x8xf32, #tpu.memory_space<vmem>>, vector<288x8xf32>,
    %c20_61 = arith.constant 20 : index
    %c0_62 = arith.constant 0 : index
    %91 = vector.load %arg6[%c20_61, %c0_62] : memref<328x4xf32, #tpu.memory_space<vmem>>, vector<288x4xf32>
    %92 = arith.truncf %91 : vector<288x4xf32> to vector<288x4xbf16>
    %c5 = arith.constant 5 : index
    %c0_63 = arith.constant 0 : index
    %c0_64 = arith.constant 0 : index
    %93 = vector.load %arg2[%c5, %c0_63, %c0_64] : memref<9x4x8xbf16, #tpu.memory_space<vmem>>, vector<1x4x8xbf16>
    %94 = vector.shape_cast %93 : vector<1x4x8xbf16> to vector<4x8xbf16>
    %cst_65 = arith.constant dense<0.000000e+00> : vector<288x8xf32>
    %95 = tpu.matmul %92, %94, %cst_65 {dimension_numbers = #tpu.dot_dimension_numbers<[1], [0], [0], [1], [0, 0, 1, 1], [], []>} : vector<288x4xbf16>, vector<4x8xbf16>, vector<288x8xf32> -> vector<288x8xf32>
    %c0_66 = arith.constant 0 : index
    %c0_67 = arith.constant 0 : index
    %96 = vector.load %arg7[%c0_66, %c0_67] : memref<288x8xf32, #tpu.memory_space<vmem>>, vector<288x8xf32>
    %97 = arith.addf %96, %95 : vector<288x8xf32>
    %c0_68 = arith.constant 0 : index
    %c0_69 = arith.constant 0 : index
    %98 = vector.load %arg7[%c0_68, %c0_69] : memref<288x8xf32, #tpu.memory_space<vmem>>, vector<288x8xf32>
    tpu.vector_store %arg7[%c0_68, %c0_69], %97 {strides = array<i32>} : memref<288x8xf32, #tpu.memory_space<vmem>>, vector<288x8xf32>,
    %c36 = arith.constant 36 : index
    %c0_70 = arith.constant 0 : index
    %99 = vector.load %arg6[%c36, %c0_70] : memref<328x4xf32, #tpu.memory_space<vmem>>, vector<288x4xf32>
    %100 = arith.truncf %99 : vector<288x4xf32> to vector<288x4xbf16>
    %c6 = arith.constant 6 : index
    %c0_71 = arith.constant 0 : index
    %c0_72 = arith.constant 0 : index
    %101 = vector.load %arg2[%c6, %c0_71, %c0_72] : memref<9x4x8xbf16, #tpu.memory_space<vmem>>, vector<1x4x8xbf16>
    %102 = vector.shape_cast %101 : vector<1x4x8xbf16> to vector<4x8xbf16>
    %cst_73 = arith.constant dense<0.000000e+00> : vector<288x8xf32>
    %103 = tpu.matmul %100, %102, %cst_73 {dimension_numbers = #tpu.dot_dimension_numbers<[1], [0], [0], [1], [0, 0, 1, 1], [], []>} : vector<288x4xbf16>, vector<4x8xbf16>, vector<288x8xf32> -> vector<288x8xf32>
    %c0_74 = arith.constant 0 : index
    %c0_75 = arith.constant 0 : index
    %104 = vector.load %arg7[%c0_74, %c0_75] : memref<288x8xf32, #tpu.memory_space<vmem>>, vector<288x8xf32>
    %105 = arith.addf %104, %103 : vector<288x8xf32>
    %c0_76 = arith.constant 0 : index
    %c0_77 = arith.constant 0 : index
    %106 = vector.load %arg7[%c0_76, %c0_77] : memref<288x8xf32, #tpu.memory_space<vmem>>, vector<288x8xf32>
    tpu.vector_store %arg7[%c0_76, %c0_77], %105 {strides = array<i32>} : memref<288x8xf32, #tpu.memory_space<vmem>>, vector<288x8xf32>,
    %c37 = arith.constant 37 : index
    %c0_78 = arith.constant 0 : index
    %107 = vector.load %arg6[%c37, %c0_78] : memref<328x4xf32, #tpu.memory_space<vmem>>, vector<288x4xf32>
    %108 = arith.truncf %107 : vector<288x4xf32> to vector<288x4xbf16>
    %c7 = arith.constant 7 : index
    %c0_79 = arith.constant 0 : index
    %c0_80 = arith.constant 0 : index
    %109 = vector.load %arg2[%c7, %c0_79, %c0_80] : memref<9x4x8xbf16, #tpu.memory_space<vmem>>, vector<1x4x8xbf16>
    %110 = vector.shape_cast %109 : vector<1x4x8xbf16> to vector<4x8xbf16>
    %cst_81 = arith.constant dense<0.000000e+00> : vector<288x8xf32>
    %111 = tpu.matmul %108, %110, %cst_81 {dimension_numbers = #tpu.dot_dimension_numbers<[1], [0], [0], [1], [0, 0, 1, 1], [], []>} : vector<288x4xbf16>, vector<4x8xbf16>, vector<288x8xf32> -> vector<288x8xf32>
    %c0_82 = arith.constant 0 : index
    %c0_83 = arith.constant 0 : index
    %112 = vector.load %arg7[%c0_82, %c0_83] : memref<288x8xf32, #tpu.memory_space<vmem>>, vector<288x8xf32>
    %113 = arith.addf %112, %111 : vector<288x8xf32>
    %c0_84 = arith.constant 0 : index
    %c0_85 = arith.constant 0 : index
    %114 = vector.load %arg7[%c0_84, %c0_85] : memref<288x8xf32, #tpu.memory_space<vmem>>, vector<288x8xf32>
    tpu.vector_store %arg7[%c0_84, %c0_85], %113 {strides = array<i32>} : memref<288x8xf32, #tpu.memory_space<vmem>>, vector<288x8xf32>,
    %c38_86 = arith.constant 38 : index
    %c0_87 = arith.constant 0 : index
    %115 = vector.load %arg6[%c38_86, %c0_87] : memref<328x4xf32, #tpu.memory_space<vmem>>, vector<288x4xf32>
    %116 = arith.truncf %115 : vector<288x4xf32> to vector<288x4xbf16>
    %c8 = arith.constant 8 : index
    %c0_88 = arith.constant 0 : index
    %c0_89 = arith.constant 0 : index
    %117 = vector.load %arg2[%c8, %c0_88, %c0_89] : memref<9x4x8xbf16, #tpu.memory_space<vmem>>, vector<1x4x8xbf16>
    %118 = vector.shape_cast %117 : vector<1x4x8xbf16> to vector<4x8xbf16>
    %cst_90 = arith.constant dense<0.000000e+00> : vector<288x8xf32>
    %119 = tpu.matmul %116, %118, %cst_90 {dimension_numbers = #tpu.dot_dimension_numbers<[1], [0], [0], [1], [0, 0, 1, 1], [], []>} : vector<288x4xbf16>, vector<4x8xbf16>, vector<288x8xf32> -> vector<288x8xf32>
    %c0_91 = arith.constant 0 : index
    %c0_92 = arith.constant 0 : index
    %120 = vector.load %arg7[%c0_91, %c0_92] : memref<288x8xf32, #tpu.memory_space<vmem>>, vector<288x8xf32>
    %121 = arith.addf %120, %119 : vector<288x8xf32>
    %c0_93 = arith.constant 0 : index
    %c0_94 = arith.constant 0 : index
    %122 = vector.load %arg7[%c0_93, %c0_94] : memref<288x8xf32, #tpu.memory_space<vmem>>, vector<288x8xf32>
    tpu.vector_store %arg7[%c0_93, %c0_94], %121 {strides = array<i32>} : memref<288x8xf32, #tpu.memory_space<vmem>>, vector<288x8xf32>,
    %c1_95 = arith.constant 1 : index
    %c0_96 = arith.constant 0 : index
    %123 = vector.load %arg7[%c1_95, %c0_96] : memref<288x8xf32, #tpu.memory_space<vmem>>, vector<16x8xf32>
    %c0_97 = arith.constant 0 : index
    %c0_98 = arith.constant 0 : index
    %c0_99 = arith.constant 0 : index
    %c0_100 = arith.constant 0 : index
    %124 = vector.load %arg3[%c0_97, %c0_98, %c0_99, %c0_100] : memref<1x16x16x8xf32, #tpu.memory_space<vmem>>, vector<1x1x16x8xf32>
    %125 = vector.shape_cast %124 : vector<1x1x16x8xf32> to vector<16x8xf32>
    %126 = vector.shape_cast %123 : vector<16x8xf32> to vector<1x1x16x8xf32>
    tpu.vector_store %arg3[%c0_97, %c0_98, %c0_99, %c0_100], %126 {strides = array<i32>} : memref<1x16x16x8xf32, #tpu.memory_space<vmem>>, vector<1x1x16x8xf32>,
    %c19_101 = arith.constant 19 : index
    %c0_102 = arith.constant 0 : index
    %127 = vector.load %arg7[%c19_101, %c0_102] : memref<288x8xf32, #tpu.memory_space<vmem>>, vector<16x8xf32>
    %c0_103 = arith.constant 0 : index
    %c1_104 = arith.constant 1 : index
    %c0_105 = arith.constant 0 : index
    %c0_106 = arith.constant 0 : index
    %128 = vector.load %arg3[%c0_103, %c1_104, %c0_105, %c0_106] : memref<1x16x16x8xf32, #tpu.memory_space<vmem>>, vector<1x1x16x8xf32>
    %129 = vector.shape_cast %128 : vector<1x1x16x8xf32> to vector<16x8xf32>
    %130 = vector.shape_cast %127 : vector<16x8xf32> to vector<1x1x16x8xf32>
    tpu.vector_store %arg3[%c0_103, %c1_104, %c0_105, %c0_106], %130 {strides = array<i32>} : memref<1x16x16x8xf32, #tpu.memory_space<vmem>>, vector<1x1x16x8xf32>,
    %c37_107 = arith.constant 37 : index
    %c0_108 = arith.constant 0 : index
    %131 = vector.load %arg7[%c37_107, %c0_108] : memref<288x8xf32, #tpu.memory_space<vmem>>, vector<16x8xf32>
    %c0_109 = arith.constant 0 : index
    %c2_110 = arith.constant 2 : index
    %c0_111 = arith.constant 0 : index
    %c0_112 = arith.constant 0 : index
    %132 = vector.load %arg3[%c0_109, %c2_110, %c0_111, %c0_112] : memref<1x16x16x8xf32, #tpu.memory_space<vmem>>, vector<1x1x16x8xf32>
    %133 = vector.shape_cast %132 : vector<1x1x16x8xf32> to vector<16x8xf32>
    %134 = vector.shape_cast %131 : vector<16x8xf32> to vector<1x1x16x8xf32>
    tpu.vector_store %arg3[%c0_109, %c2_110, %c0_111, %c0_112], %134 {strides = array<i32>} : memref<1x16x16x8xf32, #tpu.memory_space<vmem>>, vector<1x1x16x8xf32>,
    %c55 = arith.constant 55 : index
    %c0_113 = arith.constant 0 : index
    %135 = vector.load %arg7[%c55, %c0_113] : memref<288x8xf32, #tpu.memory_space<vmem>>, vector<16x8xf32>
    %c0_114 = arith.constant 0 : index
    %c3_115 = arith.constant 3 : index
    %c0_116 = arith.constant 0 : index
    %c0_117 = arith.constant 0 : index
    %136 = vector.load %arg3[%c0_114, %c3_115, %c0_116, %c0_117] : memref<1x16x16x8xf32, #tpu.memory_space<vmem>>, vector<1x1x16x8xf32>
    %137 = vector.shape_cast %136 : vector<1x1x16x8xf32> to vector<16x8xf32>
    %138 = vector.shape_cast %135 : vector<16x8xf32> to vector<1x1x16x8xf32>
    tpu.vector_store %arg3[%c0_114, %c3_115, %c0_116, %c0_117], %138 {strides = array<i32>} : memref<1x16x16x8xf32, #tpu.memory_space<vmem>>, vector<1x1x16x8xf32>,
    %c73 = arith.constant 73 : index
    %c0_118 = arith.constant 0 : index
    %139 = vector.load %arg7[%c73, %c0_118] : memref<288x8xf32, #tpu.memory_space<vmem>>, vector<16x8xf32>
    %c0_119 = arith.constant 0 : index
    %c4_120 = arith.constant 4 : index
    %c0_121 = arith.constant 0 : index
    %c0_122 = arith.constant 0 : index
    %140 = vector.load %arg3[%c0_119, %c4_120, %c0_121, %c0_122] : memref<1x16x16x8xf32, #tpu.memory_space<vmem>>, vector<1x1x16x8xf32>
    %141 = vector.shape_cast %140 : vector<1x1x16x8xf32> to vector<16x8xf32>
    %142 = vector.shape_cast %139 : vector<16x8xf32> to vector<1x1x16x8xf32>
    tpu.vector_store %arg3[%c0_119, %c4_120, %c0_121, %c0_122], %142 {strides = array<i32>} : memref<1x16x16x8xf32, #tpu.memory_space<vmem>>, vector<1x1x16x8xf32>,
    %c91 = arith.constant 91 : index
    %c0_123 = arith.constant 0 : index
    %143 = vector.load %arg7[%c91, %c0_123] : memref<288x8xf32, #tpu.memory_space<vmem>>, vector<16x8xf32>
    %c0_124 = arith.constant 0 : index
    %c5_125 = arith.constant 5 : index
    %c0_126 = arith.constant 0 : index
    %c0_127 = arith.constant 0 : index
    %144 = vector.load %arg3[%c0_124, %c5_125, %c0_126, %c0_127] : memref<1x16x16x8xf32, #tpu.memory_space<vmem>>, vector<1x1x16x8xf32>
    %145 = vector.shape_cast %144 : vector<1x1x16x8xf32> to vector<16x8xf32>
    %146 = vector.shape_cast %143 : vector<16x8xf32> to vector<1x1x16x8xf32>
    tpu.vector_store %arg3[%c0_124, %c5_125, %c0_126, %c0_127], %146 {strides = array<i32>} : memref<1x16x16x8xf32, #tpu.memory_space<vmem>>, vector<1x1x16x8xf32>,
    %c109 = arith.constant 109 : index
    %c0_128 = arith.constant 0 : index
    %147 = vector.load %arg7[%c109, %c0_128] : memref<288x8xf32, #tpu.memory_space<vmem>>, vector<16x8xf32>
    %c0_129 = arith.constant 0 : index
    %c6_130 = arith.constant 6 : index
    %c0_131 = arith.constant 0 : index
    %c0_132 = arith.constant 0 : index
    %148 = vector.load %arg3[%c0_129, %c6_130, %c0_131, %c0_132] : memref<1x16x16x8xf32, #tpu.memory_space<vmem>>, vector<1x1x16x8xf32>
    %149 = vector.shape_cast %148 : vector<1x1x16x8xf32> to vector<16x8xf32>
    %150 = vector.shape_cast %147 : vector<16x8xf32> to vector<1x1x16x8xf32>
    tpu.vector_store %arg3[%c0_129, %c6_130, %c0_131, %c0_132], %150 {strides = array<i32>} : memref<1x16x16x8xf32, #tpu.memory_space<vmem>>, vector<1x1x16x8xf32>,
    %c127 = arith.constant 127 : index
    %c0_133 = arith.constant 0 : index
    %151 = vector.load %arg7[%c127, %c0_133] : memref<288x8xf32, #tpu.memory_space<vmem>>, vector<16x8xf32>
    %c0_134 = arith.constant 0 : index
    %c7_135 = arith.constant 7 : index
    %c0_136 = arith.constant 0 : index
    %c0_137 = arith.constant 0 : index
    %152 = vector.load %arg3[%c0_134, %c7_135, %c0_136, %c0_137] : memref<1x16x16x8xf32, #tpu.memory_space<vmem>>, vector<1x1x16x8xf32>
    %153 = vector.shape_cast %152 : vector<1x1x16x8xf32> to vector<16x8xf32>
    %154 = vector.shape_cast %151 : vector<16x8xf32> to vector<1x1x16x8xf32>
    tpu.vector_store %arg3[%c0_134, %c7_135, %c0_136, %c0_137], %154 {strides = array<i32>} : memref<1x16x16x8xf32, #tpu.memory_space<vmem>>, vector<1x1x16x8xf32>,
    %c145 = arith.constant 145 : index
    %c0_138 = arith.constant 0 : index
    %155 = vector.load %arg7[%c145, %c0_138] : memref<288x8xf32, #tpu.memory_space<vmem>>, vector<16x8xf32>
    %c0_139 = arith.constant 0 : index
    %c8_140 = arith.constant 8 : index
    %c0_141 = arith.constant 0 : index
    %c0_142 = arith.constant 0 : index
    %156 = vector.load %arg3[%c0_139, %c8_140, %c0_141, %c0_142] : memref<1x16x16x8xf32, #tpu.memory_space<vmem>>, vector<1x1x16x8xf32>
    %157 = vector.shape_cast %156 : vector<1x1x16x8xf32> to vector<16x8xf32>
    %158 = vector.shape_cast %155 : vector<16x8xf32> to vector<1x1x16x8xf32>
    tpu.vector_store %arg3[%c0_139, %c8_140, %c0_141, %c0_142], %158 {strides = array<i32>} : memref<1x16x16x8xf32, #tpu.memory_space<vmem>>, vector<1x1x16x8xf32>,
    %c163 = arith.constant 163 : index
    %c0_143 = arith.constant 0 : index
    %159 = vector.load %arg7[%c163, %c0_143] : memref<288x8xf32, #tpu.memory_space<vmem>>, vector<16x8xf32>
    %c0_144 = arith.constant 0 : index
    %c9 = arith.constant 9 : index
    %c0_145 = arith.constant 0 : index
    %c0_146 = arith.constant 0 : index
    %160 = vector.load %arg3[%c0_144, %c9, %c0_145, %c0_146] : memref<1x16x16x8xf32, #tpu.memory_space<vmem>>, vector<1x1x16x8xf32>
    %161 = vector.shape_cast %160 : vector<1x1x16x8xf32> to vector<16x8xf32>
    %162 = vector.shape_cast %159 : vector<16x8xf32> to vector<1x1x16x8xf32>
    tpu.vector_store %arg3[%c0_144, %c9, %c0_145, %c0_146], %162 {strides = array<i32>} : memref<1x16x16x8xf32, #tpu.memory_space<vmem>>, vector<1x1x16x8xf32>,
    %c181 = arith.constant 181 : index
    %c0_147 = arith.constant 0 : index
    %163 = vector.load %arg7[%c181, %c0_147] : memref<288x8xf32, #tpu.memory_space<vmem>>, vector<16x8xf32>
    %c0_148 = arith.constant 0 : index
    %c10 = arith.constant 10 : index
    %c0_149 = arith.constant 0 : index
    %c0_150 = arith.constant 0 : index
    %164 = vector.load %arg3[%c0_148, %c10, %c0_149, %c0_150] : memref<1x16x16x8xf32, #tpu.memory_space<vmem>>, vector<1x1x16x8xf32>
    %165 = vector.shape_cast %164 : vector<1x1x16x8xf32> to vector<16x8xf32>
    %166 = vector.shape_cast %163 : vector<16x8xf32> to vector<1x1x16x8xf32>
    tpu.vector_store %arg3[%c0_148, %c10, %c0_149, %c0_150], %166 {strides = array<i32>} : memref<1x16x16x8xf32, #tpu.memory_space<vmem>>, vector<1x1x16x8xf32>,
    %c199 = arith.constant 199 : index
    %c0_151 = arith.constant 0 : index
    %167 = vector.load %arg7[%c199, %c0_151] : memref<288x8xf32, #tpu.memory_space<vmem>>, vector<16x8xf32>
    %c0_152 = arith.constant 0 : index
    %c11 = arith.constant 11 : index
    %c0_153 = arith.constant 0 : index
    %c0_154 = arith.constant 0 : index
    %168 = vector.load %arg3[%c0_152, %c11, %c0_153, %c0_154] : memref<1x16x16x8xf32, #tpu.memory_space<vmem>>, vector<1x1x16x8xf32>
    %169 = vector.shape_cast %168 : vector<1x1x16x8xf32> to vector<16x8xf32>
    %170 = vector.shape_cast %167 : vector<16x8xf32> to vector<1x1x16x8xf32>
    tpu.vector_store %arg3[%c0_152, %c11, %c0_153, %c0_154], %170 {strides = array<i32>} : memref<1x16x16x8xf32, #tpu.memory_space<vmem>>, vector<1x1x16x8xf32>,
    %c217 = arith.constant 217 : index
    %c0_155 = arith.constant 0 : index
    %171 = vector.load %arg7[%c217, %c0_155] : memref<288x8xf32, #tpu.memory_space<vmem>>, vector<16x8xf32>
    %c0_156 = arith.constant 0 : index
    %c12 = arith.constant 12 : index
    %c0_157 = arith.constant 0 : index
    %c0_158 = arith.constant 0 : index
    %172 = vector.load %arg3[%c0_156, %c12, %c0_157, %c0_158] : memref<1x16x16x8xf32, #tpu.memory_space<vmem>>, vector<1x1x16x8xf32>
    %173 = vector.shape_cast %172 : vector<1x1x16x8xf32> to vector<16x8xf32>
    %174 = vector.shape_cast %171 : vector<16x8xf32> to vector<1x1x16x8xf32>
    tpu.vector_store %arg3[%c0_156, %c12, %c0_157, %c0_158], %174 {strides = array<i32>} : memref<1x16x16x8xf32, #tpu.memory_space<vmem>>, vector<1x1x16x8xf32>,
    %c235 = arith.constant 235 : index
    %c0_159 = arith.constant 0 : index
    %175 = vector.load %arg7[%c235, %c0_159] : memref<288x8xf32, #tpu.memory_space<vmem>>, vector<16x8xf32>
    %c0_160 = arith.constant 0 : index
    %c13 = arith.constant 13 : index
    %c0_161 = arith.constant 0 : index
    %c0_162 = arith.constant 0 : index
    %176 = vector.load %arg3[%c0_160, %c13, %c0_161, %c0_162] : memref<1x16x16x8xf32, #tpu.memory_space<vmem>>, vector<1x1x16x8xf32>
    %177 = vector.shape_cast %176 : vector<1x1x16x8xf32> to vector<16x8xf32>
    %178 = vector.shape_cast %175 : vector<16x8xf32> to vector<1x1x16x8xf32>
    tpu.vector_store %arg3[%c0_160, %c13, %c0_161, %c0_162], %178 {strides = array<i32>} : memref<1x16x16x8xf32, #tpu.memory_space<vmem>>, vector<1x1x16x8xf32>,
    %c253 = arith.constant 253 : index
    %c0_163 = arith.constant 0 : index
    %179 = vector.load %arg7[%c253, %c0_163] : memref<288x8xf32, #tpu.memory_space<vmem>>, vector<16x8xf32>
    %c0_164 = arith.constant 0 : index
    %c14 = arith.constant 14 : index
    %c0_165 = arith.constant 0 : index
    %c0_166 = arith.constant 0 : index
    %180 = vector.load %arg3[%c0_164, %c14, %c0_165, %c0_166] : memref<1x16x16x8xf32, #tpu.memory_space<vmem>>, vector<1x1x16x8xf32>
    %181 = vector.shape_cast %180 : vector<1x1x16x8xf32> to vector<16x8xf32>
    %182 = vector.shape_cast %179 : vector<16x8xf32> to vector<1x1x16x8xf32>
    tpu.vector_store %arg3[%c0_164, %c14, %c0_165, %c0_166], %182 {strides = array<i32>} : memref<1x16x16x8xf32, #tpu.memory_space<vmem>>, vector<1x1x16x8xf32>,
    %c271 = arith.constant 271 : index
    %c0_167 = arith.constant 0 : index
    %183 = vector.load %arg7[%c271, %c0_167] : memref<288x8xf32, #tpu.memory_space<vmem>>, vector<16x8xf32>
    %c0_168 = arith.constant 0 : index
    %c15 = arith.constant 15 : index
    %c0_169 = arith.constant 0 : index
    %c0_170 = arith.constant 0 : index
    %184 = vector.load %arg3[%c0_168, %c15, %c0_169, %c0_170] : memref<1x16x16x8xf32, #tpu.memory_space<vmem>>, vector<1x1x16x8xf32>
    %185 = vector.shape_cast %184 : vector<1x1x16x8xf32> to vector<16x8xf32>
    %186 = vector.shape_cast %183 : vector<16x8xf32> to vector<1x1x16x8xf32>
    tpu.vector_store %arg3[%c0_168, %c15, %c0_169, %c0_170], %186 {strides = array<i32>} : memref<1x16x16x8xf32, #tpu.memory_space<vmem>>, vector<1x1x16x8xf32>,
    %c0_171 = arith.constant 0 : index
    %c0_172 = arith.constant 0 : index
    %c0_173 = arith.constant 0 : index
    %c0_174 = arith.constant 0 : index
    %187 = vector.load %arg3[%c0_171, %c0_172, %c0_173, %c0_174] : memref<1x16x16x8xf32, #tpu.memory_space<vmem>>, vector<1x16x16x8xf32>
    %188 = vector.shape_cast %187 : vector<1x16x16x8xf32> to vector<16x16x8xf32>
    %c0_175 = arith.constant 0 : index
    %c0_176 = arith.constant 0 : index
    %189 = vector.load %arg4[%c0_175, %c0_176] : memref<1x8xf32, #tpu.memory_space<vmem>>, vector<1x8xf32>
    %cst_177 = arith.constant dense<0.000000e+00> : vector<16x8xf32>
    %190 = vector.multi_reduction <add>, %188, %cst_177 [0] : vector<16x16x8xf32> to vector<16x8xf32>
    %cst_178 = arith.constant dense<0.000000e+00> : vector<8xf32>
    %191 = vector.multi_reduction <add>, %190, %cst_178 [0] : vector<16x8xf32> to vector<8xf32>
    %192 = vector.shape_cast %191 : vector<8xf32> to vector<1x8xf32>
    %193 = arith.addf %189, %192 : vector<1x8xf32>
    %c0_179 = arith.constant 0 : index
    %c0_180 = arith.constant 0 : index
    %194 = vector.load %arg4[%c0_179, %c0_180] : memref<1x8xf32, #tpu.memory_space<vmem>>, vector<1x8xf32>
    tpu.vector_store %arg4[%c0_179, %c0_180], %193 {strides = array<i32>} : memref<1x8xf32, #tpu.memory_space<vmem>>, vector<1x8xf32>,
    %c0_181 = arith.constant 0 : index
    %c0_182 = arith.constant 0 : index
    %195 = vector.load %arg5[%c0_181, %c0_182] : memref<1x8xf32, #tpu.memory_space<vmem>>, vector<1x8xf32>
    %196 = arith.mulf %188, %188 : vector<16x16x8xf32>
    %cst_183 = arith.constant dense<0.000000e+00> : vector<16x8xf32>
    %197 = vector.multi_reduction <add>, %196, %cst_183 [0] : vector<16x16x8xf32> to vector<16x8xf32>
    %cst_184 = arith.constant dense<0.000000e+00> : vector<8xf32>
    %198 = vector.multi_reduction <add>, %197, %cst_184 [0] : vector<16x8xf32> to vector<8xf32>
    %199 = vector.shape_cast %198 : vector<8xf32> to vector<1x8xf32>
    %200 = arith.addf %195, %199 : vector<1x8xf32>
    %c0_185 = arith.constant 0 : index
    %c0_186 = arith.constant 0 : index
    %201 = vector.load %arg5[%c0_185, %c0_186] : memref<1x8xf32, #tpu.memory_space<vmem>>, vector<1x8xf32>
    tpu.vector_store %arg5[%c0_185, %c0_186], %200 {strides = array<i32>} : memref<1x8xf32, #tpu.memory_space<vmem>>, vector<1x8xf32>,
    return
  }
  func.func @transform_0(%arg0: i32) -> (i32, i32, i32, i32) {
    %c0_i32 = arith.constant 0 : i32
    %c0_i32_0 = arith.constant 0 : i32
    %c0_i32_1 = arith.constant 0 : i32
    %c0_i32_2 = arith.constant 0 : i32
    return %arg0, %c0_i32, %c0_i32_0, %c0_i32_1 : i32, i32, i32, i32
  }
  func.func @transform_1(%arg0: i32) -> (i32, i32, i32) {
    %c0_i32 = arith.constant 0 : i32
    %c0_i32_0 = arith.constant 0 : i32
    %c0_i32_1 = arith.constant 0 : i32
    %c0_i32_2 = arith.constant 0 : i32
    return %c0_i32, %c0_i32_0, %c0_i32_1 : i32, i32, i32
  }
  func.func @transform_2(%arg0: i32) -> (i32, i32, i32, i32) {
    %c0_i32 = arith.constant 0 : i32
    %c0_i32_0 = arith.constant 0 : i32
    %c0_i32_1 = arith.constant 0 : i32
    %c0_i32_2 = arith.constant 0 : i32
    return %arg0, %c0_i32, %c0_i32_0, %c0_i32_1 : i32, i32, i32, i32
  }
  func.func @transform_3(%arg0: i32) -> (i32, i32) {
    %c0_i32 = arith.constant 0 : i32
    %c0_i32_0 = arith.constant 0 : i32
    %c0_i32_1 = arith.constant 0 : i32
    return %c0_i32, %c0_i32_0 : i32, i32
  }
  func.func @transform_4(%arg0: i32) -> (i32, i32) {
    %c0_i32 = arith.constant 0 : i32
    %c0_i32_0 = arith.constant 0 : i32
    %c0_i32_1 = arith.constant 0 : i32
    return %c0_i32, %c0_i32_0 : i32, i32
  }
}

module attributes {stable_mosaic.version = 11 : i64} {
  func.func @_bn_relu_kernel(%arg0: i32, %arg1: memref<1x16x16x8xf32, #tpu.memory_space<vmem>>, %arg2: memref<1x8xf32, #tpu.memory_space<vmem>>, %arg3: memref<1x8xf32, #tpu.memory_space<vmem>>, %arg4: memref<1x16x16x8xf32, #tpu.memory_space<vmem>>) attributes {dimension_semantics = [#tpu.dimension_semantics<parallel>], iteration_bounds = array<i64: 2>, scalar_prefetch = 0 : i64, scratch_operands = 0 : i64, tpu.core_type = #tpu.core_type<tc>, window_params = [{transform_indices = @transform_0, window_bounds = array<i64: 1, 16, 16, 8>}, {pipeline_mode = #tpu.pipeline_mode<synchronous>, transform_indices = @transform_1, window_bounds = array<i64: 1, 8>}, {pipeline_mode = #tpu.pipeline_mode<synchronous>, transform_indices = @transform_2, window_bounds = array<i64: 1, 8>}, {transform_indices = @transform_3, window_bounds = array<i64: 1, 16, 16, 8>}]} {
    %c0 = arith.constant 0 : index
    %c0_0 = arith.constant 0 : index
    %c0_1 = arith.constant 0 : index
    %c0_2 = arith.constant 0 : index
    %0 = vector.load %arg1[%c0, %c0_0, %c0_1, %c0_2] : memref<1x16x16x8xf32, #tpu.memory_space<vmem>>, vector<1x16x16x8xf32>
    %1 = vector.shape_cast %0 : vector<1x16x16x8xf32> to vector<16x16x8xf32>
    %c0_3 = arith.constant 0 : index
    %c0_4 = arith.constant 0 : index
    %2 = vector.load %arg2[%c0_3, %c0_4] : memref<1x8xf32, #tpu.memory_space<vmem>>, vector<1x8xf32>
    %3 = vector.shape_cast %2 : vector<1x8xf32> to vector<1x1x8xf32>
    %4 = vector.broadcast %3 : vector<1x1x8xf32> to vector<16x16x8xf32>
    %5 = arith.mulf %1, %4 : vector<16x16x8xf32>
    %c0_5 = arith.constant 0 : index
    %c0_6 = arith.constant 0 : index
    %6 = vector.load %arg3[%c0_5, %c0_6] : memref<1x8xf32, #tpu.memory_space<vmem>>, vector<1x8xf32>
    %7 = vector.shape_cast %6 : vector<1x8xf32> to vector<1x1x8xf32>
    %8 = vector.broadcast %7 : vector<1x1x8xf32> to vector<16x16x8xf32>
    %9 = arith.addf %5, %8 : vector<16x16x8xf32>
    %cst = arith.constant 0.000000e+00 : f32
    %10 = vector.broadcast %cst : f32 to vector<16x16x8xf32>
    %11 = arith.maximumf %9, %10 : vector<16x16x8xf32>
    %c0_7 = arith.constant 0 : index
    %c0_8 = arith.constant 0 : index
    %c0_9 = arith.constant 0 : index
    %c0_10 = arith.constant 0 : index
    %12 = vector.load %arg4[%c0_7, %c0_8, %c0_9, %c0_10] : memref<1x16x16x8xf32, #tpu.memory_space<vmem>>, vector<1x16x16x8xf32>
    %13 = vector.shape_cast %12 : vector<1x16x16x8xf32> to vector<16x16x8xf32>
    %14 = vector.shape_cast %11 : vector<16x16x8xf32> to vector<1x16x16x8xf32>
    tpu.vector_store %arg4[%c0_7, %c0_8, %c0_9, %c0_10], %14 {strides = array<i32>} : memref<1x16x16x8xf32, #tpu.memory_space<vmem>>, vector<1x16x16x8xf32>,
    return
  }
  func.func @transform_0(%arg0: i32) -> (i32, i32, i32, i32) {
    %c0_i32 = arith.constant 0 : i32
    %c0_i32_0 = arith.constant 0 : i32
    %c0_i32_1 = arith.constant 0 : i32
    %c0_i32_2 = arith.constant 0 : i32
    return %arg0, %c0_i32, %c0_i32_0, %c0_i32_1 : i32, i32, i32, i32
  }
  func.func @transform_1(%arg0: i32) -> (i32, i32) {
    %c0_i32 = arith.constant 0 : i32
    %c0_i32_0 = arith.constant 0 : i32
    %c0_i32_1 = arith.constant 0 : i32
    return %c0_i32, %c0_i32_0 : i32, i32
  }
  func.func @transform_2(%arg0: i32) -> (i32, i32) {
    %c0_i32 = arith.constant 0 : i32
    %c0_i32_0 = arith.constant 0 : i32
    %c0_i32_1 = arith.constant 0 : i32
    return %c0_i32, %c0_i32_0 : i32, i32
  }
  func.func @transform_3(%arg0: i32) -> (i32, i32, i32, i32) {
    %c0_i32 = arith.constant 0 : i32
    %c0_i32_0 = arith.constant 0 : i32
    %c0_i32_1 = arith.constant 0 : i32
    %c0_i32_2 = arith.constant 0 : i32
    return %arg0, %c0_i32, %c0_i32_0, %c0_i32_1 : i32, i32, i32, i32
  }
}

module attributes {stable_mosaic.version = 11 : i64} {
  func.func @_conv3x3_kernel(%arg0: i32, %arg1: memref<1x16x16x8xf32, #tpu.memory_space<vmem>>, %arg2: memref<1x8xf32, #tpu.memory_space<vmem>>, %arg3: memref<1x8xf32, #tpu.memory_space<vmem>>, %arg4: memref<9x8x8xbf16, #tpu.memory_space<vmem>>, %arg5: memref<1x16x16x8xf32, #tpu.memory_space<vmem>>, %arg6: memref<1x8xf32, #tpu.memory_space<vmem>>, %arg7: memref<1x8xf32, #tpu.memory_space<vmem>>, %arg8: memref<328x8xf32, #tpu.memory_space<vmem>>, %arg9: memref<288x8xf32, #tpu.memory_space<vmem>>) attributes {dimension_semantics = [#tpu.dimension_semantics<arbitrary>], iteration_bounds = array<i64: 2>, scalar_prefetch = 0 : i64, scratch_operands = 2 : i64, tpu.core_type = #tpu.core_type<tc>, window_params = [{transform_indices = @transform_0, window_bounds = array<i64: 1, 16, 16, 8>}, {pipeline_mode = #tpu.pipeline_mode<synchronous>, transform_indices = @transform_1, window_bounds = array<i64: 1, 8>}, {pipeline_mode = #tpu.pipeline_mode<synchronous>, transform_indices = @transform_2, window_bounds = array<i64: 1, 8>}, {pipeline_mode = #tpu.pipeline_mode<synchronous>, transform_indices = @transform_3, window_bounds = array<i64: 9, 8, 8>}, {transform_indices = @transform_4, window_bounds = array<i64: 1, 16, 16, 8>}, {pipeline_mode = #tpu.pipeline_mode<synchronous>, transform_indices = @transform_5, window_bounds = array<i64: 1, 8>}, {pipeline_mode = #tpu.pipeline_mode<synchronous>, transform_indices = @transform_6, window_bounds = array<i64: 1, 8>}]} {
    %c0_i32 = arith.constant 0 : i32
    %0 = arith.cmpi eq, %arg0, %c0_i32 : i32
    %1 = arith.extui %0 : i1 to i32
    %c0_i32_0 = arith.constant 0 : i32
    %2 = arith.cmpi ne, %1, %c0_i32_0 : i32
    scf.if %2 {
      %cst_192 = arith.constant 0.000000e+00 : f32
      %212 = vector.broadcast %cst_192 : f32 to vector<328x8xf32>
      %c0_193 = arith.constant 0 : index
      %c0_194 = arith.constant 0 : index
      %213 = vector.load %arg8[%c0_193, %c0_194] : memref<328x8xf32, #tpu.memory_space<vmem>>, vector<328x8xf32>
      tpu.vector_store %arg8[%c0_193, %c0_194], %212 {strides = array<i32>} : memref<328x8xf32, #tpu.memory_space<vmem>>, vector<328x8xf32>,
      %cst_195 = arith.constant 0.000000e+00 : f32
      %214 = vector.broadcast %cst_195 : f32 to vector<1x8xf32>
      %c0_196 = arith.constant 0 : index
      %c0_197 = arith.constant 0 : index
      %215 = vector.load %arg6[%c0_196, %c0_197] : memref<1x8xf32, #tpu.memory_space<vmem>>, vector<1x8xf32>
      tpu.vector_store %arg6[%c0_196, %c0_197], %214 {strides = array<i32>} : memref<1x8xf32, #tpu.memory_space<vmem>>, vector<1x8xf32>,
      %cst_198 = arith.constant 0.000000e+00 : f32
      %216 = vector.broadcast %cst_198 : f32 to vector<1x8xf32>
      %c0_199 = arith.constant 0 : index
      %c0_200 = arith.constant 0 : index
      %217 = vector.load %arg7[%c0_199, %c0_200] : memref<1x8xf32, #tpu.memory_space<vmem>>, vector<1x8xf32>
      tpu.vector_store %arg7[%c0_199, %c0_200], %216 {strides = array<i32>} : memref<1x8xf32, #tpu.memory_space<vmem>>, vector<1x8xf32>,
    } else {
    }
    %c0 = arith.constant 0 : index
    %c0_1 = arith.constant 0 : index
    %c0_2 = arith.constant 0 : index
    %c0_3 = arith.constant 0 : index
    %3 = vector.load %arg1[%c0, %c0_1, %c0_2, %c0_3] : memref<1x16x16x8xf32, #tpu.memory_space<vmem>>, vector<1x16x16x8xf32>
    %4 = vector.shape_cast %3 : vector<1x16x16x8xf32> to vector<16x16x8xf32>
    %c0_4 = arith.constant 0 : index
    %c0_5 = arith.constant 0 : index
    %5 = vector.load %arg2[%c0_4, %c0_5] : memref<1x8xf32, #tpu.memory_space<vmem>>, vector<1x8xf32>
    %6 = vector.shape_cast %5 : vector<1x8xf32> to vector<1x1x8xf32>
    %7 = vector.broadcast %6 : vector<1x1x8xf32> to vector<16x16x8xf32>
    %8 = arith.mulf %4, %7 : vector<16x16x8xf32>
    %c0_6 = arith.constant 0 : index
    %c0_7 = arith.constant 0 : index
    %9 = vector.load %arg3[%c0_6, %c0_7] : memref<1x8xf32, #tpu.memory_space<vmem>>, vector<1x8xf32>
    %10 = vector.shape_cast %9 : vector<1x8xf32> to vector<1x1x8xf32>
    %11 = vector.broadcast %10 : vector<1x1x8xf32> to vector<16x16x8xf32>
    %12 = arith.addf %8, %11 : vector<16x16x8xf32>
    %cst = arith.constant 0.000000e+00 : f32
    %13 = vector.broadcast %cst : f32 to vector<16x16x8xf32>
    %14 = arith.maximumf %12, %13 : vector<16x16x8xf32>
    %15 = vector.extract_strided_slice %14 {offsets = [0, 0, 0], sizes = [1, 16, 8], strides = [1, 1, 1]} : vector<16x16x8xf32> to vector<1x16x8xf32>
    %16 = vector.shape_cast %15 : vector<1x16x8xf32> to vector<16x8xf32>
    %c20 = arith.constant 20 : index
    %c0_8 = arith.constant 0 : index
    %17 = vector.load %arg8[%c20, %c0_8] : memref<328x8xf32, #tpu.memory_space<vmem>>, vector<16x8xf32>
    tpu.vector_store %arg8[%c20, %c0_8], %16 {strides = array<i32>} : memref<328x8xf32, #tpu.memory_space<vmem>>, vector<16x8xf32>,
    %18 = vector.extract_strided_slice %14 {offsets = [1, 0, 0], sizes = [1, 16, 8], strides = [1, 1, 1]} : vector<16x16x8xf32> to vector<1x16x8xf32>
    %19 = vector.shape_cast %18 : vector<1x16x8xf32> to vector<16x8xf32>
    %c38 = arith.constant 38 : index
    %c0_9 = arith.constant 0 : index
    %20 = vector.load %arg8[%c38, %c0_9] : memref<328x8xf32, #tpu.memory_space<vmem>>, vector<16x8xf32>
    tpu.vector_store %arg8[%c38, %c0_9], %19 {strides = array<i32>} : memref<328x8xf32, #tpu.memory_space<vmem>>, vector<16x8xf32>,
    %21 = vector.extract_strided_slice %14 {offsets = [2, 0, 0], sizes = [1, 16, 8], strides = [1, 1, 1]} : vector<16x16x8xf32> to vector<1x16x8xf32>
    %22 = vector.shape_cast %21 : vector<1x16x8xf32> to vector<16x8xf32>
    %c56 = arith.constant 56 : index
    %c0_10 = arith.constant 0 : index
    %23 = vector.load %arg8[%c56, %c0_10] : memref<328x8xf32, #tpu.memory_space<vmem>>, vector<16x8xf32>
    tpu.vector_store %arg8[%c56, %c0_10], %22 {strides = array<i32>} : memref<328x8xf32, #tpu.memory_space<vmem>>, vector<16x8xf32>,
    %24 = vector.extract_strided_slice %14 {offsets = [3, 0, 0], sizes = [1, 16, 8], strides = [1, 1, 1]} : vector<16x16x8xf32> to vector<1x16x8xf32>
    %25 = vector.shape_cast %24 : vector<1x16x8xf32> to vector<16x8xf32>
    %c74 = arith.constant 74 : index
    %c0_11 = arith.constant 0 : index
    %26 = vector.load %arg8[%c74, %c0_11] : memref<328x8xf32, #tpu.memory_space<vmem>>, vector<16x8xf32>
    tpu.vector_store %arg8[%c74, %c0_11], %25 {strides = array<i32>} : memref<328x8xf32, #tpu.memory_space<vmem>>, vector<16x8xf32>,
    %27 = vector.extract_strided_slice %14 {offsets = [4, 0, 0], sizes = [1, 16, 8], strides = [1, 1, 1]} : vector<16x16x8xf32> to vector<1x16x8xf32>
    %28 = vector.shape_cast %27 : vector<1x16x8xf32> to vector<16x8xf32>
    %c92 = arith.constant 92 : index
    %c0_12 = arith.constant 0 : index
    %29 = vector.load %arg8[%c92, %c0_12] : memref<328x8xf32, #tpu.memory_space<vmem>>, vector<16x8xf32>
    tpu.vector_store %arg8[%c92, %c0_12], %28 {strides = array<i32>} : memref<328x8xf32, #tpu.memory_space<vmem>>, vector<16x8xf32>,
    %30 = vector.extract_strided_slice %14 {offsets = [5, 0, 0], sizes = [1, 16, 8], strides = [1, 1, 1]} : vector<16x16x8xf32> to vector<1x16x8xf32>
    %31 = vector.shape_cast %30 : vector<1x16x8xf32> to vector<16x8xf32>
    %c110 = arith.constant 110 : index
    %c0_13 = arith.constant 0 : index
    %32 = vector.load %arg8[%c110, %c0_13] : memref<328x8xf32, #tpu.memory_space<vmem>>, vector<16x8xf32>
    tpu.vector_store %arg8[%c110, %c0_13], %31 {strides = array<i32>} : memref<328x8xf32, #tpu.memory_space<vmem>>, vector<16x8xf32>,
    %33 = vector.extract_strided_slice %14 {offsets = [6, 0, 0], sizes = [1, 16, 8], strides = [1, 1, 1]} : vector<16x16x8xf32> to vector<1x16x8xf32>
    %34 = vector.shape_cast %33 : vector<1x16x8xf32> to vector<16x8xf32>
    %c128 = arith.constant 128 : index
    %c0_14 = arith.constant 0 : index
    %35 = vector.load %arg8[%c128, %c0_14] : memref<328x8xf32, #tpu.memory_space<vmem>>, vector<16x8xf32>
    tpu.vector_store %arg8[%c128, %c0_14], %34 {strides = array<i32>} : memref<328x8xf32, #tpu.memory_space<vmem>>, vector<16x8xf32>,
    %36 = vector.extract_strided_slice %14 {offsets = [7, 0, 0], sizes = [1, 16, 8], strides = [1, 1, 1]} : vector<16x16x8xf32> to vector<1x16x8xf32>
    %37 = vector.shape_cast %36 : vector<1x16x8xf32> to vector<16x8xf32>
    %c146 = arith.constant 146 : index
    %c0_15 = arith.constant 0 : index
    %38 = vector.load %arg8[%c146, %c0_15] : memref<328x8xf32, #tpu.memory_space<vmem>>, vector<16x8xf32>
    tpu.vector_store %arg8[%c146, %c0_15], %37 {strides = array<i32>} : memref<328x8xf32, #tpu.memory_space<vmem>>, vector<16x8xf32>,
    %39 = vector.extract_strided_slice %14 {offsets = [8, 0, 0], sizes = [1, 16, 8], strides = [1, 1, 1]} : vector<16x16x8xf32> to vector<1x16x8xf32>
    %40 = vector.shape_cast %39 : vector<1x16x8xf32> to vector<16x8xf32>
    %c164 = arith.constant 164 : index
    %c0_16 = arith.constant 0 : index
    %41 = vector.load %arg8[%c164, %c0_16] : memref<328x8xf32, #tpu.memory_space<vmem>>, vector<16x8xf32>
    tpu.vector_store %arg8[%c164, %c0_16], %40 {strides = array<i32>} : memref<328x8xf32, #tpu.memory_space<vmem>>, vector<16x8xf32>,
    %42 = vector.extract_strided_slice %14 {offsets = [9, 0, 0], sizes = [1, 16, 8], strides = [1, 1, 1]} : vector<16x16x8xf32> to vector<1x16x8xf32>
    %43 = vector.shape_cast %42 : vector<1x16x8xf32> to vector<16x8xf32>
    %c182 = arith.constant 182 : index
    %c0_17 = arith.constant 0 : index
    %44 = vector.load %arg8[%c182, %c0_17] : memref<328x8xf32, #tpu.memory_space<vmem>>, vector<16x8xf32>
    tpu.vector_store %arg8[%c182, %c0_17], %43 {strides = array<i32>} : memref<328x8xf32, #tpu.memory_space<vmem>>, vector<16x8xf32>,
    %45 = vector.extract_strided_slice %14 {offsets = [10, 0, 0], sizes = [1, 16, 8], strides = [1, 1, 1]} : vector<16x16x8xf32> to vector<1x16x8xf32>
    %46 = vector.shape_cast %45 : vector<1x16x8xf32> to vector<16x8xf32>
    %c200 = arith.constant 200 : index
    %c0_18 = arith.constant 0 : index
    %47 = vector.load %arg8[%c200, %c0_18] : memref<328x8xf32, #tpu.memory_space<vmem>>, vector<16x8xf32>
    tpu.vector_store %arg8[%c200, %c0_18], %46 {strides = array<i32>} : memref<328x8xf32, #tpu.memory_space<vmem>>, vector<16x8xf32>,
    %48 = vector.extract_strided_slice %14 {offsets = [11, 0, 0], sizes = [1, 16, 8], strides = [1, 1, 1]} : vector<16x16x8xf32> to vector<1x16x8xf32>
    %49 = vector.shape_cast %48 : vector<1x16x8xf32> to vector<16x8xf32>
    %c218 = arith.constant 218 : index
    %c0_19 = arith.constant 0 : index
    %50 = vector.load %arg8[%c218, %c0_19] : memref<328x8xf32, #tpu.memory_space<vmem>>, vector<16x8xf32>
    tpu.vector_store %arg8[%c218, %c0_19], %49 {strides = array<i32>} : memref<328x8xf32, #tpu.memory_space<vmem>>, vector<16x8xf32>,
    %51 = vector.extract_strided_slice %14 {offsets = [12, 0, 0], sizes = [1, 16, 8], strides = [1, 1, 1]} : vector<16x16x8xf32> to vector<1x16x8xf32>
    %52 = vector.shape_cast %51 : vector<1x16x8xf32> to vector<16x8xf32>
    %c236 = arith.constant 236 : index
    %c0_20 = arith.constant 0 : index
    %53 = vector.load %arg8[%c236, %c0_20] : memref<328x8xf32, #tpu.memory_space<vmem>>, vector<16x8xf32>
    tpu.vector_store %arg8[%c236, %c0_20], %52 {strides = array<i32>} : memref<328x8xf32, #tpu.memory_space<vmem>>, vector<16x8xf32>,
    %54 = vector.extract_strided_slice %14 {offsets = [13, 0, 0], sizes = [1, 16, 8], strides = [1, 1, 1]} : vector<16x16x8xf32> to vector<1x16x8xf32>
    %55 = vector.shape_cast %54 : vector<1x16x8xf32> to vector<16x8xf32>
    %c254 = arith.constant 254 : index
    %c0_21 = arith.constant 0 : index
    %56 = vector.load %arg8[%c254, %c0_21] : memref<328x8xf32, #tpu.memory_space<vmem>>, vector<16x8xf32>
    tpu.vector_store %arg8[%c254, %c0_21], %55 {strides = array<i32>} : memref<328x8xf32, #tpu.memory_space<vmem>>, vector<16x8xf32>,
    %57 = vector.extract_strided_slice %14 {offsets = [14, 0, 0], sizes = [1, 16, 8], strides = [1, 1, 1]} : vector<16x16x8xf32> to vector<1x16x8xf32>
    %58 = vector.shape_cast %57 : vector<1x16x8xf32> to vector<16x8xf32>
    %c272 = arith.constant 272 : index
    %c0_22 = arith.constant 0 : index
    %59 = vector.load %arg8[%c272, %c0_22] : memref<328x8xf32, #tpu.memory_space<vmem>>, vector<16x8xf32>
    tpu.vector_store %arg8[%c272, %c0_22], %58 {strides = array<i32>} : memref<328x8xf32, #tpu.memory_space<vmem>>, vector<16x8xf32>,
    %60 = vector.extract_strided_slice %14 {offsets = [15, 0, 0], sizes = [1, 16, 8], strides = [1, 1, 1]} : vector<16x16x8xf32> to vector<1x16x8xf32>
    %61 = vector.shape_cast %60 : vector<1x16x8xf32> to vector<16x8xf32>
    %c290 = arith.constant 290 : index
    %c0_23 = arith.constant 0 : index
    %62 = vector.load %arg8[%c290, %c0_23] : memref<328x8xf32, #tpu.memory_space<vmem>>, vector<16x8xf32>
    tpu.vector_store %arg8[%c290, %c0_23], %61 {strides = array<i32>} : memref<328x8xf32, #tpu.memory_space<vmem>>, vector<16x8xf32>,
    %c0_24 = arith.constant 0 : index
    %c0_25 = arith.constant 0 : index
    %63 = vector.load %arg8[%c0_24, %c0_25] : memref<328x8xf32, #tpu.memory_space<vmem>>, vector<288x8xf32>
    %64 = arith.truncf %63 : vector<288x8xf32> to vector<288x8xbf16>
    %c0_26 = arith.constant 0 : index
    %c0_27 = arith.constant 0 : index
    %c0_28 = arith.constant 0 : index
    %65 = vector.load %arg4[%c0_26, %c0_27, %c0_28] : memref<9x8x8xbf16, #tpu.memory_space<vmem>>, vector<1x8x8xbf16>
    %66 = vector.shape_cast %65 : vector<1x8x8xbf16> to vector<8x8xbf16>
    %cst_29 = arith.constant dense<0.000000e+00> : vector<288x8xf32>
    %67 = tpu.matmul %64, %66, %cst_29 {dimension_numbers = #tpu.dot_dimension_numbers<[1], [0], [0], [1], [0, 0, 1, 1], [], []>} : vector<288x8xbf16>, vector<8x8xbf16>, vector<288x8xf32> -> vector<288x8xf32>
    %c0_30 = arith.constant 0 : index
    %c0_31 = arith.constant 0 : index
    %68 = vector.load %arg9[%c0_30, %c0_31] : memref<288x8xf32, #tpu.memory_space<vmem>>, vector<288x8xf32>
    tpu.vector_store %arg9[%c0_30, %c0_31], %67 {strides = array<i32>} : memref<288x8xf32, #tpu.memory_space<vmem>>, vector<288x8xf32>,
    %c1 = arith.constant 1 : index
    %c0_32 = arith.constant 0 : index
    %69 = vector.load %arg8[%c1, %c0_32] : memref<328x8xf32, #tpu.memory_space<vmem>>, vector<288x8xf32>
    %70 = arith.truncf %69 : vector<288x8xf32> to vector<288x8xbf16>
    %c1_33 = arith.constant 1 : index
    %c0_34 = arith.constant 0 : index
    %c0_35 = arith.constant 0 : index
    %71 = vector.load %arg4[%c1_33, %c0_34, %c0_35] : memref<9x8x8xbf16, #tpu.memory_space<vmem>>, vector<1x8x8xbf16>
    %72 = vector.shape_cast %71 : vector<1x8x8xbf16> to vector<8x8xbf16>
    %cst_36 = arith.constant dense<0.000000e+00> : vector<288x8xf32>
    %73 = tpu.matmul %70, %72, %cst_36 {dimension_numbers = #tpu.dot_dimension_numbers<[1], [0], [0], [1], [0, 0, 1, 1], [], []>} : vector<288x8xbf16>, vector<8x8xbf16>, vector<288x8xf32> -> vector<288x8xf32>
    %c0_37 = arith.constant 0 : index
    %c0_38 = arith.constant 0 : index
    %74 = vector.load %arg9[%c0_37, %c0_38] : memref<288x8xf32, #tpu.memory_space<vmem>>, vector<288x8xf32>
    %75 = arith.addf %74, %73 : vector<288x8xf32>
    %c0_39 = arith.constant 0 : index
    %c0_40 = arith.constant 0 : index
    %76 = vector.load %arg9[%c0_39, %c0_40] : memref<288x8xf32, #tpu.memory_space<vmem>>, vector<288x8xf32>
    tpu.vector_store %arg9[%c0_39, %c0_40], %75 {strides = array<i32>} : memref<288x8xf32, #tpu.memory_space<vmem>>, vector<288x8xf32>,
    %c2 = arith.constant 2 : index
    %c0_41 = arith.constant 0 : index
    %77 = vector.load %arg8[%c2, %c0_41] : memref<328x8xf32, #tpu.memory_space<vmem>>, vector<288x8xf32>
    %78 = arith.truncf %77 : vector<288x8xf32> to vector<288x8xbf16>
    %c2_42 = arith.constant 2 : index
    %c0_43 = arith.constant 0 : index
    %c0_44 = arith.constant 0 : index
    %79 = vector.load %arg4[%c2_42, %c0_43, %c0_44] : memref<9x8x8xbf16, #tpu.memory_space<vmem>>, vector<1x8x8xbf16>
    %80 = vector.shape_cast %79 : vector<1x8x8xbf16> to vector<8x8xbf16>
    %cst_45 = arith.constant dense<0.000000e+00> : vector<288x8xf32>
    %81 = tpu.matmul %78, %80, %cst_45 {dimension_numbers = #tpu.dot_dimension_numbers<[1], [0], [0], [1], [0, 0, 1, 1], [], []>} : vector<288x8xbf16>, vector<8x8xbf16>, vector<288x8xf32> -> vector<288x8xf32>
    %c0_46 = arith.constant 0 : index
    %c0_47 = arith.constant 0 : index
    %82 = vector.load %arg9[%c0_46, %c0_47] : memref<288x8xf32, #tpu.memory_space<vmem>>, vector<288x8xf32>
    %83 = arith.addf %82, %81 : vector<288x8xf32>
    %c0_48 = arith.constant 0 : index
    %c0_49 = arith.constant 0 : index
    %84 = vector.load %arg9[%c0_48, %c0_49] : memref<288x8xf32, #tpu.memory_space<vmem>>, vector<288x8xf32>
    tpu.vector_store %arg9[%c0_48, %c0_49], %83 {strides = array<i32>} : memref<288x8xf32, #tpu.memory_space<vmem>>, vector<288x8xf32>,
    %c18 = arith.constant 18 : index
    %c0_50 = arith.constant 0 : index
    %85 = vector.load %arg8[%c18, %c0_50] : memref<328x8xf32, #tpu.memory_space<vmem>>, vector<288x8xf32>
    %86 = arith.truncf %85 : vector<288x8xf32> to vector<288x8xbf16>
    %c3 = arith.constant 3 : index
    %c0_51 = arith.constant 0 : index
    %c0_52 = arith.constant 0 : index
    %87 = vector.load %arg4[%c3, %c0_51, %c0_52] : memref<9x8x8xbf16, #tpu.memory_space<vmem>>, vector<1x8x8xbf16>
    %88 = vector.shape_cast %87 : vector<1x8x8xbf16> to vector<8x8xbf16>
    %cst_53 = arith.constant dense<0.000000e+00> : vector<288x8xf32>
    %89 = tpu.matmul %86, %88, %cst_53 {dimension_numbers = #tpu.dot_dimension_numbers<[1], [0], [0], [1], [0, 0, 1, 1], [], []>} : vector<288x8xbf16>, vector<8x8xbf16>, vector<288x8xf32> -> vector<288x8xf32>
    %c0_54 = arith.constant 0 : index
    %c0_55 = arith.constant 0 : index
    %90 = vector.load %arg9[%c0_54, %c0_55] : memref<288x8xf32, #tpu.memory_space<vmem>>, vector<288x8xf32>
    %91 = arith.addf %90, %89 : vector<288x8xf32>
    %c0_56 = arith.constant 0 : index
    %c0_57 = arith.constant 0 : index
    %92 = vector.load %arg9[%c0_56, %c0_57] : memref<288x8xf32, #tpu.memory_space<vmem>>, vector<288x8xf32>
    tpu.vector_store %arg9[%c0_56, %c0_57], %91 {strides = array<i32>} : memref<288x8xf32, #tpu.memory_space<vmem>>, vector<288x8xf32>,
    %c19 = arith.constant 19 : index
    %c0_58 = arith.constant 0 : index
    %93 = vector.load %arg8[%c19, %c0_58] : memref<328x8xf32, #tpu.memory_space<vmem>>, vector<288x8xf32>
    %94 = arith.truncf %93 : vector<288x8xf32> to vector<288x8xbf16>
    %c4 = arith.constant 4 : index
    %c0_59 = arith.constant 0 : index
    %c0_60 = arith.constant 0 : index
    %95 = vector.load %arg4[%c4, %c0_59, %c0_60] : memref<9x8x8xbf16, #tpu.memory_space<vmem>>, vector<1x8x8xbf16>
    %96 = vector.shape_cast %95 : vector<1x8x8xbf16> to vector<8x8xbf16>
    %cst_61 = arith.constant dense<0.000000e+00> : vector<288x8xf32>
    %97 = tpu.matmul %94, %96, %cst_61 {dimension_numbers = #tpu.dot_dimension_numbers<[1], [0], [0], [1], [0, 0, 1, 1], [], []>} : vector<288x8xbf16>, vector<8x8xbf16>, vector<288x8xf32> -> vector<288x8xf32>
    %c0_62 = arith.constant 0 : index
    %c0_63 = arith.constant 0 : index
    %98 = vector.load %arg9[%c0_62, %c0_63] : memref<288x8xf32, #tpu.memory_space<vmem>>, vector<288x8xf32>
    %99 = arith.addf %98, %97 : vector<288x8xf32>
    %c0_64 = arith.constant 0 : index
    %c0_65 = arith.constant 0 : index
    %100 = vector.load %arg9[%c0_64, %c0_65] : memref<288x8xf32, #tpu.memory_space<vmem>>, vector<288x8xf32>
    tpu.vector_store %arg9[%c0_64, %c0_65], %99 {strides = array<i32>} : memref<288x8xf32, #tpu.memory_space<vmem>>, vector<288x8xf32>,
    %c20_66 = arith.constant 20 : index
    %c0_67 = arith.constant 0 : index
    %101 = vector.load %arg8[%c20_66, %c0_67] : memref<328x8xf32, #tpu.memory_space<vmem>>, vector<288x8xf32>
    %102 = arith.truncf %101 : vector<288x8xf32> to vector<288x8xbf16>
    %c5 = arith.constant 5 : index
    %c0_68 = arith.constant 0 : index
    %c0_69 = arith.constant 0 : index
    %103 = vector.load %arg4[%c5, %c0_68, %c0_69] : memref<9x8x8xbf16, #tpu.memory_space<vmem>>, vector<1x8x8xbf16>
    %104 = vector.shape_cast %103 : vector<1x8x8xbf16> to vector<8x8xbf16>
    %cst_70 = arith.constant dense<0.000000e+00> : vector<288x8xf32>
    %105 = tpu.matmul %102, %104, %cst_70 {dimension_numbers = #tpu.dot_dimension_numbers<[1], [0], [0], [1], [0, 0, 1, 1], [], []>} : vector<288x8xbf16>, vector<8x8xbf16>, vector<288x8xf32> -> vector<288x8xf32>
    %c0_71 = arith.constant 0 : index
    %c0_72 = arith.constant 0 : index
    %106 = vector.load %arg9[%c0_71, %c0_72] : memref<288x8xf32, #tpu.memory_space<vmem>>, vector<288x8xf32>
    %107 = arith.addf %106, %105 : vector<288x8xf32>
    %c0_73 = arith.constant 0 : index
    %c0_74 = arith.constant 0 : index
    %108 = vector.load %arg9[%c0_73, %c0_74] : memref<288x8xf32, #tpu.memory_space<vmem>>, vector<288x8xf32>
    tpu.vector_store %arg9[%c0_73, %c0_74], %107 {strides = array<i32>} : memref<288x8xf32, #tpu.memory_space<vmem>>, vector<288x8xf32>,
    %c36 = arith.constant 36 : index
    %c0_75 = arith.constant 0 : index
    %109 = vector.load %arg8[%c36, %c0_75] : memref<328x8xf32, #tpu.memory_space<vmem>>, vector<288x8xf32>
    %110 = arith.truncf %109 : vector<288x8xf32> to vector<288x8xbf16>
    %c6 = arith.constant 6 : index
    %c0_76 = arith.constant 0 : index
    %c0_77 = arith.constant 0 : index
    %111 = vector.load %arg4[%c6, %c0_76, %c0_77] : memref<9x8x8xbf16, #tpu.memory_space<vmem>>, vector<1x8x8xbf16>
    %112 = vector.shape_cast %111 : vector<1x8x8xbf16> to vector<8x8xbf16>
    %cst_78 = arith.constant dense<0.000000e+00> : vector<288x8xf32>
    %113 = tpu.matmul %110, %112, %cst_78 {dimension_numbers = #tpu.dot_dimension_numbers<[1], [0], [0], [1], [0, 0, 1, 1], [], []>} : vector<288x8xbf16>, vector<8x8xbf16>, vector<288x8xf32> -> vector<288x8xf32>
    %c0_79 = arith.constant 0 : index
    %c0_80 = arith.constant 0 : index
    %114 = vector.load %arg9[%c0_79, %c0_80] : memref<288x8xf32, #tpu.memory_space<vmem>>, vector<288x8xf32>
    %115 = arith.addf %114, %113 : vector<288x8xf32>
    %c0_81 = arith.constant 0 : index
    %c0_82 = arith.constant 0 : index
    %116 = vector.load %arg9[%c0_81, %c0_82] : memref<288x8xf32, #tpu.memory_space<vmem>>, vector<288x8xf32>
    tpu.vector_store %arg9[%c0_81, %c0_82], %115 {strides = array<i32>} : memref<288x8xf32, #tpu.memory_space<vmem>>, vector<288x8xf32>,
    %c37 = arith.constant 37 : index
    %c0_83 = arith.constant 0 : index
    %117 = vector.load %arg8[%c37, %c0_83] : memref<328x8xf32, #tpu.memory_space<vmem>>, vector<288x8xf32>
    %118 = arith.truncf %117 : vector<288x8xf32> to vector<288x8xbf16>
    %c7 = arith.constant 7 : index
    %c0_84 = arith.constant 0 : index
    %c0_85 = arith.constant 0 : index
    %119 = vector.load %arg4[%c7, %c0_84, %c0_85] : memref<9x8x8xbf16, #tpu.memory_space<vmem>>, vector<1x8x8xbf16>
    %120 = vector.shape_cast %119 : vector<1x8x8xbf16> to vector<8x8xbf16>
    %cst_86 = arith.constant dense<0.000000e+00> : vector<288x8xf32>
    %121 = tpu.matmul %118, %120, %cst_86 {dimension_numbers = #tpu.dot_dimension_numbers<[1], [0], [0], [1], [0, 0, 1, 1], [], []>} : vector<288x8xbf16>, vector<8x8xbf16>, vector<288x8xf32> -> vector<288x8xf32>
    %c0_87 = arith.constant 0 : index
    %c0_88 = arith.constant 0 : index
    %122 = vector.load %arg9[%c0_87, %c0_88] : memref<288x8xf32, #tpu.memory_space<vmem>>, vector<288x8xf32>
    %123 = arith.addf %122, %121 : vector<288x8xf32>
    %c0_89 = arith.constant 0 : index
    %c0_90 = arith.constant 0 : index
    %124 = vector.load %arg9[%c0_89, %c0_90] : memref<288x8xf32, #tpu.memory_space<vmem>>, vector<288x8xf32>
    tpu.vector_store %arg9[%c0_89, %c0_90], %123 {strides = array<i32>} : memref<288x8xf32, #tpu.memory_space<vmem>>, vector<288x8xf32>,
    %c38_91 = arith.constant 38 : index
    %c0_92 = arith.constant 0 : index
    %125 = vector.load %arg8[%c38_91, %c0_92] : memref<328x8xf32, #tpu.memory_space<vmem>>, vector<288x8xf32>
    %126 = arith.truncf %125 : vector<288x8xf32> to vector<288x8xbf16>
    %c8 = arith.constant 8 : index
    %c0_93 = arith.constant 0 : index
    %c0_94 = arith.constant 0 : index
    %127 = vector.load %arg4[%c8, %c0_93, %c0_94] : memref<9x8x8xbf16, #tpu.memory_space<vmem>>, vector<1x8x8xbf16>
    %128 = vector.shape_cast %127 : vector<1x8x8xbf16> to vector<8x8xbf16>
    %cst_95 = arith.constant dense<0.000000e+00> : vector<288x8xf32>
    %129 = tpu.matmul %126, %128, %cst_95 {dimension_numbers = #tpu.dot_dimension_numbers<[1], [0], [0], [1], [0, 0, 1, 1], [], []>} : vector<288x8xbf16>, vector<8x8xbf16>, vector<288x8xf32> -> vector<288x8xf32>
    %c0_96 = arith.constant 0 : index
    %c0_97 = arith.constant 0 : index
    %130 = vector.load %arg9[%c0_96, %c0_97] : memref<288x8xf32, #tpu.memory_space<vmem>>, vector<288x8xf32>
    %131 = arith.addf %130, %129 : vector<288x8xf32>
    %c0_98 = arith.constant 0 : index
    %c0_99 = arith.constant 0 : index
    %132 = vector.load %arg9[%c0_98, %c0_99] : memref<288x8xf32, #tpu.memory_space<vmem>>, vector<288x8xf32>
    tpu.vector_store %arg9[%c0_98, %c0_99], %131 {strides = array<i32>} : memref<288x8xf32, #tpu.memory_space<vmem>>, vector<288x8xf32>,
    %c1_100 = arith.constant 1 : index
    %c0_101 = arith.constant 0 : index
    %133 = vector.load %arg9[%c1_100, %c0_101] : memref<288x8xf32, #tpu.memory_space<vmem>>, vector<16x8xf32>
    %c0_102 = arith.constant 0 : index
    %c0_103 = arith.constant 0 : index
    %c0_104 = arith.constant 0 : index
    %c0_105 = arith.constant 0 : index
    %134 = vector.load %arg5[%c0_102, %c0_103, %c0_104, %c0_105] : memref<1x16x16x8xf32, #tpu.memory_space<vmem>>, vector<1x1x16x8xf32>
    %135 = vector.shape_cast %134 : vector<1x1x16x8xf32> to vector<16x8xf32>
    %136 = vector.shape_cast %133 : vector<16x8xf32> to vector<1x1x16x8xf32>
    tpu.vector_store %arg5[%c0_102, %c0_103, %c0_104, %c0_105], %136 {strides = array<i32>} : memref<1x16x16x8xf32, #tpu.memory_space<vmem>>, vector<1x1x16x8xf32>,
    %c19_106 = arith.constant 19 : index
    %c0_107 = arith.constant 0 : index
    %137 = vector.load %arg9[%c19_106, %c0_107] : memref<288x8xf32, #tpu.memory_space<vmem>>, vector<16x8xf32>
    %c0_108 = arith.constant 0 : index
    %c1_109 = arith.constant 1 : index
    %c0_110 = arith.constant 0 : index
    %c0_111 = arith.constant 0 : index
    %138 = vector.load %arg5[%c0_108, %c1_109, %c0_110, %c0_111] : memref<1x16x16x8xf32, #tpu.memory_space<vmem>>, vector<1x1x16x8xf32>
    %139 = vector.shape_cast %138 : vector<1x1x16x8xf32> to vector<16x8xf32>
    %140 = vector.shape_cast %137 : vector<16x8xf32> to vector<1x1x16x8xf32>
    tpu.vector_store %arg5[%c0_108, %c1_109, %c0_110, %c0_111], %140 {strides = array<i32>} : memref<1x16x16x8xf32, #tpu.memory_space<vmem>>, vector<1x1x16x8xf32>,
    %c37_112 = arith.constant 37 : index
    %c0_113 = arith.constant 0 : index
    %141 = vector.load %arg9[%c37_112, %c0_113] : memref<288x8xf32, #tpu.memory_space<vmem>>, vector<16x8xf32>
    %c0_114 = arith.constant 0 : index
    %c2_115 = arith.constant 2 : index
    %c0_116 = arith.constant 0 : index
    %c0_117 = arith.constant 0 : index
    %142 = vector.load %arg5[%c0_114, %c2_115, %c0_116, %c0_117] : memref<1x16x16x8xf32, #tpu.memory_space<vmem>>, vector<1x1x16x8xf32>
    %143 = vector.shape_cast %142 : vector<1x1x16x8xf32> to vector<16x8xf32>
    %144 = vector.shape_cast %141 : vector<16x8xf32> to vector<1x1x16x8xf32>
    tpu.vector_store %arg5[%c0_114, %c2_115, %c0_116, %c0_117], %144 {strides = array<i32>} : memref<1x16x16x8xf32, #tpu.memory_space<vmem>>, vector<1x1x16x8xf32>,
    %c55 = arith.constant 55 : index
    %c0_118 = arith.constant 0 : index
    %145 = vector.load %arg9[%c55, %c0_118] : memref<288x8xf32, #tpu.memory_space<vmem>>, vector<16x8xf32>
    %c0_119 = arith.constant 0 : index
    %c3_120 = arith.constant 3 : index
    %c0_121 = arith.constant 0 : index
    %c0_122 = arith.constant 0 : index
    %146 = vector.load %arg5[%c0_119, %c3_120, %c0_121, %c0_122] : memref<1x16x16x8xf32, #tpu.memory_space<vmem>>, vector<1x1x16x8xf32>
    %147 = vector.shape_cast %146 : vector<1x1x16x8xf32> to vector<16x8xf32>
    %148 = vector.shape_cast %145 : vector<16x8xf32> to vector<1x1x16x8xf32>
    tpu.vector_store %arg5[%c0_119, %c3_120, %c0_121, %c0_122], %148 {strides = array<i32>} : memref<1x16x16x8xf32, #tpu.memory_space<vmem>>, vector<1x1x16x8xf32>,
    %c73 = arith.constant 73 : index
    %c0_123 = arith.constant 0 : index
    %149 = vector.load %arg9[%c73, %c0_123] : memref<288x8xf32, #tpu.memory_space<vmem>>, vector<16x8xf32>
    %c0_124 = arith.constant 0 : index
    %c4_125 = arith.constant 4 : index
    %c0_126 = arith.constant 0 : index
    %c0_127 = arith.constant 0 : index
    %150 = vector.load %arg5[%c0_124, %c4_125, %c0_126, %c0_127] : memref<1x16x16x8xf32, #tpu.memory_space<vmem>>, vector<1x1x16x8xf32>
    %151 = vector.shape_cast %150 : vector<1x1x16x8xf32> to vector<16x8xf32>
    %152 = vector.shape_cast %149 : vector<16x8xf32> to vector<1x1x16x8xf32>
    tpu.vector_store %arg5[%c0_124, %c4_125, %c0_126, %c0_127], %152 {strides = array<i32>} : memref<1x16x16x8xf32, #tpu.memory_space<vmem>>, vector<1x1x16x8xf32>,
    %c91 = arith.constant 91 : index
    %c0_128 = arith.constant 0 : index
    %153 = vector.load %arg9[%c91, %c0_128] : memref<288x8xf32, #tpu.memory_space<vmem>>, vector<16x8xf32>
    %c0_129 = arith.constant 0 : index
    %c5_130 = arith.constant 5 : index
    %c0_131 = arith.constant 0 : index
    %c0_132 = arith.constant 0 : index
    %154 = vector.load %arg5[%c0_129, %c5_130, %c0_131, %c0_132] : memref<1x16x16x8xf32, #tpu.memory_space<vmem>>, vector<1x1x16x8xf32>
    %155 = vector.shape_cast %154 : vector<1x1x16x8xf32> to vector<16x8xf32>
    %156 = vector.shape_cast %153 : vector<16x8xf32> to vector<1x1x16x8xf32>
    tpu.vector_store %arg5[%c0_129, %c5_130, %c0_131, %c0_132], %156 {strides = array<i32>} : memref<1x16x16x8xf32, #tpu.memory_space<vmem>>, vector<1x1x16x8xf32>,
    %c109 = arith.constant 109 : index
    %c0_133 = arith.constant 0 : index
    %157 = vector.load %arg9[%c109, %c0_133] : memref<288x8xf32, #tpu.memory_space<vmem>>, vector<16x8xf32>
    %c0_134 = arith.constant 0 : index
    %c6_135 = arith.constant 6 : index
    %c0_136 = arith.constant 0 : index
    %c0_137 = arith.constant 0 : index
    %158 = vector.load %arg5[%c0_134, %c6_135, %c0_136, %c0_137] : memref<1x16x16x8xf32, #tpu.memory_space<vmem>>, vector<1x1x16x8xf32>
    %159 = vector.shape_cast %158 : vector<1x1x16x8xf32> to vector<16x8xf32>
    %160 = vector.shape_cast %157 : vector<16x8xf32> to vector<1x1x16x8xf32>
    tpu.vector_store %arg5[%c0_134, %c6_135, %c0_136, %c0_137], %160 {strides = array<i32>} : memref<1x16x16x8xf32, #tpu.memory_space<vmem>>, vector<1x1x16x8xf32>,
    %c127 = arith.constant 127 : index
    %c0_138 = arith.constant 0 : index
    %161 = vector.load %arg9[%c127, %c0_138] : memref<288x8xf32, #tpu.memory_space<vmem>>, vector<16x8xf32>
    %c0_139 = arith.constant 0 : index
    %c7_140 = arith.constant 7 : index
    %c0_141 = arith.constant 0 : index
    %c0_142 = arith.constant 0 : index
    %162 = vector.load %arg5[%c0_139, %c7_140, %c0_141, %c0_142] : memref<1x16x16x8xf32, #tpu.memory_space<vmem>>, vector<1x1x16x8xf32>
    %163 = vector.shape_cast %162 : vector<1x1x16x8xf32> to vector<16x8xf32>
    %164 = vector.shape_cast %161 : vector<16x8xf32> to vector<1x1x16x8xf32>
    tpu.vector_store %arg5[%c0_139, %c7_140, %c0_141, %c0_142], %164 {strides = array<i32>} : memref<1x16x16x8xf32, #tpu.memory_space<vmem>>, vector<1x1x16x8xf32>,
    %c145 = arith.constant 145 : index
    %c0_143 = arith.constant 0 : index
    %165 = vector.load %arg9[%c145, %c0_143] : memref<288x8xf32, #tpu.memory_space<vmem>>, vector<16x8xf32>
    %c0_144 = arith.constant 0 : index
    %c8_145 = arith.constant 8 : index
    %c0_146 = arith.constant 0 : index
    %c0_147 = arith.constant 0 : index
    %166 = vector.load %arg5[%c0_144, %c8_145, %c0_146, %c0_147] : memref<1x16x16x8xf32, #tpu.memory_space<vmem>>, vector<1x1x16x8xf32>
    %167 = vector.shape_cast %166 : vector<1x1x16x8xf32> to vector<16x8xf32>
    %168 = vector.shape_cast %165 : vector<16x8xf32> to vector<1x1x16x8xf32>
    tpu.vector_store %arg5[%c0_144, %c8_145, %c0_146, %c0_147], %168 {strides = array<i32>} : memref<1x16x16x8xf32, #tpu.memory_space<vmem>>, vector<1x1x16x8xf32>,
    %c163 = arith.constant 163 : index
    %c0_148 = arith.constant 0 : index
    %169 = vector.load %arg9[%c163, %c0_148] : memref<288x8xf32, #tpu.memory_space<vmem>>, vector<16x8xf32>
    %c0_149 = arith.constant 0 : index
    %c9 = arith.constant 9 : index
    %c0_150 = arith.constant 0 : index
    %c0_151 = arith.constant 0 : index
    %170 = vector.load %arg5[%c0_149, %c9, %c0_150, %c0_151] : memref<1x16x16x8xf32, #tpu.memory_space<vmem>>, vector<1x1x16x8xf32>
    %171 = vector.shape_cast %170 : vector<1x1x16x8xf32> to vector<16x8xf32>
    %172 = vector.shape_cast %169 : vector<16x8xf32> to vector<1x1x16x8xf32>
    tpu.vector_store %arg5[%c0_149, %c9, %c0_150, %c0_151], %172 {strides = array<i32>} : memref<1x16x16x8xf32, #tpu.memory_space<vmem>>, vector<1x1x16x8xf32>,
    %c181 = arith.constant 181 : index
    %c0_152 = arith.constant 0 : index
    %173 = vector.load %arg9[%c181, %c0_152] : memref<288x8xf32, #tpu.memory_space<vmem>>, vector<16x8xf32>
    %c0_153 = arith.constant 0 : index
    %c10 = arith.constant 10 : index
    %c0_154 = arith.constant 0 : index
    %c0_155 = arith.constant 0 : index
    %174 = vector.load %arg5[%c0_153, %c10, %c0_154, %c0_155] : memref<1x16x16x8xf32, #tpu.memory_space<vmem>>, vector<1x1x16x8xf32>
    %175 = vector.shape_cast %174 : vector<1x1x16x8xf32> to vector<16x8xf32>
    %176 = vector.shape_cast %173 : vector<16x8xf32> to vector<1x1x16x8xf32>
    tpu.vector_store %arg5[%c0_153, %c10, %c0_154, %c0_155], %176 {strides = array<i32>} : memref<1x16x16x8xf32, #tpu.memory_space<vmem>>, vector<1x1x16x8xf32>,
    %c199 = arith.constant 199 : index
    %c0_156 = arith.constant 0 : index
    %177 = vector.load %arg9[%c199, %c0_156] : memref<288x8xf32, #tpu.memory_space<vmem>>, vector<16x8xf32>
    %c0_157 = arith.constant 0 : index
    %c11 = arith.constant 11 : index
    %c0_158 = arith.constant 0 : index
    %c0_159 = arith.constant 0 : index
    %178 = vector.load %arg5[%c0_157, %c11, %c0_158, %c0_159] : memref<1x16x16x8xf32, #tpu.memory_space<vmem>>, vector<1x1x16x8xf32>
    %179 = vector.shape_cast %178 : vector<1x1x16x8xf32> to vector<16x8xf32>
    %180 = vector.shape_cast %177 : vector<16x8xf32> to vector<1x1x16x8xf32>
    tpu.vector_store %arg5[%c0_157, %c11, %c0_158, %c0_159], %180 {strides = array<i32>} : memref<1x16x16x8xf32, #tpu.memory_space<vmem>>, vector<1x1x16x8xf32>,
    %c217 = arith.constant 217 : index
    %c0_160 = arith.constant 0 : index
    %181 = vector.load %arg9[%c217, %c0_160] : memref<288x8xf32, #tpu.memory_space<vmem>>, vector<16x8xf32>
    %c0_161 = arith.constant 0 : index
    %c12 = arith.constant 12 : index
    %c0_162 = arith.constant 0 : index
    %c0_163 = arith.constant 0 : index
    %182 = vector.load %arg5[%c0_161, %c12, %c0_162, %c0_163] : memref<1x16x16x8xf32, #tpu.memory_space<vmem>>, vector<1x1x16x8xf32>
    %183 = vector.shape_cast %182 : vector<1x1x16x8xf32> to vector<16x8xf32>
    %184 = vector.shape_cast %181 : vector<16x8xf32> to vector<1x1x16x8xf32>
    tpu.vector_store %arg5[%c0_161, %c12, %c0_162, %c0_163], %184 {strides = array<i32>} : memref<1x16x16x8xf32, #tpu.memory_space<vmem>>, vector<1x1x16x8xf32>,
    %c235 = arith.constant 235 : index
    %c0_164 = arith.constant 0 : index
    %185 = vector.load %arg9[%c235, %c0_164] : memref<288x8xf32, #tpu.memory_space<vmem>>, vector<16x8xf32>
    %c0_165 = arith.constant 0 : index
    %c13 = arith.constant 13 : index
    %c0_166 = arith.constant 0 : index
    %c0_167 = arith.constant 0 : index
    %186 = vector.load %arg5[%c0_165, %c13, %c0_166, %c0_167] : memref<1x16x16x8xf32, #tpu.memory_space<vmem>>, vector<1x1x16x8xf32>
    %187 = vector.shape_cast %186 : vector<1x1x16x8xf32> to vector<16x8xf32>
    %188 = vector.shape_cast %185 : vector<16x8xf32> to vector<1x1x16x8xf32>
    tpu.vector_store %arg5[%c0_165, %c13, %c0_166, %c0_167], %188 {strides = array<i32>} : memref<1x16x16x8xf32, #tpu.memory_space<vmem>>, vector<1x1x16x8xf32>,
    %c253 = arith.constant 253 : index
    %c0_168 = arith.constant 0 : index
    %189 = vector.load %arg9[%c253, %c0_168] : memref<288x8xf32, #tpu.memory_space<vmem>>, vector<16x8xf32>
    %c0_169 = arith.constant 0 : index
    %c14 = arith.constant 14 : index
    %c0_170 = arith.constant 0 : index
    %c0_171 = arith.constant 0 : index
    %190 = vector.load %arg5[%c0_169, %c14, %c0_170, %c0_171] : memref<1x16x16x8xf32, #tpu.memory_space<vmem>>, vector<1x1x16x8xf32>
    %191 = vector.shape_cast %190 : vector<1x1x16x8xf32> to vector<16x8xf32>
    %192 = vector.shape_cast %189 : vector<16x8xf32> to vector<1x1x16x8xf32>
    tpu.vector_store %arg5[%c0_169, %c14, %c0_170, %c0_171], %192 {strides = array<i32>} : memref<1x16x16x8xf32, #tpu.memory_space<vmem>>, vector<1x1x16x8xf32>,
    %c271 = arith.constant 271 : index
    %c0_172 = arith.constant 0 : index
    %193 = vector.load %arg9[%c271, %c0_172] : memref<288x8xf32, #tpu.memory_space<vmem>>, vector<16x8xf32>
    %c0_173 = arith.constant 0 : index
    %c15 = arith.constant 15 : index
    %c0_174 = arith.constant 0 : index
    %c0_175 = arith.constant 0 : index
    %194 = vector.load %arg5[%c0_173, %c15, %c0_174, %c0_175] : memref<1x16x16x8xf32, #tpu.memory_space<vmem>>, vector<1x1x16x8xf32>
    %195 = vector.shape_cast %194 : vector<1x1x16x8xf32> to vector<16x8xf32>
    %196 = vector.shape_cast %193 : vector<16x8xf32> to vector<1x1x16x8xf32>
    tpu.vector_store %arg5[%c0_173, %c15, %c0_174, %c0_175], %196 {strides = array<i32>} : memref<1x16x16x8xf32, #tpu.memory_space<vmem>>, vector<1x1x16x8xf32>,
    %c0_176 = arith.constant 0 : index
    %c0_177 = arith.constant 0 : index
    %c0_178 = arith.constant 0 : index
    %c0_179 = arith.constant 0 : index
    %197 = vector.load %arg5[%c0_176, %c0_177, %c0_178, %c0_179] : memref<1x16x16x8xf32, #tpu.memory_space<vmem>>, vector<1x16x16x8xf32>
    %198 = vector.shape_cast %197 : vector<1x16x16x8xf32> to vector<16x16x8xf32>
    %c0_180 = arith.constant 0 : index
    %c0_181 = arith.constant 0 : index
    %199 = vector.load %arg6[%c0_180, %c0_181] : memref<1x8xf32, #tpu.memory_space<vmem>>, vector<1x8xf32>
    %cst_182 = arith.constant dense<0.000000e+00> : vector<16x8xf32>
    %200 = vector.multi_reduction <add>, %198, %cst_182 [0] : vector<16x16x8xf32> to vector<16x8xf32>
    %cst_183 = arith.constant dense<0.000000e+00> : vector<8xf32>
    %201 = vector.multi_reduction <add>, %200, %cst_183 [0] : vector<16x8xf32> to vector<8xf32>
    %202 = vector.shape_cast %201 : vector<8xf32> to vector<1x8xf32>
    %203 = arith.addf %199, %202 : vector<1x8xf32>
    %c0_184 = arith.constant 0 : index
    %c0_185 = arith.constant 0 : index
    %204 = vector.load %arg6[%c0_184, %c0_185] : memref<1x8xf32, #tpu.memory_space<vmem>>, vector<1x8xf32>
    tpu.vector_store %arg6[%c0_184, %c0_185], %203 {strides = array<i32>} : memref<1x8xf32, #tpu.memory_space<vmem>>, vector<1x8xf32>,
    %c0_186 = arith.constant 0 : index
    %c0_187 = arith.constant 0 : index
    %205 = vector.load %arg7[%c0_186, %c0_187] : memref<1x8xf32, #tpu.memory_space<vmem>>, vector<1x8xf32>
    %206 = arith.mulf %198, %198 : vector<16x16x8xf32>
    %cst_188 = arith.constant dense<0.000000e+00> : vector<16x8xf32>
    %207 = vector.multi_reduction <add>, %206, %cst_188 [0] : vector<16x16x8xf32> to vector<16x8xf32>
    %cst_189 = arith.constant dense<0.000000e+00> : vector<8xf32>
    %208 = vector.multi_reduction <add>, %207, %cst_189 [0] : vector<16x8xf32> to vector<8xf32>
    %209 = vector.shape_cast %208 : vector<8xf32> to vector<1x8xf32>
    %210 = arith.addf %205, %209 : vector<1x8xf32>
    %c0_190 = arith.constant 0 : index
    %c0_191 = arith.constant 0 : index
    %211 = vector.load %arg7[%c0_190, %c0_191] : memref<1x8xf32, #tpu.memory_space<vmem>>, vector<1x8xf32>
    tpu.vector_store %arg7[%c0_190, %c0_191], %210 {strides = array<i32>} : memref<1x8xf32, #tpu.memory_space<vmem>>, vector<1x8xf32>,
    return
  }
  func.func @transform_0(%arg0: i32) -> (i32, i32, i32, i32) {
    %c0_i32 = arith.constant 0 : i32
    %c0_i32_0 = arith.constant 0 : i32
    %c0_i32_1 = arith.constant 0 : i32
    %c0_i32_2 = arith.constant 0 : i32
    return %arg0, %c0_i32, %c0_i32_0, %c0_i32_1 : i32, i32, i32, i32
  }
  func.func @transform_1(%arg0: i32) -> (i32, i32) {
    %c0_i32 = arith.constant 0 : i32
    %c0_i32_0 = arith.constant 0 : i32
    %c0_i32_1 = arith.constant 0 : i32
    return %c0_i32, %c0_i32_0 : i32, i32
  }
  func.func @transform_2(%arg0: i32) -> (i32, i32) {
    %c0_i32 = arith.constant 0 : i32
    %c0_i32_0 = arith.constant 0 : i32
    %c0_i32_1 = arith.constant 0 : i32
    return %c0_i32, %c0_i32_0 : i32, i32
  }
  func.func @transform_3(%arg0: i32) -> (i32, i32, i32) {
    %c0_i32 = arith.constant 0 : i32
    %c0_i32_0 = arith.constant 0 : i32
    %c0_i32_1 = arith.constant 0 : i32
    %c0_i32_2 = arith.constant 0 : i32
    return %c0_i32, %c0_i32_0, %c0_i32_1 : i32, i32, i32
  }
  func.func @transform_4(%arg0: i32) -> (i32, i32, i32, i32) {
    %c0_i32 = arith.constant 0 : i32
    %c0_i32_0 = arith.constant 0 : i32
    %c0_i32_1 = arith.constant 0 : i32
    %c0_i32_2 = arith.constant 0 : i32
    return %arg0, %c0_i32, %c0_i32_0, %c0_i32_1 : i32, i32, i32, i32
  }
  func.func @transform_5(%arg0: i32) -> (i32, i32) {
    %c0_i32 = arith.constant 0 : i32
    %c0_i32_0 = arith.constant 0 : i32
    %c0_i32_1 = arith.constant 0 : i32
    return %c0_i32, %c0_i32_0 : i32, i32
  }
  func.func @transform_6(%arg0: i32) -> (i32, i32) {
    %c0_i32 = arith.constant 0 : i32
    %c0_i32_0 = arith.constant 0 : i32
    %c0_i32_1 = arith.constant 0 : i32
    return %c0_i32, %c0_i32_0 : i32, i32
  }
}

</mosaic_0001>

<bundles_post_ra>
// kernel: double_conv_forward.5
= control target key start
LH: loop header
LB: loop body
LE: loop exit
PB: predicated region body
PF: predicated region fallthrough
CT: control target
= control target key end

     0   :  { %s452_s12 = smov 0   ;;  %s643_s0 = inlined_call_operand.vmem [shape: f32[2,16,16,8], index: 0, kind: input, shape index: {}]   ;;  %s644_s1 = inlined_call_operand.vmem [shape: f32[1,8], index: 1, kind: input, shape index: {}]   ;;  %s645_s2 = inlined_call_operand.vmem [shape: f32[1,8], index: 2, kind: input, shape index: {}]   ;;  %s646_s3 = inlined_call_operand.vmem [shape: f32[2,16,16,8], index: 3, kind: output, shape index: {}]  }
   0x1 LB: > { %s401_s13 = sadd.s32 4294967295, %s430_s12   ;;  %p405_p0 = scmp.ge.s32.totalorder %s430_s12, 1  ;;  %s430_s12 = sphi %s452_s12, %s13_s12  }
   0x2   : > { %p137_p1 = scmp.lt.s32.totalorder %s430_s12, 3 }
   0x4   : > { %p138_p2 = pnand %p405_p0, %p137_p1 }
   0x5   : > { %p161_p3 = scmp.lt.s32.totalorder (!%p138_p2), %s401_s13, 1 }
   0x6   : > { %141 = sbr.rel (%p138_p2) target bundleno = 44 (0x2c), region = 32 }
   0xb   : > { %s648_s13 = smov (!%p161_p3, %s401_s13), 1  ;;  %v463_v0 = vld [vmem:[%s644_s1] ss:$0 sm:$0xff]  ;;  %vm313_vm0 = vcmask 64512  }
   0xc   : > { %s414_s14 = sshll.u32 %s648_s13, 8  ;;  %v473_v1 = vld [vmem:[%s645_s2] ss:$0 sm:$0xff] }
   0xd   : > { %s468_s19 = scalar_lea.vmem %s643_s0, %s414_s14  ;;  %s496_s24 = scalar_lea.vmem %s646_s3, %s414_s14 }
   0xe   : > { %v171_v2 = vld [vmem:[%s468_s19] sm:$0xff]  ;;  %v172_v3 = vld [vmem:[%s468_s19 + $0x8] sm:$0xff]  ;;  %v173_v4 = vld [vmem:[%s468_s19 + $0x10] sm:$0xff] }
   0xf   : > { %v210_v5 = vmul.f32 %v463_v0, %v171_v2  ;;  %v211_v6 = vmul.f32 %v463_v0, %v172_v3  ;;  %v212_v7 = vmul.f32 %v463_v0, %v173_v4  ;;  %v174_v8 = vld [vmem:[%s468_s19 + $0x18] sm:$0xff]  ;;  %v175_v9 = vld [vmem:[%s468_s19 + $0x20] sm:$0xff]  ;;  %v176_v10 = vld [vmem:[%s468_s19 + $0x28] sm:$0xff] }
  0x10   : > { %v213_v11 = vmul.f32 %v463_v0, %v174_v8  ;;  %v214_v12 = vmul.f32 %v463_v0, %v175_v9  ;;  %v215_v13 = vmul.f32 %v463_v0, %v176_v10  ;;  %v177_v14 = vld [vmem:[%s468_s19 + $0x30] sm:$0xff]  ;;  %v178_v15 = vld [vmem:[%s468_s19 + $0x38] sm:$0xff]  ;;  %v179_v24 = vld [vmem:[%s468_s19 + $0x40] sm:$0xff] }
  0x11   : > { %v249_v16 = vadd.f32 %v473_v1, %v210_v5  ;;  %v250_v17 = vadd.f32 %v473_v1, %v211_v6  ;;  %v251_v18 = vadd.f32 %v473_v1, %v212_v7  ;;  %v216_v19 = vmul.f32 %v463_v0, %v177_v14  ;;  %v180_v25 = vld [vmem:[%s468_s19 + $0x48] sm:$0xff]  ;;  %v181_v26 = vld [vmem:[%s468_s19 + $0x50] sm:$0xff]  ;;  %v182_v31 = vld [vmem:[%s468_s19 + $0x58] sm:$0xff] }
  0x12   : > { %v252_v20 = vadd.f32 %v473_v1, %v213_v11  ;;  %v253_v21 = vadd.f32 %v473_v1, %v214_v12  ;;  %v254_v22 = vadd.f32 %v473_v1, %v215_v13  ;;  %v217_v23 = vmul.f32 %v463_v0, %v178_v15  ;;  %v183_v32 = vld [vmem:[%s468_s19 + $0x60] sm:$0xff]  ;;  %v184_v33 = vld [vmem:[%s468_s19 + $0x68] sm:$0xff]  ;;  %v185_v38 = vld [vmem:[%s468_s19 + $0x70] sm:$0xff] }
  0x13   : > { %v281_v27 = vmax.f32 %v249_v16, 0.0  ;;  %v282_v28 = vmax.f32 %v250_v17, 0.0  ;;  %v283_v29 = vmax.f32 %v251_v18, 0.0  ;;  %v255_v30 = vadd.f32 %v473_v1, %v216_v19  ;;  %v186_v43 = vld [vmem:[%s468_s19 + $0x78] sm:$0xff]  ;;  %v187_v56 = vld [vmem:[%s468_s19 + $0x80] sm:$0xff]  ;;  %v188_v57 = vld [vmem:[%s468_s19 + $0x88] sm:$0xff] }
  0x14   : > { %v284_v34 = vmax.f32 %v252_v20, 0.0  ;;  %v285_v35 = vmax.f32 %v253_v21, 0.0  ;;  %v286_v36 = vmax.f32 %v254_v22, 0.0  ;;  %v256_v37 = vadd.f32 %v473_v1, %v217_v23  ;;  %v189_v58 = vld [vmem:[%s468_s19 + $0x90] sm:$0xff]  ;;  %v190_v63 = vld [vmem:[%s468_s19 + $0x98] sm:$0xff]  ;;  %v191_v2 = vld [vmem:[%s468_s19 + $0xa0] sm:$0xff] }
  0x15   : > { %314 = vst.msk [vmem:[%s496_s24] sm:$0xff] %vm313_vm0, %v281_v27  ;;  %315 = vst.msk [vmem:[%s496_s24 + $0x8] sm:$0xff] %vm313_vm0, %v282_v28  ;;  %v287_v39 = vmax.f32 %v255_v30, 0.0  ;;  %v218_v40 = vmul.f32 %v463_v0, %v179_v24  ;;  %v219_v41 = vmul.f32 %v463_v0, %v180_v25  ;;  %v220_v42 = vmul.f32 %v463_v0, %v181_v26  ;;  %v192_v3 = vld [vmem:[%s468_s19 + $0xa8] sm:$0xff]  ;;  %v193_v8 = vld [vmem:[%s468_s19 + $0xb0] sm:$0xff] }
  0x16   : > { %316 = vst.msk [vmem:[%s496_s24 + $0x10] sm:$0xff] %vm313_vm0, %v283_v29  ;;  %317 = vst.msk [vmem:[%s496_s24 + $0x18] sm:$0xff] %vm313_vm0, %v284_v34  ;;  %v288_v44 = vmax.f32 %v256_v37, 0.0  ;;  %v221_v45 = vmul.f32 %v463_v0, %v182_v31  ;;  %v222_v46 = vmul.f32 %v463_v0, %v183_v32  ;;  %v223_v47 = vmul.f32 %v463_v0, %v184_v33  ;;  %v194_v13 = vld [vmem:[%s468_s19 + $0xb8] sm:$0xff]  ;;  %v195_v26 = vld [vmem:[%s468_s19 + $0xc0] sm:$0xff] }
  0x17   : > { %318 = vst.msk [vmem:[%s496_s24 + $0x20] sm:$0xff] %vm313_vm0, %v285_v35  ;;  %319 = vst.msk [vmem:[%s496_s24 + $0x28] sm:$0xff] %vm313_vm0, %v286_v36  ;;  %v257_v48 = vadd.f32 %v473_v1, %v218_v40  ;;  %v258_v49 = vadd.f32 %v473_v1, %v219_v41  ;;  %v259_v50 = vadd.f32 %v473_v1, %v220_v42  ;;  %v196_v27 = vld [vmem:[%s468_s19 + $0xc8] sm:$0xff]  ;;  %v197_v28 = vld [vmem:[%s468_s19 + $0xd0] sm:$0xff] }
  0x18   : > { %320 = vst.msk [vmem:[%s496_s24 + $0x30] sm:$0xff] %vm313_vm0, %v287_v39  ;;  %v224_v51 = vmul.f32 %v463_v0, %v185_v38  ;;  %321 = vst.msk [vmem:[%s496_s24 + $0x38] sm:$0xff] %vm313_vm0, %v288_v44  ;;  %v260_v52 = vadd.f32 %v473_v1, %v221_v45  ;;  %v261_v53 = vadd.f32 %v473_v1, %v222_v46  ;;  %v198_v33 = vld [vmem:[%s468_s19 + $0xd8] sm:$0xff]  ;;  %v199_v34 = vld [vmem:[%s468_s19 + $0xe0] sm:$0xff] }
  0x19   : > { %v262_v54 = vadd.f32 %v473_v1, %v223_v47  ;;  %v225_v55 = vmul.f32 %v463_v0, %v186_v43  ;;  %v289_v59 = vmax.f32 %v257_v48, 0.0  ;;  %v290_v60 = vmax.f32 %v258_v49, 0.0  ;;  %v200_v35 = vld [vmem:[%s468_s19 + $0xe8] sm:$0xff]  ;;  %v201_v40 = vld [vmem:[%s468_s19 + $0xf0] sm:$0xff]  ;;  %v202_v45 = vld [vmem:[%s468_s19 + $0xf8] sm:$0xff] }
  0x1a   : > { %v291_v61 = vmax.f32 %v259_v50, 0.0  ;;  %v263_v62 = vadd.f32 %v473_v1, %v224_v51  ;;  %v292_v4 = vmax.f32 %v260_v52, 0.0  ;;  %v293_v5 = vmax.f32 %v261_v53, 0.0 }
  0x1b   : > { %v294_v6 = vmax.f32 %v262_v54, 0.0  ;;  %v264_v7 = vadd.f32 %v473_v1, %v225_v55  ;;  %322 = vst.msk [vmem:[%s496_s24 + $0x40] sm:$0xff] %vm313_vm0, %v289_v59  ;;  %323 = vst.msk [vmem:[%s496_s24 + $0x48] sm:$0xff] %vm313_vm0, %v290_v60  ;;  %v226_v10 = vmul.f32 %v463_v0, %v187_v56  ;;  %v227_v11 = vmul.f32 %v463_v0, %v188_v57 }
  0x1c   : > { %324 = vst.msk [vmem:[%s496_s24 + $0x50] sm:$0xff] %vm313_vm0, %v291_v61  ;;  %v295_v9 = vmax.f32 %v263_v62, 0.0  ;;  %v228_v12 = vmul.f32 %v463_v0, %v189_v58  ;;  %325 = vst.msk [vmem:[%s496_s24 + $0x58] sm:$0xff] %vm313_vm0, %v292_v4  ;;  %v229_v15 = vmul.f32 %v463_v0, %v190_v63  ;;  %v230_v16 = vmul.f32 %v463_v0, %v191_v2 }
  0x1d   : > { %326 = vst.msk [vmem:[%s496_s24 + $0x60] sm:$0xff] %vm313_vm0, %v293_v5  ;;  %327 = vst.msk [vmem:[%s496_s24 + $0x68] sm:$0xff] %vm313_vm0, %v294_v6  ;;  %v296_v14 = vmax.f32 %v264_v7, 0.0  ;;  %v231_v17 = vmul.f32 %v463_v0, %v192_v3  ;;  %v265_v18 = vadd.f32 %v473_v1, %v226_v10  ;;  %v266_v19 = vadd.f32 %v473_v1, %v227_v11 }
  0x1e   : > { %328 = vst.msk [vmem:[%s496_s24 + $0x70] sm:$0xff] %vm313_vm0, %v295_v9  ;;  %v267_v20 = vadd.f32 %v473_v1, %v228_v12  ;;  %v232_v21 = vmul.f32 %v463_v0, %v193_v8  ;;  %v268_v22 = vadd.f32 %v473_v1, %v229_v15  ;;  %v269_v23 = vadd.f32 %v473_v1, %v230_v16 }
  0x1f   : > { %329 = vst.msk [vmem:[%s496_s24 + $0x78] sm:$0xff] %vm313_vm0, %v296_v14  ;;  %v270_v24 = vadd.f32 %v473_v1, %v231_v17  ;;  %v233_v25 = vmul.f32 %v463_v0, %v194_v13  ;;  %v297_v29 = vmax.f32 %v265_v18, 0.0  ;;  %v298_v30 = vmax.f32 %v266_v19, 0.0 }
  0x20   : > { %v299_v31 = vmax.f32 %v267_v20, 0.0  ;;  %v271_v32 = vadd.f32 %v473_v1, %v232_v21  ;;  %v300_v36 = vmax.f32 %v268_v22, 0.0  ;;  %v301_v37 = vmax.f32 %v269_v23, 0.0 }
  0x21   : > { %v302_v38 = vmax.f32 %v270_v24, 0.0  ;;  %v272_v39 = vadd.f32 %v473_v1, %v233_v25  ;;  %330 = vst.msk [vmem:[%s496_s24 + $0x80] sm:$0xff] %vm313_vm0, %v297_v29  ;;  %331 = vst.msk [vmem:[%s496_s24 + $0x88] sm:$0xff] %vm313_vm0, %v298_v30  ;;  %v234_v42 = vmul.f32 %v463_v0, %v195_v26  ;;  %v235_v43 = vmul.f32 %v463_v0, %v196_v27 }
  0x22   : > { %332 = vst.msk [vmem:[%s496_s24 + $0x90] sm:$0xff] %vm313_vm0, %v299_v31  ;;  %v303_v41 = vmax.f32 %v271_v32, 0.0  ;;  %v236_v44 = vmul.f32 %v463_v0, %v197_v28  ;;  %333 = vst.msk [vmem:[%s496_s24 + $0x98] sm:$0xff] %vm313_vm0, %v300_v36  ;;  %v237_v47 = vmul.f32 %v463_v0, %v198_v33  ;;  %v238_v48 = vmul.f32 %v463_v0, %v199_v34 }
  0x23   : > { %334 = vst.msk [vmem:[%s496_s24 + $0xa0] sm:$0xff] %vm313_vm0, %v301_v37  ;;  %335 = vst.msk [vmem:[%s496_s24 + $0xa8] sm:$0xff] %vm313_vm0, %v302_v38  ;;  %v304_v46 = vmax.f32 %v272_v39, 0.0  ;;  %v239_v49 = vmul.f32 %v463_v0, %v200_v35  ;;  %v273_v50 = vadd.f32 %v473_v1, %v234_v42  ;;  %v274_v51 = vadd.f32 %v473_v1, %v235_v43 }
  0x24   : > { %336 = vst.msk [vmem:[%s496_s24 + $0xb0] sm:$0xff] %vm313_vm0, %v303_v41  ;;  %v275_v52 = vadd.f32 %v473_v1, %v236_v44  ;;  %v240_v53 = vmul.f32 %v463_v0, %v201_v40  ;;  %v276_v54 = vadd.f32 %v473_v1, %v237_v47  ;;  %v277_v55 = vadd.f32 %v473_v1, %v238_v48 }
  0x25   : > { %337 = vst.msk [vmem:[%s496_s24 + $0xb8] sm:$0xff] %vm313_vm0, %v304_v46  ;;  %v278_v56 = vadd.f32 %v473_v1, %v239_v49  ;;  %v241_v57 = vmul.f32 %v463_v0, %v202_v45  ;;  %v305_v58 = vmax.f32 %v273_v50, 0.0  ;;  %v306_v59 = vmax.f32 %v274_v51, 0.0 }
  0x26   : > { %v307_v60 = vmax.f32 %v275_v52, 0.0  ;;  %v279_v61 = vadd.f32 %v473_v1, %v240_v53  ;;  %v308_v62 = vmax.f32 %v276_v54, 0.0  ;;  %v309_v63 = vmax.f32 %v277_v55, 0.0 }
  0x27   : > { %v310_v2 = vmax.f32 %v278_v56, 0.0  ;;  %v280_v3 = vadd.f32 %v473_v1, %v241_v57  ;;  %338 = vst.msk [vmem:[%s496_s24 + $0xc0] sm:$0xff] %vm313_vm0, %v305_v58  ;;  %339 = vst.msk [vmem:[%s496_s24 + $0xc8] sm:$0xff] %vm313_vm0, %v306_v59 }
  0x28   : > { %340 = vst.msk [vmem:[%s496_s24 + $0xd0] sm:$0xff] %vm313_vm0, %v307_v60  ;;  %v311_v4 = vmax.f32 %v279_v61, 0.0  ;;  %341 = vst.msk [vmem:[%s496_s24 + $0xd8] sm:$0xff] %vm313_vm0, %v308_v62 }
  0x29   : > { %342 = vst.msk [vmem:[%s496_s24 + $0xe0] sm:$0xff] %vm313_vm0, %v309_v63  ;;  %343 = vst.msk [vmem:[%s496_s24 + $0xe8] sm:$0xff] %vm313_vm0, %v310_v2  ;;  %v312_v0 = vmax.f32 %v280_v3, 0.0 }
  0x2a   : > { %344 = vst.msk [vmem:[%s496_s24 + $0xf0] sm:$0xff] %vm313_vm0, %v311_v4 }
  0x2b   : > { %345 = vst.msk [vmem:[%s496_s24 + $0xf8] sm:$0xff] %vm313_vm0, %v312_v0 }
  0x2c PF: > { %s13_s12 = sadd.s32 1, %s430_s12  }
  0x2d   : > { %p10_p4 = scmp.ge.s32.totalorder %s13_s12, 4  }
  0x2f   :  { %12 = sbr.rel (!%p10_p4) target bundleno = 1 (0x1), region = 62 }

// kernel: double_conv_forward.3
= control target key start
LH: loop header
LB: loop body
LE: loop exit
PB: predicated region body
PF: predicated region fallthrough
CT: control target
= control target key end

     0   :  { %s4960_s15 = smov 0   ;;  %s5886_s0 = inlined_call_operand.vmem [shape: f32[2,16,16,4], index: 0, kind: input, shape index: {}]   ;;  %s5887_s1 = inlined_call_operand.vmem [shape: bf16[9,4,8], index: 1, kind: input, shape index: {}]   ;;  %s5888_s2 = inlined_call_operand.vmem [shape: f32[2,16,16,8], index: 2, kind: output, shape index: {0}]   ;;  %s5889_s3 = inlined_call_operand.vmem [shape: f32[1,8], index: 3, kind: output, shape index: {1}]   ;;  %s5890_s4 = inlined_call_operand.vmem [shape: f32[1,8], index: 4, kind: output, shape index: {2}]  }
   0x1 LB: > { %s4178_s16 = sadd.s32 4294967295, %s4932_s15   ;;  %p4182_p0 = scmp.ge.s32.totalorder %s4932_s15, 1  ;;  %s4932_s15 = sphi %s4960_s15, %s15_s15  }
   0x2   : > { %p157_p1 = scmp.lt.s32.totalorder %s4932_s15, 3 }
   0x4   : > { %p158_p2 = pnand %p4182_p0, %p157_p1 }
   0x5   : > { %p183_p3 = scmp.lt.s32.totalorder (!%p158_p2), %s4178_s16, 1  ;;  %p4187_p4 = scmp.ne.s32.totalorder (!%p158_p2), %s4178_s16, 0 }
   0x6   : > { %161 = sbr.rel (%p158_p2) target bundleno = 621 (0x26d), region = 28 }
   0xb   : > { %s184_s17 = scalar_select %p183_p3, %s4178_s16, 1 }
   0xc   : > { %197 = sbr.rel (%p4187_p4) target bundleno = 40 (0x28), region = 32 }
   0xd   : > { %s4390_s18 = sshll.u32 %s184_s17, 8 }
   0xe   : > { %s4971_s21 = scalar_lea.vmem %s5886_s0, %s4390_s18  ;;  %s4976_s24 = scalar_lea.vmem %s5888_s2, %s4390_s18 }
  0x11   : > { %vm198_vm0 = vcmask 31744   ;;  %vm240_vm1 = vcmask 57344   ;;  %v4934_v0 = vmov 0.0  }
  0x12   : > { %199 = vst.msk [vmem:[#allocation2] sm:$0xff] %vm198_vm0, %v4934_v0  ;;  %200 = vst.msk [vmem:[#allocation2 + $0x8] sm:$0xff] %vm198_vm0, %v4934_v0 }
  0x13   : > { %201 = vst.msk [vmem:[#allocation2 + $0x10] sm:$0xff] %vm198_vm0, %v4934_v0  ;;  %202 = vst.msk [vmem:[#allocation2 + $0x18] sm:$0xff] %vm198_vm0, %v4934_v0 }
  0x14   : > { %203 = vst.msk [vmem:[#allocation2 + $0x20] sm:$0xff] %vm198_vm0, %v4934_v0  ;;  %204 = vst.msk [vmem:[#allocation2 + $0x28] sm:$0xff] %vm198_vm0, %v4934_v0 }
  0x15   : > { %205 = vst.msk [vmem:[#allocation2 + $0x30] sm:$0xff] %vm198_vm0, %v4934_v0  ;;  %206 = vst.msk [vmem:[#allocation2 + $0x38] sm:$0xff] %vm198_vm0, %v4934_v0 }
  0x16   : > { %207 = vst.msk [vmem:[#allocation2 + $0x40] sm:$0xff] %vm198_vm0, %v4934_v0  ;;  %208 = vst.msk [vmem:[#allocation2 + $0x48] sm:$0xff] %vm198_vm0, %v4934_v0 }
  0x17   : > { %209 = vst.msk [vmem:[#allocation2 + $0x50] sm:$0xff] %vm198_vm0, %v4934_v0  ;;  %210 = vst.msk [vmem:[#allocation2 + $0x58] sm:$0xff] %vm198_vm0, %v4934_v0 }
  0x18   : > { %211 = vst.msk [vmem:[#allocation2 + $0x60] sm:$0xff] %vm198_vm0, %v4934_v0  ;;  %212 = vst.msk [vmem:[#allocation2 + $0x68] sm:$0xff] %vm198_vm0, %v4934_v0 }
  0x19   : > { %213 = vst.msk [vmem:[#allocation2 + $0x70] sm:$0xff] %vm198_vm0, %v4934_v0  ;;  %214 = vst.msk [vmem:[#allocation2 + $0x78] sm:$0xff] %vm198_vm0, %v4934_v0 }
  0x1a   : > { %215 = vst.msk [vmem:[#allocation2 + $0x80] sm:$0xff] %vm198_vm0, %v4934_v0  ;;  %216 = vst.msk [vmem:[#allocation2 + $0x88] sm:$0xff] %vm198_vm0, %v4934_v0 }
  0x1b   : > { %217 = vst.msk [vmem:[#allocation2 + $0x90] sm:$0xff] %vm198_vm0, %v4934_v0  ;;  %218 = vst.msk [vmem:[#allocation2 + $0x98] sm:$0xff] %vm198_vm0, %v4934_v0 }
  0x1c   : > { %219 = vst.msk [vmem:[#allocation2 + $0xa0] sm:$0xff] %vm198_vm0, %v4934_v0  ;;  %220 = vst.msk [vmem:[#allocation2 + $0xa8] sm:$0xff] %vm198_vm0, %v4934_v0 }
  0x1d   : > { %221 = vst.msk [vmem:[#allocation2 + $0xb0] sm:$0xff] %vm198_vm0, %v4934_v0  ;;  %222 = vst.msk [vmem:[#allocation2 + $0xb8] sm:$0xff] %vm198_vm0, %v4934_v0 }
  0x1e   : > { %223 = vst.msk [vmem:[#allocation2 + $0xc0] sm:$0xff] %vm198_vm0, %v4934_v0  ;;  %224 = vst.msk [vmem:[#allocation2 + $0xc8] sm:$0xff] %vm198_vm0, %v4934_v0 }
  0x1f   : > { %225 = vst.msk [vmem:[#allocation2 + $0xd0] sm:$0xff] %vm198_vm0, %v4934_v0  ;;  %226 = vst.msk [vmem:[#allocation2 + $0xd8] sm:$0xff] %vm198_vm0, %v4934_v0 }
  0x20   : > { %227 = vst.msk [vmem:[#allocation2 + $0xe0] sm:$0xff] %vm198_vm0, %v4934_v0  ;;  %228 = vst.msk [vmem:[#allocation2 + $0xe8] sm:$0xff] %vm198_vm0, %v4934_v0 }
  0x21   : > { %229 = vst.msk [vmem:[#allocation2 + $0xf0] sm:$0xff] %vm198_vm0, %v4934_v0  ;;  %230 = vst.msk [vmem:[#allocation2 + $0xf8] sm:$0xff] %vm198_vm0, %v4934_v0 }
  0x22   : > { %231 = vst.msk [vmem:[#allocation2 + $0x100] sm:$0xff] %vm198_vm0, %v4934_v0  ;;  %232 = vst.msk [vmem:[#allocation2 + $0x108] sm:$0xff] %vm198_vm0, %v4934_v0 }
  0x23   : > { %233 = vst.msk [vmem:[#allocation2 + $0x110] sm:$0xff] %vm198_vm0, %v4934_v0  ;;  %234 = vst.msk [vmem:[#allocation2 + $0x118] sm:$0xff] %vm198_vm0, %v4934_v0 }
  0x24   : > { %235 = vst.msk [vmem:[#allocation2 + $0x120] sm:$0xff] %vm198_vm0, %v4934_v0  ;;  %236 = vst.msk [vmem:[#allocation2 + $0x128] sm:$0xff] %vm198_vm0, %v4934_v0 }
  0x25   : > { %237 = vst.msk [vmem:[#allocation2 + $0x130] sm:$0xff] %vm198_vm0, %v4934_v0  ;;  %238 = vst.msk [vmem:[#allocation2 + $0x138] sm:$0xff] %vm198_vm0, %v4934_v0 }
  0x26   : > { %239 = vst.msk [vmem:[#allocation2 + $0x140] sm:$0xff] %vm198_vm0, %v4934_v0 }
  0x27   : > { %241 = vst.msk [vmem:[%s5889_s3] sm:$0x1] %vm240_vm1, %v4934_v0  ;;  %242 = vst.msk [vmem:[%s5890_s4] sm:$0x1] %vm240_vm1, %v4934_v0 }
  0x28 PF: > { %v362_v1 = vld [vmem:[%s5887_s1] sm:$0x3]  ;;  %vm417_vm2 = vcmask 1041408   ;;  %vm275_vm3 = vcmask 31744   ;;  %v309_v3 = vld [vmem:[#allocation2 + $0x8] sm:$0xff]  ;;  %v258_v8 = vld [vmem:[%s4971_s21 + $0x78] sm:$0xff] }
  0x29   : > { %v308_v2 = vld [vmem:[#allocation2] sm:$0xff]  ;;  %4907 = vmatprep.subr.msk.bf16.mxu0 %vm417_vm2, %v362_v1  ;;  %4908 = vmatprep.subr.msk.bf16.mxu1 %vm417_vm2, %v362_v1  ;;  %v419_v4 = vsel %vm417_vm2, %v362_v1, 0  ;;  %v244_v7 = vld [vmem:[%s4971_s21 + $0x8] sm:$0xff]  ;;  %291 = vst.msk [vmem:[#allocation2 + $0x9a] sm:$0xff] %vm275_vm3, %v258_v8  ;;  %v261_v12 = vld [vmem:[%s4971_s21 + $0x90] sm:$0xff]  ;;  %vm598_vm4 = vcmask 64512  }
  0x2a   : > { %v344_v5 = vpack.c.bf16 %v309_v3, %v308_v2  ;;  %v243_v6 = vld [vmem:[%s4971_s21] sm:$0xff]  ;;  %4564 = vmatpush3.bf16.msra.mxu0 %v419_v4  ;;  %4906 = vmatpush3.bf16.msra.mxu1 %v419_v4  ;;  %277 = vst.msk [vmem:[#allocation2 + $0x1c] sm:$0xff] %vm275_vm3, %v244_v7  ;;  %v260_v10 = vld [vmem:[%s4971_s21 + $0x88] sm:$0xff]  ;;  %v262_v13 = vld [vmem:[%s4971_s21 + $0x98] sm:$0xff]  ;;  %vm4003_vm5 = vcmask 57344  }
  0x2b   : > { %276 = vst.msk [vmem:[#allocation2 + $0x14] sm:$0xff] %vm275_vm3, %v243_v6  ;;  %v259_v9 = vld [vmem:[%s4971_s21 + $0x80] sm:$0xff]  ;;  %293 = vst.msk [vmem:[#allocation2 + $0xac] sm:$0xff] %vm275_vm3, %v260_v10  ;;  %v245_v15 = vld [vmem:[%s4971_s21 + $0x10] sm:$0xff] }
  0x2c   : > { %v4206_v11 = vld [vmem:[%s5887_s1 + $0x2] sm:$0x3]  ;;  %4565 = vmatprep.mubr.msk.bf16.mxu0 %vm275_vm3, %v344_v5  ;;  %292 = vst.msk [vmem:[#allocation2 + $0xa4] sm:$0xff] %vm275_vm3, %v259_v9  ;;  %v4225_v14 = vld [vmem:[%s5887_s1 + $0x4] sm:$0x3]  ;;  %294 = vst.msk [vmem:[#allocation2 + $0xb6] sm:$0xff] %vm275_vm3, %v261_v12 }
  0x2d   : > { %4909 = vmatprep.subr.msk.bf16.mxu1 %vm417_vm2, %v4206_v11  ;;  %295 = vst.msk [vmem:[#allocation2 + $0xbe] sm:$0xff] %vm275_vm3, %v262_v13  ;;  %4910 = vmatprep.subr.msk.bf16.mxu0 %vm417_vm2, %v4225_v14  ;;  %v246_v16 = vld [vmem:[%s4971_s21 + $0x18] sm:$0xff]  ;;  %v247_v17 = vld [vmem:[%s4971_s21 + $0x20] sm:$0xff]  ;;  %278 = vst.msk [vmem:[#allocation2 + $0x26] sm:$0xff] %vm275_vm3, %v245_v15  ;;  %v1144_v36 = vsel %vm417_vm2, %v4225_v14, 0  ;;  %v746_v43 = vsel %vm417_vm2, %v4206_v11, 0 }
  0x2e   : > { %279 = vst.msk [vmem:[#allocation2 + $0x2e] sm:$0xff] %vm275_vm3, %v246_v16  ;;  %280 = vst.msk [vmem:[#allocation2 + $0x38] sm:$0xff] %vm275_vm3, %v247_v17  ;;  %v263_v18 = vld [vmem:[%s4971_s21 + $0xa0] sm:$0xff]  ;;  %v264_v19 = vld [vmem:[%s4971_s21 + $0xa8] sm:$0xff] }
  0x2f   : > { %v265_v20 = vld [vmem:[%s4971_s21 + $0xb0] sm:$0xff]  ;;  %296 = vst.msk [vmem:[#allocation2 + $0xc8] sm:$0xff] %vm275_vm3, %v263_v18  ;;  %297 = vst.msk [vmem:[#allocation2 + $0xd0] sm:$0xff] %vm275_vm3, %v264_v19  ;;  %v248_v21 = vld [vmem:[%s4971_s21 + $0x28] sm:$0xff] }
  0x30   : > { %298 = vst.msk [vmem:[#allocation2 + $0xda] sm:$0xff] %vm275_vm3, %v265_v20  ;;  %v249_v22 = vld [vmem:[%s4971_s21 + $0x30] sm:$0xff]  ;;  %v250_v23 = vld [vmem:[%s4971_s21 + $0x38] sm:$0xff]  ;;  %281 = vst.msk [vmem:[#allocation2 + $0x40] sm:$0xff] %vm275_vm3, %v248_v21 }
  0x31   : > { %282 = vst.msk [vmem:[#allocation2 + $0x4a] sm:$0xff] %vm275_vm3, %v249_v22  ;;  %v251_v24 = vld [vmem:[%s4971_s21 + $0x40] sm:$0xff]  ;;  %283 = vst.msk [vmem:[#allocation2 + $0x52] sm:$0xff] %vm275_vm3, %v250_v23  ;;  %v266_v25 = vld [vmem:[%s4971_s21 + $0xb8] sm:$0xff] }
  0x32   : > { %v267_v26 = vld [vmem:[%s4971_s21 + $0xc0] sm:$0xff]  ;;  %284 = vst.msk [vmem:[#allocation2 + $0x5c] sm:$0xff] %vm275_vm3, %v251_v24  ;;  %299 = vst.msk [vmem:[#allocation2 + $0xe2] sm:$0xff] %vm275_vm3, %v266_v25  ;;  %v268_v27 = vld [vmem:[%s4971_s21 + $0xc8] sm:$0xff] }
  0x33   : > { %300 = vst.msk [vmem:[#allocation2 + $0xec] sm:$0xff] %vm275_vm3, %v267_v26  ;;  %v269_v28 = vld [vmem:[%s4971_s21 + $0xd0] sm:$0xff]  ;;  %v252_v29 = vld [vmem:[%s4971_s21 + $0x48] sm:$0xff]  ;;  %v311_v31 = vld [vmem:[#allocation2 + $0x18] sm:$0xff] }
  0x34   : > { %v310_v30 = vld [vmem:[#allocation2 + $0x10] sm:$0xff]  ;;  %301 = vst.msk [vmem:[#allocation2 + $0xf4] sm:$0xff] %vm275_vm3, %v268_v27  ;;  %302 = vst.msk [vmem:[#allocation2 + $0xfe] sm:$0xff] %vm275_vm3, %v269_v28  ;;  %v328_v34 = vld [vmem:[#allocation2 + $0xa0] sm:$0xff] }
  0x35   : > { %v253_v32 = vld [vmem:[%s4971_s21 + $0x50] sm:$0xff]  ;;  %285 = vst.msk [vmem:[#allocation2 + $0x64] sm:$0xff] %vm275_vm3, %v252_v29  ;;  %v345_v33 = vpack.c.bf16 %v311_v31, %v310_v30  ;;  %v329_v35 = vld [vmem:[#allocation2 + $0xa8] sm:$0xff]  ;;  %v254_v37 = vld [vmem:[%s4971_s21 + $0x58] sm:$0xff] }
  0x36   : > { %286 = vst.msk [vmem:[#allocation2 + $0x6e] sm:$0xff] %vm275_vm3, %v253_v32  ;;  %v354_v38 = vpack.c.bf16 %v329_v35, %v328_v34  ;;  %v330_v39 = vld [vmem:[#allocation2 + $0xb0] sm:$0xff]  ;;  %v331_v40 = vld [vmem:[#allocation2 + $0xb8] sm:$0xff]  ;;  %v332_v41 = vld [vmem:[#allocation2 + $0xc0] sm:$0xff] }
  0x37   : > { %287 = vst.msk [vmem:[#allocation2 + $0x76] sm:$0xff] %vm275_vm3, %v254_v37  ;;  %4566 = vmatmul.mubr.msk.bf16.vlgmr.msra.gmra.mxu0 %vm275_vm3, %v345_v33  ;;  %v355_v42 = vpack.c.bf16 %v331_v40, %v330_v39  ;;  %v312_v44 = vld [vmem:[#allocation2 + $0x20] sm:$0xff]  ;;  %v313_v45 = vld [vmem:[#allocation2 + $0x28] sm:$0xff]  ;;  %v314_v47 = vld [vmem:[#allocation2 + $0x30] sm:$0xff] }
  0x38   : > { %4585 = vmatprep.mubr.msk.bf16.mxu1 %vm275_vm3, %v354_v38  ;;  %4640 = vmatpush3.bf16.msra.mxu0 %v1144_v36  ;;  %v346_v46 = vpack.c.bf16 %v313_v45, %v312_v44  ;;  %v315_v48 = vld [vmem:[#allocation2 + $0x38] sm:$0xff]  ;;  %v333_v49 = vld [vmem:[#allocation2 + $0xc8] sm:$0xff]  ;;  %v316_v51 = vld [vmem:[#allocation2 + $0x40] sm:$0xff] }
  0x39   : > { %4586 = vmatmul.mubr.msk.bf16.vlgmr.msra.gmra.mxu1 %vm275_vm3, %v355_v42  ;;  %v356_v50 = vpack.c.bf16 %v333_v49, %v332_v41  ;;  %v317_v52 = vld [vmem:[#allocation2 + $0x48] sm:$0xff]  ;;  %v334_v53 = vld [vmem:[#allocation2 + $0xd0] sm:$0xff]  ;;  %v335_v54 = vld [vmem:[#allocation2 + $0xd8] sm:$0xff]  ;;  %v347_v55 = vpack.c.bf16 %v315_v48, %v314_v47 }
  0x3a   : > { %4602 = vmatpush3.bf16.msra.mxu1 %v746_v43  ;;  %4569 = vmatprep.mubr.msk.bf16.mxu0 %vm275_vm3, %v346_v46  ;;  %v336_v56 = vld [vmem:[#allocation2 + $0xe0] sm:$0xff]  ;;  %v337_v57 = vld [vmem:[#allocation2 + $0xe8] sm:$0xff]  ;;  %v348_v58 = vpack.c.bf16 %v317_v52, %v316_v51  ;;  %v270_v59 = vld [vmem:[%s4971_s21 + $0xd8] sm:$0xff]  ;;  %v357_v60 = vpack.c.bf16 %v335_v54, %v334_v53 }
  0x3b   : > { %4589 = vmatprep.mubr.msk.bf16.mxu1 %vm275_vm3, %v356_v50  ;;  %303 = vst.msk [vmem:[#allocation2 + $0x106] sm:$0xff] %vm275_vm3, %v270_v59  ;;  %v271_v61 = vld [vmem:[%s4971_s21 + $0xe0] sm:$0xff]  ;;  %v358_v62 = vpack.c.bf16 %v337_v57, %v336_v56  ;;  %v272_v63 = vld [vmem:[%s4971_s21 + $0xe8] sm:$0xff]  ;;  %v257_v2 = vld [vmem:[%s4971_s21 + $0x70] sm:$0xff] }
  0x3c   : > { %304 = vst.msk [vmem:[#allocation2 + $0x110] sm:$0xff] %vm275_vm3, %v271_v61  ;;  %v255_v0 = vld [vmem:[%s4971_s21 + $0x60] sm:$0xff]  ;;  %v256_v1 = vld [vmem:[%s4971_s21 + $0x68] sm:$0xff]  ;;  %305 = vst.msk [vmem:[#allocation2 + $0x118] sm:$0xff] %vm275_vm3, %v272_v63 }
  0x3d   : > { %288 = vst.msk [vmem:[#allocation2 + $0x80] sm:$0xff] %vm275_vm3, %v255_v0  ;;  %289 = vst.msk [vmem:[#allocation2 + $0x88] sm:$0xff] %vm275_vm3, %v256_v1  ;;  %v318_v3 = vld [vmem:[#allocation2 + $0x50] sm:$0xff]  ;;  %v319_v4 = vld [vmem:[#allocation2 + $0x58] sm:$0xff] }
  0x3e   : > { %290 = vst.msk [vmem:[#allocation2 + $0x92] sm:$0xff] %vm275_vm3, %v257_v2  ;;  %v4244_v5 = vld [vmem:[%s5887_s1 + $0x6] sm:$0x3]  ;;  %v321_v7 = vld [vmem:[#allocation2 + $0x68] sm:$0xff]  ;;  %v338_v8 = vld [vmem:[#allocation2 + $0xf0] sm:$0xff]  ;;  %v349_v10 = vpack.c.bf16 %v319_v4, %v318_v3 }
  0x3f   : > { %4570 = vmatmul.mubr.msk.bf16.gmra.mxu0 %vm275_vm3, %v347_v55  ;;  %v320_v6 = vld [vmem:[#allocation2 + $0x60] sm:$0xff]  ;;  %4911 = vmatprep.subr.msk.bf16.mxu1 %vm417_vm2, %v4244_v5  ;;  %v339_v9 = vld [vmem:[#allocation2 + $0xf8] sm:$0xff]  ;;  %v4263_v11 = vld [vmem:[%s5887_s1 + $0x8] sm:$0x3]  ;;  %v1542_v41 = vsel %vm417_vm2, %v4244_v5, 0 }
  0x40   : > { %4573 = vmatprep.mubr.msk.bf16.mxu0 %vm275_vm3, %v348_v58  ;;  %v350_v12 = vpack.c.bf16 %v321_v7, %v320_v6  ;;  %4912 = vmatprep.subr.msk.bf16.mxu0 %vm417_vm2, %v4263_v11  ;;  %v359_v15 = vpack.c.bf16 %v339_v9, %v338_v8  ;;  %v322_v17 = vld [vmem:[#allocation2 + $0x70] sm:$0xff]  ;;  %v323_v18 = vld [vmem:[#allocation2 + $0x78] sm:$0xff]  ;;  %v635_v24 = vld [vmem:[#allocation2 + $0x1] sm:$0xff]  ;;  %v1940_v54 = vsel %vm417_vm2, %v4263_v11, 0 }
  0x41   : > { %4590 = vmatmul.mubr.msk.bf16.gmra.mxu1 %vm275_vm3, %v357_v60  ;;  %v351_v23 = vpack.c.bf16 %v323_v18, %v322_v17  ;;  %v636_v25 = vld [vmem:[#allocation2 + $0x9] sm:$0xff]  ;;  %v637_v33 = vld [vmem:[#allocation2 + $0x11] sm:$0xff]  ;;  %v638_v34 = vld [vmem:[#allocation2 + $0x19] sm:$0xff] }
  0x42   : > { %4593 = vmatprep.mubr.msk.bf16.mxu1 %vm275_vm3, %v358_v62  ;;  %v340_v13 = vld [vmem:[#allocation2 + $0x100] sm:$0xff]  ;;  %v341_v14 = vld [vmem:[#allocation2 + $0x108] sm:$0xff]  ;;  %v671_v28 = vpack.c.bf16 %v636_v25, %v635_v24  ;;  %v672_v39 = vpack.c.bf16 %v638_v34, %v637_v33  ;;  %v1035_v42 = vld [vmem:[#allocation2 + $0x12] sm:$0xff] }
  0x43   : > { %v360_v16 = vpack.c.bf16 %v341_v14, %v340_v13  ;;  %v342_v21 = vld [vmem:[#allocation2 + $0x110] sm:$0xff]  ;;  %v343_v22 = vld [vmem:[#allocation2 + $0x118] sm:$0xff]  ;;  %v1033_v31 = vld [vmem:[#allocation2 + $0x2] sm:$0xff] }
  0x44   : > { %v324_v19 = vld [vmem:[#allocation2 + $0x80] sm:$0xff]  ;;  %v325_v20 = vld [vmem:[#allocation2 + $0x88] sm:$0xff]  ;;  %v361_v27 = vpack.c.bf16 %v343_v22, %v342_v21  ;;  %v641_v46 = vld [vmem:[#allocation2 + $0x31] sm:$0xff] }
  0x45   : > { %v352_v26 = vpack.c.bf16 %v325_v20, %v324_v19  ;;  %v326_v29 = vld [vmem:[#allocation2 + $0x90] sm:$0xff]  ;;  %v327_v30 = vld [vmem:[#allocation2 + $0x98] sm:$0xff]  ;;  %v639_v36 = vld [vmem:[#allocation2 + $0x21] sm:$0xff] }
  0x46   : > { %v1034_v32 = vld [vmem:[#allocation2 + $0xa] sm:$0xff]  ;;  %v353_v35 = vpack.c.bf16 %v327_v30, %v326_v29  ;;  %v1036_v43 = vld [vmem:[#allocation2 + $0x1a] sm:$0xff]  ;;  %v1037_v44 = vld [vmem:[#allocation2 + $0x22] sm:$0xff] }
  0x47   : > { %4574 = vmatmul.mubr.msk.bf16.gmra.mxu0 %vm275_vm3, %v349_v10  ;;  %v640_v37 = vld [vmem:[#allocation2 + $0x29] sm:$0xff]  ;;  %v1069_v38 = vpack.c.bf16 %v1034_v32, %v1033_v31  ;;  %v642_v47 = vld [vmem:[#allocation2 + $0x39] sm:$0xff]  ;;  %v5139_v49 = vpack.c.bf16 %v1036_v43, %v1035_v42  ;;  %v643_v50 = vld [vmem:[#allocation2 + $0x41] sm:$0xff] }
  0x48   : > { %4577 = vmatprep.mubr.msk.bf16.mxu0 %vm275_vm3, %v350_v12  ;;  %v673_v40 = vpack.c.bf16 %v640_v37, %v639_v36  ;;  %v1038_v45 = vld [vmem:[#allocation2 + $0x2a] sm:$0xff]  ;;  %v674_v53 = vpack.c.bf16 %v642_v47, %v641_v46  ;;  %v1039_v57 = vld [vmem:[#allocation2 + $0x32] sm:$0xff]  ;;  %v1040_v58 = vld [vmem:[#allocation2 + $0x3a] sm:$0xff] }
  0x49   : > { %4594 = vmatmul.mubr.msk.bf16.gmra.mxu1 %vm275_vm3, %v359_v15  ;;  %v5137_v48 = vld [vmem:[%s5887_s1 + $0xa] sm:$0x3]  ;;  %v5143_v52 = vpack.c.bf16 %v1038_v45, %v1037_v44  ;;  %v5149_v56 = vld [vmem:[%s5887_s1 + $0xc] sm:$0x3]  ;;  %v1041_v59 = vld [vmem:[#allocation2 + $0x42] sm:$0xff]  ;;  %v5159_v63 = vpack.c.bf16 %v1040_v58, %v1039_v57 }
  0x4a   : > { %4597 = vmatprep.mubr.msk.bf16.mxu1 %vm275_vm3, %v360_v16  ;;  %v644_v51 = vld [vmem:[#allocation2 + $0x49] sm:$0xff]  ;;  %v645_v61 = vld [vmem:[#allocation2 + $0x51] sm:$0xff]  ;;  %v646_v62 = vld [vmem:[#allocation2 + $0x59] sm:$0xff] }
  0x4b   : > { %v675_v55 = vpack.c.bf16 %v644_v51, %v643_v50  ;;  %v1042_v60 = vld [vmem:[#allocation2 + $0x4a] sm:$0xff]  ;;  %v647_v0 = vld [vmem:[#allocation2 + $0x61] sm:$0xff]  ;;  %v676_v3 = vpack.c.bf16 %v646_v62, %v645_v61  ;;  %v274_v6 = vld [vmem:[%s4971_s21 + $0xf8] sm:$0xff] }
  0x4c   : > { %v648_v1 = vld [vmem:[#allocation2 + $0x69] sm:$0xff]  ;;  %v5161_v2 = vpack.c.bf16 %v1042_v60, %v1041_v59  ;;  %307 = vst.msk [vmem:[#allocation2 + $0x12a] sm:$0xff] %vm275_vm3, %v274_v6  ;;  %v1043_v7 = vld [vmem:[#allocation2 + $0x52] sm:$0xff]  ;;  %v1044_v8 = vld [vmem:[#allocation2 + $0x5a] sm:$0xff] }
  0x4d   : > { %v677_v4 = vpack.c.bf16 %v648_v1, %v647_v0  ;;  %v273_v5 = vld [vmem:[%s4971_s21 + $0xf0] sm:$0xff]  ;;  %v1045_v9 = vld [vmem:[#allocation2 + $0x62] sm:$0xff]  ;;  %v650_v12 = vld [vmem:[#allocation2 + $0x79] sm:$0xff]  ;;  %v5173_v13 = vpack.c.bf16 %v1044_v8, %v1043_v7 }
  0x4e   : > { %306 = vst.msk [vmem:[#allocation2 + $0x122] sm:$0xff] %vm275_vm3, %v273_v5  ;;  %v1046_v10 = vld [vmem:[#allocation2 + $0x6a] sm:$0xff]  ;;  %v651_v14 = vld [vmem:[#allocation2 + $0x81] sm:$0xff]  ;;  %v1047_v19 = vld [vmem:[#allocation2 + $0x72] sm:$0xff] }
  0x4f   : > { %4578 = vmatmul.mubr.msk.bf16.gmra.mxu0 %vm275_vm3, %v351_v23  ;;  %v649_v11 = vld [vmem:[#allocation2 + $0x71] sm:$0xff]  ;;  %v652_v15 = vld [vmem:[#allocation2 + $0x89] sm:$0xff]  ;;  %v5175_v16 = vpack.c.bf16 %v1046_v10, %v1045_v9  ;;  %v1048_v20 = vld [vmem:[#allocation2 + $0x7a] sm:$0xff] }
  0x50   : > { %4581 = vmatprep.mubr.msk.bf16.mxu0 %vm275_vm3, %v352_v26  ;;  %v678_v17 = vpack.c.bf16 %v650_v12, %v649_v11  ;;  %v679_v18 = vpack.c.bf16 %v652_v15, %v651_v14  ;;  %v1049_v21 = vld [vmem:[#allocation2 + $0x82] sm:$0xff]  ;;  %v1050_v22 = vld [vmem:[#allocation2 + $0x8a] sm:$0xff]  ;;  %v654_v24 = vld [vmem:[#allocation2 + $0x99] sm:$0xff]  ;;  %v5183_v25 = vpack.c.bf16 %v1048_v20, %v1047_v19 }
  0x51   : > { %4598 = vmatmul.mubr.msk.bf16.gmra.mxu1 %vm275_vm3, %v361_v27  ;;  %v653_v23 = vld [vmem:[#allocation2 + $0x91] sm:$0xff]  ;;  %v655_v26 = vld [vmem:[#allocation2 + $0xa1] sm:$0xff]  ;;  %v656_v27 = vld [vmem:[#allocation2 + $0xa9] sm:$0xff] }
  0x52   : > { %4603 = vmatprep.mubr.msk.bf16.mxu1 %vm275_vm3, %v671_v28  ;;  %v5185_v28 = vpack.c.bf16 %v1050_v22, %v1049_v21  ;;  %v680_v29 = vpack.c.bf16 %v654_v24, %v653_v23  ;;  %v681_v30 = vpack.c.bf16 %v656_v27, %v655_v26  ;;  %v1051_v31 = vld [vmem:[#allocation2 + $0x92] sm:$0xff]  ;;  %v1052_v32 = vld [vmem:[#allocation2 + $0x9a] sm:$0xff]  ;;  %v1053_v33 = vld [vmem:[#allocation2 + $0xa2] sm:$0xff]  ;;  %v2338_v27 = vsel %vm417_vm2, %v5137_v48, 0 }
  0x53   : > { %v1054_v34 = vld [vmem:[#allocation2 + $0xaa] sm:$0xff]  ;;  %v658_v36 = vld [vmem:[#allocation2 + $0xb9] sm:$0xff]  ;;  %v5193_v37 = vpack.c.bf16 %v1052_v32, %v1051_v31  ;;  %v1057_v45 = vld [vmem:[#allocation2 + $0xc2] sm:$0xff] }
  0x54   : > { %v1055_v43 = vld [vmem:[#allocation2 + $0xb2] sm:$0xff]  ;;  %v1056_v44 = vld [vmem:[#allocation2 + $0xba] sm:$0xff]  ;;  %v1058_v46 = vld [vmem:[#allocation2 + $0xca] sm:$0xff] }
  0x55   : > { %v661_v47 = vld [vmem:[#allocation2 + $0xd1] sm:$0xff]  ;;  %v662_v50 = vld [vmem:[#allocation2 + $0xd9] sm:$0xff]  ;;  %v5203_v51 = vpack.c.bf16 %v1056_v44, %v1055_v43  ;;  %v1061_v61 = vld [vmem:[#allocation2 + $0xe2] sm:$0xff] }
  0x56   : > { %v684_v57 = vpack.c.bf16 %v662_v50, %v661_v47  ;;  %v1059_v59 = vld [vmem:[#allocation2 + $0xd2] sm:$0xff]  ;;  %v1060_v60 = vld [vmem:[#allocation2 + $0xda] sm:$0xff]  ;;  %v1062_v62 = vld [vmem:[#allocation2 + $0xea] sm:$0xff] }
  0x57   : > { %4582 = vmatmul.mubr.msk.bf16.gmra.mxu0 %vm275_vm3, %v353_v35  ;;  %v657_v35 = vld [vmem:[#allocation2 + $0xb1] sm:$0xff]  ;;  %v666_v1 = vld [vmem:[#allocation2 + $0xf9] sm:$0xff]  ;;  %v668_v5 = vld [vmem:[#allocation2 + $0x109] sm:$0xff]  ;;  %v5215_v6 = vpack.c.bf16 %v1062_v62, %v1061_v61 }
  0x58   : > { %4641 = vmatprep.mubr.msk.bf16.mxu0 %vm275_vm3, %v1069_v38  ;;  %v659_v38 = vld [vmem:[#allocation2 + $0xc1] sm:$0xff]  ;;  %v665_v0 = vld [vmem:[#allocation2 + $0xf1] sm:$0xff]  ;;  %v670_v15 = vld [vmem:[#allocation2 + $0x119] sm:$0xff] }
  0x59   : > { %4604 = vmatmul.mubr.msk.bf16.vlgmr.msra.gmra.mxu1 %vm275_vm3, %v672_v39  ;;  %v660_v39 = vld [vmem:[#allocation2 + $0xc9] sm:$0xff]  ;;  %v686_v7 = vpack.c.bf16 %v666_v1, %v665_v0  ;;  %v1063_v9 = vld [vmem:[#allocation2 + $0xf2] sm:$0xff]  ;;  %v1064_v10 = vld [vmem:[#allocation2 + $0xfa] sm:$0xff] }
  0x5a   : > { %4678 = vmatpush3.bf16.msra.mxu1 %v1542_v41  ;;  %4607 = vmatprep.mubr.msk.bf16.mxu1 %vm275_vm3, %v673_v40  ;;  %v5195_v40 = vpack.c.bf16 %v1054_v34, %v1053_v33  ;;  %v682_v41 = vpack.c.bf16 %v658_v36, %v657_v35  ;;  %v683_v42 = vpack.c.bf16 %v660_v39, %v659_v38  ;;  %v1065_v11 = vld [vmem:[#allocation2 + $0x102] sm:$0xff]  ;;  %v1066_v12 = vld [vmem:[#allocation2 + $0x10a] sm:$0xff]  ;;  %v1067_v20 = vld [vmem:[#allocation2 + $0x112] sm:$0xff]  ;;  %v2736_v34 = vsel %vm417_vm2, %v5149_v56, 0 }
  0x5b   : > { %4913 = vmatprep.subr.msk.bf16.mxu1 %vm417_vm2, %v5137_v48  ;;  %v669_v14 = vld [vmem:[#allocation2 + $0x111] sm:$0xff]  ;;  %v1068_v21 = vld [vmem:[#allocation2 + $0x11a] sm:$0xff]  ;;  %v5244_v31 = vld [vmem:[%s5887_s1 + $0xe] sm:$0x3] }
  0x5c   : > { %v688_v19 = vpack.c.bf16 %v670_v15, %v669_v14  ;;  %v1829_v22 = vld [vmem:[#allocation2 + $0x13] sm:$0xff]  ;;  %v1830_v23 = vld [vmem:[#allocation2 + $0x1b] sm:$0xff]  ;;  %v5234_v24 = vpack.c.bf16 %v1068_v21, %v1067_v20  ;;  %v5257_v35 = vld [vmem:[%s5887_s1 + $0x10] sm:$0x3] }
  0x5d   : > { %v1865_v26 = vpack.c.bf16 %v1830_v23, %v1829_v22  ;;  %v1834_v32 = vld [vmem:[#allocation2 + $0x3b] sm:$0xff]  ;;  %v1837_v36 = vld [vmem:[#allocation2 + $0x53] sm:$0xff]  ;;  %v1856_v1 = vld [vmem:[#allocation2 + $0xeb] sm:$0xff] }
  0x5e   : > { %v1838_v38 = vld [vmem:[#allocation2 + $0x5b] sm:$0xff]  ;;  %v1845_v47 = vld [vmem:[#allocation2 + $0x93] sm:$0xff]  ;;  %v1863_v21 = vld [vmem:[#allocation2 + $0x123] sm:$0xff] }
  0x5f   : > { %4642 = vmatmul.mubr.msk.bf16.vlgmr.msra.gmra.mxu0 %vm275_vm3, %v5139_v49  ;;  %v1869_v39 = vpack.c.bf16 %v1838_v38, %v1837_v36  ;;  %v1842_v43 = vld [vmem:[#allocation2 + $0x7b] sm:$0xff]  ;;  %v1853_v61 = vld [vmem:[#allocation2 + $0xd3] sm:$0xff]  ;;  %v1864_v22 = vld [vmem:[#allocation2 + $0x12b] sm:$0xff] }
  0x60   : > { %4716 = vmatpush3.bf16.msra.mxu0 %v1940_v54  ;;  %4645 = vmatprep.mubr.msk.bf16.mxu0 %vm275_vm3, %v5143_v52  ;;  %v664_v54 = vld [vmem:[#allocation2 + $0xe9] sm:$0xff]  ;;  %v1846_v50 = vld [vmem:[#allocation2 + $0x9b] sm:$0xff] }
  0x61   : > { %4608 = vmatmul.mubr.msk.bf16.gmra.mxu1 %vm275_vm3, %v674_v53  ;;  %4914 = vmatprep.subr.msk.bf16.mxu0 %vm417_vm2, %v5149_v56  ;;  %v663_v53 = vld [vmem:[#allocation2 + $0xe1] sm:$0xff]  ;;  %v2227_v14 = vld [vmem:[#allocation2 + $0x14] sm:$0xff]  ;;  %v2230_v23 = vld [vmem:[#allocation2 + $0x2c] sm:$0xff] }
  0x62   : > { %4611 = vmatprep.mubr.msk.bf16.mxu1 %vm275_vm3, %v675_v55  ;;  %v5205_v55 = vpack.c.bf16 %v1058_v46, %v1057_v45  ;;  %v685_v58 = vpack.c.bf16 %v664_v54, %v663_v53  ;;  %v1844_v46 = vld [vmem:[#allocation2 + $0x8b] sm:$0xff]  ;;  %v1873_v53 = vpack.c.bf16 %v1846_v50, %v1845_v47  ;;  %v1854_v62 = vld [vmem:[#allocation2 + $0xdb] sm:$0xff] }
  0x63   : > { %v1848_v54 = vld [vmem:[#allocation2 + $0xab] sm:$0xff]  ;;  %v1877_v0 = vpack.c.bf16 %v1854_v62, %v1853_v61  ;;  %v2228_v15 = vld [vmem:[#allocation2 + $0x1c] sm:$0xff]  ;;  %v2243_v47 = vld [vmem:[#allocation2 + $0x94] sm:$0xff] }
  0x64   : > { %v2263_v20 = vpack.c.bf16 %v2228_v15, %v2227_v14  ;;  %v2238_v38 = vld [vmem:[#allocation2 + $0x6c] sm:$0xff]  ;;  %v2244_v50 = vld [vmem:[#allocation2 + $0x9c] sm:$0xff] }
  0x65   : > { %v2252_v14 = vld [vmem:[#allocation2 + $0xdc] sm:$0xff] }
  0x67   : > { %4646 = vmatmul.mubr.msk.bf16.gmra.mxu0 %vm275_vm3, %v5159_v63 }
  0x68   : > { %4649 = vmatprep.mubr.msk.bf16.mxu0 %vm275_vm3, %v5161_v2 }
  0x69   : > { %4612 = vmatmul.mubr.msk.bf16.gmra.mxu1 %vm275_vm3, %v676_v3  ;;  %v5213_v3 = vpack.c.bf16 %v1060_v60, %v1059_v59  ;;  %v1852_v60 = vld [vmem:[#allocation2 + $0xcb] sm:$0xff] }
  0x6a   : > { %4615 = vmatprep.mubr.msk.bf16.mxu1 %vm275_vm3, %v677_v4  ;;  %v667_v4 = vld [vmem:[#allocation2 + $0x101] sm:$0xff] }
  0x6b   : > { %v687_v8 = vpack.c.bf16 %v668_v5, %v667_v4  ;;  %v1857_v4 = vld [vmem:[#allocation2 + $0xf3] sm:$0xff]  ;;  %v1858_v5 = vld [vmem:[#allocation2 + $0xfb] sm:$0xff] }
  0x6f   : > { %4650 = vmatmul.mubr.msk.bf16.gmra.mxu0 %vm275_vm3, %v5173_v13 }
  0x70   : > { %4653 = vmatprep.mubr.msk.bf16.mxu0 %vm275_vm3, %v5175_v16 }
  0x71   : > { %4616 = vmatmul.mubr.msk.bf16.gmra.mxu1 %vm275_vm3, %v678_v17  ;;  %v5223_v17 = vpack.c.bf16 %v1064_v10, %v1063_v9  ;;  %v1861_v9 = vld [vmem:[#allocation2 + $0x113] sm:$0xff]  ;;  %v1862_v10 = vld [vmem:[#allocation2 + $0x11b] sm:$0xff] }
  0x72   : > { %4619 = vmatprep.mubr.msk.bf16.mxu1 %vm275_vm3, %v679_v18  ;;  %v5225_v18 = vpack.c.bf16 %v1066_v12, %v1065_v11  ;;  %v1466_v11 = vld [vmem:[#allocation2 + $0x12a] sm:$0xff] }
  0x77   : > { %4654 = vmatmul.mubr.msk.bf16.gmra.mxu0 %vm275_vm3, %v5183_v25 }
  0x78   : > { %4657 = vmatprep.mubr.msk.bf16.mxu0 %vm275_vm3, %v5185_v28 }
  0x79   : > { %4620 = vmatmul.mubr.msk.bf16.gmra.mxu1 %vm275_vm3, %v680_v29  ;;  %v1831_v29 = vld [vmem:[#allocation2 + $0x23] sm:$0xff] }
  0x7a   : > { %4623 = vmatprep.mubr.msk.bf16.mxu1 %vm275_vm3, %v681_v30  ;;  %v1832_v30 = vld [vmem:[#allocation2 + $0x2b] sm:$0xff] }
  0x7b   : > { %v1866_v33 = vpack.c.bf16 %v1832_v30, %v1831_v29 }
  0x7f   : > { %4658 = vmatmul.mubr.msk.bf16.gmra.mxu0 %vm275_vm3, %v5193_v37 }
  0x80   : > { %4661 = vmatprep.mubr.msk.bf16.mxu0 %vm275_vm3, %v5195_v40 }
  0x81   : > { %4624 = vmatmul.mubr.msk.bf16.gmra.mxu1 %vm275_vm3, %v682_v41  ;;  %v1839_v41 = vld [vmem:[#allocation2 + $0x63] sm:$0xff] }
  0x82   : > { %4627 = vmatprep.mubr.msk.bf16.mxu1 %vm275_vm3, %v683_v42  ;;  %v1840_v42 = vld [vmem:[#allocation2 + $0x6b] sm:$0xff] }
  0x83   : > { %v1870_v44 = vpack.c.bf16 %v1840_v42, %v1839_v41 }
  0x87   : > { %4662 = vmatmul.mubr.msk.bf16.gmra.mxu0 %vm275_vm3, %v5203_v51 }
  0x88   : > { %4665 = vmatprep.mubr.msk.bf16.mxu0 %vm275_vm3, %v5205_v55 }
  0x89   : > { %4628 = vmatmul.mubr.msk.bf16.gmra.mxu1 %vm275_vm3, %v684_v57  ;;  %v1849_v57 = vld [vmem:[#allocation2 + $0xb3] sm:$0xff] }
  0x8a   : > { %4631 = vmatprep.mubr.msk.bf16.mxu1 %vm275_vm3, %v685_v58  ;;  %v1850_v58 = vld [vmem:[#allocation2 + $0xbb] sm:$0xff] }
  0x8b   : > { %v1875_v59 = vpack.c.bf16 %v1850_v58, %v1849_v57 }
  0x8f   : > { %4666 = vmatmul.mubr.msk.bf16.gmra.mxu0 %vm275_vm3, %v5213_v3 }
  0x90   : > { %4669 = vmatprep.mubr.msk.bf16.mxu0 %vm275_vm3, %v5215_v6 }
  0x91   : > { %4632 = vmatmul.mubr.msk.bf16.gmra.mxu1 %vm275_vm3, %v686_v7  ;;  %v1879_v7 = vpack.c.bf16 %v1858_v5, %v1857_v4 }
  0x92   : > { %4635 = vmatprep.mubr.msk.bf16.mxu1 %vm275_vm3, %v687_v8  ;;  %v1860_v8 = vld [vmem:[#allocation2 + $0x10b] sm:$0xff] }
  0x97   : > { %4670 = vmatmul.mubr.msk.bf16.gmra.mxu0 %vm275_vm3, %v5223_v17 }
  0x98   : > { %4673 = vmatprep.mubr.msk.bf16.mxu0 %vm275_vm3, %v5225_v18 }
  0x99   : > { %4636 = vmatmul.mubr.msk.bf16.gmra.mxu1 %vm275_vm3, %v688_v19 }
  0x9a   : > { %4679 = vmatprep.mubr.msk.bf16.mxu1 %vm275_vm3, %v5139_v49  ;;  %v1833_v49 = vld [vmem:[#allocation2 + $0x33] sm:$0xff] }
  0x9b   : > { %v1867_v48 = vpack.c.bf16 %v1834_v32, %v1833_v49  ;;  %v3134_v49 = vsel %vm417_vm2, %v5244_v31, 0  ;;  %v2233_v32 = vld [vmem:[#allocation2 + $0x44] sm:$0xff] }
  0x9f   : > { %4674 = vmatmul.mubr.msk.bf16.gmra.mxu0 %vm275_vm3, %v5234_v24 }
  0xa0   : > { %4717 = vmatprep.mubr.msk.bf16.mxu0 %vm275_vm3, %v1865_v26  ;;  %v2231_v26 = vld [vmem:[#allocation2 + $0x34] sm:$0xff] }
  0xa1   : > { %4680 = vmatmul.mubr.msk.bf16.vlgmr.msra.gmra.mxu1 %vm275_vm3, %v5143_v52  ;;  %v1835_v52 = vld [vmem:[#allocation2 + $0x43] sm:$0xff] }
  0xa2   : > { %4754 = vmatpush3.bf16.msra.mxu1 %v2338_v27  ;;  %4683 = vmatprep.mubr.msk.bf16.mxu1 %vm275_vm3, %v5159_v63  ;;  %v1836_v63 = vld [vmem:[#allocation2 + $0x4b] sm:$0xff]  ;;  %v2232_v27 = vld [vmem:[#allocation2 + $0x3c] sm:$0xff] }
  0xa3   : > { %4915 = vmatprep.subr.msk.bf16.mxu1 %vm417_vm2, %v5244_v31  ;;  %v1868_v56 = vpack.c.bf16 %v1836_v63, %v1835_v52  ;;  %v2265_v30 = vpack.c.bf16 %v2232_v27, %v2231_v26  ;;  %v3532_v63 = vsel %vm417_vm2, %v5257_v35, 0  ;;  %v2237_v31 = vld [vmem:[#allocation2 + $0x64] sm:$0xff]  ;;  %v2254_v26 = vld [vmem:[#allocation2 + $0xec] sm:$0xff] }
  0xa4   : > { %v2268_v41 = vpack.c.bf16 %v2238_v38, %v2237_v31 }
  0xa7   : > { %4718 = vmatmul.mubr.msk.bf16.vlgmr.msra.gmra.mxu0 %vm275_vm3, %v1866_v33  ;;  %v2234_v33 = vld [vmem:[#allocation2 + $0x4c] sm:$0xff] }
  0xa8   : > { %4792 = vmatpush3.bf16.msra.mxu0 %v2736_v34  ;;  %4721 = vmatprep.mubr.msk.bf16.mxu0 %vm275_vm3, %v1867_v48  ;;  %v2235_v48 = vld [vmem:[#allocation2 + $0x54] sm:$0xff]  ;;  %v2236_v34 = vld [vmem:[#allocation2 + $0x5c] sm:$0xff]  ;;  %v2266_v52 = vpack.c.bf16 %v2234_v33, %v2233_v32 }
  0xa9   : > { %4684 = vmatmul.mubr.msk.bf16.gmra.mxu1 %vm275_vm3, %v5161_v2  ;;  %4916 = vmatprep.subr.msk.bf16.mxu0 %vm417_vm2, %v5257_v35  ;;  %v1841_v2 = vld [vmem:[#allocation2 + $0x73] sm:$0xff]  ;;  %v2267_v36 = vpack.c.bf16 %v2236_v34, %v2235_v48 }
  0xaa   : > { %4687 = vmatprep.mubr.msk.bf16.mxu1 %vm275_vm3, %v5173_v13  ;;  %v1871_v45 = vpack.c.bf16 %v1842_v43, %v1841_v2  ;;  %v1843_v13 = vld [vmem:[#allocation2 + $0x83] sm:$0xff] }
  0xaf   : > { %4722 = vmatmul.mubr.msk.bf16.gmra.mxu0 %vm275_vm3, %v1868_v56  ;;  %v2239_v56 = vld [vmem:[#allocation2 + $0x74] sm:$0xff] }
  0xb0   : > { %4725 = vmatprep.mubr.msk.bf16.mxu0 %vm275_vm3, %v1869_v39  ;;  %v2240_v39 = vld [vmem:[#allocation2 + $0x7c] sm:$0xff] }
  0xb1   : > { %4688 = vmatmul.mubr.msk.bf16.gmra.mxu1 %vm275_vm3, %v5175_v16  ;;  %v1872_v16 = vpack.c.bf16 %v1844_v46, %v1843_v13  ;;  %v2269_v42 = vpack.c.bf16 %v2240_v39, %v2239_v56  ;;  %v2257_v39 = vld [vmem:[#allocation2 + $0x104] sm:$0xff] }
  0xb2   : > { %4691 = vmatprep.mubr.msk.bf16.mxu1 %vm275_vm3, %v5183_v25  ;;  %v1847_v25 = vld [vmem:[#allocation2 + $0xa3] sm:$0xff] }
  0xb7   : > { %4726 = vmatmul.mubr.msk.bf16.gmra.mxu0 %vm275_vm3, %v1870_v44  ;;  %v2241_v44 = vld [vmem:[#allocation2 + $0x84] sm:$0xff] }
  0xb8   : > { %4729 = vmatprep.mubr.msk.bf16.mxu0 %vm275_vm3, %v1871_v45  ;;  %v2242_v45 = vld [vmem:[#allocation2 + $0x8c] sm:$0xff] }
  0xb9   : > { %4692 = vmatmul.mubr.msk.bf16.gmra.mxu1 %vm275_vm3, %v5185_v28  ;;  %v1874_v28 = vpack.c.bf16 %v1848_v54, %v1847_v25  ;;  %v2270_v25 = vpack.c.bf16 %v2242_v45, %v2241_v44  ;;  %v2271_v54 = vpack.c.bf16 %v2244_v50, %v2243_v47  ;;  %v2260_v44 = vld [vmem:[#allocation2 + $0x11c] sm:$0xff] }
  0xba   : > { %4695 = vmatprep.mubr.msk.bf16.mxu1 %vm275_vm3, %v5193_v37  ;;  %v1851_v37 = vld [vmem:[#allocation2 + $0xc3] sm:$0xff] }
  0xbf   : > { %4730 = vmatmul.mubr.msk.bf16.gmra.mxu0 %vm275_vm3, %v1872_v16 }
  0xc0   : > { %4733 = vmatprep.mubr.msk.bf16.mxu0 %vm275_vm3, %v1873_v53 }
  0xc1   : > { %4696 = vmatmul.mubr.msk.bf16.gmra.mxu1 %vm275_vm3, %v5195_v40  ;;  %v1876_v40 = vpack.c.bf16 %v1852_v60, %v1851_v37  ;;  %v2245_v37 = vld [vmem:[#allocation2 + $0xa4] sm:$0xff]  ;;  %v2246_v60 = vld [vmem:[#allocation2 + $0xac] sm:$0xff] }
  0xc2   : > { %4699 = vmatprep.mubr.msk.bf16.mxu1 %vm275_vm3, %v5203_v51  ;;  %v1855_v51 = vld [vmem:[#allocation2 + $0xe3] sm:$0xff]  ;;  %v2272_v4 = vpack.c.bf16 %v2246_v60, %v2245_v37 }
  0xc7   : > { %4734 = vmatmul.mubr.msk.bf16.gmra.mxu0 %vm275_vm3, %v1874_v28 }
  0xc8   : > { %4737 = vmatprep.mubr.msk.bf16.mxu0 %vm275_vm3, %v1875_v59 }
  0xc9   : > { %4700 = vmatmul.mubr.msk.bf16.gmra.mxu1 %vm275_vm3, %v5205_v55  ;;  %v1878_v55 = vpack.c.bf16 %v1856_v1, %v1855_v51 }
  0xca   : > { %4703 = vmatprep.mubr.msk.bf16.mxu1 %vm275_vm3, %v5213_v3  ;;  %v1859_v3 = vld [vmem:[#allocation2 + $0x103] sm:$0xff] }
  0xcb   : > { %v1880_v12 = vpack.c.bf16 %v1860_v8, %v1859_v3 }
  0xcf   : > { %4738 = vmatmul.mubr.msk.bf16.gmra.mxu0 %vm275_vm3, %v1876_v40  ;;  %v2247_v40 = vld [vmem:[#allocation2 + $0xb4] sm:$0xff] }
  0xd0   : > { %4741 = vmatprep.mubr.msk.bf16.mxu0 %vm275_vm3, %v1877_v0  ;;  %v2248_v0 = vld [vmem:[#allocation2 + $0xbc] sm:$0xff] }
  0xd1   : > { %4704 = vmatmul.mubr.msk.bf16.gmra.mxu1 %vm275_vm3, %v5215_v6  ;;  %v1465_v6 = vld [vmem:[#allocation2 + $0x122] sm:$0xff]  ;;  %v2273_v5 = vpack.c.bf16 %v2248_v0, %v2247_v40 }
  0xd2   : > { %4707 = vmatprep.mubr.msk.bf16.mxu1 %vm275_vm3, %v5223_v17  ;;  %v1881_v17 = vpack.c.bf16 %v1862_v10, %v1861_v9  ;;  %v1484_v19 = vpack.c.bf16 %v1466_v11, %v1465_v6  ;;  %v2249_v9 = vld [vmem:[#allocation2 + $0xc4] sm:$0xff]  ;;  %v2250_v10 = vld [vmem:[#allocation2 + $0xcc] sm:$0xff] }
  0xd3   : > { %v3023_v40 = vld [vmem:[#allocation2 + $0x25] sm:$0xff] }
  0xd7   : > { %4742 = vmatmul.mubr.msk.bf16.gmra.mxu0 %vm275_vm3, %v1878_v55 }
  0xd8   : > { %4745 = vmatprep.mubr.msk.bf16.mxu0 %vm275_vm3, %v1879_v7 }
  0xd9   : > { %4708 = vmatmul.mubr.msk.bf16.gmra.mxu1 %vm275_vm3, %v5225_v18  ;;  %v2229_v18 = vld [vmem:[#allocation2 + $0x24] sm:$0xff] }
  0xda   : > { %4711 = vmatprep.mubr.msk.bf16.mxu1 %vm275_vm3, %v5234_v24  ;;  %v1882_v24 = vpack.c.bf16 %v1864_v22, %v1863_v21  ;;  %v2264_v29 = vpack.c.bf16 %v2230_v23, %v2229_v18 }
  0xdf   : > { %4746 = vmatmul.mubr.msk.bf16.gmra.mxu0 %vm275_vm3, %v1880_v12  ;;  %v2251_v12 = vld [vmem:[#allocation2 + $0xd4] sm:$0xff] }
  0xe0   : > { %4749 = vmatprep.mubr.msk.bf16.mxu0 %vm275_vm3, %v1881_v17 }
  0xe1   : > { %4712 = vmatmul.mubr.msk.bf16.gmra.mxu1 %vm275_vm3, %v1484_v19  ;;  %v2274_v19 = vpack.c.bf16 %v2250_v10, %v2249_v9 }
  0xe2   : > { %4755 = vmatprep.mubr.msk.bf16.mxu1 %vm275_vm3, %v2263_v20  ;;  %v2275_v20 = vpack.c.bf16 %v2252_v14, %v2251_v12 }
  0xe7   : > { %4750 = vmatmul.mubr.msk.bf16.gmra.mxu0 %vm275_vm3, %v1882_v24  ;;  %v2253_v24 = vld [vmem:[#allocation2 + $0xe4] sm:$0xff] }
  0xe8   : > { %4793 = vmatprep.mubr.msk.bf16.mxu0 %vm275_vm3, %v2264_v29  ;;  %v2276_v48 = vpack.c.bf16 %v2254_v26, %v2253_v24  ;;  %v3421_v24 = vld [vmem:[#allocation2 + $0x26] sm:$0xff] }
  0xe9   : > { %4756 = vmatmul.mubr.msk.bf16.vlgmr.msra.gmra.mxu1 %vm275_vm3, %v2264_v29 }
  0xea   : > { %4830 = vmatpush3.bf16.msra.mxu1 %v3134_v49  ;;  %4759 = vmatprep.mubr.msk.bf16.mxu1 %vm275_vm3, %v2265_v30  ;;  %v2256_v49 = vld [vmem:[#allocation2 + $0xfc] sm:$0xff] }
  0xef   : > { %4794 = vmatmul.mubr.msk.bf16.vlgmr.msra.gmra.mxu0 %vm275_vm3, %v2265_v30  ;;  %v2255_v30 = vld [vmem:[#allocation2 + $0xf4] sm:$0xff] }
  0xf0   : > { %4868 = vmatpush3.bf16.msra.mxu0 %v3532_v63  ;;  %4797 = vmatprep.mubr.msk.bf16.mxu0 %vm275_vm3, %v2266_v52  ;;  %v2277_v34 = vpack.c.bf16 %v2256_v49, %v2255_v30  ;;  %v3422_v49 = vld [vmem:[#allocation2 + $0x2e] sm:$0xff] }
  0xf1   : > { %4760 = vmatmul.mubr.msk.bf16.gmra.mxu1 %vm275_vm3, %v2266_v52 }
  0xf2   : > { %4763 = vmatprep.mubr.msk.bf16.mxu1 %vm275_vm3, %v2267_v36 }
  0xf7   : > { %v4567_v2 = vpop.f32.mrf.mxu0  ;;  %4798 = vmatmul.mubr.msk.bf16.gmra.mxu0 %vm275_vm3, %v2267_v36 }
  0xf8   : > { %601 = vst.msk [vmem:[#allocation3 + $0x10] sm:$0xff] %vm598_vm4, %v4567_v2  ;;  %4801 = vmatprep.mubr.msk.bf16.mxu0 %vm275_vm3, %v2268_v41 }
  0xf9   : > { %v4587_v35 = vpop.f32.mrf.mxu1  ;;  %4764 = vmatmul.mubr.msk.bf16.gmra.mxu1 %vm275_vm3, %v2268_v41  ;;  %v455_v43 = vpop.f32.mrf.mxu0  ;;  %v2258_v41 = vld [vmem:[#allocation2 + $0x10c] sm:$0xff] }
  0xfa   : > { %621 = vst.msk [vmem:[#allocation3 + $0xb0] sm:$0xff] %vm598_vm4, %v4587_v35  ;;  %599 = vst.msk [vmem:[#allocation3] sm:$0xff] %vm598_vm4, %v455_v43  ;;  %4767 = vmatprep.mubr.msk.bf16.mxu1 %vm275_vm3, %v2269_v42  ;;  %v2259_v43 = vld [vmem:[#allocation2 + $0x114] sm:$0xff]  ;;  %v2278_v50 = vpack.c.bf16 %v2258_v41, %v2257_v39 }
  0xfb   : > { %v535_v13 = vpop.f32.mrf.mxu1  ;;  %v4568_v46 = vpop.f32.mrf.mxu0  ;;  %v3028_v39 = vld [vmem:[#allocation2 + $0x4d] sm:$0xff] }
  0xfc   : > { %619 = vst.msk [vmem:[#allocation3 + $0xa0] sm:$0xff] %vm598_vm4, %v535_v13  ;;  %602 = vst.msk [vmem:[#allocation3 + $0x18] sm:$0xff] %vm598_vm4, %v4568_v46 }
  0xfd   : > { %v4588_v16 = vpop.f32.mrf.mxu1  ;;  %v458_v53 = vpop.f32.mrf.mxu0 }
  0xfe   : > { %622 = vst.msk [vmem:[#allocation3 + $0xb8] sm:$0xff] %vm598_vm4, %v4588_v16  ;;  %600 = vst.msk [vmem:[#allocation3 + $0x8] sm:$0xff] %vm598_vm4, %v458_v53  ;;  %v2279_v53 = vpack.c.bf16 %v2260_v44, %v2259_v43 }
  0xff   : > { %v538_v57 = vpop.f32.mrf.mxu1  ;;  %v4571_v58 = vpop.f32.mrf.mxu0  ;;  %4802 = vmatmul.mubr.msk.bf16.gmra.mxu0 %vm275_vm3, %v2269_v42  ;;  %v927_v31 = vld [vmem:[#allocation3 + $0x10] sm:$0xff] }
 0x100   : > { %620 = vst.msk [vmem:[#allocation3 + $0xa8] sm:$0xff] %vm598_vm4, %v538_v57  ;;  %605 = vst.msk [vmem:[#allocation3 + $0x30] sm:$0xff] %vm598_vm4, %v4571_v58  ;;  %4805 = vmatprep.mubr.msk.bf16.mxu0 %vm275_vm3, %v2270_v25 }
 0x101   : > { %v4591_v28 = vpop.f32.mrf.mxu1  ;;  %4768 = vmatmul.mubr.msk.bf16.gmra.mxu1 %vm275_vm3, %v2270_v25  ;;  %v471_v59 = vpop.f32.mrf.mxu0  ;;  %v925_v2 = vld [vmem:[#allocation3] sm:$0xff] }
 0x102   : > { %625 = vst.msk [vmem:[#allocation3 + $0xd0] sm:$0xff] %vm598_vm4, %v4591_v28  ;;  %603 = vst.msk [vmem:[#allocation3 + $0x20] sm:$0xff] %vm598_vm4, %v471_v59  ;;  %4771 = vmatprep.mubr.msk.bf16.mxu1 %vm275_vm3, %v2271_v54 }
 0x103   : > { %v551_v61 = vpop.f32.mrf.mxu1  ;;  %v4572_v62 = vpop.f32.mrf.mxu0  ;;  %v928_v46 = vld [vmem:[#allocation3 + $0x18] sm:$0xff] }
 0x104   : > { %623 = vst.msk [vmem:[#allocation3 + $0xc0] sm:$0xff] %vm598_vm4, %v551_v61  ;;  %606 = vst.msk [vmem:[#allocation3 + $0x38] sm:$0xff] %vm598_vm4, %v4572_v62  ;;  %v2261_v61 = vld [vmem:[#allocation2 + $0x124] sm:$0xff]  ;;  %v2262_v62 = vld [vmem:[#allocation2 + $0x12c] sm:$0xff] }
 0x105   : > { %v4592_v51 = vpop.f32.mrf.mxu1  ;;  %v474_v1 = vpop.f32.mrf.mxu0 }
 0x106   : > { %626 = vst.msk [vmem:[#allocation3 + $0xd8] sm:$0xff] %vm598_vm4, %v4592_v51  ;;  %604 = vst.msk [vmem:[#allocation3 + $0x28] sm:$0xff] %vm598_vm4, %v474_v1 }
 0x107   : > { %v554_v55 = vpop.f32.mrf.mxu1  ;;  %v4575_v7 = vpop.f32.mrf.mxu0  ;;  %4806 = vmatmul.mubr.msk.bf16.gmra.mxu0 %vm275_vm3, %v2271_v54  ;;  %v926_v54 = vld [vmem:[#allocation3 + $0x8] sm:$0xff]  ;;  %v931_v59 = vld [vmem:[#allocation3 + $0x30] sm:$0xff] }
 0x108   : > { %624 = vst.msk [vmem:[#allocation3 + $0xc8] sm:$0xff] %vm598_vm4, %v554_v55  ;;  %609 = vst.msk [vmem:[#allocation3 + $0x50] sm:$0xff] %vm598_vm4, %v4575_v7  ;;  %4809 = vmatprep.mubr.msk.bf16.mxu0 %vm275_vm3, %v2272_v4 }
 0x109   : > { %v4595_v3 = vpop.f32.mrf.mxu1  ;;  %4772 = vmatmul.mubr.msk.bf16.gmra.mxu1 %vm275_vm3, %v2272_v4  ;;  %v487_v8 = vpop.f32.mrf.mxu0  ;;  %v929_v1 = vld [vmem:[#allocation3 + $0x20] sm:$0xff] }
 0x10a   : > { %629 = vst.msk [vmem:[#allocation3 + $0xf0] sm:$0xff] %vm598_vm4, %v4595_v3  ;;  %607 = vst.msk [vmem:[#allocation3 + $0x40] sm:$0xff] %vm598_vm4, %v487_v8  ;;  %4775 = vmatprep.mubr.msk.bf16.mxu1 %vm275_vm3, %v2273_v5 }
 0x10b   : > { %v567_v6 = vpop.f32.mrf.mxu1  ;;  %v4576_v11 = vpop.f32.mrf.mxu0  ;;  %v932_v9 = vld [vmem:[#allocation3 + $0x38] sm:$0xff] }
 0x10c   : > { %627 = vst.msk [vmem:[#allocation3 + $0xe0] sm:$0xff] %vm598_vm4, %v567_v6  ;;  %610 = vst.msk [vmem:[#allocation3 + $0x58] sm:$0xff] %vm598_vm4, %v4576_v11  ;;  %v2280_v6 = vpack.c.bf16 %v2262_v62, %v2261_v61 }
 0x10d   : > { %v4596_v15 = vpop.f32.mrf.mxu1  ;;  %v490_v17 = vpop.f32.mrf.mxu0 }
 0x10e   : > { %630 = vst.msk [vmem:[#allocation3 + $0xf8] sm:$0xff] %vm598_vm4, %v4596_v15  ;;  %608 = vst.msk [vmem:[#allocation3 + $0x48] sm:$0xff] %vm598_vm4, %v490_v17 }
 0x10f   : > { %v570_v21 = vpop.f32.mrf.mxu1  ;;  %v4579_v22 = vpop.f32.mrf.mxu0  ;;  %4810 = vmatmul.mubr.msk.bf16.gmra.mxu0 %vm275_vm3, %v2273_v5  ;;  %v3024_v5 = vld [vmem:[#allocation2 + $0x2d] sm:$0xff] }
 0x110   : > { %628 = vst.msk [vmem:[#allocation3 + $0xe8] sm:$0xff] %vm598_vm4, %v570_v21  ;;  %613 = vst.msk [vmem:[#allocation3 + $0x70] sm:$0xff] %vm598_vm4, %v4579_v22  ;;  %4813 = vmatprep.mubr.msk.bf16.mxu0 %vm275_vm3, %v2274_v19  ;;  %v3059_v14 = vpack.c.bf16 %v3024_v5, %v3023_v40  ;;  %v3030_v5 = vld [vmem:[#allocation2 + $0x5d] sm:$0xff] }
 0x111   : > { %v4599_v18 = vpop.f32.mrf.mxu1  ;;  %4776 = vmatmul.mubr.msk.bf16.gmra.mxu1 %vm275_vm3, %v2274_v19  ;;  %v503_v23 = vpop.f32.mrf.mxu0  ;;  %v930_v19 = vld [vmem:[#allocation3 + $0x28] sm:$0xff] }
 0x112   : > { %633 = vst.msk [vmem:[#allocation3 + $0x110] sm:$0xff] %vm598_vm4, %v4599_v18  ;;  %611 = vst.msk [vmem:[#allocation3 + $0x60] sm:$0xff] %vm598_vm4, %v503_v23  ;;  %4779 = vmatprep.mubr.msk.bf16.mxu1 %vm275_vm3, %v2275_v20  ;;  %v2659_v18 = vld [vmem:[#allocation2 + $0x134] sm:$0xff]  ;;  %v2660_v23 = vld [vmem:[#allocation2 + $0x13c] sm:$0xff] }
 0x113   : > { %v583_v27 = vpop.f32.mrf.mxu1  ;;  %v4580_v29 = vpop.f32.mrf.mxu0  ;;  %v936_v44 = vld [vmem:[#allocation3 + $0x58] sm:$0xff] }
 0x114   : > { %631 = vst.msk [vmem:[#allocation3 + $0x100] sm:$0xff] %vm598_vm4, %v583_v27  ;;  %614 = vst.msk [vmem:[#allocation3 + $0x78] sm:$0xff] %vm598_vm4, %v4580_v29  ;;  %v935_v29 = vld [vmem:[#allocation3 + $0x50] sm:$0xff] }
 0x115   : > { %v4600_v32 = vpop.f32.mrf.mxu1  ;;  %v506_v33 = vpop.f32.mrf.mxu0 }
 0x116   : > { %634 = vst.msk [vmem:[#allocation3 + $0x118] sm:$0xff] %vm598_vm4, %v4600_v32  ;;  %612 = vst.msk [vmem:[#allocation3 + $0x68] sm:$0xff] %vm598_vm4, %v506_v33 }
 0x117   : > { %v586_v52 = vpop.f32.mrf.mxu1  ;;  %v4583_v63 = vpop.f32.mrf.mxu0  ;;  %4814 = vmatmul.mubr.msk.bf16.gmra.mxu0 %vm275_vm3, %v2275_v20  ;;  %v939_v62 = vld [vmem:[#allocation3 + $0x70] sm:$0xff] }
 0x118   : > { %632 = vst.msk [vmem:[#allocation3 + $0x108] sm:$0xff] %vm598_vm4, %v586_v52  ;;  %617 = vst.msk [vmem:[#allocation3 + $0x90] sm:$0xff] %vm598_vm4, %v4583_v63  ;;  %4817 = vmatprep.mubr.msk.bf16.mxu0 %vm275_vm3, %v2276_v48  ;;  %v3027_v52 = vld [vmem:[#allocation2 + $0x45] sm:$0xff] }
 0x119   : > { %v4605_v36 = vpop.f32.mrf.mxu1  ;;  %4780 = vmatmul.mubr.msk.bf16.gmra.mxu1 %vm275_vm3, %v2276_v48  ;;  %v519_v38 = vpop.f32.mrf.mxu0  ;;  %v3025_v48 = vld [vmem:[#allocation2 + $0x35] sm:$0xff] }
 0x11a   : > { %v963_v56 = vadd.f32 %v4605_v36, %v927_v31  ;;  %615 = vst.msk [vmem:[#allocation3 + $0x80] sm:$0xff] %vm598_vm4, %v519_v38  ;;  %4783 = vmatprep.mubr.msk.bf16.mxu1 %vm275_vm3, %v2277_v34  ;;  %v933_v31 = vld [vmem:[#allocation3 + $0x40] sm:$0xff] }
 0x11b   : > { %v782_v42 = vpop.f32.mrf.mxu1  ;;  %v4584_v35 = vpop.f32.mrf.mxu0 }
 0x11c   : > { %999 = vst.msk [vmem:[#allocation3 + $0x10] sm:$0xff] %vm598_vm4, %v963_v56  ;;  %v961_v45 = vadd.f32 %v925_v2, %v782_v42  ;;  %618 = vst.msk [vmem:[#allocation3 + $0x98] sm:$0xff] %vm598_vm4, %v4584_v35  ;;  %v2678_v56 = vpack.c.bf16 %v2660_v23, %v2659_v18  ;;  %v3457_v2 = vpack.c.bf16 %v3422_v49, %v3421_v24 }
 0x11d   : > { %v4606_v13 = vpop.f32.mrf.mxu1  ;;  %v522_v47 = vpop.f32.mrf.mxu0 }
 0x11e   : > { %997 = vst.msk [vmem:[#allocation3] sm:$0xff] %vm598_vm4, %v961_v45  ;;  %v964_v16 = vadd.f32 %v4606_v13, %v928_v46  ;;  %616 = vst.msk [vmem:[#allocation3 + $0x88] sm:$0xff] %vm598_vm4, %v522_v47 }
 0x11f   : > { %v785_v25 = vpop.f32.mrf.mxu1  ;;  %v4643_v57 = vpop.f32.mrf.mxu0  ;;  %4818 = vmatmul.mubr.msk.bf16.gmra.mxu0 %vm275_vm3, %v2277_v34  ;;  %v3026_v34 = vld [vmem:[#allocation2 + $0x3d] sm:$0xff] }
 0x120   : > { %1000 = vst.msk [vmem:[#allocation3 + $0x18] sm:$0xff] %vm598_vm4, %v964_v16  ;;  %v962_v58 = vadd.f32 %v926_v54, %v785_v25  ;;  %4821 = vmatprep.mubr.msk.bf16.mxu0 %vm275_vm3, %v2278_v50  ;;  %v3060_v13 = vpack.c.bf16 %v3026_v34, %v3025_v48  ;;  %v934_v25 = vld [vmem:[#allocation3 + $0x48] sm:$0xff]  ;;  %v3429_v48 = vld [vmem:[#allocation2 + $0x66] sm:$0xff] }
 0x121   : > { %v4609_v28 = vpop.f32.mrf.mxu1  ;;  %4784 = vmatmul.mubr.msk.bf16.gmra.mxu1 %vm275_vm3, %v2278_v50  ;;  %v1180_v37 = vpop.f32.mrf.mxu0  ;;  %v3061_v50 = vpack.c.bf16 %v3028_v39, %v3027_v52  ;;  %v3033_v39 = vld [vmem:[#allocation2 + $0x75] sm:$0xff] }
 0x122   : > { %998 = vst.msk [vmem:[#allocation3 + $0x8] sm:$0xff] %vm598_vm4, %v962_v58  ;;  %v967_v60 = vadd.f32 %v4609_v28, %v931_v59  ;;  %4787 = vmatprep.mubr.msk.bf16.mxu1 %vm275_vm3, %v2279_v53  ;;  %v3423_v28 = vld [vmem:[#allocation2 + $0x36] sm:$0xff]  ;;  %v3424_v59 = vld [vmem:[#allocation2 + $0x3e] sm:$0xff] }
 0x123   : > { %v1325_v0 = vld [vmem:[#allocation3 + $0x10] sm:$0xff]  ;;  %v798_v51 = vpop.f32.mrf.mxu1  ;;  %v4644_v4 = vpop.f32.mrf.mxu0 }
 0x124   : > { %v1361_v55 = vadd.f32 %v4643_v57, %v1325_v0  ;;  %1003 = vst.msk [vmem:[#allocation3 + $0x30] sm:$0xff] %vm598_vm4, %v967_v60  ;;  %v965_v7 = vadd.f32 %v929_v1, %v798_v51  ;;  %v3426_v0 = vld [vmem:[#allocation2 + $0x4e] sm:$0xff] }
 0x125   : > { %v1323_v3 = vld [vmem:[#allocation3] sm:$0xff]  ;;  %v4610_v8 = vpop.f32.mrf.mxu1  ;;  %v1183_v10 = vpop.f32.mrf.mxu0 }
 0x126   : > { %1397 = vst.msk [vmem:[#allocation3 + $0x10] sm:$0xff] %vm598_vm4, %v1361_v55  ;;  %v1359_v11 = vadd.f32 %v1323_v3, %v1180_v37  ;;  %1001 = vst.msk [vmem:[#allocation3 + $0x20] sm:$0xff] %vm598_vm4, %v965_v7  ;;  %v968_v12 = vadd.f32 %v4610_v8, %v932_v9  ;;  %v3425_v37 = vld [vmem:[#allocation2 + $0x46] sm:$0xff] }
 0x127   : > { %v1326_v15 = vld [vmem:[#allocation3 + $0x18] sm:$0xff]  ;;  %v801_v17 = vpop.f32.mrf.mxu1  ;;  %v4647_v20 = vpop.f32.mrf.mxu0  ;;  %4822 = vmatmul.mubr.msk.bf16.gmra.mxu0 %vm275_vm3, %v2279_v53  ;;  %v937_v8 = vld [vmem:[#allocation3 + $0x60] sm:$0xff] }
 0x128   : > { %1395 = vst.msk [vmem:[#allocation3] sm:$0xff] %vm598_vm4, %v1359_v11  ;;  %v1362_v21 = vadd.f32 %v4644_v4, %v1326_v15  ;;  %1004 = vst.msk [vmem:[#allocation3 + $0x38] sm:$0xff] %vm598_vm4, %v968_v12  ;;  %v966_v22 = vadd.f32 %v930_v19, %v801_v17  ;;  %4825 = vmatprep.mubr.msk.bf16.mxu0 %vm275_vm3, %v2280_v6  ;;  %v3029_v4 = vld [vmem:[#allocation2 + $0x55] sm:$0xff]  ;;  %v3031_v55 = vld [vmem:[#allocation2 + $0x65] sm:$0xff] }
 0x129   : > { %v1324_v26 = vld [vmem:[#allocation3 + $0x8] sm:$0xff]  ;;  %v4613_v27 = vpop.f32.mrf.mxu1  ;;  %4788 = vmatmul.mubr.msk.bf16.gmra.mxu1 %vm275_vm3, %v2280_v6  ;;  %v1196_v30 = vpop.f32.mrf.mxu0  ;;  %v940_v19 = vld [vmem:[#allocation3 + $0x78] sm:$0xff] }
 0x12a   : > { %1398 = vst.msk [vmem:[#allocation3 + $0x18] sm:$0xff] %vm598_vm4, %v1362_v21  ;;  %v1360_v32 = vadd.f32 %v1324_v26, %v1183_v10  ;;  %1002 = vst.msk [vmem:[#allocation3 + $0x28] sm:$0xff] %vm598_vm4, %v966_v22  ;;  %v971_v33 = vadd.f32 %v4613_v27, %v935_v29  ;;  %4831 = vmatprep.mubr.msk.bf16.mxu1 %vm275_vm3, %v3059_v14  ;;  %v3458_v10 = vpack.c.bf16 %v3424_v59, %v3423_v28  ;;  %v3032_v6 = vld [vmem:[#allocation2 + $0x6d] sm:$0xff] }
 0x12b   : > { %v1329_v63 = vld [vmem:[#allocation3 + $0x30] sm:$0xff]  ;;  %v814_v36 = vpop.f32.mrf.mxu1  ;;  %v4648_v38 = vpop.f32.mrf.mxu0  ;;  %v3459_v14 = vpack.c.bf16 %v3426_v0, %v3425_v37  ;;  %v3062_v21 = vpack.c.bf16 %v3030_v5, %v3029_v4  ;;  %v3063_v23 = vpack.c.bf16 %v3032_v6, %v3031_v55  ;;  %v938_v27 = vld [vmem:[#allocation3 + $0x68] sm:$0xff]  ;;  %v3433_v4 = vld [vmem:[#allocation2 + $0x86] sm:$0xff] }
 0x12c   : > { %1396 = vst.msk [vmem:[#allocation3 + $0x8] sm:$0xff] %vm598_vm4, %v1360_v32  ;;  %v1365_v41 = vadd.f32 %v4647_v20, %v1329_v63  ;;  %1007 = vst.msk [vmem:[#allocation3 + $0x50] sm:$0xff] %vm598_vm4, %v971_v33  ;;  %v969_v42 = vadd.f32 %v933_v31, %v814_v36  ;;  %v3427_v32 = vld [vmem:[#allocation2 + $0x56] sm:$0xff]  ;;  %v3428_v33 = vld [vmem:[#allocation2 + $0x5e] sm:$0xff] }
 0x12d   : > { %v1327_v35 = vld [vmem:[#allocation3 + $0x20] sm:$0xff]  ;;  %v4614_v43 = vpop.f32.mrf.mxu1  ;;  %v1199_v45 = vpop.f32.mrf.mxu0  ;;  %v943_v63 = vld [vmem:[#allocation3 + $0x90] sm:$0xff] }
 0x12e   : > { %1401 = vst.msk [vmem:[#allocation3 + $0x30] sm:$0xff] %vm598_vm4, %v1365_v41  ;;  %v1363_v46 = vadd.f32 %v1327_v35, %v1196_v30  ;;  %1005 = vst.msk [vmem:[#allocation3 + $0x40] sm:$0xff] %vm598_vm4, %v969_v42  ;;  %v972_v47 = vadd.f32 %v4614_v43, %v936_v44  ;;  %v3430_v31 = vld [vmem:[#allocation2 + $0x6e] sm:$0xff]  ;;  %v3034_v41 = vld [vmem:[#allocation2 + $0x7d] sm:$0xff] }
 0x12f   : > { %v1330_v16 = vld [vmem:[#allocation3 + $0x38] sm:$0xff]  ;;  %v817_v53 = vpop.f32.mrf.mxu1  ;;  %v4651_v54 = vpop.f32.mrf.mxu0  ;;  %4826 = vmatmul.mubr.msk.bf16.gmra.mxu0 %vm275_vm3, %v2678_v56  ;;  %v941_v43 = vld [vmem:[#allocation3 + $0x80] sm:$0xff]  ;;  %v3037_v6 = vld [vmem:[#allocation2 + $0x95] sm:$0xff] }
 0x130   : > { %1399 = vst.msk [vmem:[#allocation3 + $0x20] sm:$0xff] %vm598_vm4, %v1363_v46  ;;  %v1366_v57 = vadd.f32 %v4648_v38, %v1330_v16  ;;  %1008 = vst.msk [vmem:[#allocation3 + $0x58] sm:$0xff] %vm598_vm4, %v972_v47  ;;  %v970_v58 = vadd.f32 %v934_v25, %v817_v53  ;;  %4869 = vmatprep.mubr.msk.bf16.mxu0 %vm275_vm3, %v3457_v2  ;;  %v3035_v42 = vld [vmem:[#allocation2 + $0x85] sm:$0xff] }
 0x131   : > { %v1328_v60 = vld [vmem:[#allocation3 + $0x28] sm:$0xff]  ;;  %v4617_v61 = vpop.f32.mrf.mxu1  ;;  %4832 = vmatmul.mubr.msk.bf16.vlgmr.msra.gmra.mxu1 %vm275_vm3, %v3060_v13  ;;  %v1212_v40 = vpop.f32.mrf.mxu0  ;;  %v944_v25 = vld [vmem:[#allocation3 + $0x98] sm:$0xff] }
 0x132   : > { %1402 = vst.msk [vmem:[#allocation3 + $0x38] sm:$0xff] %vm598_vm4, %v1366_v57  ;;  %v1364_v51 = vadd.f32 %v1328_v60, %v1199_v45  ;;  %1006 = vst.msk [vmem:[#allocation3 + $0x48] sm:$0xff] %vm598_vm4, %v970_v58  ;;  %v975_v1 = vadd.f32 %v4617_v61, %v939_v62  ;;  %4835 = vmatprep.mubr.msk.bf16.mxu1 %vm275_vm3, %v3061_v50  ;;  %v3460_v45 = vpack.c.bf16 %v3428_v33, %v3427_v32  ;;  %v3036_v13 = vld [vmem:[#allocation2 + $0x8d] sm:$0xff] }
 0x133   : > { %v1333_v7 = vld [vmem:[#allocation3 + $0x50] sm:$0xff]  ;;  %v830_v3 = vpop.f32.mrf.mxu1  ;;  %v4652_v9 = vpop.f32.mrf.mxu0  ;;  %v3461_v50 = vpack.c.bf16 %v3430_v31, %v3429_v48  ;;  %v3064_v57 = vpack.c.bf16 %v3034_v41, %v3033_v39  ;;  %v3065_v59 = vpack.c.bf16 %v3036_v13, %v3035_v42  ;;  %v942_v61 = vld [vmem:[#allocation3 + $0x88] sm:$0xff]  ;;  %v3437_v39 = vld [vmem:[#allocation2 + $0xa6] sm:$0xff] }
 0x134   : > { %1400 = vst.msk [vmem:[#allocation3 + $0x28] sm:$0xff] %vm598_vm4, %v1364_v51  ;;  %v1369_v11 = vadd.f32 %v4651_v54, %v1333_v7  ;;  %1011 = vst.msk [vmem:[#allocation3 + $0x70] sm:$0xff] %vm598_vm4, %v975_v1  ;;  %v973_v12 = vadd.f32 %v937_v8, %v830_v3  ;;  %v3431_v51 = vld [vmem:[#allocation2 + $0x76] sm:$0xff]  ;;  %v3432_v1 = vld [vmem:[#allocation2 + $0x7e] sm:$0xff] }
 0x135   : > { %v1331_v15 = vld [vmem:[#allocation3 + $0x40] sm:$0xff]  ;;  %v4618_v17 = vpop.f32.mrf.mxu1  ;;  %v1215_v20 = vpop.f32.mrf.mxu0  ;;  %v947_v7 = vld [vmem:[#allocation3 + $0xb0] sm:$0xff] }
 0x136   : > { %1405 = vst.msk [vmem:[#allocation3 + $0x50] sm:$0xff] %vm598_vm4, %v1369_v11  ;;  %v1367_v22 = vadd.f32 %v1331_v15, %v1212_v40  ;;  %1009 = vst.msk [vmem:[#allocation3 + $0x60] sm:$0xff] %vm598_vm4, %v973_v12  ;;  %v976_v18 = vadd.f32 %v4618_v17, %v940_v19  ;;  %v3434_v8 = vld [vmem:[#allocation2 + $0x8e] sm:$0xff]  ;;  %v3038_v11 = vld [vmem:[#allocation2 + $0x9d] sm:$0xff] }
 0x137   : > { %v1334_v24 = vld [vmem:[#allocation3 + $0x58] sm:$0xff]  ;;  %v833_v26 = vpop.f32.mrf.mxu1  ;;  %v4655_v29 = vpop.f32.mrf.mxu0  ;;  %4870 = vmatmul.mubr.msk.bf16.vlgmr.msra.gmra.mxu0 %vm275_vm3, %v3458_v10  ;;  %v945_v17 = vld [vmem:[#allocation3 + $0xa0] sm:$0xff]  ;;  %v3041_v13 = vld [vmem:[#allocation2 + $0xb5] sm:$0xff] }
 0x138   : > { %1403 = vst.msk [vmem:[#allocation3 + $0x40] sm:$0xff] %vm598_vm4, %v1367_v22  ;;  %v1370_v30 = vadd.f32 %v4652_v9, %v1334_v24  ;;  %1012 = vst.msk [vmem:[#allocation3 + $0x78] sm:$0xff] %vm598_vm4, %v976_v18  ;;  %v974_v49 = vadd.f32 %v938_v27, %v833_v26  ;;  %4873 = vmatprep.mubr.msk.bf16.mxu0 %vm275_vm3, %v3459_v14  ;;  %v3039_v12 = vld [vmem:[#allocation2 + $0xa5] sm:$0xff] }
 0x139   : > { %v1332_v34 = vld [vmem:[#allocation3 + $0x48] sm:$0xff]  ;;  %v4621_v52 = vpop.f32.mrf.mxu1  ;;  %4836 = vmatmul.mubr.msk.bf16.gmra.mxu1 %vm275_vm3, %v3062_v21  ;;  %v1228_v36 = vpop.f32.mrf.mxu0  ;;  %v948_v27 = vld [vmem:[#allocation3 + $0xb8] sm:$0xff] }
 0x13a   : > { %1406 = vst.msk [vmem:[#allocation3 + $0x58] sm:$0xff] %vm598_vm4, %v1370_v30  ;;  %v1368_v38 = vadd.f32 %v1332_v34, %v1215_v20  ;;  %1010 = vst.msk [vmem:[#allocation3 + $0x68] sm:$0xff] %vm598_vm4, %v974_v49  ;;  %v979_v56 = vadd.f32 %v4621_v52, %v943_v63  ;;  %4839 = vmatprep.mubr.msk.bf16.mxu1 %vm275_vm3, %v3063_v23  ;;  %v3462_v20 = vpack.c.bf16 %v3432_v1, %v3431_v51  ;;  %v3040_v21 = vld [vmem:[#allocation2 + $0xad] sm:$0xff] }
 0x13b   : > { %v1337_v2 = vld [vmem:[#allocation3 + $0x70] sm:$0xff]  ;;  %v846_v35 = vpop.f32.mrf.mxu1  ;;  %v4656_v44 = vpop.f32.mrf.mxu0  ;;  %v3463_v23 = vpack.c.bf16 %v3434_v8, %v3433_v4  ;;  %v3066_v30 = vpack.c.bf16 %v3038_v11, %v3037_v6  ;;  %v3067_v33 = vpack.c.bf16 %v3040_v21, %v3039_v12  ;;  %v946_v52 = vld [vmem:[#allocation3 + $0xa8] sm:$0xff]  ;;  %v3441_v6 = vld [vmem:[#allocation2 + $0xc6] sm:$0xff] }
 0x13c   : > { %1404 = vst.msk [vmem:[#allocation3 + $0x48] sm:$0xff] %vm598_vm4, %v1368_v38  ;;  %v1373_v46 = vadd.f32 %v4655_v29, %v1337_v2  ;;  %1015 = vst.msk [vmem:[#allocation3 + $0x90] sm:$0xff] %vm598_vm4, %v979_v56  ;;  %v977_v47 = vadd.f32 %v941_v43, %v846_v35  ;;  %v3435_v38 = vld [vmem:[#allocation2 + $0x96] sm:$0xff]  ;;  %v3436_v56 = vld [vmem:[#allocation2 + $0x9e] sm:$0xff] }
 0x13d   : > { %v1335_v16 = vld [vmem:[#allocation3 + $0x60] sm:$0xff]  ;;  %v4622_v53 = vpop.f32.mrf.mxu1  ;;  %v1231_v54 = vpop.f32.mrf.mxu0  ;;  %v951_v2 = vld [vmem:[#allocation3 + $0xd0] sm:$0xff] }
 0x13e   : > { %1409 = vst.msk [vmem:[#allocation3 + $0x70] sm:$0xff] %vm598_vm4, %v1373_v46  ;;  %v1371_v58 = vadd.f32 %v1335_v16, %v1228_v36  ;;  %1013 = vst.msk [vmem:[#allocation3 + $0x80] sm:$0xff] %vm598_vm4, %v977_v47  ;;  %v980_v28 = vadd.f32 %v4622_v53, %v944_v25  ;;  %v3438_v43 = vld [vmem:[#allocation2 + $0xae] sm:$0xff]  ;;  %v3042_v46 = vld [vmem:[#allocation2 + $0xbd] sm:$0xff] }
 0x13f   : > { %v1338_v37 = vld [vmem:[#allocation3 + $0x78] sm:$0xff]  ;;  %v849_v60 = vpop.f32.mrf.mxu1  ;;  %v4659_v62 = vpop.f32.mrf.mxu0  ;;  %4874 = vmatmul.mubr.msk.bf16.gmra.mxu0 %vm275_vm3, %v3460_v45  ;;  %v949_v53 = vld [vmem:[#allocation3 + $0xc0] sm:$0xff]  ;;  %v3045_v21 = vld [vmem:[#allocation2 + $0xd5] sm:$0xff] }
 0x140   : > { %1407 = vst.msk [vmem:[#allocation3 + $0x60] sm:$0xff] %vm598_vm4, %v1371_v58  ;;  %v1374_v40 = vadd.f32 %v4656_v44, %v1338_v37  ;;  %1016 = vst.msk [vmem:[#allocation3 + $0x98] sm:$0xff] %vm598_vm4, %v980_v28  ;;  %v978_v0 = vadd.f32 %v942_v61, %v849_v60  ;;  %4877 = vmatprep.mubr.msk.bf16.mxu0 %vm275_vm3, %v3461_v50  ;;  %v3043_v47 = vld [vmem:[#allocation2 + $0xc5] sm:$0xff] }
 0x141   : > { %v1336_v5 = vld [vmem:[#allocation3 + $0x68] sm:$0xff]  ;;  %v4625_v55 = vpop.f32.mrf.mxu1  ;;  %4840 = vmatmul.mubr.msk.bf16.gmra.mxu1 %vm275_vm3, %v3064_v57  ;;  %v1244_v3 = vpop.f32.mrf.mxu0  ;;  %v952_v61 = vld [vmem:[#allocation3 + $0xd8] sm:$0xff] }
 0x142   : > { %1410 = vst.msk [vmem:[#allocation3 + $0x78] sm:$0xff] %vm598_vm4, %v1374_v40  ;;  %v1372_v9 = vadd.f32 %v1336_v5, %v1231_v54  ;;  %1014 = vst.msk [vmem:[#allocation3 + $0x88] sm:$0xff] %vm598_vm4, %v978_v0  ;;  %v983_v10 = vadd.f32 %v4625_v55, %v947_v7  ;;  %4843 = vmatprep.mubr.msk.bf16.mxu1 %vm275_vm3, %v3065_v59  ;;  %v3464_v54 = vpack.c.bf16 %v3436_v56, %v3435_v38  ;;  %v3044_v57 = vld [vmem:[#allocation2 + $0xcd] sm:$0xff] }
 0x143   : > { %v1341_v14 = vld [vmem:[#allocation3 + $0x90] sm:$0xff]  ;;  %v862_v15 = vpop.f32.mrf.mxu1  ;;  %v4660_v19 = vpop.f32.mrf.mxu0  ;;  %v3465_v59 = vpack.c.bf16 %v3438_v43, %v3437_v39  ;;  %v3068_v40 = vpack.c.bf16 %v3042_v46, %v3041_v13  ;;  %v3069_v1 = vpack.c.bf16 %v3044_v57, %v3043_v47  ;;  %v950_v55 = vld [vmem:[#allocation3 + $0xc8] sm:$0xff]  ;;  %v3445_v13 = vld [vmem:[#allocation2 + $0xe6] sm:$0xff] }
 0x144   : > { %1408 = vst.msk [vmem:[#allocation3 + $0x68] sm:$0xff] %vm598_vm4, %v1372_v9  ;;  %v1377_v22 = vadd.f32 %v4659_v62, %v1341_v14  ;;  %1019 = vst.msk [vmem:[#allocation3 + $0xb0] sm:$0xff] %vm598_vm4, %v983_v10  ;;  %v981_v18 = vadd.f32 %v945_v17, %v862_v15  ;;  %v3439_v9 = vld [vmem:[#allocation2 + $0xb6] sm:$0xff]  ;;  %v3440_v10 = vld [vmem:[#allocation2 + $0xbe] sm:$0xff] }
 0x145   : > { %v1339_v24 = vld [vmem:[#allocation3 + $0x80] sm:$0xff]  ;;  %v4626_v26 = vpop.f32.mrf.mxu1  ;;  %v1247_v29 = vpop.f32.mrf.mxu0  ;;  %v955_v14 = vld [vmem:[#allocation3 + $0xf0] sm:$0xff] }
 0x146   : > { %1413 = vst.msk [vmem:[#allocation3 + $0x90] sm:$0xff] %vm598_vm4, %v1377_v22  ;;  %v1375_v49 = vadd.f32 %v1339_v24, %v1244_v3  ;;  %1017 = vst.msk [vmem:[#allocation3 + $0xa0] sm:$0xff] %vm598_vm4, %v981_v18  ;;  %v984_v32 = vadd.f32 %v4626_v26, %v948_v27  ;;  %v3442_v17 = vld [vmem:[#allocation2 + $0xce] sm:$0xff]  ;;  %v3046_v22 = vld [vmem:[#allocation2 + $0xdd] sm:$0xff] }
 0x147   : > { %v1342_v48 = vld [vmem:[#allocation3 + $0x98] sm:$0xff]  ;;  %v865_v34 = vpop.f32.mrf.mxu1  ;;  %v4663_v63 = vpop.f32.mrf.mxu0  ;;  %4878 = vmatmul.mubr.msk.bf16.gmra.mxu0 %vm275_vm3, %v3462_v20  ;;  %v953_v26 = vld [vmem:[#allocation3 + $0xe0] sm:$0xff]  ;;  %v3049_v57 = vld [vmem:[#allocation2 + $0xf5] sm:$0xff] }
 0x148   : > { %1411 = vst.msk [vmem:[#allocation3 + $0x80] sm:$0xff] %vm598_vm4, %v1375_v49  ;;  %v1378_v36 = vadd.f32 %v4660_v19, %v1342_v48  ;;  %1020 = vst.msk [vmem:[#allocation3 + $0xb8] sm:$0xff] %vm598_vm4, %v984_v32  ;;  %v982_v31 = vadd.f32 %v946_v52, %v865_v34  ;;  %4881 = vmatprep.mubr.msk.bf16.mxu0 %vm275_vm3, %v3463_v23  ;;  %v3047_v18 = vld [vmem:[#allocation2 + $0xe5] sm:$0xff] }
 0x149   : > { %v1340_v41 = vld [vmem:[#allocation3 + $0x88] sm:$0xff]  ;;  %v4629_v42 = vpop.f32.mrf.mxu1  ;;  %4844 = vmatmul.mubr.msk.bf16.gmra.mxu1 %vm275_vm3, %v3066_v30  ;;  %v1260_v35 = vpop.f32.mrf.mxu0  ;;  %v956_v52 = vld [vmem:[#allocation3 + $0xf8] sm:$0xff] }
 0x14a   : > { %1414 = vst.msk [vmem:[#allocation3 + $0x98] sm:$0xff] %vm598_vm4, %v1378_v36  ;;  %v1376_v44 = vadd.f32 %v1340_v41, %v1247_v29  ;;  %1018 = vst.msk [vmem:[#allocation3 + $0xa8] sm:$0xff] %vm598_vm4, %v982_v31  ;;  %v987_v45 = vadd.f32 %v4629_v42, %v951_v2  ;;  %4847 = vmatprep.mubr.msk.bf16.mxu1 %vm275_vm3, %v3067_v33  ;;  %v3466_v29 = vpack.c.bf16 %v3440_v10, %v3439_v9  ;;  %v3048_v30 = vld [vmem:[#allocation2 + $0xed] sm:$0xff] }
 0x14b   : > { %v1345_v50 = vld [vmem:[#allocation3 + $0xb0] sm:$0xff]  ;;  %v878_v16 = vpop.f32.mrf.mxu1  ;;  %v4664_v25 = vpop.f32.mrf.mxu0  ;;  %v3467_v33 = vpack.c.bf16 %v3442_v17, %v3441_v6  ;;  %v3070_v36 = vpack.c.bf16 %v3046_v22, %v3045_v21  ;;  %v3071_v56 = vpack.c.bf16 %v3048_v30, %v3047_v18  ;;  %v954_v42 = vld [vmem:[#allocation3 + $0xe8] sm:$0xff]  ;;  %v3449_v21 = vld [vmem:[#allocation2 + $0x106] sm:$0xff] }
 0x14c   : > { %1412 = vst.msk [vmem:[#allocation3 + $0x88] sm:$0xff] %vm598_vm4, %v1376_v44  ;;  %v1381_v58 = vadd.f32 %v4663_v63, %v1345_v50  ;;  %1023 = vst.msk [vmem:[#allocation3 + $0xd0] sm:$0xff] %vm598_vm4, %v987_v45  ;;  %v985_v28 = vadd.f32 %v949_v53, %v878_v16  ;;  %v3443_v44 = vld [vmem:[#allocation2 + $0xd6] sm:$0xff]  ;;  %v3444_v45 = vld [vmem:[#allocation2 + $0xde] sm:$0xff] }
 0x14d   : > { %v1343_v37 = vld [vmem:[#allocation3 + $0xa0] sm:$0xff]  ;;  %v4630_v60 = vpop.f32.mrf.mxu1  ;;  %v1263_v62 = vpop.f32.mrf.mxu0  ;;  %v959_v50 = vld [vmem:[#allocation3 + $0x110] sm:$0xff] }
 0x14e   : > { %1417 = vst.msk [vmem:[#allocation3 + $0xb0] sm:$0xff] %vm598_vm4, %v1381_v58  ;;  %v1379_v0 = vadd.f32 %v1343_v37, %v1260_v35  ;;  %1021 = vst.msk [vmem:[#allocation3 + $0xc0] sm:$0xff] %vm598_vm4, %v985_v28  ;;  %v988_v51 = vadd.f32 %v4630_v60, %v952_v61  ;;  %v3446_v53 = vld [vmem:[#allocation2 + $0xee] sm:$0xff]  ;;  %v3050_v58 = vld [vmem:[#allocation2 + $0xfd] sm:$0xff] }
 0x14f   : > { %v1346_v4 = vld [vmem:[#allocation3 + $0xb8] sm:$0xff]  ;;  %v881_v5 = vpop.f32.mrf.mxu1  ;;  %v4667_v7 = vpop.f32.mrf.mxu0  ;;  %4882 = vmatmul.mubr.msk.bf16.gmra.mxu0 %vm275_vm3, %v3464_v54  ;;  %v957_v60 = vld [vmem:[#allocation3 + $0x100] sm:$0xff]  ;;  %v3053_v30 = vld [vmem:[#allocation2 + $0x115] sm:$0xff] }
 0x150   : > { %1415 = vst.msk [vmem:[#allocation3 + $0xa0] sm:$0xff] %vm598_vm4, %v1379_v0  ;;  %v1382_v3 = vadd.f32 %v4664_v25, %v1346_v4  ;;  %1024 = vst.msk [vmem:[#allocation3 + $0xd8] sm:$0xff] %vm598_vm4, %v988_v51  ;;  %v986_v8 = vadd.f32 %v950_v55, %v881_v5  ;;  %4885 = vmatprep.mubr.msk.bf16.mxu0 %vm275_vm3, %v3465_v59  ;;  %v3051_v28 = vld [vmem:[#allocation2 + $0x105] sm:$0xff] }
 0x151   : > { %v1344_v11 = vld [vmem:[#allocation3 + $0xa8] sm:$0xff]  ;;  %v4633_v12 = vpop.f32.mrf.mxu1  ;;  %4848 = vmatmul.mubr.msk.bf16.gmra.mxu1 %vm275_vm3, %v3068_v40  ;;  %v1276_v15 = vpop.f32.mrf.mxu0  ;;  %v960_v55 = vld [vmem:[#allocation3 + $0x118] sm:$0xff] }
 0x152   : > { %1418 = vst.msk [vmem:[#allocation3 + $0xb8] sm:$0xff] %vm598_vm4, %v1382_v3  ;;  %v1380_v19 = vadd.f32 %v1344_v11, %v1263_v62  ;;  %1022 = vst.msk [vmem:[#allocation3 + $0xc8] sm:$0xff] %vm598_vm4, %v986_v8  ;;  %v991_v20 = vadd.f32 %v4633_v12, %v955_v14  ;;  %4851 = vmatprep.mubr.msk.bf16.mxu1 %vm275_vm3, %v3069_v1  ;;  %v3468_v62 = vpack.c.bf16 %v3444_v45, %v3443_v44  ;;  %v3052_v40 = vld [vmem:[#allocation2 + $0x10d] sm:$0xff] }
 0x153   : > { %v1349_v23 = vld [vmem:[#allocation3 + $0xd0] sm:$0xff]  ;;  %v894_v24 = vpop.f32.mrf.mxu1  ;;  %v4668_v27 = vpop.f32.mrf.mxu0  ;;  %v3469_v1 = vpack.c.bf16 %v3446_v53, %v3445_v13  ;;  %v3072_v3 = vpack.c.bf16 %v3050_v58, %v3049_v57  ;;  %v3073_v10 = vpack.c.bf16 %v3052_v40, %v3051_v28  ;;  %v958_v12 = vld [vmem:[#allocation3 + $0x108] sm:$0xff]  ;;  %v3453_v57 = vld [vmem:[#allocation2 + $0x126] sm:$0xff] }
 0x154   : > { %1416 = vst.msk [vmem:[#allocation3 + $0xa8] sm:$0xff] %vm598_vm4, %v1380_v19  ;;  %v1385_v49 = vadd.f32 %v4667_v7, %v1349_v23  ;;  %1027 = vst.msk [vmem:[#allocation3 + $0xf0] sm:$0xff] %vm598_vm4, %v991_v20  ;;  %v989_v32 = vadd.f32 %v953_v26, %v894_v24  ;;  %v3447_v19 = vld [vmem:[#allocation2 + $0xf6] sm:$0xff]  ;;  %v3448_v20 = vld [vmem:[#allocation2 + $0xfe] sm:$0xff] }
 0x155   : > { %v1347_v48 = vld [vmem:[#allocation3 + $0xc0] sm:$0xff]  ;;  %v4634_v34 = vpop.f32.mrf.mxu1  ;;  %v1279_v63 = vpop.f32.mrf.mxu0  ;;  %v1723_v23 = vld [vmem:[#allocation3 + $0x10] sm:$0xff] }
 0x156   : > { %1421 = vst.msk [vmem:[#allocation3 + $0xd0] sm:$0xff] %vm598_vm4, %v1385_v49  ;;  %v1383_v31 = vadd.f32 %v1347_v48, %v1276_v15  ;;  %1025 = vst.msk [vmem:[#allocation3 + $0xe0] sm:$0xff] %vm598_vm4, %v989_v32  ;;  %v992_v38 = vadd.f32 %v4634_v34, %v956_v52  ;;  %v3450_v26 = vld [vmem:[#allocation2 + $0x10e] sm:$0xff]  ;;  %v3054_v49 = vld [vmem:[#allocation2 + $0x11d] sm:$0xff] }
 0x157   : > { %v1350_v39 = vld [vmem:[#allocation3 + $0xd8] sm:$0xff]  ;;  %v897_v41 = vpop.f32.mrf.mxu1  ;;  %v4671_v2 = vpop.f32.mrf.mxu0  ;;  %4886 = vmatmul.mubr.msk.bf16.gmra.mxu0 %vm275_vm3, %v3466_v29  ;;  %v1721_v34 = vld [vmem:[#allocation3] sm:$0xff]  ;;  %v3057_v40 = vld [vmem:[#allocation2 + $0x135] sm:$0xff] }
 0x158   : > { %1419 = vst.msk [vmem:[#allocation3 + $0xc0] sm:$0xff] %vm598_vm4, %v1383_v31  ;;  %v1386_v35 = vadd.f32 %v4668_v27, %v1350_v39  ;;  %1028 = vst.msk [vmem:[#allocation3 + $0xf8] sm:$0xff] %vm598_vm4, %v992_v38  ;;  %v990_v43 = vadd.f32 %v954_v42, %v897_v41  ;;  %4889 = vmatprep.mubr.msk.bf16.mxu0 %vm275_vm3, %v3467_v33  ;;  %v3055_v32 = vld [vmem:[#allocation2 + $0x125] sm:$0xff] }
 0x159   : > { %v1348_v46 = vld [vmem:[#allocation3 + $0xc8] sm:$0xff]  ;;  %v4637_v47 = vpop.f32.mrf.mxu1  ;;  %4852 = vmatmul.mubr.msk.bf16.gmra.mxu1 %vm275_vm3, %v3070_v36  ;;  %v1292_v16 = vpop.f32.mrf.mxu0  ;;  %v1724_v42 = vld [vmem:[#allocation3 + $0x18] sm:$0xff] }
 0x15a   : > { %1422 = vst.msk [vmem:[#allocation3 + $0xd8] sm:$0xff] %vm598_vm4, %v1386_v35  ;;  %v1384_v25 = vadd.f32 %v1348_v46, %v1279_v63  ;;  %1026 = vst.msk [vmem:[#allocation3 + $0xe8] sm:$0xff] %vm598_vm4, %v990_v43  ;;  %v995_v54 = vadd.f32 %v4637_v47, %v959_v50  ;;  %4855 = vmatprep.mubr.msk.bf16.mxu1 %vm275_vm3, %v3071_v56  ;;  %v3470_v63 = vpack.c.bf16 %v3448_v20, %v3447_v19  ;;  %v3056_v36 = vld [vmem:[#allocation2 + $0x12d] sm:$0xff] }
 0x15b   : > { %v1353_v59 = vld [vmem:[#allocation3 + $0xf0] sm:$0xff]  ;;  %v910_v37 = vpop.f32.mrf.mxu1  ;;  %v4672_v61 = vpop.f32.mrf.mxu0  ;;  %v3471_v56 = vpack.c.bf16 %v3450_v26, %v3449_v21  ;;  %v3074_v35 = vpack.c.bf16 %v3054_v49, %v3053_v30  ;;  %v3075_v45 = vpack.c.bf16 %v3056_v36, %v3055_v32  ;;  %v1722_v47 = vld [vmem:[#allocation3 + $0x8] sm:$0xff] }
 0x15c   : > { %1420 = vst.msk [vmem:[#allocation3 + $0xc8] sm:$0xff] %vm598_vm4, %v1384_v25  ;;  %v1389_v0 = vadd.f32 %v4671_v2, %v1353_v59  ;;  %1031 = vst.msk [vmem:[#allocation3 + $0x110] sm:$0xff] %vm598_vm4, %v995_v54  ;;  %v993_v51 = vadd.f32 %v957_v60, %v910_v37  ;;  %v3451_v25 = vld [vmem:[#allocation2 + $0x116] sm:$0xff]  ;;  %v3452_v54 = vld [vmem:[#allocation2 + $0x11e] sm:$0xff] }
 0x15d   : > { %v1351_v4 = vld [vmem:[#allocation3 + $0xe0] sm:$0xff]  ;;  %v4638_v5 = vpop.f32.mrf.mxu1  ;;  %v1295_v7 = vpop.f32.mrf.mxu0  ;;  %v1727_v59 = vld [vmem:[#allocation3 + $0x30] sm:$0xff]  ;;  %v1726_v20 = vld [vmem:[#allocation3 + $0x28] sm:$0xff] }
 0x15e   : > { %1425 = vst.msk [vmem:[#allocation3 + $0xf0] sm:$0xff] %vm598_vm4, %v1389_v0  ;;  %v1387_v8 = vadd.f32 %v1351_v4, %v1292_v16  ;;  %1029 = vst.msk [vmem:[#allocation3 + $0x100] sm:$0xff] %vm598_vm4, %v993_v51  ;;  %v996_v9 = vadd.f32 %v4638_v5, %v960_v55  ;;  %v3454_v60 = vld [vmem:[#allocation2 + $0x12e] sm:$0xff]  ;;  %v3058_v0 = vld [vmem:[#allocation2 + $0x13d] sm:$0xff]  ;;  %v3472_v55 = vpack.c.bf16 %v3452_v54, %v3451_v25 }
 0x15f   : > { %v1354_v6 = vld [vmem:[#allocation3 + $0xf8] sm:$0xff]  ;;  %v913_v11 = vpop.f32.mrf.mxu1  ;;  %v4675_v14 = vpop.f32.mrf.mxu0  ;;  %4890 = vmatmul.mubr.msk.bf16.gmra.mxu0 %vm275_vm3, %v3468_v62  ;;  %v1725_v4 = vld [vmem:[#allocation3 + $0x20] sm:$0xff] }
 0x160   : > { %1423 = vst.msk [vmem:[#allocation3 + $0xe0] sm:$0xff] %vm598_vm4, %v1387_v8  ;;  %v1390_v15 = vadd.f32 %v4672_v61, %v1354_v6  ;;  %1032 = vst.msk [vmem:[#allocation3 + $0x118] sm:$0xff] %vm598_vm4, %v996_v9  ;;  %v994_v17 = vadd.f32 %v958_v12, %v913_v11  ;;  %4893 = vmatprep.mubr.msk.bf16.mxu0 %vm275_vm3, %v3469_v1  ;;  %v3473_v8 = vpack.c.bf16 %v3454_v60, %v3453_v57  ;;  %v1728_v6 = vld [vmem:[#allocation3 + $0x38] sm:$0xff] }
 0x161   : > { %v1352_v22 = vld [vmem:[#allocation3 + $0xe8] sm:$0xff]  ;;  %v4681_v18 = vpop.f32.mrf.mxu1  ;;  %4856 = vmatmul.mubr.msk.bf16.gmra.mxu1 %vm275_vm3, %v3072_v3  ;;  %v1308_v24 = vpop.f32.mrf.mxu0  ;;  %v3076_v12 = vpack.c.bf16 %v3058_v0, %v3057_v40  ;;  %v1736_v40 = vld [vmem:[#allocation3 + $0x78] sm:$0xff] }
 0x162   : > { %1426 = vst.msk [vmem:[#allocation3 + $0xf8] sm:$0xff] %vm598_vm4, %v1390_v15  ;;  %v1388_v27 = vadd.f32 %v1352_v22, %v1295_v7  ;;  %1030 = vst.msk [vmem:[#allocation3 + $0x108] sm:$0xff] %vm598_vm4, %v994_v17  ;;  %v1759_v29 = vadd.f32 %v4681_v18, %v1723_v23  ;;  %4859 = vmatprep.mubr.msk.bf16.mxu1 %vm275_vm3, %v3073_v10  ;;  %v3455_v23 = vld [vmem:[#allocation2 + $0x136] sm:$0xff] }
 0x163   : > { %v1357_v33 = vld [vmem:[#allocation3 + $0x110] sm:$0xff]  ;;  %v1578_v48 = vpop.f32.mrf.mxu1  ;;  %v4676_v52 = vpop.f32.mrf.mxu0 }
 0x164   : > { %1424 = vst.msk [vmem:[#allocation3 + $0xe8] sm:$0xff] %vm598_vm4, %v1388_v27  ;;  %v1393_v31 = vadd.f32 %v4675_v14, %v1357_v33  ;;  %1795 = vst.msk [vmem:[#allocation3 + $0x10] sm:$0xff] %vm598_vm4, %v1759_v29  ;;  %v1757_v38 = vadd.f32 %v1721_v34, %v1578_v48  ;;  %v1731_v29 = vld [vmem:[#allocation3 + $0x50] sm:$0xff]  ;;  %v1729_v34 = vld [vmem:[#allocation3 + $0x40] sm:$0xff] }
 0x165   : > { %v1355_v39 = vld [vmem:[#allocation3 + $0x100] sm:$0xff]  ;;  %v4682_v41 = vpop.f32.mrf.mxu1  ;;  %v1311_v2 = vpop.f32.mrf.mxu0 }
 0x166   : > { %1429 = vst.msk [vmem:[#allocation3 + $0x110] sm:$0xff] %vm598_vm4, %v1393_v31  ;;  %v1391_v43 = vadd.f32 %v1355_v39, %v1308_v24  ;;  %1793 = vst.msk [vmem:[#allocation3] sm:$0xff] %vm598_vm4, %v1757_v38  ;;  %v1760_v44 = vadd.f32 %v4682_v41, %v1724_v42  ;;  %v3456_v24 = vld [vmem:[#allocation2 + $0x13e] sm:$0xff] }
 0x167   : > { %v1358_v13 = vld [vmem:[#allocation3 + $0x118] sm:$0xff]  ;;  %v1581_v46 = vpop.f32.mrf.mxu1  ;;  %v4719_v50 = vpop.f32.mrf.mxu0  ;;  %4894 = vmatmul.mubr.msk.bf16.gmra.mxu0 %vm275_vm3, %v3470_v63  ;;  %v3474_v63 = vpack.c.bf16 %v3456_v24, %v3455_v23 }
 0x168   : > { %1427 = vst.msk [vmem:[#allocation3 + $0x100] sm:$0xff] %vm598_vm4, %v1391_v43  ;;  %v1394_v16 = vadd.f32 %v4676_v52, %v1358_v13  ;;  %1796 = vst.msk [vmem:[#allocation3 + $0x18] sm:$0xff] %vm598_vm4, %v1760_v44  ;;  %v1758_v53 = vadd.f32 %v1722_v47, %v1581_v46  ;;  %4897 = vmatprep.mubr.msk.bf16.mxu0 %vm275_vm3, %v3471_v56  ;;  %v1732_v39 = vld [vmem:[#allocation3 + $0x58] sm:$0xff]  ;;  %v1730_v44 = vld [vmem:[#allocation3 + $0x48] sm:$0xff] }
 0x169   : > { %v1356_v58 = vld [vmem:[#allocation3 + $0x108] sm:$0xff]  ;;  %v4685_v28 = vpop.f32.mrf.mxu1  ;;  %4860 = vmatmul.mubr.msk.bf16.gmra.mxu1 %vm275_vm3, %v3074_v35  ;;  %v1976_v37 = vpop.f32.mrf.mxu0  ;;  %v1740_v24 = vld [vmem:[#allocation3 + $0x98] sm:$0xff] }
 0x16a   : > { %1430 = vst.msk [vmem:[#allocation3 + $0x118] sm:$0xff] %vm598_vm4, %v1394_v16  ;;  %v1392_v61 = vadd.f32 %v1356_v58, %v1311_v2  ;;  %1794 = vst.msk [vmem:[#allocation3 + $0x8] sm:$0xff] %vm598_vm4, %v1758_v53  ;;  %v1763_v62 = vadd.f32 %v4685_v28, %v1727_v59  ;;  %4863 = vmatprep.mubr.msk.bf16.mxu1 %vm275_vm3, %v3075_v45  ;;  %v1735_v16 = vld [vmem:[#allocation3 + $0x70] sm:$0xff]  ;;  %v1733_v28 = vld [vmem:[#allocation3 + $0x60] sm:$0xff] }
 0x16b   : > { %v2121_v51 = vld [vmem:[#allocation3 + $0x10] sm:$0xff]  ;;  %v1594_v1 = vpop.f32.mrf.mxu1  ;;  %v4720_v5 = vpop.f32.mrf.mxu0 }
 0x16c   : > { %1428 = vst.msk [vmem:[#allocation3 + $0x108] sm:$0xff] %vm598_vm4, %v1392_v61  ;;  %v2157_v7 = vadd.f32 %v4719_v50, %v2121_v51  ;;  %1799 = vst.msk [vmem:[#allocation3 + $0x30] sm:$0xff] %vm598_vm4, %v1763_v62  ;;  %v1761_v3 = vadd.f32 %v1725_v4, %v1594_v1 }
 0x16d   : > { %v2119_v9 = vld [vmem:[#allocation3] sm:$0xff]  ;;  %v4686_v10 = vpop.f32.mrf.mxu1  ;;  %v1979_v11 = vpop.f32.mrf.mxu0 }
 0x16e   : > { %2193 = vst.msk [vmem:[#allocation3 + $0x10] sm:$0xff] %vm598_vm4, %v2157_v7  ;;  %v2155_v14 = vadd.f32 %v2119_v9, %v1976_v37  ;;  %1797 = vst.msk [vmem:[#allocation3 + $0x20] sm:$0xff] %vm598_vm4, %v1761_v3  ;;  %v1764_v15 = vadd.f32 %v4686_v10, %v1728_v6  ;;  %v1739_v6 = vld [vmem:[#allocation3 + $0x90] sm:$0xff] }
 0x16f   : > { %v2122_v17 = vld [vmem:[#allocation3 + $0x18] sm:$0xff]  ;;  %v1597_v19 = vpop.f32.mrf.mxu1  ;;  %v4723_v21 = vpop.f32.mrf.mxu0  ;;  %4898 = vmatmul.mubr.msk.bf16.gmra.mxu0 %vm275_vm3, %v3472_v55  ;;  %v1734_v55 = vld [vmem:[#allocation3 + $0x68] sm:$0xff] }
 0x170   : > { %2191 = vst.msk [vmem:[#allocation3] sm:$0xff] %vm598_vm4, %v2155_v14  ;;  %v2158_v22 = vadd.f32 %v4720_v5, %v2122_v17  ;;  %1800 = vst.msk [vmem:[#allocation3 + $0x38] sm:$0xff] %vm598_vm4, %v1764_v15  ;;  %v1762_v18 = vadd.f32 %v1726_v20, %v1597_v19  ;;  %4901 = vmatprep.mubr.msk.bf16.mxu0 %vm275_vm3, %v3473_v8  ;;  %v1737_v19 = vld [vmem:[#allocation3 + $0x80] sm:$0xff] }
 0x171   : > { %v2120_v26 = vld [vmem:[#allocation3 + $0x8] sm:$0xff]  ;;  %v4689_v27 = vpop.f32.mrf.mxu1  ;;  %4864 = vmatmul.mubr.msk.bf16.gmra.mxu1 %vm275_vm3, %v3076_v12  ;;  %v1992_v30 = vpop.f32.mrf.mxu0 }
 0x172   : > { %2194 = vst.msk [vmem:[#allocation3 + $0x18] sm:$0xff] %vm598_vm4, %v2158_v22  ;;  %v2156_v49 = vadd.f32 %v2120_v26, %v1979_v11  ;;  %1798 = vst.msk [vmem:[#allocation3 + $0x28] sm:$0xff] %vm598_vm4, %v1762_v18  ;;  %v1767_v32 = vadd.f32 %v4689_v27, %v1731_v29 }
 0x173   : > { %v2125_v33 = vld [vmem:[#allocation3 + $0x30] sm:$0xff]  ;;  %v1610_v48 = vpop.f32.mrf.mxu1  ;;  %v4724_v52 = vpop.f32.mrf.mxu0 }
 0x174   : > { %2192 = vst.msk [vmem:[#allocation3 + $0x8] sm:$0xff] %vm598_vm4, %v2156_v49  ;;  %v2161_v36 = vadd.f32 %v4723_v21, %v2125_v33  ;;  %1803 = vst.msk [vmem:[#allocation3 + $0x50] sm:$0xff] %vm598_vm4, %v1767_v32  ;;  %v1765_v31 = vadd.f32 %v1729_v34, %v1610_v48  ;;  %v1738_v32 = vld [vmem:[#allocation3 + $0x88] sm:$0xff] }
 0x175   : > { %v2123_v38 = vld [vmem:[#allocation3 + $0x20] sm:$0xff]  ;;  %v4690_v56 = vpop.f32.mrf.mxu1  ;;  %v1995_v41 = vpop.f32.mrf.mxu0 }
 0x176   : > { %2197 = vst.msk [vmem:[#allocation3 + $0x30] sm:$0xff] %vm598_vm4, %v2161_v36  ;;  %v2159_v42 = vadd.f32 %v2123_v38, %v1992_v30  ;;  %1801 = vst.msk [vmem:[#allocation3 + $0x40] sm:$0xff] %vm598_vm4, %v1765_v31  ;;  %v1768_v2 = vadd.f32 %v4690_v56, %v1732_v39  ;;  %v1743_v36 = vld [vmem:[#allocation3 + $0xb0] sm:$0xff] }
 0x177   : > { %v2126_v35 = vld [vmem:[#allocation3 + $0x38] sm:$0xff]  ;;  %v1613_v43 = vpop.f32.mrf.mxu1  ;;  %v4727_v45 = vpop.f32.mrf.mxu0  ;;  %4902 = vmatmul.mubr.msk.bf16.gmra.mxu0 %vm275_vm3, %v3474_v63 }
 0x178   : > { %2195 = vst.msk [vmem:[#allocation3 + $0x20] sm:$0xff] %vm598_vm4, %v2159_v42  ;;  %v2162_v13 = vadd.f32 %v4724_v52, %v2126_v35  ;;  %1804 = vst.msk [vmem:[#allocation3 + $0x58] sm:$0xff] %vm598_vm4, %v1768_v2  ;;  %v1766_v46 = vadd.f32 %v1730_v44, %v1613_v43  ;;  %v1741_v42 = vld [vmem:[#allocation3 + $0xa0] sm:$0xff] }
 0x179   : > { %v2124_v47 = vld [vmem:[#allocation3 + $0x28] sm:$0xff]  ;;  %v4693_v50 = vpop.f32.mrf.mxu1  ;;  %v2008_v53 = vpop.f32.mrf.mxu0 }
 0x17a   : > { %2198 = vst.msk [vmem:[#allocation3 + $0x38] sm:$0xff] %vm598_vm4, %v2162_v13  ;;  %v2160_v25 = vadd.f32 %v2124_v47, %v1995_v41  ;;  %1802 = vst.msk [vmem:[#allocation3 + $0x48] sm:$0xff] %vm598_vm4, %v1766_v46  ;;  %v1771_v54 = vadd.f32 %v4693_v50, %v1735_v16  ;;  %v1744_v13 = vld [vmem:[#allocation3 + $0xb8] sm:$0xff] }
 0x17b   : > { %v2129_v57 = vld [vmem:[#allocation3 + $0x50] sm:$0xff]  ;;  %v1626_v58 = vpop.f32.mrf.mxu1  ;;  %v4728_v59 = vpop.f32.mrf.mxu0 }
 0x17c   : > { %2196 = vst.msk [vmem:[#allocation3 + $0x28] sm:$0xff] %vm598_vm4, %v2160_v25  ;;  %v2165_v37 = vadd.f32 %v4727_v45, %v2129_v57  ;;  %1807 = vst.msk [vmem:[#allocation3 + $0x70] sm:$0xff] %vm598_vm4, %v1771_v54  ;;  %v1769_v60 = vadd.f32 %v1733_v28, %v1626_v58  ;;  %v1742_v25 = vld [vmem:[#allocation3 + $0xa8] sm:$0xff] }
 0x17d   : > { %v2127_v61 = vld [vmem:[#allocation3 + $0x40] sm:$0xff]  ;;  %v4694_v62 = vpop.f32.mrf.mxu1  ;;  %v2011_v0 = vpop.f32.mrf.mxu0 }
 0x17e   : > { %2201 = vst.msk [vmem:[#allocation3 + $0x50] sm:$0xff] %vm598_vm4, %v2165_v37  ;;  %v2163_v51 = vadd.f32 %v2127_v61, %v2008_v53  ;;  %1805 = vst.msk [vmem:[#allocation3 + $0x60] sm:$0xff] %vm598_vm4, %v1769_v60  ;;  %v1772_v1 = vadd.f32 %v4694_v62, %v1736_v40  ;;  %v1747_v37 = vld [vmem:[#allocation3 + $0xd0] sm:$0xff] }
 0x17f   : > { %v2130_v4 = vld [vmem:[#allocation3 + $0x58] sm:$0xff]  ;;  %v1629_v5 = vpop.f32.mrf.mxu1  ;;  %v4731_v7 = vpop.f32.mrf.mxu0 }
 0x180   : > { %2199 = vst.msk [vmem:[#allocation3 + $0x40] sm:$0xff] %vm598_vm4, %v2163_v51  ;;  %v2166_v3 = vadd.f32 %v4728_v59, %v2130_v4  ;;  %1808 = vst.msk [vmem:[#allocation3 + $0x78] sm:$0xff] %vm598_vm4, %v1772_v1  ;;  %v1770_v8 = vadd.f32 %v1734_v55, %v1629_v5  ;;  %v1745_v51 = vld [vmem:[#allocation3 + $0xc0] sm:$0xff] }
 0x181   : > { %v2128_v9 = vld [vmem:[#allocation3 + $0x48] sm:$0xff]  ;;  %v4697_v10 = vpop.f32.mrf.mxu1  ;;  %v2024_v11 = vpop.f32.mrf.mxu0 }
 0x182   : > { %2202 = vst.msk [vmem:[#allocation3 + $0x58] sm:$0xff] %vm598_vm4, %v2166_v3  ;;  %v2164_v12 = vadd.f32 %v2128_v9, %v2011_v0  ;;  %1806 = vst.msk [vmem:[#allocation3 + $0x68] sm:$0xff] %vm598_vm4, %v1770_v8  ;;  %v1775_v14 = vadd.f32 %v4697_v10, %v1739_v6  ;;  %v1748_v3 = vld [vmem:[#allocation3 + $0xd8] sm:$0xff] }
 0x183   : > { %v2133_v15 = vld [vmem:[#allocation3 + $0x70] sm:$0xff]  ;;  %v1642_v17 = vpop.f32.mrf.mxu1  ;;  %v4732_v20 = vpop.f32.mrf.mxu0 }
 0x184   : > { %2200 = vst.msk [vmem:[#allocation3 + $0x48] sm:$0xff] %vm598_vm4, %v2164_v12  ;;  %v2169_v21 = vadd.f32 %v4731_v7, %v2133_v15  ;;  %1811 = vst.msk [vmem:[#allocation3 + $0x90] sm:$0xff] %vm598_vm4, %v1775_v14  ;;  %v1773_v22 = vadd.f32 %v1737_v19, %v1642_v17  ;;  %v1746_v12 = vld [vmem:[#allocation3 + $0xc8] sm:$0xff] }
 0x185   : > { %v2131_v18 = vld [vmem:[#allocation3 + $0x60] sm:$0xff]  ;;  %v4698_v23 = vpop.f32.mrf.mxu1  ;;  %v2027_v26 = vpop.f32.mrf.mxu0 }
 0x186   : > { %2205 = vst.msk [vmem:[#allocation3 + $0x70] sm:$0xff] %vm598_vm4, %v2169_v21  ;;  %v2167_v27 = vadd.f32 %v2131_v18, %v2024_v11  ;;  %1809 = vst.msk [vmem:[#allocation3 + $0x80] sm:$0xff] %vm598_vm4, %v1773_v22  ;;  %v1776_v29 = vadd.f32 %v4698_v23, %v1740_v24  ;;  %v1751_v21 = vld [vmem:[#allocation3 + $0xf0] sm:$0xff] }
 0x187   : > { %v2134_v30 = vld [vmem:[#allocation3 + $0x78] sm:$0xff]  ;;  %v1645_v49 = vpop.f32.mrf.mxu1  ;;  %v4735_v33 = vpop.f32.mrf.mxu0 }
 0x188   : > { %2203 = vst.msk [vmem:[#allocation3 + $0x60] sm:$0xff] %vm598_vm4, %v2167_v27  ;;  %v2170_v48 = vadd.f32 %v4732_v20, %v2134_v30  ;;  %1812 = vst.msk [vmem:[#allocation3 + $0x98] sm:$0xff] %vm598_vm4, %v1776_v29  ;;  %v1774_v34 = vadd.f32 %v1738_v32, %v1645_v49  ;;  %v1749_v27 = vld [vmem:[#allocation3 + $0xe0] sm:$0xff] }
 0x189   : > { %v2132_v52 = vld [vmem:[#allocation3 + $0x68] sm:$0xff]  ;;  %v4701_v63 = vpop.f32.mrf.mxu1  ;;  %v2040_v31 = vpop.f32.mrf.mxu0 }
 0x18a   : > { %2206 = vst.msk [vmem:[#allocation3 + $0x78] sm:$0xff] %vm598_vm4, %v2170_v48  ;;  %v2168_v38 = vadd.f32 %v2132_v52, %v2027_v26  ;;  %1810 = vst.msk [vmem:[#allocation3 + $0x88] sm:$0xff] %vm598_vm4, %v1774_v34  ;;  %v1779_v56 = vadd.f32 %v4701_v63, %v1743_v36  ;;  %v1752_v48 = vld [vmem:[#allocation3 + $0xf8] sm:$0xff] }
 0x18b   : > { %v2137_v39 = vld [vmem:[#allocation3 + $0x90] sm:$0xff]  ;;  %v1658_v41 = vpop.f32.mrf.mxu1  ;;  %v4736_v2 = vpop.f32.mrf.mxu0 }
 0x18c   : > { %2204 = vst.msk [vmem:[#allocation3 + $0x68] sm:$0xff] %vm598_vm4, %v2168_v38  ;;  %v2173_v35 = vadd.f32 %v4735_v33, %v2137_v39  ;;  %1815 = vst.msk [vmem:[#allocation3 + $0xb0] sm:$0xff] %vm598_vm4, %v1779_v56  ;;  %v1777_v43 = vadd.f32 %v1741_v42, %v1658_v41  ;;  %v1750_v38 = vld [vmem:[#allocation3 + $0xe8] sm:$0xff] }
 0x18d   : > { %v2135_v44 = vld [vmem:[#allocation3 + $0x80] sm:$0xff]  ;;  %v4702_v45 = vpop.f32.mrf.mxu1  ;;  %v2043_v46 = vpop.f32.mrf.mxu0 }
 0x18e   : > { %2209 = vst.msk [vmem:[#allocation3 + $0x90] sm:$0xff] %vm598_vm4, %v2173_v35  ;;  %v2171_v47 = vadd.f32 %v2135_v44, %v2040_v31  ;;  %1813 = vst.msk [vmem:[#allocation3 + $0xa0] sm:$0xff] %vm598_vm4, %v1777_v43  ;;  %v1780_v50 = vadd.f32 %v4702_v45, %v1744_v13  ;;  %v1755_v35 = vld [vmem:[#allocation3 + $0x110] sm:$0xff] }
 0x18f   : > { %v2138_v16 = vld [vmem:[#allocation3 + $0x98] sm:$0xff]  ;;  %v1661_v53 = vpop.f32.mrf.mxu1  ;;  %v4739_v54 = vpop.f32.mrf.mxu0 }
 0x190   : > { %2207 = vst.msk [vmem:[#allocation3 + $0x80] sm:$0xff] %vm598_vm4, %v2171_v47  ;;  %v2174_v57 = vadd.f32 %v4736_v2, %v2138_v16  ;;  %1816 = vst.msk [vmem:[#allocation3 + $0xb8] sm:$0xff] %vm598_vm4, %v1780_v50  ;;  %v1778_v58 = vadd.f32 %v1742_v25, %v1661_v53  ;;  %v1753_v47 = vld [vmem:[#allocation3 + $0x100] sm:$0xff] }
 0x191   : > { %v2136_v28 = vld [vmem:[#allocation3 + $0x88] sm:$0xff]  ;;  %v4705_v59 = vpop.f32.mrf.mxu1  ;;  %v2056_v60 = vpop.f32.mrf.mxu0 }
 0x192   : > { %2210 = vst.msk [vmem:[#allocation3 + $0x98] sm:$0xff] %vm598_vm4, %v2174_v57  ;;  %v2172_v61 = vadd.f32 %v2136_v28, %v2043_v46  ;;  %1814 = vst.msk [vmem:[#allocation3 + $0xa8] sm:$0xff] %vm598_vm4, %v1778_v58  ;;  %v1783_v62 = vadd.f32 %v4705_v59, %v1747_v37  ;;  %v1756_v57 = vld [vmem:[#allocation3 + $0x118] sm:$0xff] }
 0x193   : > { %v2141_v40 = vld [vmem:[#allocation3 + $0xb0] sm:$0xff]  ;;  %v1674_v0 = vpop.f32.mrf.mxu1  ;;  %v4740_v1 = vpop.f32.mrf.mxu0 }
 0x194   : > { %2208 = vst.msk [vmem:[#allocation3 + $0x88] sm:$0xff] %vm598_vm4, %v2172_v61  ;;  %v2177_v4 = vadd.f32 %v4739_v54, %v2141_v40  ;;  %1819 = vst.msk [vmem:[#allocation3 + $0xd0] sm:$0xff] %vm598_vm4, %v1783_v62  ;;  %v1781_v5 = vadd.f32 %v1745_v51, %v1674_v0  ;;  %v1754_v61 = vld [vmem:[#allocation3 + $0x108] sm:$0xff] }
 0x195   : > { %v2139_v55 = vld [vmem:[#allocation3 + $0xa0] sm:$0xff]  ;;  %v4706_v7 = vpop.f32.mrf.mxu1  ;;  %v2059_v8 = vpop.f32.mrf.mxu0 }
 0x196   : > { %2213 = vst.msk [vmem:[#allocation3 + $0xb0] sm:$0xff] %vm598_vm4, %v2177_v4  ;;  %v2175_v9 = vadd.f32 %v2139_v55, %v2056_v60  ;;  %1817 = vst.msk [vmem:[#allocation3 + $0xc0] sm:$0xff] %vm598_vm4, %v1781_v5  ;;  %v1784_v10 = vadd.f32 %v4706_v7, %v1748_v3  ;;  %v2519_v4 = vld [vmem:[#allocation3 + $0x10] sm:$0xff] }
 0x197   : > { %v2142_v6 = vld [vmem:[#allocation3 + $0xb8] sm:$0xff]  ;;  %v1677_v11 = vpop.f32.mrf.mxu1  ;;  %v4743_v14 = vpop.f32.mrf.mxu0 }
 0x198   : > { %2211 = vst.msk [vmem:[#allocation3 + $0xa0] sm:$0xff] %vm598_vm4, %v2175_v9  ;;  %v2178_v15 = vadd.f32 %v4740_v1, %v2142_v6  ;;  %1820 = vst.msk [vmem:[#allocation3 + $0xd8] sm:$0xff] %vm598_vm4, %v1784_v10  ;;  %v1782_v17 = vadd.f32 %v1746_v12, %v1677_v11  ;;  %v2517_v9 = vld [vmem:[#allocation3] sm:$0xff] }
 0x199   : > { %v2140_v19 = vld [vmem:[#allocation3 + $0xa8] sm:$0xff]  ;;  %v4709_v20 = vpop.f32.mrf.mxu1  ;;  %v2072_v22 = vpop.f32.mrf.mxu0 }
 0x19a   : > { %2214 = vst.msk [vmem:[#allocation3 + $0xb8] sm:$0xff] %vm598_vm4, %v2178_v15  ;;  %v2176_v18 = vadd.f32 %v2140_v19, %v2059_v8  ;;  %1818 = vst.msk [vmem:[#allocation3 + $0xc8] sm:$0xff] %vm598_vm4, %v1782_v17  ;;  %v1787_v23 = vadd.f32 %v4709_v20, %v1751_v21  ;;  %v2520_v15 = vld [vmem:[#allocation3 + $0x18] sm:$0xff] }
 0x19b   : > { %v2145_v24 = vld [vmem:[#allocation3 + $0xd0] sm:$0xff]  ;;  %v1690_v26 = vpop.f32.mrf.mxu1  ;;  %v4744_v29 = vpop.f32.mrf.mxu0 }
 0x19c   : > { %2212 = vst.msk [vmem:[#allocation3 + $0xa8] sm:$0xff] %vm598_vm4, %v2176_v18  ;;  %v2181_v30 = vadd.f32 %v4743_v14, %v2145_v24  ;;  %1823 = vst.msk [vmem:[#allocation3 + $0xf0] sm:$0xff] %vm598_vm4, %v1787_v23  ;;  %v1785_v49 = vadd.f32 %v1749_v27, %v1690_v26  ;;  %v2518_v18 = vld [vmem:[#allocation3 + $0x8] sm:$0xff] }
 0x19d   : > { %v2143_v32 = vld [vmem:[#allocation3 + $0xc0] sm:$0xff]  ;;  %v4710_v33 = vpop.f32.mrf.mxu1  ;;  %v2075_v34 = vpop.f32.mrf.mxu0 }
 0x19e   : > { %2217 = vst.msk [vmem:[#allocation3 + $0xd0] sm:$0xff] %vm598_vm4, %v2181_v30  ;;  %v2179_v52 = vadd.f32 %v2143_v32, %v2072_v22  ;;  %1821 = vst.msk [vmem:[#allocation3 + $0xe0] sm:$0xff] %vm598_vm4, %v1785_v49  ;;  %v1788_v63 = vadd.f32 %v4710_v33, %v1752_v48  ;;  %v2523_v30 = vld [vmem:[#allocation3 + $0x30] sm:$0xff] }
 0x19f   : > { %v2146_v36 = vld [vmem:[#allocation3 + $0xd8] sm:$0xff]  ;;  %v1693_v31 = vpop.f32.mrf.mxu1  ;;  %v4747_v56 = vpop.f32.mrf.mxu0 }
 0x1a0   : > { %2215 = vst.msk [vmem:[#allocation3 + $0xc0] sm:$0xff] %vm598_vm4, %v2179_v52  ;;  %v2182_v39 = vadd.f32 %v4744_v29, %v2146_v36  ;;  %1824 = vst.msk [vmem:[#allocation3 + $0xf8] sm:$0xff] %vm598_vm4, %v1788_v63  ;;  %v1786_v41 = vadd.f32 %v1750_v38, %v1693_v31  ;;  %v2521_v52 = vld [vmem:[#allocation3 + $0x20] sm:$0xff] }
 0x1a1   : > { %v2144_v42 = vld [vmem:[#allocation3 + $0xc8] sm:$0xff]  ;;  %v4713_v2 = vpop.f32.mrf.mxu1  ;;  %v2088_v43 = vpop.f32.mrf.mxu0 }
 0x1a2   : > { %2218 = vst.msk [vmem:[#allocation3 + $0xd8] sm:$0xff] %vm598_vm4, %v2182_v39  ;;  %v2180_v44 = vadd.f32 %v2144_v42, %v2075_v34  ;;  %1822 = vst.msk [vmem:[#allocation3 + $0xe8] sm:$0xff] %vm598_vm4, %v1786_v41  ;;  %v1791_v45 = vadd.f32 %v4713_v2, %v1755_v35  ;;  %v2524_v39 = vld [vmem:[#allocation3 + $0x38] sm:$0xff] }
 0x1a3   : > { %v2149_v13 = vld [vmem:[#allocation3 + $0xf0] sm:$0xff]  ;;  %v1706_v46 = vpop.f32.mrf.mxu1  ;;  %v4748_v50 = vpop.f32.mrf.mxu0 }
 0x1a4   : > { %2216 = vst.msk [vmem:[#allocation3 + $0xc8] sm:$0xff] %vm598_vm4, %v2180_v44  ;;  %v2185_v16 = vadd.f32 %v4747_v56, %v2149_v13  ;;  %1827 = vst.msk [vmem:[#allocation3 + $0x110] sm:$0xff] %vm598_vm4, %v1791_v45  ;;  %v1789_v53 = vadd.f32 %v1753_v47, %v1706_v46  ;;  %v2522_v44 = vld [vmem:[#allocation3 + $0x28] sm:$0xff] }
 0x1a5   : > { %v2147_v25 = vld [vmem:[#allocation3 + $0xe0] sm:$0xff]  ;;  %v4714_v54 = vpop.f32.mrf.mxu1  ;;  %v2091_v58 = vpop.f32.mrf.mxu0 }
 0x1a6   : > { %2221 = vst.msk [vmem:[#allocation3 + $0xf0] sm:$0xff] %vm598_vm4, %v2185_v16  ;;  %v2183_v28 = vadd.f32 %v2147_v25, %v2088_v43  ;;  %1825 = vst.msk [vmem:[#allocation3 + $0x100] sm:$0xff] %vm598_vm4, %v1789_v53  ;;  %v1792_v59 = vadd.f32 %v4714_v54, %v1756_v57  ;;  %v2527_v16 = vld [vmem:[#allocation3 + $0x50] sm:$0xff] }
 0x1a7   : > { %v2150_v37 = vld [vmem:[#allocation3 + $0xf8] sm:$0xff]  ;;  %v1709_v60 = vpop.f32.mrf.mxu1  ;;  %v4751_v62 = vpop.f32.mrf.mxu0 }
 0x1a8   : > { %2219 = vst.msk [vmem:[#allocation3 + $0xe0] sm:$0xff] %vm598_vm4, %v2183_v28  ;;  %v2186_v40 = vadd.f32 %v4748_v50, %v2150_v37  ;;  %1828 = vst.msk [vmem:[#allocation3 + $0x118] sm:$0xff] %vm598_vm4, %v1792_v59  ;;  %v1790_v0 = vadd.f32 %v1754_v61, %v1709_v60  ;;  %v2525_v28 = vld [vmem:[#allocation3 + $0x40] sm:$0xff] }
 0x1a9   : > { %v2148_v51 = vld [vmem:[#allocation3 + $0xe8] sm:$0xff]  ;;  %v4757_v1 = vpop.f32.mrf.mxu1  ;;  %v2104_v5 = vpop.f32.mrf.mxu0 }
 0x1aa   : > { %2222 = vst.msk [vmem:[#allocation3 + $0xf8] sm:$0xff] %vm598_vm4, %v2186_v40  ;;  %v2184_v55 = vadd.f32 %v2148_v51, %v2091_v58  ;;  %1826 = vst.msk [vmem:[#allocation3 + $0x108] sm:$0xff] %vm598_vm4, %v1790_v0  ;;  %v2555_v7 = vadd.f32 %v4757_v1, %v2519_v4  ;;  %v2528_v40 = vld [vmem:[#allocation3 + $0x58] sm:$0xff] }
 0x1ab   : > { %v2153_v3 = vld [vmem:[#allocation3 + $0x110] sm:$0xff]  ;;  %v2374_v8 = vpop.f32.mrf.mxu1  ;;  %v4752_v10 = vpop.f32.mrf.mxu0 }
 0x1ac   : > { %2220 = vst.msk [vmem:[#allocation3 + $0xe8] sm:$0xff] %vm598_vm4, %v2184_v55  ;;  %v2189_v6 = vadd.f32 %v4751_v62, %v2153_v3  ;;  %2591 = vst.msk [vmem:[#allocation3 + $0x10] sm:$0xff] %vm598_vm4, %v2555_v7  ;;  %v2553_v11 = vadd.f32 %v2517_v9, %v2374_v8  ;;  %v2526_v55 = vld [vmem:[#allocation3 + $0x48] sm:$0xff] }
 0x1ad   : > { %v2151_v12 = vld [vmem:[#allocation3 + $0x100] sm:$0xff]  ;;  %v4758_v14 = vpop.f32.mrf.mxu1  ;;  %v2107_v17 = vpop.f32.mrf.mxu0 }
 0x1ae   : > { %2225 = vst.msk [vmem:[#allocation3 + $0x110] sm:$0xff] %vm598_vm4, %v2189_v6  ;;  %v2187_v19 = vadd.f32 %v2151_v12, %v2104_v5  ;;  %2589 = vst.msk [vmem:[#allocation3] sm:$0xff] %vm598_vm4, %v2553_v11  ;;  %v2556_v20 = vadd.f32 %v4758_v14, %v2520_v15  ;;  %v2531_v6 = vld [vmem:[#allocation3 + $0x70] sm:$0xff] }
 0x1af   : > { %v2154_v21 = vld [vmem:[#allocation3 + $0x118] sm:$0xff]  ;;  %v2377_v22 = vpop.f32.mrf.mxu1  ;;  %v4795_v23 = vpop.f32.mrf.mxu0 }
 0x1b0   : > { %2223 = vst.msk [vmem:[#allocation3 + $0x100] sm:$0xff] %vm598_vm4, %v2187_v19  ;;  %v2190_v24 = vadd.f32 %v4752_v10, %v2154_v21  ;;  %2592 = vst.msk [vmem:[#allocation3 + $0x18] sm:$0xff] %vm598_vm4, %v2556_v20  ;;  %v2554_v26 = vadd.f32 %v2518_v18, %v2377_v22  ;;  %v2529_v19 = vld [vmem:[#allocation3 + $0x60] sm:$0xff] }
 0x1b1   : > { %v2152_v27 = vld [vmem:[#allocation3 + $0x108] sm:$0xff]  ;;  %v4761_v29 = vpop.f32.mrf.mxu1  ;;  %v2772_v49 = vpop.f32.mrf.mxu0 }
 0x1b2   : > { %2226 = vst.msk [vmem:[#allocation3 + $0x118] sm:$0xff] %vm598_vm4, %v2190_v24  ;;  %v2188_v32 = vadd.f32 %v2152_v27, %v2107_v17  ;;  %2590 = vst.msk [vmem:[#allocation3 + $0x8] sm:$0xff] %vm598_vm4, %v2554_v26  ;;  %v2559_v33 = vadd.f32 %v4761_v29, %v2523_v30  ;;  %v2532_v24 = vld [vmem:[#allocation3 + $0x78] sm:$0xff] }
 0x1b3   : > { %v2917_v48 = vld [vmem:[#allocation3 + $0x10] sm:$0xff]  ;;  %v2390_v34 = vpop.f32.mrf.mxu1  ;;  %v4796_v63 = vpop.f32.mrf.mxu0 }
 0x1b4   : > { %2224 = vst.msk [vmem:[#allocation3 + $0x108] sm:$0xff] %vm598_vm4, %v2188_v32  ;;  %v2953_v36 = vadd.f32 %v4795_v23, %v2917_v48  ;;  %2595 = vst.msk [vmem:[#allocation3 + $0x30] sm:$0xff] %vm598_vm4, %v2559_v33  ;;  %v2557_v31 = vadd.f32 %v2521_v52, %v2390_v34  ;;  %v2530_v32 = vld [vmem:[#allocation3 + $0x68] sm:$0xff] }
 0x1b5   : > { %v2915_v38 = vld [vmem:[#allocation3] sm:$0xff]  ;;  %v4762_v56 = vpop.f32.mrf.mxu1  ;;  %v2775_v41 = vpop.f32.mrf.mxu0 }
 0x1b6   : > { %2989 = vst.msk [vmem:[#allocation3 + $0x10] sm:$0xff] %vm598_vm4, %v2953_v36  ;;  %v2951_v42 = vadd.f32 %v2915_v38, %v2772_v49  ;;  %2593 = vst.msk [vmem:[#allocation3 + $0x20] sm:$0xff] %vm598_vm4, %v2557_v31  ;;  %v2560_v2 = vadd.f32 %v4762_v56, %v2524_v39  ;;  %v2535_v36 = vld [vmem:[#allocation3 + $0x90] sm:$0xff] }
 0x1b7   : > { %v2918_v35 = vld [vmem:[#allocation3 + $0x18] sm:$0xff]  ;;  %v2393_v43 = vpop.f32.mrf.mxu1  ;;  %v4799_v45 = vpop.f32.mrf.mxu0 }
 0x1b8   : > { %2987 = vst.msk [vmem:[#allocation3] sm:$0xff] %vm598_vm4, %v2951_v42  ;;  %v2954_v13 = vadd.f32 %v4796_v63, %v2918_v35  ;;  %2596 = vst.msk [vmem:[#allocation3 + $0x38] sm:$0xff] %vm598_vm4, %v2560_v2  ;;  %v2558_v46 = vadd.f32 %v2522_v44, %v2393_v43  ;;  %v2533_v42 = vld [vmem:[#allocation3 + $0x80] sm:$0xff] }
 0x1b9   : > { %v2916_v47 = vld [vmem:[#allocation3 + $0x8] sm:$0xff]  ;;  %v4765_v50 = vpop.f32.mrf.mxu1  ;;  %v2788_v53 = vpop.f32.mrf.mxu0 }
 0x1ba   : > { %2990 = vst.msk [vmem:[#allocation3 + $0x18] sm:$0xff] %vm598_vm4, %v2954_v13  ;;  %v2952_v25 = vadd.f32 %v2916_v47, %v2775_v41  ;;  %2594 = vst.msk [vmem:[#allocation3 + $0x28] sm:$0xff] %vm598_vm4, %v2558_v46  ;;  %v2563_v54 = vadd.f32 %v4765_v50, %v2527_v16  ;;  %v2536_v13 = vld [vmem:[#allocation3 + $0x98] sm:$0xff] }
 0x1bb   : > { %v2921_v57 = vld [vmem:[#allocation3 + $0x30] sm:$0xff]  ;;  %v2406_v58 = vpop.f32.mrf.mxu1  ;;  %v4800_v59 = vpop.f32.mrf.mxu0 }
 0x1bc   : > { %2988 = vst.msk [vmem:[#allocation3 + $0x8] sm:$0xff] %vm598_vm4, %v2952_v25  ;;  %v2957_v37 = vadd.f32 %v4799_v45, %v2921_v57  ;;  %2599 = vst.msk [vmem:[#allocation3 + $0x50] sm:$0xff] %vm598_vm4, %v2563_v54  ;;  %v2561_v60 = vadd.f32 %v2525_v28, %v2406_v58  ;;  %v2534_v25 = vld [vmem:[#allocation3 + $0x88] sm:$0xff] }
 0x1bd   : > { %v2919_v61 = vld [vmem:[#allocation3 + $0x20] sm:$0xff]  ;;  %v4766_v62 = vpop.f32.mrf.mxu1  ;;  %v2791_v0 = vpop.f32.mrf.mxu0 }
 0x1be   : > { %2993 = vst.msk [vmem:[#allocation3 + $0x30] sm:$0xff] %vm598_vm4, %v2957_v37  ;;  %v2955_v51 = vadd.f32 %v2919_v61, %v2788_v53  ;;  %2597 = vst.msk [vmem:[#allocation3 + $0x40] sm:$0xff] %vm598_vm4, %v2561_v60  ;;  %v2564_v1 = vadd.f32 %v4766_v62, %v2528_v40  ;;  %v2539_v37 = vld [vmem:[#allocation3 + $0xb0] sm:$0xff] }
 0x1bf   : > { %v2922_v4 = vld [vmem:[#allocation3 + $0x38] sm:$0xff]  ;;  %v2409_v5 = vpop.f32.mrf.mxu1  ;;  %v4803_v7 = vpop.f32.mrf.mxu0 }
 0x1c0   : > { %2991 = vst.msk [vmem:[#allocation3 + $0x20] sm:$0xff] %vm598_vm4, %v2955_v51  ;;  %v2958_v3 = vadd.f32 %v4800_v59, %v2922_v4  ;;  %2600 = vst.msk [vmem:[#allocation3 + $0x58] sm:$0xff] %vm598_vm4, %v2564_v1  ;;  %v2562_v8 = vadd.f32 %v2526_v55, %v2409_v5  ;;  %v2537_v51 = vld [vmem:[#allocation3 + $0xa0] sm:$0xff] }
 0x1c1   : > { %v2920_v9 = vld [vmem:[#allocation3 + $0x28] sm:$0xff]  ;;  %v4769_v10 = vpop.f32.mrf.mxu1  ;;  %v2804_v11 = vpop.f32.mrf.mxu0 }
 0x1c2   : > { %2994 = vst.msk [vmem:[#allocation3 + $0x38] sm:$0xff] %vm598_vm4, %v2958_v3  ;;  %v2956_v12 = vadd.f32 %v2920_v9, %v2791_v0  ;;  %2598 = vst.msk [vmem:[#allocation3 + $0x48] sm:$0xff] %vm598_vm4, %v2562_v8  ;;  %v2567_v14 = vadd.f32 %v4769_v10, %v2531_v6  ;;  %v2540_v3 = vld [vmem:[#allocation3 + $0xb8] sm:$0xff] }
 0x1c3   : > { %v2925_v15 = vld [vmem:[#allocation3 + $0x50] sm:$0xff]  ;;  %v2422_v17 = vpop.f32.mrf.mxu1  ;;  %v4804_v20 = vpop.f32.mrf.mxu0 }
 0x1c4   : > { %2992 = vst.msk [vmem:[#allocation3 + $0x28] sm:$0xff] %vm598_vm4, %v2956_v12  ;;  %v2961_v21 = vadd.f32 %v4803_v7, %v2925_v15  ;;  %2603 = vst.msk [vmem:[#allocation3 + $0x70] sm:$0xff] %vm598_vm4, %v2567_v14  ;;  %v2565_v22 = vadd.f32 %v2529_v19, %v2422_v17  ;;  %v2538_v12 = vld [vmem:[#allocation3 + $0xa8] sm:$0xff] }
 0x1c5   : > { %v2923_v18 = vld [vmem:[#allocation3 + $0x40] sm:$0xff]  ;;  %v4770_v23 = vpop.f32.mrf.mxu1  ;;  %v2807_v26 = vpop.f32.mrf.mxu0 }
 0x1c6   : > { %2997 = vst.msk [vmem:[#allocation3 + $0x50] sm:$0xff] %vm598_vm4, %v2961_v21  ;;  %v2959_v27 = vadd.f32 %v2923_v18, %v2804_v11  ;;  %2601 = vst.msk [vmem:[#allocation3 + $0x60] sm:$0xff] %vm598_vm4, %v2565_v22  ;;  %v2568_v29 = vadd.f32 %v4770_v23, %v2532_v24  ;;  %v2543_v21 = vld [vmem:[#allocation3 + $0xd0] sm:$0xff] }
 0x1c7   : > { %v2926_v30 = vld [vmem:[#allocation3 + $0x58] sm:$0xff]  ;;  %v2425_v49 = vpop.f32.mrf.mxu1  ;;  %v4807_v33 = vpop.f32.mrf.mxu0 }
 0x1c8   : > { %2995 = vst.msk [vmem:[#allocation3 + $0x40] sm:$0xff] %vm598_vm4, %v2959_v27  ;;  %v2962_v48 = vadd.f32 %v4804_v20, %v2926_v30  ;;  %2604 = vst.msk [vmem:[#allocation3 + $0x78] sm:$0xff] %vm598_vm4, %v2568_v29  ;;  %v2566_v34 = vadd.f32 %v2530_v32, %v2425_v49  ;;  %v2541_v27 = vld [vmem:[#allocation3 + $0xc0] sm:$0xff] }
 0x1c9   : > { %v2924_v52 = vld [vmem:[#allocation3 + $0x48] sm:$0xff]  ;;  %v4773_v63 = vpop.f32.mrf.mxu1  ;;  %v2820_v31 = vpop.f32.mrf.mxu0 }
 0x1ca   : > { %2998 = vst.msk [vmem:[#allocation3 + $0x58] sm:$0xff] %vm598_vm4, %v2962_v48  ;;  %v2960_v38 = vadd.f32 %v2924_v52, %v2807_v26  ;;  %2602 = vst.msk [vmem:[#allocation3 + $0x68] sm:$0xff] %vm598_vm4, %v2566_v34  ;;  %v2571_v56 = vadd.f32 %v4773_v63, %v2535_v36  ;;  %v2544_v48 = vld [vmem:[#allocation3 + $0xd8] sm:$0xff] }
 0x1cb   : > { %v2929_v39 = vld [vmem:[#allocation3 + $0x70] sm:$0xff]  ;;  %v2438_v41 = vpop.f32.mrf.mxu1  ;;  %v4808_v2 = vpop.f32.mrf.mxu0 }
 0x1cc   : > { %2996 = vst.msk [vmem:[#allocation3 + $0x48] sm:$0xff] %vm598_vm4, %v2960_v38  ;;  %v2965_v35 = vadd.f32 %v4807_v33, %v2929_v39  ;;  %2607 = vst.msk [vmem:[#allocation3 + $0x90] sm:$0xff] %vm598_vm4, %v2571_v56  ;;  %v2569_v43 = vadd.f32 %v2533_v42, %v2438_v41  ;;  %v2542_v38 = vld [vmem:[#allocation3 + $0xc8] sm:$0xff] }
 0x1cd   : > { %v2927_v44 = vld [vmem:[#allocation3 + $0x60] sm:$0xff]  ;;  %v4774_v45 = vpop.f32.mrf.mxu1  ;;  %v2823_v46 = vpop.f32.mrf.mxu0 }
 0x1ce   : > { %3001 = vst.msk [vmem:[#allocation3 + $0x70] sm:$0xff] %vm598_vm4, %v2965_v35  ;;  %v2963_v47 = vadd.f32 %v2927_v44, %v2820_v31  ;;  %2605 = vst.msk [vmem:[#allocation3 + $0x80] sm:$0xff] %vm598_vm4, %v2569_v43  ;;  %v2572_v50 = vadd.f32 %v4774_v45, %v2536_v13  ;;  %v2547_v35 = vld [vmem:[#allocation3 + $0xf0] sm:$0xff] }
 0x1cf   : > { %v2930_v16 = vld [vmem:[#allocation3 + $0x78] sm:$0xff]  ;;  %v2441_v53 = vpop.f32.mrf.mxu1  ;;  %v4811_v54 = vpop.f32.mrf.mxu0 }
 0x1d0   : > { %2999 = vst.msk [vmem:[#allocation3 + $0x60] sm:$0xff] %vm598_vm4, %v2963_v47  ;;  %v2966_v57 = vadd.f32 %v4808_v2, %v2930_v16  ;;  %2608 = vst.msk [vmem:[#allocation3 + $0x98] sm:$0xff] %vm598_vm4, %v2572_v50  ;;  %v2570_v58 = vadd.f32 %v2534_v25, %v2441_v53  ;;  %v2545_v47 = vld [vmem:[#allocation3 + $0xe0] sm:$0xff] }
 0x1d1   : > { %v2928_v28 = vld [vmem:[#allocation3 + $0x68] sm:$0xff]  ;;  %v4777_v59 = vpop.f32.mrf.mxu1  ;;  %v2836_v60 = vpop.f32.mrf.mxu0 }
 0x1d2   : > { %3002 = vst.msk [vmem:[#allocation3 + $0x78] sm:$0xff] %vm598_vm4, %v2966_v57  ;;  %v2964_v61 = vadd.f32 %v2928_v28, %v2823_v46  ;;  %2606 = vst.msk [vmem:[#allocation3 + $0x88] sm:$0xff] %vm598_vm4, %v2570_v58  ;;  %v2575_v62 = vadd.f32 %v4777_v59, %v2539_v37  ;;  %v2548_v57 = vld [vmem:[#allocation3 + $0xf8] sm:$0xff] }
 0x1d3   : > { %v2933_v40 = vld [vmem:[#allocation3 + $0x90] sm:$0xff]  ;;  %v2454_v0 = vpop.f32.mrf.mxu1  ;;  %v4812_v1 = vpop.f32.mrf.mxu0 }
 0x1d4   : > { %3000 = vst.msk [vmem:[#allocation3 + $0x68] sm:$0xff] %vm598_vm4, %v2964_v61  ;;  %v2969_v4 = vadd.f32 %v4811_v54, %v2933_v40  ;;  %2611 = vst.msk [vmem:[#allocation3 + $0xb0] sm:$0xff] %vm598_vm4, %v2575_v62  ;;  %v2573_v5 = vadd.f32 %v2537_v51, %v2454_v0  ;;  %v2546_v61 = vld [vmem:[#allocation3 + $0xe8] sm:$0xff] }
 0x1d5   : > { %v2931_v55 = vld [vmem:[#allocation3 + $0x80] sm:$0xff]  ;;  %v4778_v7 = vpop.f32.mrf.mxu1  ;;  %v2839_v8 = vpop.f32.mrf.mxu0 }
 0x1d6   : > { %3005 = vst.msk [vmem:[#allocation3 + $0x90] sm:$0xff] %vm598_vm4, %v2969_v4  ;;  %v2967_v9 = vadd.f32 %v2931_v55, %v2836_v60  ;;  %2609 = vst.msk [vmem:[#allocation3 + $0xa0] sm:$0xff] %vm598_vm4, %v2573_v5  ;;  %v2576_v10 = vadd.f32 %v4778_v7, %v2540_v3  ;;  %v2551_v4 = vld [vmem:[#allocation3 + $0x110] sm:$0xff] }
 0x1d7   : > { %v2934_v6 = vld [vmem:[#allocation3 + $0x98] sm:$0xff]  ;;  %v2457_v11 = vpop.f32.mrf.mxu1  ;;  %v4815_v14 = vpop.f32.mrf.mxu0 }
 0x1d8   : > { %3003 = vst.msk [vmem:[#allocation3 + $0x80] sm:$0xff] %vm598_vm4, %v2967_v9  ;;  %v2970_v15 = vadd.f32 %v4812_v1, %v2934_v6  ;;  %2612 = vst.msk [vmem:[#allocation3 + $0xb8] sm:$0xff] %vm598_vm4, %v2576_v10  ;;  %v2574_v17 = vadd.f32 %v2538_v12, %v2457_v11  ;;  %v2549_v9 = vld [vmem:[#allocation3 + $0x100] sm:$0xff] }
 0x1d9   : > { %v2932_v19 = vld [vmem:[#allocation3 + $0x88] sm:$0xff]  ;;  %v4781_v20 = vpop.f32.mrf.mxu1  ;;  %v2852_v22 = vpop.f32.mrf.mxu0 }
 0x1da   : > { %3006 = vst.msk [vmem:[#allocation3 + $0x98] sm:$0xff] %vm598_vm4, %v2970_v15  ;;  %v2968_v18 = vadd.f32 %v2932_v19, %v2839_v8  ;;  %2610 = vst.msk [vmem:[#allocation3 + $0xa8] sm:$0xff] %vm598_vm4, %v2574_v17  ;;  %v2579_v23 = vadd.f32 %v4781_v20, %v2543_v21  ;;  %v2552_v15 = vld [vmem:[#allocation3 + $0x118] sm:$0xff] }
 0x1db   : > { %v2937_v24 = vld [vmem:[#allocation3 + $0xb0] sm:$0xff]  ;;  %v2470_v26 = vpop.f32.mrf.mxu1  ;;  %v4816_v29 = vpop.f32.mrf.mxu0 }
 0x1dc   : > { %3004 = vst.msk [vmem:[#allocation3 + $0x88] sm:$0xff] %vm598_vm4, %v2968_v18  ;;  %v2973_v30 = vadd.f32 %v4815_v14, %v2937_v24  ;;  %2615 = vst.msk [vmem:[#allocation3 + $0xd0] sm:$0xff] %vm598_vm4, %v2579_v23  ;;  %v2577_v49 = vadd.f32 %v2541_v27, %v2470_v26  ;;  %v2550_v18 = vld [vmem:[#allocation3 + $0x108] sm:$0xff] }
 0x1dd   : > { %v2935_v32 = vld [vmem:[#allocation3 + $0xa0] sm:$0xff]  ;;  %v4782_v33 = vpop.f32.mrf.mxu1  ;;  %v2855_v34 = vpop.f32.mrf.mxu0 }
 0x1de   : > { %3009 = vst.msk [vmem:[#allocation3 + $0xb0] sm:$0xff] %vm598_vm4, %v2973_v30  ;;  %v2971_v52 = vadd.f32 %v2935_v32, %v2852_v22  ;;  %2613 = vst.msk [vmem:[#allocation3 + $0xc0] sm:$0xff] %vm598_vm4, %v2577_v49  ;;  %v2580_v63 = vadd.f32 %v4782_v33, %v2544_v48  ;;  %v3315_v30 = vld [vmem:[#allocation3 + $0x10] sm:$0xff] }
 0x1df   : > { %v2938_v36 = vld [vmem:[#allocation3 + $0xb8] sm:$0xff]  ;;  %v2473_v31 = vpop.f32.mrf.mxu1  ;;  %v4819_v56 = vpop.f32.mrf.mxu0 }
 0x1e0   : > { %3007 = vst.msk [vmem:[#allocation3 + $0xa0] sm:$0xff] %vm598_vm4, %v2971_v52  ;;  %v2974_v39 = vadd.f32 %v4816_v29, %v2938_v36  ;;  %2616 = vst.msk [vmem:[#allocation3 + $0xd8] sm:$0xff] %vm598_vm4, %v2580_v63  ;;  %v2578_v41 = vadd.f32 %v2542_v38, %v2473_v31  ;;  %v3313_v52 = vld [vmem:[#allocation3] sm:$0xff] }
 0x1e1   : > { %v2936_v42 = vld [vmem:[#allocation3 + $0xa8] sm:$0xff]  ;;  %v4785_v2 = vpop.f32.mrf.mxu1  ;;  %v2868_v43 = vpop.f32.mrf.mxu0 }
 0x1e2   : > { %3010 = vst.msk [vmem:[#allocation3 + $0xb8] sm:$0xff] %vm598_vm4, %v2974_v39  ;;  %v2972_v44 = vadd.f32 %v2936_v42, %v2855_v34  ;;  %2614 = vst.msk [vmem:[#allocation3 + $0xc8] sm:$0xff] %vm598_vm4, %v2578_v41  ;;  %v2583_v45 = vadd.f32 %v4785_v2, %v2547_v35  ;;  %v3316_v39 = vld [vmem:[#allocation3 + $0x18] sm:$0xff] }
 0x1e3   : > { %v2941_v13 = vld [vmem:[#allocation3 + $0xd0] sm:$0xff]  ;;  %v2486_v46 = vpop.f32.mrf.mxu1  ;;  %v4820_v50 = vpop.f32.mrf.mxu0 }
 0x1e4   : > { %3008 = vst.msk [vmem:[#allocation3 + $0xa8] sm:$0xff] %vm598_vm4, %v2972_v44  ;;  %v2977_v16 = vadd.f32 %v4819_v56, %v2941_v13  ;;  %2619 = vst.msk [vmem:[#allocation3 + $0xf0] sm:$0xff] %vm598_vm4, %v2583_v45  ;;  %v2581_v53 = vadd.f32 %v2545_v47, %v2486_v46  ;;  %v3314_v44 = vld [vmem:[#allocation3 + $0x8] sm:$0xff] }
 0x1e5   : > { %v2939_v25 = vld [vmem:[#allocation3 + $0xc0] sm:$0xff]  ;;  %v4786_v54 = vpop.f32.mrf.mxu1  ;;  %v2871_v58 = vpop.f32.mrf.mxu0 }
 0x1e6   : > { %3013 = vst.msk [vmem:[#allocation3 + $0xd0] sm:$0xff] %vm598_vm4, %v2977_v16  ;;  %v2975_v28 = vadd.f32 %v2939_v25, %v2868_v43  ;;  %2617 = vst.msk [vmem:[#allocation3 + $0xe0] sm:$0xff] %vm598_vm4, %v2581_v53  ;;  %v2584_v59 = vadd.f32 %v4786_v54, %v2548_v57  ;;  %v3319_v16 = vld [vmem:[#allocation3 + $0x30] sm:$0xff] }
 0x1e7   : > { %v2942_v37 = vld [vmem:[#allocation3 + $0xd8] sm:$0xff]  ;;  %v2489_v60 = vpop.f32.mrf.mxu1  ;;  %v4823_v62 = vpop.f32.mrf.mxu0 }
 0x1e8   : > { %3011 = vst.msk [vmem:[#allocation3 + $0xc0] sm:$0xff] %vm598_vm4, %v2975_v28  ;;  %v2978_v40 = vadd.f32 %v4820_v50, %v2942_v37  ;;  %2620 = vst.msk [vmem:[#allocation3 + $0xf8] sm:$0xff] %vm598_vm4, %v2584_v59  ;;  %v2582_v0 = vadd.f32 %v2546_v61, %v2489_v60  ;;  %v3317_v28 = vld [vmem:[#allocation3 + $0x20] sm:$0xff] }
 0x1e9   : > { %v2940_v51 = vld [vmem:[#allocation3 + $0xc8] sm:$0xff]  ;;  %v4789_v1 = vpop.f32.mrf.mxu1  ;;  %v2884_v5 = vpop.f32.mrf.mxu0 }
 0x1ea   : > { %3014 = vst.msk [vmem:[#allocation3 + $0xd8] sm:$0xff] %vm598_vm4, %v2978_v40  ;;  %v2976_v55 = vadd.f32 %v2940_v51, %v2871_v58  ;;  %2618 = vst.msk [vmem:[#allocation3 + $0xe8] sm:$0xff] %vm598_vm4, %v2582_v0  ;;  %v2587_v7 = vadd.f32 %v4789_v1, %v2551_v4  ;;  %v3320_v40 = vld [vmem:[#allocation3 + $0x38] sm:$0xff] }
 0x1eb   : > { %v2945_v3 = vld [vmem:[#allocation3 + $0xf0] sm:$0xff]  ;;  %v2502_v8 = vpop.f32.mrf.mxu1  ;;  %v4824_v10 = vpop.f32.mrf.mxu0 }
 0x1ec   : > { %3012 = vst.msk [vmem:[#allocation3 + $0xc8] sm:$0xff] %vm598_vm4, %v2976_v55  ;;  %v2981_v6 = vadd.f32 %v4823_v62, %v2945_v3  ;;  %2623 = vst.msk [vmem:[#allocation3 + $0x110] sm:$0xff] %vm598_vm4, %v2587_v7  ;;  %v2585_v11 = vadd.f32 %v2549_v9, %v2502_v8  ;;  %v3318_v55 = vld [vmem:[#allocation3 + $0x28] sm:$0xff] }
 0x1ed   : > { %v2943_v12 = vld [vmem:[#allocation3 + $0xe0] sm:$0xff]  ;;  %v4790_v14 = vpop.f32.mrf.mxu1  ;;  %v2887_v17 = vpop.f32.mrf.mxu0 }
 0x1ee   : > { %3017 = vst.msk [vmem:[#allocation3 + $0xf0] sm:$0xff] %vm598_vm4, %v2981_v6  ;;  %v2979_v19 = vadd.f32 %v2943_v12, %v2884_v5  ;;  %2621 = vst.msk [vmem:[#allocation3 + $0x100] sm:$0xff] %vm598_vm4, %v2585_v11  ;;  %v2588_v20 = vadd.f32 %v4790_v14, %v2552_v15  ;;  %v3323_v6 = vld [vmem:[#allocation3 + $0x50] sm:$0xff] }
 0x1ef   : > { %v2946_v21 = vld [vmem:[#allocation3 + $0xf8] sm:$0xff]  ;;  %v2505_v22 = vpop.f32.mrf.mxu1  ;;  %v4827_v23 = vpop.f32.mrf.mxu0 }
 0x1f0   : > { %3015 = vst.msk [vmem:[#allocation3 + $0xe0] sm:$0xff] %vm598_vm4, %v2979_v19  ;;  %v2982_v24 = vadd.f32 %v4824_v10, %v2946_v21  ;;  %2624 = vst.msk [vmem:[#allocation3 + $0x118] sm:$0xff] %vm598_vm4, %v2588_v20  ;;  %v2586_v26 = vadd.f32 %v2550_v18, %v2505_v22  ;;  %v3321_v19 = vld [vmem:[#allocation3 + $0x40] sm:$0xff] }
 0x1f1   : > { %v2944_v27 = vld [vmem:[#allocation3 + $0xe8] sm:$0xff]  ;;  %v4833_v29 = vpop.f32.mrf.mxu1  ;;  %v2900_v49 = vpop.f32.mrf.mxu0 }
 0x1f2   : > { %3018 = vst.msk [vmem:[#allocation3 + $0xf8] sm:$0xff] %vm598_vm4, %v2982_v24  ;;  %v2980_v32 = vadd.f32 %v2944_v27, %v2887_v17  ;;  %2622 = vst.msk [vmem:[#allocation3 + $0x108] sm:$0xff] %vm598_vm4, %v2586_v26  ;;  %v3351_v33 = vadd.f32 %v4833_v29, %v3315_v30  ;;  %v3324_v24 = vld [vmem:[#allocation3 + $0x58] sm:$0xff] }
 0x1f3   : > { %v2949_v48 = vld [vmem:[#allocation3 + $0x110] sm:$0xff]  ;;  %v3170_v34 = vpop.f32.mrf.mxu1  ;;  %v4828_v63 = vpop.f32.mrf.mxu0 }
 0x1f4   : > { %3016 = vst.msk [vmem:[#allocation3 + $0xe8] sm:$0xff] %vm598_vm4, %v2980_v32  ;;  %v2985_v36 = vadd.f32 %v4827_v23, %v2949_v48  ;;  %3387 = vst.msk [vmem:[#allocation3 + $0x10] sm:$0xff] %vm598_vm4, %v3351_v33  ;;  %v3349_v31 = vadd.f32 %v3313_v52, %v3170_v34  ;;  %v3322_v32 = vld [vmem:[#allocation3 + $0x48] sm:$0xff] }
 0x1f5   : > { %v2947_v38 = vld [vmem:[#allocation3 + $0x100] sm:$0xff]  ;;  %v4834_v56 = vpop.f32.mrf.mxu1  ;;  %v2903_v41 = vpop.f32.mrf.mxu0 }
 0x1f6   : > { %3021 = vst.msk [vmem:[#allocation3 + $0x110] sm:$0xff] %vm598_vm4, %v2985_v36  ;;  %v2983_v42 = vadd.f32 %v2947_v38, %v2900_v49  ;;  %3385 = vst.msk [vmem:[#allocation3] sm:$0xff] %vm598_vm4, %v3349_v31  ;;  %v3352_v2 = vadd.f32 %v4834_v56, %v3316_v39  ;;  %v3327_v31 = vld [vmem:[#allocation3 + $0x70] sm:$0xff] }
 0x1f7   : > { %v2950_v35 = vld [vmem:[#allocation3 + $0x118] sm:$0xff]  ;;  %v3173_v43 = vpop.f32.mrf.mxu1  ;;  %v4871_v45 = vpop.f32.mrf.mxu0 }
 0x1f8   : > { %3019 = vst.msk [vmem:[#allocation3 + $0x100] sm:$0xff] %vm598_vm4, %v2983_v42  ;;  %v2986_v13 = vadd.f32 %v4828_v63, %v2950_v35  ;;  %3388 = vst.msk [vmem:[#allocation3 + $0x18] sm:$0xff] %vm598_vm4, %v3352_v2  ;;  %v3350_v46 = vadd.f32 %v3314_v44, %v3173_v43 }
 0x1f9   : > { %v2948_v47 = vld [vmem:[#allocation3 + $0x108] sm:$0xff]  ;;  %v4837_v50 = vpop.f32.mrf.mxu1  ;;  %v3568_v53 = vpop.f32.mrf.mxu0 }
 0x1fa   : > { %3022 = vst.msk [vmem:[#allocation3 + $0x118] sm:$0xff] %vm598_vm4, %v2986_v13  ;;  %v2984_v25 = vadd.f32 %v2948_v47, %v2903_v41  ;;  %3386 = vst.msk [vmem:[#allocation3 + $0x8] sm:$0xff] %vm598_vm4, %v3350_v46  ;;  %v3355_v54 = vadd.f32 %v4837_v50, %v3319_v16  ;;  %v3325_v41 = vld [vmem:[#allocation3 + $0x60] sm:$0xff]  ;;  %v3328_v50 = vld [vmem:[#allocation3 + $0x78] sm:$0xff] }
 0x1fb   : > { %v3713_v57 = vld [vmem:[#allocation3 + $0x10] sm:$0xff]  ;;  %v3186_v58 = vpop.f32.mrf.mxu1  ;;  %v4872_v59 = vpop.f32.mrf.mxu0 }
 0x1fc   : > { %3020 = vst.msk [vmem:[#allocation3 + $0x108] sm:$0xff] %vm598_vm4, %v2984_v25  ;;  %v3749_v37 = vadd.f32 %v4871_v45, %v3713_v57  ;;  %3391 = vst.msk [vmem:[#allocation3 + $0x30] sm:$0xff] %vm598_vm4, %v3355_v54  ;;  %v3353_v60 = vadd.f32 %v3317_v28, %v3186_v58  ;;  %v3326_v28 = vld [vmem:[#allocation3 + $0x68] sm:$0xff] }
 0x1fd   : > { %v3711_v61 = vld [vmem:[#allocation3] sm:$0xff]  ;;  %v4838_v62 = vpop.f32.mrf.mxu1  ;;  %v3571_v0 = vpop.f32.mrf.mxu0 }
 0x1fe   : > { %3785 = vst.msk [vmem:[#allocation3 + $0x10] sm:$0xff] %vm598_vm4, %v3749_v37  ;;  %v3747_v51 = vadd.f32 %v3711_v61, %v3568_v53  ;;  %3389 = vst.msk [vmem:[#allocation3 + $0x20] sm:$0xff] %vm598_vm4, %v3353_v60  ;;  %v3356_v1 = vadd.f32 %v4838_v62, %v3320_v40 }
 0x1ff   : > { %v3714_v4 = vld [vmem:[#allocation3 + $0x18] sm:$0xff]  ;;  %v3189_v5 = vpop.f32.mrf.mxu1  ;;  %v4875_v7 = vpop.f32.mrf.mxu0 }
 0x200   : > { %3783 = vst.msk [vmem:[#allocation3] sm:$0xff] %vm598_vm4, %v3747_v51  ;;  %v3750_v3 = vadd.f32 %v4872_v59, %v3714_v4  ;;  %3392 = vst.msk [vmem:[#allocation3 + $0x38] sm:$0xff] %vm598_vm4, %v3356_v1  ;;  %v3354_v8 = vadd.f32 %v3318_v55, %v3189_v5 }
 0x201   : > { %v3712_v9 = vld [vmem:[#allocation3 + $0x8] sm:$0xff]  ;;  %v4841_v10 = vpop.f32.mrf.mxu1  ;;  %v3584_v11 = vpop.f32.mrf.mxu0 }
 0x202   : > { %3786 = vst.msk [vmem:[#allocation3 + $0x18] sm:$0xff] %vm598_vm4, %v3750_v3  ;;  %v3748_v12 = vadd.f32 %v3712_v9, %v3571_v0  ;;  %3390 = vst.msk [vmem:[#allocation3 + $0x28] sm:$0xff] %vm598_vm4, %v3354_v8  ;;  %v3359_v14 = vadd.f32 %v4841_v10, %v3323_v6  ;;  %v3331_v0 = vld [vmem:[#allocation3 + $0x90] sm:$0xff]  ;;  %v3329_v9 = vld [vmem:[#allocation3 + $0x80] sm:$0xff] }
 0x203   : > { %v3717_v15 = vld [vmem:[#allocation3 + $0x30] sm:$0xff]  ;;  %v3202_v17 = vpop.f32.mrf.mxu1  ;;  %v4876_v20 = vpop.f32.mrf.mxu0 }
 0x204   : > { %3784 = vst.msk [vmem:[#allocation3 + $0x8] sm:$0xff] %vm598_vm4, %v3748_v12  ;;  %v3753_v21 = vadd.f32 %v4875_v7, %v3717_v15  ;;  %3395 = vst.msk [vmem:[#allocation3 + $0x50] sm:$0xff] %vm598_vm4, %v3359_v14  ;;  %v3357_v22 = vadd.f32 %v3321_v19, %v3202_v17  ;;  %v3332_v14 = vld [vmem:[#allocation3 + $0x98] sm:$0xff] }
 0x205   : > { %v3715_v18 = vld [vmem:[#allocation3 + $0x20] sm:$0xff]  ;;  %v4842_v23 = vpop.f32.mrf.mxu1  ;;  %v3587_v26 = vpop.f32.mrf.mxu0 }
 0x206   : > { %3789 = vst.msk [vmem:[#allocation3 + $0x30] sm:$0xff] %vm598_vm4, %v3753_v21  ;;  %v3751_v27 = vadd.f32 %v3715_v18, %v3584_v11  ;;  %3393 = vst.msk [vmem:[#allocation3 + $0x40] sm:$0xff] %vm598_vm4, %v3357_v22  ;;  %v3360_v29 = vadd.f32 %v4842_v23, %v3324_v24  ;;  %v3330_v18 = vld [vmem:[#allocation3 + $0x88] sm:$0xff] }
 0x207   : > { %v3718_v30 = vld [vmem:[#allocation3 + $0x38] sm:$0xff]  ;;  %v3205_v49 = vpop.f32.mrf.mxu1  ;;  %v4879_v33 = vpop.f32.mrf.mxu0 }
 0x208   : > { %3787 = vst.msk [vmem:[#allocation3 + $0x20] sm:$0xff] %vm598_vm4, %v3751_v27  ;;  %v3754_v48 = vadd.f32 %v4876_v20, %v3718_v30  ;;  %3396 = vst.msk [vmem:[#allocation3 + $0x58] sm:$0xff] %vm598_vm4, %v3360_v29  ;;  %v3358_v34 = vadd.f32 %v3322_v32, %v3205_v49 }
 0x209   : > { %v3823_v52 = vld [vmem:[#allocation3 + $0x13] sm:$0xff]  ;;  %v3716_v63 = vld [vmem:[#allocation3 + $0x28] sm:$0xff]  ;;  %v4845_v36 = vpop.f32.mrf.mxu1  ;;  %v3600_v38 = vpop.f32.mrf.mxu0 }
 0x20a   : > { %4358 = vst.msk [vmem:[%s4976_s24 + $0x10] sm:$0xff] %vm598_vm4, %v3823_v52  ;;  %3790 = vst.msk [vmem:[#allocation3 + $0x38] sm:$0xff] %vm598_vm4, %v3754_v48  ;;  %v3752_v56 = vadd.f32 %v3716_v63, %v3587_v26  ;;  %v3363_v39 = vadd.f32 %v4845_v36, %v3327_v31 }
 0x20b   : > { %3394 = vst.msk [vmem:[#allocation3 + $0x48] sm:$0xff] %vm598_vm4, %v3358_v34  ;;  %v3819_v42 = vld [vmem:[#allocation3 + $0x1] sm:$0xff]  ;;  %v3820_v2 = vld [vmem:[#allocation3 + $0x9] sm:$0xff]  ;;  %v3218_v43 = vpop.f32.mrf.mxu1  ;;  %v4880_v44 = vpop.f32.mrf.mxu0 }
 0x20c   : > { %v3721_v35 = vld [vmem:[#allocation3 + $0x50] sm:$0xff]  ;;  %3821 = vst.msk [vmem:[%s4976_s24] sm:$0xff] %vm598_vm4, %v3819_v42  ;;  %3822 = vst.msk [vmem:[%s4976_s24 + $0x8] sm:$0xff] %vm598_vm4, %v3820_v2  ;;  %v3361_v13 = vadd.f32 %v3325_v41, %v3218_v43  ;;  %v3336_v41 = vld [vmem:[#allocation3 + $0xb8] sm:$0xff] }
 0x20d   : > { %3788 = vst.msk [vmem:[#allocation3 + $0x28] sm:$0xff] %vm598_vm4, %v3752_v56  ;;  %v3757_v45 = vadd.f32 %v4879_v33, %v3721_v35  ;;  %3399 = vst.msk [vmem:[#allocation3 + $0x70] sm:$0xff] %vm598_vm4, %v3363_v39  ;;  %v3719_v46 = vld [vmem:[#allocation3 + $0x40] sm:$0xff]  ;;  %v4846_v47 = vpop.f32.mrf.mxu1  ;;  %v3603_v16 = vpop.f32.mrf.mxu0  ;;  %v3335_v33 = vld [vmem:[#allocation3 + $0xb0] sm:$0xff] }
 0x20e   : > { %v3755_v53 = vadd.f32 %v3719_v46, %v3600_v38  ;;  %3397 = vst.msk [vmem:[#allocation3 + $0x60] sm:$0xff] %vm598_vm4, %v3361_v13  ;;  %v3364_v25 = vadd.f32 %v4846_v47, %v3328_v50  ;;  %v3333_v38 = vld [vmem:[#allocation3 + $0xa0] sm:$0xff]  ;;  %v3334_v50 = vld [vmem:[#allocation3 + $0xa8] sm:$0xff] }
 0x20f   : > { %3793 = vst.msk [vmem:[#allocation3 + $0x50] sm:$0xff] %vm598_vm4, %v3757_v45  ;;  %v3824_v54 = vld [vmem:[#allocation3 + $0x1b] sm:$0xff]  ;;  %v3221_v58 = vpop.f32.mrf.mxu1  ;;  %v4883_v59 = vpop.f32.mrf.mxu0 }
 0x210   : > { %v3722_v57 = vld [vmem:[#allocation3 + $0x58] sm:$0xff]  ;;  %4359 = vst.msk [vmem:[%s4976_s24 + $0x18] sm:$0xff] %vm598_vm4, %v3824_v54  ;;  %3791 = vst.msk [vmem:[#allocation3 + $0x40] sm:$0xff] %vm598_vm4, %v3755_v53  ;;  %v3362_v60 = vadd.f32 %v3326_v28, %v3221_v58 }
 0x211   : > { %v3758_v37 = vadd.f32 %v4880_v44, %v3722_v57  ;;  %3400 = vst.msk [vmem:[#allocation3 + $0x78] sm:$0xff] %vm598_vm4, %v3364_v25  ;;  %v3833_v61 = vld [vmem:[#allocation3 + $0x37] sm:$0xff]  ;;  %v4849_v40 = vpop.f32.mrf.mxu1  ;;  %v3616_v51 = vpop.f32.mrf.mxu0 }
 0x212   : > { %v3720_v62 = vld [vmem:[#allocation3 + $0x48] sm:$0xff]  ;;  %4362 = vst.msk [vmem:[%s4976_s24 + $0x30] sm:$0xff] %vm598_vm4, %v3833_v61  ;;  %3398 = vst.msk [vmem:[#allocation3 + $0x68] sm:$0xff] %vm598_vm4, %v3362_v60  ;;  %v3367_v4 = vadd.f32 %v4849_v40, %v3331_v0  ;;  %v3337_v40 = vld [vmem:[#allocation3 + $0xc0] sm:$0xff] }
 0x213   : > { %3794 = vst.msk [vmem:[#allocation3 + $0x58] sm:$0xff] %vm598_vm4, %v3758_v37  ;;  %v3756_v1 = vadd.f32 %v3720_v62, %v3603_v16  ;;  %v3234_v55 = vpop.f32.mrf.mxu1  ;;  %v4884_v7 = vpop.f32.mrf.mxu0  ;;  %v3898_v58 = vld [vmem:[%s4976_s24] sm:$0xff] }
 0x214   : > { %v3828_v5 = vld [vmem:[#allocation3 + $0x25] sm:$0xff]  ;;  %v3829_v3 = vld [vmem:[#allocation3 + $0x2d] sm:$0xff]  ;;  %3403 = vst.msk [vmem:[#allocation3 + $0x90] sm:$0xff] %vm598_vm4, %v3367_v4  ;;  %v3365_v11 = vadd.f32 %v3329_v9, %v3234_v55 }
 0x215   : > { %4360 = vst.msk [vmem:[%s4976_s24 + $0x20] sm:$0xff] %vm598_vm4, %v3828_v5  ;;  %3792 = vst.msk [vmem:[#allocation3 + $0x48] sm:$0xff] %vm598_vm4, %v3756_v1  ;;  %v3725_v8 = vld [vmem:[#allocation3 + $0x70] sm:$0xff]  ;;  %v3723_v6 = vld [vmem:[#allocation3 + $0x60] sm:$0xff]  ;;  %v4850_v12 = vpop.f32.mrf.mxu1  ;;  %v3619_v15 = vpop.f32.mrf.mxu0  ;;  %v4006_v5 = vmul.f32 %v3898_v58, %v3898_v58 }
 0x216   : > { %4361 = vst.msk [vmem:[%s4976_s24 + $0x28] sm:$0xff] %vm598_vm4, %v3829_v3  ;;  %v3761_v10 = vadd.f32 %v4883_v59, %v3725_v8  ;;  %v3759_v17 = vadd.f32 %v3723_v6, %v3616_v51  ;;  %v3368_v19 = vadd.f32 %v4850_v12, %v3332_v14  ;;  %3401 = vst.msk [vmem:[#allocation3 + $0x80] sm:$0xff] %vm598_vm4, %v3365_v11  ;;  %v3339_v59 = vld [vmem:[#allocation3 + $0xd0] sm:$0xff]  ;;  %v3900_v51 = vld [vmem:[%s4976_s24 + $0x10] sm:$0xff] }
 0x217   : > { %v3834_v20 = vld [vmem:[#allocation3 + $0x3f] sm:$0xff]  ;;  %v3237_v22 = vpop.f32.mrf.mxu1  ;;  %v4887_v23 = vpop.f32.mrf.mxu0  ;;  %v3901_v9 = vld [vmem:[%s4976_s24 + $0x18] sm:$0xff]  ;;  %v4008_v11 = vmul.f32 %v3900_v51, %v3900_v51 }
 0x218   : > { %3797 = vst.msk [vmem:[#allocation3 + $0x70] sm:$0xff] %vm598_vm4, %v3761_v10  ;;  %v3726_v21 = vld [vmem:[#allocation3 + $0x78] sm:$0xff]  ;;  %4363 = vst.msk [vmem:[%s4976_s24 + $0x38] sm:$0xff] %vm598_vm4, %v3834_v20  ;;  %v3366_v26 = vadd.f32 %v3330_v18, %v3237_v22 }
 0x219   : > { %3795 = vst.msk [vmem:[#allocation3 + $0x60] sm:$0xff] %vm598_vm4, %v3759_v17  ;;  %v3762_v24 = vadd.f32 %v4884_v7, %v3726_v21  ;;  %3404 = vst.msk [vmem:[#allocation3 + $0x98] sm:$0xff] %vm598_vm4, %v3368_v19  ;;  %v3724_v29 = vld [vmem:[#allocation3 + $0x68] sm:$0xff]  ;;  %v4853_v30 = vpop.f32.mrf.mxu1  ;;  %v3632_v49 = vpop.f32.mrf.mxu0  ;;  %v3340_v3 = vld [vmem:[#allocation3 + $0xd8] sm:$0xff] }
 0x21a   : > { %v3839_v27 = vld [vmem:[#allocation3 + $0x51] sm:$0xff]  ;;  %v3760_v32 = vadd.f32 %v3724_v29, %v3619_v15  ;;  %3402 = vst.msk [vmem:[#allocation3 + $0x88] sm:$0xff] %vm598_vm4, %v3366_v26  ;;  %v3371_v52 = vadd.f32 %v4853_v30, %v3335_v33  ;;  %v3338_v19 = vld [vmem:[#allocation3 + $0xc8] sm:$0xff]  ;;  %v3899_v21 = vld [vmem:[%s4976_s24 + $0x8] sm:$0xff]  ;;  %v4038_v26 = vsel %vm598_vm4, %v4006_v5, 0.0  ;;  %v3932_v33 = vsel %vm598_vm4, %v3900_v51, 0.0 }
 0x21b   : > { %4365 = vst.msk [vmem:[%s4976_s24 + $0x48] sm:$0xff] %vm598_vm4, %v3839_v27  ;;  %3798 = vst.msk [vmem:[#allocation3 + $0x78] sm:$0xff] %vm598_vm4, %v3762_v24  ;;  %v3729_v34 = vld [vmem:[#allocation3 + $0x90] sm:$0xff]  ;;  %v3250_v63 = vpop.f32.mrf.mxu1  ;;  %v4888_v36 = vpop.f32.mrf.mxu0  ;;  %v3931_v24 = vsel %vm598_vm4, %v3898_v58, 0.0  ;;  %v3963_v27 = vsel %vm598_vm4, %v3901_v9, 0.0  ;;  %v3344_v58 = vld [vmem:[#allocation3 + $0xf8] sm:$0xff] }
 0x21c   : > { %v3838_v48 = vld [vmem:[#allocation3 + $0x49] sm:$0xff]  ;;  %3796 = vst.msk [vmem:[#allocation3 + $0x68] sm:$0xff] %vm598_vm4, %v3760_v32  ;;  %v3765_v31 = vadd.f32 %v4887_v23, %v3729_v34  ;;  %3407 = vst.msk [vmem:[#allocation3 + $0xb0] sm:$0xff] %vm598_vm4, %v3371_v52  ;;  %v3369_v56 = vadd.f32 %v3333_v38, %v3250_v63  ;;  %v3902_v12 = vld [vmem:[%s4976_s24 + $0x20] sm:$0xff]  ;;  %v4009_v38 = vmul.f32 %v3901_v9, %v3901_v9 }
 0x21d   : > { %4364 = vst.msk [vmem:[%s4976_s24 + $0x40] sm:$0xff] %vm598_vm4, %v3838_v48  ;;  %v4854_v39 = vpop.f32.mrf.mxu1  ;;  %v3635_v42 = vpop.f32.mrf.mxu0  ;;  %v3727_v2 = vld [vmem:[#allocation3 + $0x80] sm:$0xff]  ;;  %v4010_v34 = vmul.f32 %v3902_v12, %v3902_v12  ;;  %v3342_v5 = vld [vmem:[#allocation3 + $0xe8] sm:$0xff] }
 0x21e   : > { %3801 = vst.msk [vmem:[#allocation3 + $0x90] sm:$0xff] %vm598_vm4, %v3765_v31  ;;  %v3372_v35 = vadd.f32 %v4854_v39, %v3336_v41  ;;  %v3763_v44 = vadd.f32 %v3727_v2, %v3632_v49  ;;  %3405 = vst.msk [vmem:[#allocation3 + $0xa0] sm:$0xff] %vm598_vm4, %v3369_v56  ;;  %v3343_v49 = vld [vmem:[#allocation3 + $0xf0] sm:$0xff]  ;;  %v3903_v48 = vld [vmem:[%s4976_s24 + $0x28] sm:$0xff]  ;;  %v3962_v31 = vsel %vm598_vm4, %v3899_v21, 0.0  ;;  %v3933_v2 = vadd.f32 %v3932_v33, %v3931_v24 }
 0x21f   : > { %v3253_v13 = vpop.f32.mrf.mxu1  ;;  %v4891_v46 = vpop.f32.mrf.mxu0 }
 0x220   : > { %v3843_v43 = vld [vmem:[#allocation3 + $0x5b] sm:$0xff]  ;;  %3408 = vst.msk [vmem:[#allocation3 + $0xb8] sm:$0xff] %vm598_vm4, %v3372_v35  ;;  %3799 = vst.msk [vmem:[#allocation3 + $0x80] sm:$0xff] %vm598_vm4, %v3763_v44  ;;  %v3370_v25 = vadd.f32 %v3334_v50, %v3253_v13  ;;  %v4007_v35 = vmul.f32 %v3899_v21, %v3899_v21  ;;  %v3964_v44 = vadd.f32 %v3963_v27, %v3962_v31  ;;  %v3905_v13 = vld [vmem:[%s4976_s24 + $0x38] sm:$0xff]  ;;  %v3965_v50 = vsel %vm598_vm4, %v3903_v48, 0.0 }
 0x221   : > { %v3730_v45 = vld [vmem:[#allocation3 + $0x98] sm:$0xff]  ;;  %4366 = vst.msk [vmem:[%s4976_s24 + $0x50] sm:$0xff] %vm598_vm4, %v3843_v43  ;;  %v3728_v53 = vld [vmem:[#allocation3 + $0x88] sm:$0xff]  ;;  %v4857_v54 = vpop.f32.mrf.mxu1  ;;  %v3648_v57 = vpop.f32.mrf.mxu0  ;;  %v4013_v51 = vmul.f32 %v3905_v13, %v3905_v13  ;;  %v3347_v27 = vld [vmem:[#allocation3 + $0x110] sm:$0xff] }
 0x222   : > { %v3766_v47 = vadd.f32 %v4888_v36, %v3730_v45  ;;  %v3849_v16 = vld [vmem:[#allocation3 + $0x75] sm:$0xff]  ;;  %v3764_v28 = vadd.f32 %v3728_v53, %v3635_v42  ;;  %3406 = vst.msk [vmem:[#allocation3 + $0xa8] sm:$0xff] %vm598_vm4, %v3370_v25  ;;  %v3375_v61 = vadd.f32 %v4857_v54, %v3339_v59  ;;  %v4039_v36 = vsel %vm598_vm4, %v4008_v11, 0.0  ;;  %v3904_v45 = vld [vmem:[%s4976_s24 + $0x30] sm:$0xff]  ;;  %v3341_v54 = vld [vmem:[#allocation3 + $0xe0] sm:$0xff] }
 0x223   : > { %4369 = vst.msk [vmem:[%s4976_s24 + $0x68] sm:$0xff] %vm598_vm4, %v3849_v16  ;;  %v3844_v37 = vld [vmem:[#allocation3 + $0x63] sm:$0xff]  ;;  %v3848_v60 = vld [vmem:[#allocation3 + $0x6d] sm:$0xff]  ;;  %v3266_v62 = vpop.f32.mrf.mxu1  ;;  %v4892_v0 = vpop.f32.mrf.mxu0  ;;  %v4040_v43 = vadd.f32 %v4039_v36, %v4038_v26  ;;  %v4011_v16 = vmul.f32 %v3903_v48, %v3903_v48  ;;  %v4041_v59 = vsel %vm598_vm4, %v4010_v34, 0.0 }
 0x224   : > { %3802 = vst.msk [vmem:[#allocation3 + $0x98] sm:$0xff] %vm598_vm4, %v3766_v47  ;;  %4367 = vst.msk [vmem:[%s4976_s24 + $0x58] sm:$0xff] %vm598_vm4, %v3844_v37  ;;  %v3733_v1 = vld [vmem:[#allocation3 + $0xb0] sm:$0xff]  ;;  %v3373_v4 = vadd.f32 %v3337_v40, %v3266_v62  ;;  %v3934_v47 = vsel %vm598_vm4, %v3902_v12, 0.0  ;;  %v4070_v62 = vsel %vm598_vm4, %v4009_v38, 0.0  ;;  %v4012_v40 = vmul.f32 %v3904_v45, %v3904_v45  ;;  %v3906_v9 = vld [vmem:[%s4976_s24 + $0x40] sm:$0xff] }
 0x225   : > { %4368 = vst.msk [vmem:[%s4976_s24 + $0x60] sm:$0xff] %vm598_vm4, %v3848_v60  ;;  %3800 = vst.msk [vmem:[#allocation3 + $0x88] sm:$0xff] %vm598_vm4, %v3764_v28  ;;  %v3769_v55 = vadd.f32 %v4891_v46, %v3733_v1  ;;  %v4858_v7 = vpop.f32.mrf.mxu1  ;;  %v3651_v8 = vpop.f32.mrf.mxu0  ;;  %v3731_v10 = vld [vmem:[#allocation3 + $0xa0] sm:$0xff]  ;;  %v4069_v12 = vsel %vm598_vm4, %v4007_v35, 0.0 }
 0x226   : > { %3411 = vst.msk [vmem:[#allocation3 + $0xd0] sm:$0xff] %vm598_vm4, %v3375_v61  ;;  %3409 = vst.msk [vmem:[#allocation3 + $0xc0] sm:$0xff] %vm598_vm4, %v3373_v4  ;;  %v3376_v6 = vadd.f32 %v4858_v7, %v3340_v3  ;;  %v3767_v14 = vadd.f32 %v3731_v10, %v3648_v57  ;;  %v3935_v7 = vadd.f32 %v3934_v47, %v3933_v2 }
 0x227   : > { %3805 = vst.msk [vmem:[#allocation3 + $0xb0] sm:$0xff] %vm598_vm4, %v3769_v55  ;;  %v3734_v15 = vld [vmem:[#allocation3 + $0xb8] sm:$0xff]  ;;  %v3269_v17 = vpop.f32.mrf.mxu1  ;;  %v4895_v20 = vpop.f32.mrf.mxu0  ;;  %v3966_v3 = vadd.f32 %v3965_v50, %v3964_v44  ;;  %v3938_v50 = vsel %vm598_vm4, %v3906_v9, 0.0 }
 0x228   : > { %v3853_v22 = vld [vmem:[#allocation3 + $0x7f] sm:$0xff]  ;;  %v3770_v18 = vadd.f32 %v4892_v0, %v3734_v15  ;;  %3412 = vst.msk [vmem:[#allocation3 + $0xd8] sm:$0xff] %vm598_vm4, %v3376_v6  ;;  %v3374_v23 = vadd.f32 %v3338_v19, %v3269_v17  ;;  %3803 = vst.msk [vmem:[#allocation3 + $0xa0] sm:$0xff] %vm598_vm4, %v3767_v14  ;;  %v3967_v0 = vsel %vm598_vm4, %v3905_v13, 0.0  ;;  %v4042_v14 = vadd.f32 %v4041_v59, %v4040_v43 }
 0x229   : > { %4370 = vst.msk [vmem:[%s4976_s24 + $0x70] sm:$0xff] %vm598_vm4, %v3853_v22  ;;  %v4861_v30 = vpop.f32.mrf.mxu1  ;;  %v3664_v32 = vpop.f32.mrf.mxu0  ;;  %v3732_v52 = vld [vmem:[#allocation3 + $0xa8] sm:$0xff]  ;;  %v4072_v15 = vsel %vm598_vm4, %v4011_v16, 0.0  ;;  %v4071_v22 = vadd.f32 %v4070_v62, %v4069_v12  ;;  %v3348_v13 = vld [vmem:[#allocation3 + $0x118] sm:$0xff] }
 0x22a   : > { %3806 = vst.msk [vmem:[#allocation3 + $0xb8] sm:$0xff] %vm598_vm4, %v3770_v18  ;;  %3410 = vst.msk [vmem:[#allocation3 + $0xc8] sm:$0xff] %vm598_vm4, %v3374_v23  ;;  %v3379_v63 = vadd.f32 %v4861_v30, %v3343_v49  ;;  %v3768_v39 = vadd.f32 %v3732_v52, %v3651_v8  ;;  %v3907_v8 = vld [vmem:[%s4976_s24 + $0x48] sm:$0xff]  ;;  %v3936_v18 = vsel %vm598_vm4, %v3904_v45, 0.0  ;;  %v3968_v23 = vadd.f32 %v3967_v0, %v3966_v3 }
 0x22b   : > { %v3858_v29 = vld [vmem:[#allocation3 + $0x91] sm:$0xff]  ;;  %v3282_v41 = vpop.f32.mrf.mxu1  ;;  %v4896_v42 = vpop.f32.mrf.mxu0  ;;  %v4015_v30 = vmul.f32 %v3907_v8, %v3907_v8  ;;  %v4014_v49 = vmul.f32 %v3906_v9, %v3906_v9  ;;  %v4073_v36 = vadd.f32 %v4072_v15, %v4071_v22  ;;  %v3969_v31 = vsel %vm598_vm4, %v3907_v8, 0.0 }
 0x22c   : > { %4372 = vst.msk [vmem:[%s4976_s24 + $0x80] sm:$0xff] %vm598_vm4, %v3858_v29  ;;  %v3854_v56 = vld [vmem:[#allocation3 + $0x87] sm:$0xff]  ;;  %3415 = vst.msk [vmem:[#allocation3 + $0xf0] sm:$0xff] %vm598_vm4, %v3379_v63  ;;  %v3377_v60 = vadd.f32 %v3341_v54, %v3282_v41  ;;  %v3909_v24 = vld [vmem:[%s4976_s24 + $0x58] sm:$0xff]  ;;  %v4074_v29 = vsel %vm598_vm4, %v4013_v51, 0.0  ;;  %v4043_v63 = vsel %vm598_vm4, %v4012_v40, 0.0  ;;  %v3937_v38 = vadd.f32 %v3936_v18, %v3935_v7 }
 0x22d   : > { %4371 = vst.msk [vmem:[%s4976_s24 + $0x78] sm:$0xff] %vm598_vm4, %v3854_v56  ;;  %v3737_v46 = vld [vmem:[#allocation3 + $0xd0] sm:$0xff]  ;;  %3804 = vst.msk [vmem:[#allocation3 + $0xa8] sm:$0xff] %vm598_vm4, %v3768_v39  ;;  %v3735_v25 = vld [vmem:[#allocation3 + $0xc0] sm:$0xff]  ;;  %v4862_v57 = vpop.f32.mrf.mxu1  ;;  %v3667_v28 = vpop.f32.mrf.mxu0  ;;  %v4017_v35 = vmul.f32 %v3909_v24, %v3909_v24  ;;  %v4075_v47 = vadd.f32 %v4074_v29, %v4073_v36  ;;  %v4045_v59 = vsel %vm598_vm4, %v4014_v49, 0.0  ;;  %v3971_v3 = vsel %vm598_vm4, %v3909_v24, 0.0 }
 0x22e   : > { %v3773_v53 = vadd.f32 %v4895_v20, %v3737_v46  ;;  %v3771_v37 = vadd.f32 %v3735_v25, %v3664_v32  ;;  %v3380_v61 = vadd.f32 %v4862_v57, %v3344_v58  ;;  %3413 = vst.msk [vmem:[#allocation3 + $0xe0] sm:$0xff] %vm598_vm4, %v3377_v60  ;;  %v3908_v32 = vld [vmem:[%s4976_s24 + $0x50] sm:$0xff]  ;;  %v3345_v41 = vld [vmem:[#allocation3 + $0x100] sm:$0xff]  ;;  %v3910_v2 = vld [vmem:[%s4976_s24 + $0x60] sm:$0xff]  ;;  %v3970_v58 = vadd.f32 %v3969_v31, %v3968_v23 }
 0x22f   : > { %v3738_v1 = vld [vmem:[#allocation3 + $0xd8] sm:$0xff]  ;;  %v3285_v4 = vpop.f32.mrf.mxu1  ;;  %v4899_v55 = vpop.f32.mrf.mxu0  ;;  %v4016_v16 = vmul.f32 %v3908_v32, %v3908_v32  ;;  %v3346_v57 = vld [vmem:[#allocation3 + $0x108] sm:$0xff]  ;;  %v4018_v51 = vmul.f32 %v3910_v2, %v3910_v2  ;;  %v4078_v8 = vsel %vm598_vm4, %v4017_v35, 0.0  ;;  %v3942_v18 = vsel %vm598_vm4, %v3910_v2, 0.0 }
 0x230   : > { %3809 = vst.msk [vmem:[#allocation3 + $0xd0] sm:$0xff] %vm598_vm4, %v3773_v53  ;;  %v3859_v10 = vld [vmem:[#allocation3 + $0x99] sm:$0xff]  ;;  %3807 = vst.msk [vmem:[#allocation3 + $0xc0] sm:$0xff] %vm598_vm4, %v3771_v37  ;;  %v3774_v6 = vadd.f32 %v4896_v42, %v3738_v1  ;;  %v3378_v11 = vadd.f32 %v3342_v5, %v3285_v4  ;;  %v4044_v42 = vadd.f32 %v4043_v63, %v4042_v14  ;;  %v3912_v25 = vld [vmem:[%s4976_s24 + $0x70] sm:$0xff]  ;;  %v3940_v37 = vsel %vm598_vm4, %v3908_v32, 0.0 }
 0x231   : > { %3416 = vst.msk [vmem:[#allocation3 + $0xf8] sm:$0xff] %vm598_vm4, %v3380_v61  ;;  %4373 = vst.msk [vmem:[%s4976_s24 + $0x88] sm:$0xff] %vm598_vm4, %v3859_v10  ;;  %v3868_v17 = vld [vmem:[#allocation3 + $0xb5] sm:$0xff]  ;;  %v3736_v19 = vld [vmem:[#allocation3 + $0xc8] sm:$0xff]  ;;  %v4865_v20 = vpop.f32.mrf.mxu1  ;;  %v3680_v21 = vpop.f32.mrf.mxu0  ;;  %v4020_v12 = vmul.f32 %v3912_v25, %v3912_v25  ;;  %v3972_v23 = vadd.f32 %v3971_v3, %v3970_v58  ;;  %v4049_v24 = vsel %vm598_vm4, %v4018_v51, 0.0 }
 0x232   : > { %4376 = vst.msk [vmem:[%s4976_s24 + $0xa0] sm:$0xff] %vm598_vm4, %v3868_v17  ;;  %3810 = vst.msk [vmem:[#allocation3 + $0xd8] sm:$0xff] %vm598_vm4, %v3774_v6  ;;  %v3772_v26 = vadd.f32 %v3736_v19, %v3667_v28  ;;  %v3383_v48 = vadd.f32 %v4865_v20, %v3347_v27  ;;  %v3911_v53 = vld [vmem:[%s4976_s24 + $0x68] sm:$0xff]  ;;  %v4076_v28 = vsel %vm598_vm4, %v4015_v30, 0.0  ;;  %v4046_v17 = vadd.f32 %v4045_v59, %v4044_v42 }
 0x233   : > { %3414 = vst.msk [vmem:[#allocation3 + $0xe8] sm:$0xff] %vm598_vm4, %v3378_v11  ;;  %v3741_v33 = vld [vmem:[#allocation3 + $0xf0] sm:$0xff]  ;;  %v3298_v34 = vpop.f32.mrf.mxu1  ;;  %v4900_v52 = vpop.f32.mrf.mxu0  ;;  %v4019_v7 = vmul.f32 %v3911_v53, %v3911_v53  ;;  %v4077_v6 = vadd.f32 %v4076_v28, %v4075_v47  ;;  %v4047_v11 = vsel %vm598_vm4, %v4016_v16, 0.0  ;;  %v3914_v20 = vld [vmem:[%s4976_s24 + $0x80] sm:$0xff]  ;;  %v3973_v49 = vsel %vm598_vm4, %v3911_v53, 0.0 }
 0x234   : > { %v3863_v56 = vld [vmem:[#allocation3 + $0xa3] sm:$0xff]  ;;  %v3864_v39 = vld [vmem:[#allocation3 + $0xab] sm:$0xff]  ;;  %3808 = vst.msk [vmem:[#allocation3 + $0xc8] sm:$0xff] %vm598_vm4, %v3772_v26  ;;  %v3777_v43 = vadd.f32 %v4899_v55, %v3741_v33  ;;  %3419 = vst.msk [vmem:[#allocation3 + $0x110] sm:$0xff] %vm598_vm4, %v3383_v48  ;;  %v3381_v44 = vadd.f32 %v3345_v41, %v3298_v34  ;;  %v3939_v55 = vadd.f32 %v3938_v50, %v3937_v38  ;;  %v4051_v63 = vsel %vm598_vm4, %v4020_v12, 0.0 }
 0x235   : > { %4374 = vst.msk [vmem:[%s4976_s24 + $0x90] sm:$0xff] %vm598_vm4, %v3863_v56  ;;  %4375 = vst.msk [vmem:[%s4976_s24 + $0x98] sm:$0xff] %vm598_vm4, %v3864_v39  ;;  %v4866_v45 = vpop.f32.mrf.mxu1  ;;  %v3683_v46 = vpop.f32.mrf.mxu0  ;;  %v3739_v61 = vld [vmem:[#allocation3 + $0xe0] sm:$0xff]  ;;  %v3913_v14 = vld [vmem:[%s4976_s24 + $0x78] sm:$0xff]  ;;  %v4079_v26 = vadd.f32 %v4078_v8, %v4077_v6  ;;  %v4048_v30 = vadd.f32 %v4047_v11, %v4046_v17  ;;  %v4080_v32 = vsel %vm598_vm4, %v4019_v7, 0.0  ;;  %v4022_v36 = vmul.f32 %v3914_v20, %v3914_v20 }
 0x236   : > { %v3384_v54 = vadd.f32 %v4866_v45, %v3348_v13  ;;  %3813 = vst.msk [vmem:[#allocation3 + $0xf0] sm:$0xff] %vm598_vm4, %v3777_v43  ;;  %3417 = vst.msk [vmem:[#allocation3 + $0x100] sm:$0xff] %vm598_vm4, %v3381_v44  ;;  %v3775_v1 = vadd.f32 %v3739_v61, %v3680_v21  ;;  %v3941_v19 = vadd.f32 %v3940_v37, %v3939_v55  ;;  %v3975_v44 = vsel %vm598_vm4, %v3913_v14, 0.0 }
 0x237   : > { %v3869_v60 = vld [vmem:[#allocation3 + $0xbd] sm:$0xff]  ;;  %v3301_v40 = vpop.f32.mrf.mxu1  ;;  %v4903_v0 = vpop.f32.mrf.mxu0  ;;  %v4021_v33 = vmul.f32 %v3913_v14, %v3913_v14  ;;  %v4050_v39 = vadd.f32 %v4049_v24, %v4048_v30  ;;  %v3974_v43 = vadd.f32 %v3973_v49, %v3972_v23  ;;  %v4081_v45 = vadd.f32 %v4080_v32, %v4079_v26 }
 0x238   : > { %v3742_v62 = vld [vmem:[#allocation3 + $0xf8] sm:$0xff]  ;;  %4377 = vst.msk [vmem:[%s4976_s24 + $0xa8] sm:$0xff] %vm598_vm4, %v3869_v60  ;;  %3420 = vst.msk [vmem:[#allocation3 + $0x118] sm:$0xff] %vm598_vm4, %v3384_v54  ;;  %v3382_v5 = vadd.f32 %v3346_v57, %v3301_v40  ;;  %v3915_v27 = vld [vmem:[%s4976_s24 + $0x88] sm:$0xff]  ;;  %v3943_v56 = vadd.f32 %v3942_v18, %v3941_v19  ;;  %v3946_v28 = vsel %vm598_vm4, %v3914_v20, 0.0  ;;  %v4053_v59 = vsel %vm598_vm4, %v4022_v36, 0.0 }
 0x239   : > { %v3778_v4 = vadd.f32 %v4900_v52, %v3742_v62  ;;  %v3696_v10 = vpop.f32.mrf.mxu0  ;;  %3811 = vst.msk [vmem:[#allocation3 + $0xe0] sm:$0xff] %vm598_vm4, %v3775_v1  ;;  %v3944_v52 = vsel %vm598_vm4, %v3912_v25, 0.0  ;;  %v4023_v41 = vmul.f32 %v3915_v27, %v3915_v27  ;;  %v4052_v50 = vadd.f32 %v4051_v63, %v4050_v39  ;;  %v3918_v37 = vld [vmem:[%s4976_s24 + $0xa0] sm:$0xff] }
 0x23a   : > { %v3740_v9 = vld [vmem:[#allocation3 + $0xe8] sm:$0xff]  ;;  %3418 = vst.msk [vmem:[#allocation3 + $0x108] sm:$0xff] %vm598_vm4, %v3382_v5  ;;  %v3945_v47 = vadd.f32 %v3944_v52, %v3943_v56  ;;  %v4082_v16 = vsel %vm598_vm4, %v4021_v33, 0.0  ;;  %v3976_v62 = vadd.f32 %v3975_v44, %v3974_v43  ;;  %v3977_v40 = vsel %vm598_vm4, %v3915_v27, 0.0 }
 0x23b   : > { %3814 = vst.msk [vmem:[#allocation3 + $0xf8] sm:$0xff] %vm598_vm4, %v3778_v4  ;;  %v3776_v15 = vadd.f32 %v3740_v9, %v3683_v46  ;;  %v3873_v21 = vld [vmem:[#allocation3 + $0xc7] sm:$0xff]  ;;  %v3874_v22 = vld [vmem:[#allocation3 + $0xcf] sm:$0xff]  ;;  %v4904_v34 = vpop.f32.mrf.mxu0  ;;  %v4083_v1 = vadd.f32 %v4082_v16, %v4081_v45  ;;  %v4054_v9 = vadd.f32 %v4053_v59, %v4052_v50  ;;  %v3950_v26 = vsel %vm598_vm4, %v3918_v37, 0.0 }
 0x23c   : > { %4378 = vst.msk [vmem:[%s4976_s24 + $0xb0] sm:$0xff] %vm598_vm4, %v3873_v21  ;;  %4379 = vst.msk [vmem:[%s4976_s24 + $0xb8] sm:$0xff] %vm598_vm4, %v3874_v22  ;;  %v3745_v29 = vld [vmem:[#allocation3 + $0x110] sm:$0xff]  ;;  %v3916_v48 = vld [vmem:[%s4976_s24 + $0x90] sm:$0xff]  ;;  %v3947_v8 = vadd.f32 %v3946_v28, %v3945_v47  ;;  %v3978_v12 = vadd.f32 %v3977_v40, %v3976_v62 }
 0x23d   : > { %3812 = vst.msk [vmem:[#allocation3 + $0xe8] sm:$0xff] %vm598_vm4, %v3776_v15  ;;  %v3781_v31 = vadd.f32 %v4903_v0, %v3745_v29  ;;  %v3743_v38 = vld [vmem:[#allocation3 + $0x100] sm:$0xff]  ;;  %v3917_v42 = vld [vmem:[%s4976_s24 + $0x98] sm:$0xff]  ;;  %v4024_v13 = vmul.f32 %v3916_v48, %v3916_v48  ;;  %v3699_v57 = vpop.f32.mrf.mxu0  ;;  %v4084_v0 = vsel %vm598_vm4, %v4023_v41, 0.0  ;;  %v3948_v4 = vsel %vm598_vm4, %v3916_v48, 0.0 }
 0x23e   : > { %v3779_v2 = vadd.f32 %v3743_v38, %v3696_v10  ;;  %v4025_v60 = vmul.f32 %v3917_v42, %v3917_v42  ;;  %v4026_v10 = vmul.f32 %v3918_v37, %v3918_v37  ;;  %v3979_v6 = vsel %vm598_vm4, %v3917_v42, 0.0 }
 0x23f   : > { %v3746_v35 = vld [vmem:[#allocation3 + $0x118] sm:$0xff]  ;;  %v3919_v46 = vld [vmem:[%s4976_s24 + $0xa8] sm:$0xff]  ;;  %3817 = vst.msk [vmem:[#allocation3 + $0x110] sm:$0xff] %vm598_vm4, %v3781_v31  ;;  %v4055_v5 = vsel %vm598_vm4, %v4024_v13, 0.0  ;;  %v4085_v14 = vadd.f32 %v4084_v0, %v4083_v1  ;;  %v3949_v17 = vadd.f32 %v3948_v4, %v3947_v8  ;;  %v3980_v22 = vadd.f32 %v3979_v6, %v3978_v12 }
 0x240   : > { %v3878_v53 = vld [vmem:[#allocation3 + $0xd9] sm:$0xff]  ;;  %3815 = vst.msk [vmem:[#allocation3 + $0x100] sm:$0xff] %vm598_vm4, %v3779_v2  ;;  %v3782_v54 = vadd.f32 %v4904_v34, %v3746_v35  ;;  %v4027_v55 = vmul.f32 %v3919_v46, %v3919_v46  ;;  %v4086_v15 = vsel %vm598_vm4, %v4025_v60, 0.0  ;;  %v4056_v19 = vadd.f32 %v4055_v5, %v4054_v9 }
 0x241   : > { %v3744_v58 = vld [vmem:[#allocation3 + $0x108] sm:$0xff]  ;;  %4380 = vst.msk [vmem:[%s4976_s24 + $0xc0] sm:$0xff] %vm598_vm4, %v3878_v53  ;;  %v3981_v20 = vsel %vm598_vm4, %v3919_v46, 0.0  ;;  %v4057_v27 = vsel %vm598_vm4, %v4026_v10, 0.0  ;;  %v4087_v29 = vadd.f32 %v4086_v15, %v4085_v14  ;;  %v3951_v36 = vadd.f32 %v3950_v26, %v3949_v17 }
 0x242   : > { %v3884_v25 = vld [vmem:[#allocation3 + $0xf3] sm:$0xff]  ;;  %v3780_v61 = vadd.f32 %v3744_v58, %v3699_v57  ;;  %3818 = vst.msk [vmem:[#allocation3 + $0x118] sm:$0xff] %vm598_vm4, %v3782_v54  ;;  %v4088_v18 = vsel %vm598_vm4, %v4027_v55, 0.0  ;;  %v3982_v49 = vadd.f32 %v3981_v20, %v3980_v22  ;;  %v4058_v31 = vadd.f32 %v4057_v27, %v4056_v19 }
 0x243   : > { %4383 = vst.msk [vmem:[%s4976_s24 + $0xd8] sm:$0xff] %vm598_vm4, %v3884_v25  ;;  %v3920_v7 = vld [vmem:[%s4976_s24 + $0xb0] sm:$0xff]  ;;  %v3921_v11 = vld [vmem:[%s4976_s24 + $0xb8] sm:$0xff]  ;;  %v4089_v63 = vadd.f32 %v4088_v18, %v4087_v29 }
 0x244   : > { %v3879_v51 = vld [vmem:[#allocation3 + $0xe1] sm:$0xff]  ;;  %v3883_v3 = vld [vmem:[#allocation3 + $0xeb] sm:$0xff]  ;;  %3816 = vst.msk [vmem:[#allocation3 + $0x108] sm:$0xff] %vm598_vm4, %v3780_v61  ;;  %v4028_v21 = vmul.f32 %v3920_v7, %v3920_v7  ;;  %v4029_v23 = vmul.f32 %v3921_v11, %v3921_v11  ;;  %v3952_v32 = vsel %vm598_vm4, %v3920_v7, 0.0  ;;  %v3983_v33 = vsel %vm598_vm4, %v3921_v11, 0.0 }
 0x245   : > { %4381 = vst.msk [vmem:[%s4976_s24 + $0xc8] sm:$0xff] %vm598_vm4, %v3879_v51  ;;  %4382 = vst.msk [vmem:[%s4976_s24 + $0xd0] sm:$0xff] %vm598_vm4, %v3883_v3  ;;  %v3953_v45 = vadd.f32 %v3952_v32, %v3951_v36  ;;  %v3984_v13 = vadd.f32 %v3983_v33, %v3982_v49 }
 0x246   : > { %v4059_v38 = vsel %vm598_vm4, %v4028_v21, 0.0  ;;  %v4090_v42 = vsel %vm598_vm4, %v4029_v23, 0.0 }
 0x247   : > { %v3888_v24 = vld [vmem:[#allocation3 + $0xfd] sm:$0xff]  ;;  %v4060_v50 = vadd.f32 %v4059_v38, %v4058_v31  ;;  %v4091_v54 = vadd.f32 %v4090_v42, %v4089_v63  ;;  %v3930_v42 = vld [vmem:[%s5889_s3] sm:$0x1] }
 0x248   : > { %v3922_v30 = vld [vmem:[%s4976_s24 + $0xc0] sm:$0xff]  ;;  %4384 = vst.msk [vmem:[%s4976_s24 + $0xe0] sm:$0xff] %vm598_vm4, %v3888_v24 }
 0x249   : > { %v4030_v48 = vmul.f32 %v3922_v30, %v3922_v30  ;;  %v3894_v52 = vld [vmem:[#allocation3 + $0x117] sm:$0xff]  ;;  %v3954_v2 = vsel %vm598_vm4, %v3922_v30, 0.0 }
 0x24a   : > { %v3925_v34 = vld [vmem:[%s4976_s24 + $0xd8] sm:$0xff]  ;;  %4387 = vst.msk [vmem:[%s4976_s24 + $0xf8] sm:$0xff] %vm598_vm4, %v3894_v52  ;;  %v3955_v57 = vadd.f32 %v3954_v2, %v3953_v45 }
 0x24b   : > { %v3889_v39 = vld [vmem:[#allocation3 + $0x105] sm:$0xff]  ;;  %v3893_v41 = vld [vmem:[#allocation3 + $0x10f] sm:$0xff]  ;;  %v4061_v46 = vsel %vm598_vm4, %v4030_v48, 0.0  ;;  %v4033_v16 = vmul.f32 %v3925_v34, %v3925_v34  ;;  %v3987_v0 = vsel %vm598_vm4, %v3925_v34, 0.0 }
 0x24c   : > { %v3923_v56 = vld [vmem:[%s4976_s24 + $0xc8] sm:$0xff]  ;;  %v3924_v35 = vld [vmem:[%s4976_s24 + $0xd0] sm:$0xff]  ;;  %4385 = vst.msk [vmem:[%s4976_s24 + $0xe8] sm:$0xff] %vm598_vm4, %v3889_v39  ;;  %4386 = vst.msk [vmem:[%s4976_s24 + $0xf0] sm:$0xff] %vm598_vm4, %v3893_v41  ;;  %v4062_v28 = vadd.f32 %v4061_v46, %v4060_v50 }
 0x24d   : > { %v3985_v43 = vsel %vm598_vm4, %v3923_v56, 0.0  ;;  %v4031_v44 = vmul.f32 %v3923_v56, %v3923_v56  ;;  %v4032_v47 = vmul.f32 %v3924_v35, %v3924_v35  ;;  %v3956_v53 = vsel %vm598_vm4, %v3924_v35, 0.0 }
 0x24e   : > { %v3986_v58 = vadd.f32 %v3985_v43, %v3984_v13  ;;  %v3957_v60 = vadd.f32 %v3956_v53, %v3955_v57  ;;  %v4094_v51 = vsel %vm598_vm4, %v4033_v16, 0.0  ;;  %v4005_v43 = vld [vmem:[%s5890_s4] sm:$0x1] }
 0x24f   : > { %v4092_v25 = vsel %vm598_vm4, %v4031_v44, 0.0  ;;  %v4063_v59 = vsel %vm598_vm4, %v4032_v47, 0.0  ;;  %v3926_v37 = vld [vmem:[%s4976_s24 + $0xe0] sm:$0xff] }
 0x250   : > { %v4093_v61 = vadd.f32 %v4092_v25, %v4091_v54  ;;  %v3958_v62 = vsel %vm598_vm4, %v3926_v37, 0.0  ;;  %v4034_v40 = vmul.f32 %v3926_v37, %v3926_v37  ;;  %v4064_v4 = vadd.f32 %v4063_v59, %v4062_v28 }
 0x251   : > { %v3929_v1 = vld [vmem:[%s4976_s24 + $0xf8] sm:$0xff]  ;;  %v3959_v5 = vadd.f32 %v3958_v62, %v3957_v60  ;;  %v3988_v8 = vadd.f32 %v3987_v0, %v3986_v58 }
 0x252   : > { %v4065_v55 = vsel %vm598_vm4, %v4034_v40, 0.0  ;;  %v4037_v9 = vmul.f32 %v3929_v1, %v3929_v1  ;;  %v4095_v17 = vadd.f32 %v4094_v51, %v4093_v61  ;;  %v3991_v20 = vsel %vm598_vm4, %v3929_v1, 0.0 }
 0x253   : > { %v3927_v7 = vld [vmem:[%s4976_s24 + $0xe8] sm:$0xff]  ;;  %v3928_v3 = vld [vmem:[%s4976_s24 + $0xf0] sm:$0xff]  ;;  %v4066_v19 = vadd.f32 %v4065_v55, %v4064_v4 }
 0x254   : > { %v3960_v10 = vsel %vm598_vm4, %v3928_v3, 0.0  ;;  %v3989_v6 = vsel %vm598_vm4, %v3927_v7, 0.0  ;;  %v4035_v11 = vmul.f32 %v3927_v7, %v3927_v7  ;;  %v4036_v15 = vmul.f32 %v3928_v3, %v3928_v3 }
 0x255   : > { %v3961_v12 = vadd.f32 %v3960_v10, %v3959_v5  ;;  %v3990_v14 = vadd.f32 %v3989_v6, %v3988_v8  ;;  %v4098_v24 = vsel %vm598_vm4, %v4037_v9, 0.0 }
 0x256   : > { %v4096_v21 = vsel %vm598_vm4, %v4035_v11, 0.0  ;;  %v4067_v18 = vsel %vm598_vm4, %v4036_v15, 0.0 }
 0x257   : > { %v3992_v22 = vadd.f32 %v3991_v20, %v3990_v14  ;;  %v4097_v23 = vadd.f32 %v4096_v21, %v4095_v17  ;;  %v4068_v26 = vadd.f32 %v4067_v18, %v4066_v19  ;;  %v3993_v27 = vsel %vm598_vm4, %v3961_v12, 0.0 }
 0x259   : > { %v3994_v29 = vsel %vm598_vm4, %v3992_v22, 0.0  ;;  %v4099_v30 = vadd.f32 %v4098_v24, %v4097_v23  ;;  %v4100_v32 = vsel %vm598_vm4, %v4068_v26, 0.0 }
 0x25a   : > { %v3995_v49 = vadd.f32 %v3994_v29, %v3993_v27 }
 0x25b   : > { %v4101_v33 = vsel %vm598_vm4, %v4099_v30, 0.0 }
 0x25c   : > { %v3996_v48 = vrot.slane %v3995_v49, 4  ;;  %v4102_v34 = vadd.f32 %v4101_v33, %v4100_v32 }
 0x25e   : > { %v3997_v52 = vadd.f32 %v3996_v48, %v3995_v49  ;;  %v4103_v63 = vrot.slane %v4102_v34, 4 }
 0x260   : > { %v3998_v36 = vrot.slane %v3997_v52, 2  ;;  %v4104_v31 = vadd.f32 %v4103_v63, %v4102_v34 }
 0x262   : > { %v3999_v38 = vadd.f32 %v3998_v36, %v3997_v52  ;;  %v4105_v56 = vrot.slane %v4104_v31, 2 }
 0x264   : > { %v4000_v39 = vrot.slane %v3999_v38, 1  ;;  %v4106_v41 = vadd.f32 %v4105_v56, %v4104_v31 }
 0x266   : > { %v4001_v2 = vadd.f32 %v4000_v39, %v3999_v38  ;;  %v4107_v35 = vrot.slane %v4106_v41, 1 }
 0x268   : > { %v4002_v44 = vadd.f32 %v4001_v2, %v3930_v42  ;;  %v4108_v45 = vadd.f32 %v4107_v35, %v4106_v41 }
 0x26a   : > { %4004 = vst.msk [vmem:[%s5889_s3] sm:$0x1] %vm4003_vm5, %v4002_v44  ;;  %v4109_v13 = vadd.f32 %v4108_v45, %v4005_v43 }
 0x26c   : > { %4110 = vst.msk [vmem:[%s5890_s4] sm:$0x1] %vm4003_vm5, %v4109_v13 }
 0x26d PF: > { %s15_s15 = sadd.s32 1, %s4932_s15  }
 0x26e   : > { %p12_p5 = scmp.ge.s32.totalorder %s15_s15, 4  }
 0x270   :  { %14 = sbr.rel (!%p12_p5) target bundleno = 1 (0x1), region = 101 }

// kernel: double_conv_forward.4
= control target key start
LH: loop header
LB: loop body
LE: loop exit
PB: predicated region body
PF: predicated region fallthrough
CT: control target
= control target key end

     0   :  { %s5135_s21 = smov 0   ;;  %s6152_s0 = inlined_call_operand.vmem [shape: f32[2,16,16,8], index: 0, kind: input, shape index: {}]   ;;  %s6153_s1 = inlined_call_operand.vmem [shape: f32[1,8], index: 1, kind: input, shape index: {}]   ;;  %s6154_s2 = inlined_call_operand.vmem [shape: f32[1,8], index: 2, kind: input, shape index: {}]   ;;  %s6155_s3 = inlined_call_operand.vmem [shape: bf16[9,8,8], index: 3, kind: input, shape index: {}]   ;;  %s6156_s4 = inlined_call_operand.vmem [shape: f32[2,16,16,8], index: 4, kind: output, shape index: {0}]   ;;  %s6157_s5 = inlined_call_operand.vmem [shape: f32[1,8], index: 5, kind: output, shape index: {1}]   ;;  %s6158_s6 = inlined_call_operand.vmem [shape: f32[1,8], index: 6, kind: output, shape index: {2}]  }
   0x1 LB: > { %s4341_s22 = sadd.s32 4294967295, %s5097_s21   ;;  %p4345_p0 = scmp.ge.s32.totalorder %s5097_s21, 1  ;;  %s5097_s21 = sphi %s5135_s21, %s17_s21  }
   0x2   : > { %p207_p1 = scmp.lt.s32.totalorder %s5097_s21, 3 }
   0x4   : > { %p208_p2 = pnand %p4345_p0, %p207_p1 }
   0x5   : > { %p237_p3 = scmp.lt.s32.totalorder (!%p208_p2), %s4341_s22, 1  ;;  %p4350_p4 = scmp.ne.s32.totalorder (!%p208_p2), %s4341_s22, 0 }
   0x6   : > { %211 = sbr.rel (%p208_p2) target bundleno = 627 (0x273), region = 36 }
   0xb   : > { %s238_s23 = scalar_select %p237_p3, %s4341_s22, 1 }
   0xc   : > { %251 = sbr.rel (%p4350_p4) target bundleno = 40 (0x28), region = 40 }
   0xd   : > { %s4555_s24 = sshll.u32 %s238_s23, 8 }
   0xe   : > { %s5146_s27 = scalar_lea.vmem %s6152_s0, %s4555_s24  ;;  %s5151_s30 = scalar_lea.vmem %s6156_s4, %s4555_s24 }
  0x11   : > { %vm252_vm0 = vcmask 64512   ;;  %vm294_vm1 = vcmask 57344   ;;  %v5099_v0 = vmov 0.0  }
  0x12   : > { %253 = vst.msk [vmem:[#allocation2] sm:$0xff] %vm252_vm0, %v5099_v0  ;;  %254 = vst.msk [vmem:[#allocation2 + $0x8] sm:$0xff] %vm252_vm0, %v5099_v0 }
  0x13   : > { %255 = vst.msk [vmem:[#allocation2 + $0x10] sm:$0xff] %vm252_vm0, %v5099_v0  ;;  %256 = vst.msk [vmem:[#allocation2 + $0x18] sm:$0xff] %vm252_vm0, %v5099_v0 }
  0x14   : > { %257 = vst.msk [vmem:[#allocation2 + $0x20] sm:$0xff] %vm252_vm0, %v5099_v0  ;;  %258 = vst.msk [vmem:[#allocation2 + $0x28] sm:$0xff] %vm252_vm0, %v5099_v0 }
  0x15   : > { %259 = vst.msk [vmem:[#allocation2 + $0x30] sm:$0xff] %vm252_vm0, %v5099_v0  ;;  %260 = vst.msk [vmem:[#allocation2 + $0x38] sm:$0xff] %vm252_vm0, %v5099_v0 }
  0x16   : > { %261 = vst.msk [vmem:[#allocation2 + $0x40] sm:$0xff] %vm252_vm0, %v5099_v0  ;;  %262 = vst.msk [vmem:[#allocation2 + $0x48] sm:$0xff] %vm252_vm0, %v5099_v0 }
  0x17   : > { %263 = vst.msk [vmem:[#allocation2 + $0x50] sm:$0xff] %vm252_vm0, %v5099_v0  ;;  %264 = vst.msk [vmem:[#allocation2 + $0x58] sm:$0xff] %vm252_vm0, %v5099_v0 }
  0x18   : > { %265 = vst.msk [vmem:[#allocation2 + $0x60] sm:$0xff] %vm252_vm0, %v5099_v0  ;;  %266 = vst.msk [vmem:[#allocation2 + $0x68] sm:$0xff] %vm252_vm0, %v5099_v0 }
  0x19   : > { %267 = vst.msk [vmem:[#allocation2 + $0x70] sm:$0xff] %vm252_vm0, %v5099_v0  ;;  %268 = vst.msk [vmem:[#allocation2 + $0x78] sm:$0xff] %vm252_vm0, %v5099_v0 }
  0x1a   : > { %269 = vst.msk [vmem:[#allocation2 + $0x80] sm:$0xff] %vm252_vm0, %v5099_v0  ;;  %270 = vst.msk [vmem:[#allocation2 + $0x88] sm:$0xff] %vm252_vm0, %v5099_v0 }
  0x1b   : > { %271 = vst.msk [vmem:[#allocation2 + $0x90] sm:$0xff] %vm252_vm0, %v5099_v0  ;;  %272 = vst.msk [vmem:[#allocation2 + $0x98] sm:$0xff] %vm252_vm0, %v5099_v0 }
  0x1c   : > { %273 = vst.msk [vmem:[#allocation2 + $0xa0] sm:$0xff] %vm252_vm0, %v5099_v0  ;;  %274 = vst.msk [vmem:[#allocation2 + $0xa8] sm:$0xff] %vm252_vm0, %v5099_v0 }
  0x1d   : > { %275 = vst.msk [vmem:[#allocation2 + $0xb0] sm:$0xff] %vm252_vm0, %v5099_v0  ;;  %276 = vst.msk [vmem:[#allocation2 + $0xb8] sm:$0xff] %vm252_vm0, %v5099_v0 }
  0x1e   : > { %277 = vst.msk [vmem:[#allocation2 + $0xc0] sm:$0xff] %vm252_vm0, %v5099_v0  ;;  %278 = vst.msk [vmem:[#allocation2 + $0xc8] sm:$0xff] %vm252_vm0, %v5099_v0 }
  0x1f   : > { %279 = vst.msk [vmem:[#allocation2 + $0xd0] sm:$0xff] %vm252_vm0, %v5099_v0  ;;  %280 = vst.msk [vmem:[#allocation2 + $0xd8] sm:$0xff] %vm252_vm0, %v5099_v0 }
  0x20   : > { %281 = vst.msk [vmem:[#allocation2 + $0xe0] sm:$0xff] %vm252_vm0, %v5099_v0  ;;  %282 = vst.msk [vmem:[#allocation2 + $0xe8] sm:$0xff] %vm252_vm0, %v5099_v0 }
  0x21   : > { %283 = vst.msk [vmem:[#allocation2 + $0xf0] sm:$0xff] %vm252_vm0, %v5099_v0  ;;  %284 = vst.msk [vmem:[#allocation2 + $0xf8] sm:$0xff] %vm252_vm0, %v5099_v0 }
  0x22   : > { %285 = vst.msk [vmem:[#allocation2 + $0x100] sm:$0xff] %vm252_vm0, %v5099_v0  ;;  %286 = vst.msk [vmem:[#allocation2 + $0x108] sm:$0xff] %vm252_vm0, %v5099_v0 }
  0x23   : > { %287 = vst.msk [vmem:[#allocation2 + $0x110] sm:$0xff] %vm252_vm0, %v5099_v0  ;;  %288 = vst.msk [vmem:[#allocation2 + $0x118] sm:$0xff] %vm252_vm0, %v5099_v0 }
  0x24   : > { %289 = vst.msk [vmem:[#allocation2 + $0x120] sm:$0xff] %vm252_vm0, %v5099_v0  ;;  %290 = vst.msk [vmem:[#allocation2 + $0x128] sm:$0xff] %vm252_vm0, %v5099_v0 }
  0x25   : > { %291 = vst.msk [vmem:[#allocation2 + $0x130] sm:$0xff] %vm252_vm0, %v5099_v0  ;;  %292 = vst.msk [vmem:[#allocation2 + $0x138] sm:$0xff] %vm252_vm0, %v5099_v0 }
  0x26   : > { %293 = vst.msk [vmem:[#allocation2 + $0x140] sm:$0xff] %vm252_vm0, %v5099_v0 }
  0x27   : > { %295 = vst.msk [vmem:[%s6157_s5] sm:$0x1] %vm294_vm1, %v5099_v0  ;;  %296 = vst.msk [vmem:[%s6158_s6] sm:$0x1] %vm294_vm1, %v5099_v0 }
  0x28 PF: > { %v526_v1 = vld [vmem:[%s6155_s3] sm:$0xf]  ;;  %vm581_vm2 = vcmask 1043456   ;;  %v473_v3 = vld [vmem:[#allocation2 + $0x8] sm:$0xff]  ;;  %vm439_vm3 = vcmask 64512   ;;  %v312_v12 = vld [vmem:[%s5146_s27 + $0x78] sm:$0xff] }
  0x29   : > { %v472_v2 = vld [vmem:[#allocation2] sm:$0xff]  ;;  %5072 = vmatprep.subr.msk.bf16.mxu0 %vm581_vm2, %v526_v1  ;;  %5073 = vmatprep.subr.msk.bf16.mxu1 %vm581_vm2, %v526_v1  ;;  %v583_v4 = vsel %vm581_vm2, %v526_v1, 0  ;;  %v298_v7 = vld [vmem:[%s5146_s27 + $0x8] sm:$0xff]  ;;  %v315_v18 = vld [vmem:[%s5146_s27 + $0x90] sm:$0xff]  ;;  %vm4166_vm4 = vcmask 57344  }
  0x2a   : > { %v508_v5 = vpack.c.bf16 %v473_v3, %v472_v2  ;;  %v297_v6 = vld [vmem:[%s5146_s27] sm:$0xff]  ;;  %4729 = vmatpush3.bf16.msra.mxu0 %v583_v4  ;;  %5071 = vmatpush3.bf16.msra.mxu1 %v583_v4  ;;  %v314_v14 = vld [vmem:[%s5146_s27 + $0x88] sm:$0xff]  ;;  %v316_v22 = vld [vmem:[%s5146_s27 + $0x98] sm:$0xff] }
  0x2b   : > { %v5213_v8 = vld [vmem:[%s6153_s1] ss:$0 sm:$0xff]  ;;  %v4371_v17 = vld [vmem:[%s6155_s3 + $0x4] sm:$0xf]  ;;  %v4390_v24 = vld [vmem:[%s6155_s3 + $0x8] sm:$0xf] }
  0x2c   : > { %v336_v9 = vmul.f32 %v5213_v8, %v297_v6  ;;  %v337_v10 = vmul.f32 %v5213_v8, %v298_v7  ;;  %v5220_v11 = vld [vmem:[%s6154_s2] ss:$0 sm:$0xff]  ;;  %4730 = vmatprep.mubr.msk.bf16.mxu0 %vm439_vm3, %v508_v5  ;;  %v351_v15 = vmul.f32 %v5213_v8, %v312_v12  ;;  %v353_v21 = vmul.f32 %v5213_v8, %v314_v14  ;;  %v299_v29 = vld [vmem:[%s5146_s27 + $0x10] sm:$0xff]  ;;  %v300_v30 = vld [vmem:[%s5146_s27 + $0x18] sm:$0xff] }
  0x2d   : > { %v313_v13 = vld [vmem:[%s5146_s27 + $0x80] sm:$0xff]  ;;  %5074 = vmatprep.subr.msk.bf16.mxu1 %vm581_vm2, %v4371_v17  ;;  %v354_v23 = vmul.f32 %v5213_v8, %v315_v18  ;;  %v355_v27 = vmul.f32 %v5213_v8, %v316_v22  ;;  %v5245_v28 = vsel %vm581_vm2, %v4371_v17, 0  ;;  %5075 = vmatprep.subr.msk.bf16.mxu0 %vm581_vm2, %v4390_v24  ;;  %v318_v37 = vld [vmem:[%s5146_s27 + $0xa8] sm:$0xff]  ;;  %v5257_v41 = vsel %vm581_vm2, %v4390_v24, 0  ;;  %v319_v42 = vld [vmem:[%s5146_s27 + $0xb0] sm:$0xff] }
  0x2e   : > { %v352_v16 = vmul.f32 %v5213_v8, %v313_v13  ;;  %v375_v19 = vadd.f32 %v5220_v11, %v336_v9  ;;  %v376_v20 = vadd.f32 %v5220_v11, %v337_v10  ;;  %v390_v25 = vadd.f32 %v5220_v11, %v351_v15  ;;  %v301_v35 = vld [vmem:[%s5146_s27 + $0x20] sm:$0xff]  ;;  %v302_v43 = vld [vmem:[%s5146_s27 + $0x28] sm:$0xff]  ;;  %v303_v48 = vld [vmem:[%s5146_s27 + $0x30] sm:$0xff] }
  0x2f   : > { %v392_v33 = vadd.f32 %v5220_v11, %v353_v21  ;;  %v393_v34 = vadd.f32 %v5220_v11, %v354_v23  ;;  %v317_v36 = vld [vmem:[%s5146_s27 + $0xa0] sm:$0xff]  ;;  %v394_v40 = vadd.f32 %v5220_v11, %v355_v27  ;;  %v338_v46 = vmul.f32 %v5213_v8, %v299_v29  ;;  %v304_v61 = vld [vmem:[%s5146_s27 + $0x38] sm:$0xff]  ;;  %v322_v5 = vld [vmem:[%s5146_s27 + $0xc8] sm:$0xff] }
  0x30   : > { %v391_v26 = vadd.f32 %v5220_v11, %v352_v16  ;;  %v407_v31 = vmax.f32 %v375_v19, 0.0  ;;  %v408_v32 = vmax.f32 %v376_v20, 0.0  ;;  %v422_v38 = vmax.f32 %v390_v25, 0.0  ;;  %v305_v62 = vld [vmem:[%s5146_s27 + $0x40] sm:$0xff]  ;;  %v320_v3 = vld [vmem:[%s5146_s27 + $0xb8] sm:$0xff]  ;;  %v323_v12 = vld [vmem:[%s5146_s27 + $0xd0] sm:$0xff] }
  0x31   : > { %v424_v44 = vmax.f32 %v392_v33, 0.0  ;;  %v425_v45 = vmax.f32 %v393_v34, 0.0  ;;  %v339_v47 = vmul.f32 %v5213_v8, %v300_v30  ;;  %v426_v49 = vmax.f32 %v394_v40, 0.0  ;;  %v321_v4 = vld [vmem:[%s5146_s27 + $0xc0] sm:$0xff]  ;;  %v306_v17 = vld [vmem:[%s5146_s27 + $0x48] sm:$0xff]  ;;  %v307_v24 = vld [vmem:[%s5146_s27 + $0x50] sm:$0xff] }
  0x32   : > { %v423_v39 = vmax.f32 %v391_v26, 0.0  ;;  %440 = vst.msk [vmem:[#allocation2 + $0x14] sm:$0xff] %vm439_vm3, %v407_v31  ;;  %441 = vst.msk [vmem:[#allocation2 + $0x1c] sm:$0xff] %vm439_vm3, %v408_v32  ;;  %v340_v50 = vmul.f32 %v5213_v8, %v301_v35  ;;  %v356_v51 = vmul.f32 %v5213_v8, %v317_v36  ;;  %v357_v52 = vmul.f32 %v5213_v8, %v318_v37  ;;  %v308_v25 = vld [vmem:[%s5146_s27 + $0x58] sm:$0xff]  ;;  %v325_v33 = vld [vmem:[%s5146_s27 + $0xe0] sm:$0xff] }
  0x33   : > { %455 = vst.msk [vmem:[#allocation2 + $0x9a] sm:$0xff] %vm439_vm3, %v422_v38  ;;  %457 = vst.msk [vmem:[#allocation2 + $0xac] sm:$0xff] %vm439_vm3, %v424_v44  ;;  %v377_v53 = vadd.f32 %v5220_v11, %v338_v46  ;;  %v378_v54 = vadd.f32 %v5220_v11, %v339_v47  ;;  %v358_v55 = vmul.f32 %v5213_v8, %v319_v42  ;;  %v324_v32 = vld [vmem:[%s5146_s27 + $0xd8] sm:$0xff]  ;;  %v5319_v40 = vld [vmem:[%s6155_s3 + $0x10] sm:$0xf] }
  0x34   : > { %456 = vst.msk [vmem:[#allocation2 + $0xa4] sm:$0xff] %vm439_vm3, %v423_v39  ;;  %458 = vst.msk [vmem:[#allocation2 + $0xb6] sm:$0xff] %vm439_vm3, %v425_v45  ;;  %v341_v56 = vmul.f32 %v5213_v8, %v302_v43  ;;  %v379_v57 = vadd.f32 %v5220_v11, %v340_v50  ;;  %v395_v58 = vadd.f32 %v5220_v11, %v356_v51  ;;  %v326_v47 = vld [vmem:[%s5146_s27 + $0xe8] sm:$0xff] }
  0x35   : > { %459 = vst.msk [vmem:[#allocation2 + $0xbe] sm:$0xff] %vm439_vm3, %v426_v49  ;;  %v396_v59 = vadd.f32 %v5220_v11, %v357_v52  ;;  %v342_v60 = vmul.f32 %v5213_v8, %v303_v48  ;;  %v409_v63 = vmax.f32 %v377_v53, 0.0  ;;  %v410_v0 = vmax.f32 %v378_v54, 0.0  ;;  %v309_v48 = vld [vmem:[%s5146_s27 + $0x60] sm:$0xff] }
  0x36   : > { %v397_v1 = vadd.f32 %v5220_v11, %v358_v55  ;;  %v380_v2 = vadd.f32 %v5220_v11, %v341_v56  ;;  %v411_v6 = vmax.f32 %v379_v57, 0.0  ;;  %v427_v7 = vmax.f32 %v395_v58, 0.0  ;;  %v310_v58 = vld [vmem:[%s5146_s27 + $0x68] sm:$0xff] }
  0x37   : > { %v428_v9 = vmax.f32 %v396_v59, 0.0  ;;  %v381_v10 = vadd.f32 %v5220_v11, %v342_v60  ;;  %442 = vst.msk [vmem:[#allocation2 + $0x26] sm:$0xff] %vm439_vm3, %v409_v63  ;;  %443 = vst.msk [vmem:[#allocation2 + $0x2e] sm:$0xff] %vm439_vm3, %v410_v0  ;;  %v343_v15 = vmul.f32 %v5213_v8, %v304_v61  ;;  %v344_v16 = vmul.f32 %v5213_v8, %v305_v62 }
  0x38   : > { %v429_v13 = vmax.f32 %v397_v1, 0.0  ;;  %v412_v14 = vmax.f32 %v380_v2, 0.0  ;;  %444 = vst.msk [vmem:[#allocation2 + $0x38] sm:$0xff] %vm439_vm3, %v411_v6  ;;  %460 = vst.msk [vmem:[#allocation2 + $0xc8] sm:$0xff] %vm439_vm3, %v427_v7  ;;  %v359_v21 = vmul.f32 %v5213_v8, %v320_v3  ;;  %v360_v22 = vmul.f32 %v5213_v8, %v321_v4 }
  0x39   : > { %v474_v18 = vld [vmem:[#allocation2 + $0x10] sm:$0xff]  ;;  %v475_v19 = vld [vmem:[#allocation2 + $0x18] sm:$0xff]  ;;  %461 = vst.msk [vmem:[#allocation2 + $0xd0] sm:$0xff] %vm439_vm3, %v428_v9  ;;  %v413_v20 = vmax.f32 %v381_v10, 0.0  ;;  %v361_v23 = vmul.f32 %v5213_v8, %v322_v5  ;;  %v382_v29 = vadd.f32 %v5220_v11, %v343_v15  ;;  %v383_v30 = vadd.f32 %v5220_v11, %v344_v16 }
  0x3a   : > { %v509_v26 = vpack.c.bf16 %v475_v19, %v474_v18  ;;  %462 = vst.msk [vmem:[#allocation2 + $0xda] sm:$0xff] %vm439_vm3, %v429_v13  ;;  %445 = vst.msk [vmem:[#allocation2 + $0x40] sm:$0xff] %vm439_vm3, %v412_v14  ;;  %v362_v31 = vmul.f32 %v5213_v8, %v323_v12  ;;  %v398_v36 = vadd.f32 %v5220_v11, %v359_v21 }
  0x3b   : > { %v492_v27 = vld [vmem:[#allocation2 + $0xa0] sm:$0xff]  ;;  %v493_v34 = vld [vmem:[#allocation2 + $0xa8] sm:$0xff]  ;;  %v494_v35 = vld [vmem:[#allocation2 + $0xb0] sm:$0xff]  ;;  %446 = vst.msk [vmem:[#allocation2 + $0x4a] sm:$0xff] %vm439_vm3, %v413_v20  ;;  %v399_v37 = vadd.f32 %v5220_v11, %v360_v22  ;;  %v400_v38 = vadd.f32 %v5220_v11, %v361_v23  ;;  %v345_v39 = vmul.f32 %v5213_v8, %v306_v17  ;;  %v414_v44 = vmax.f32 %v382_v29, 0.0 }
  0x3c   : > { %4731 = vmatmul.mubr.msk.bf16.vlgmr.msra.gmra.mxu0 %vm439_vm3, %v509_v26  ;;  %v518_v42 = vpack.c.bf16 %v493_v34, %v492_v27  ;;  %v495_v43 = vld [vmem:[#allocation2 + $0xb8] sm:$0xff]  ;;  %v415_v45 = vmax.f32 %v383_v30, 0.0  ;;  %v401_v46 = vadd.f32 %v5220_v11, %v362_v31  ;;  %v430_v50 = vmax.f32 %v398_v36, 0.0  ;;  %v496_v53 = vld [vmem:[#allocation2 + $0xc0] sm:$0xff] }
  0x3d   : > { %v519_v49 = vpack.c.bf16 %v495_v43, %v494_v35  ;;  %4805 = vmatpush3.bf16.msra.mxu0 %v5257_v41  ;;  %v431_v51 = vmax.f32 %v399_v37, 0.0  ;;  %v432_v52 = vmax.f32 %v400_v38, 0.0  ;;  %447 = vst.msk [vmem:[#allocation2 + $0x52] sm:$0xff] %vm439_vm3, %v414_v44  ;;  %v346_v55 = vmul.f32 %v5213_v8, %v307_v24  ;;  %v5336_v41 = vld [vmem:[%s6155_s3 + $0xc] sm:$0xf] }
  0x3e   : > { %4750 = vmatprep.mubr.msk.bf16.mxu1 %vm439_vm3, %v518_v42  ;;  %448 = vst.msk [vmem:[#allocation2 + $0x5c] sm:$0xff] %vm439_vm3, %v415_v45  ;;  %v433_v54 = vmax.f32 %v401_v46, 0.0  ;;  %v384_v56 = vadd.f32 %v5220_v11, %v345_v39  ;;  %v347_v57 = vmul.f32 %v5213_v8, %v308_v25  ;;  %5077 = vmatprep.subr.msk.bf16.mxu0 %vm581_vm2, %v5319_v40  ;;  %v476_v59 = vld [vmem:[#allocation2 + $0x20] sm:$0xff]  ;;  %v477_v60 = vld [vmem:[#allocation2 + $0x28] sm:$0xff]  ;;  %v478_v61 = vld [vmem:[#allocation2 + $0x30] sm:$0xff] }
  0x3f   : > { %4751 = vmatmul.mubr.msk.bf16.vlgmr.msra.gmra.mxu1 %vm439_vm3, %v519_v49  ;;  %463 = vst.msk [vmem:[#allocation2 + $0xe2] sm:$0xff] %vm439_vm3, %v430_v50  ;;  %464 = vst.msk [vmem:[#allocation2 + $0xec] sm:$0xff] %vm439_vm3, %v431_v51  ;;  %v363_v62 = vmul.f32 %v5213_v8, %v324_v32  ;;  %v364_v63 = vmul.f32 %v5213_v8, %v325_v33  ;;  %v365_v0 = vmul.f32 %v5213_v8, %v326_v47  ;;  %v479_v3 = vld [vmem:[#allocation2 + $0x38] sm:$0xff]  ;;  %v497_v4 = vld [vmem:[#allocation2 + $0xc8] sm:$0xff] }
  0x40   : > { %465 = vst.msk [vmem:[#allocation2 + $0xf4] sm:$0xff] %vm439_vm3, %v432_v52  ;;  %v348_v1 = vmul.f32 %v5213_v8, %v309_v48  ;;  %4767 = vmatpush3.bf16.msra.mxu1 %v5245_v28  ;;  %v510_v2 = vpack.c.bf16 %v477_v60, %v476_v59  ;;  %v498_v5 = vld [vmem:[#allocation2 + $0xd0] sm:$0xff]  ;;  %466 = vst.msk [vmem:[#allocation2 + $0xfe] sm:$0xff] %vm439_vm3, %v433_v54  ;;  %v385_v6 = vadd.f32 %v5220_v11, %v346_v55  ;;  %v798_v60 = vld [vmem:[#allocation2 + $0x1] sm:$0xff] }
  0x41   : > { %v416_v7 = vmax.f32 %v384_v56, 0.0  ;;  %v386_v9 = vadd.f32 %v5220_v11, %v347_v57  ;;  %v511_v10 = vpack.c.bf16 %v479_v3, %v478_v61  ;;  %v520_v12 = vpack.c.bf16 %v497_v4, %v496_v53  ;;  %v499_v13 = vld [vmem:[#allocation2 + $0xd8] sm:$0xff]  ;;  %v480_v14 = vld [vmem:[#allocation2 + $0x40] sm:$0xff]  ;;  %v311_v28 = vld [vmem:[%s5146_s27 + $0x70] sm:$0xff]  ;;  %5076 = vmatprep.subr.msk.bf16.mxu1 %vm581_vm2, %v5336_v41 }
  0x42   : > { %v402_v15 = vadd.f32 %v5220_v11, %v363_v62  ;;  %v403_v16 = vadd.f32 %v5220_v11, %v364_v63  ;;  %4734 = vmatprep.mubr.msk.bf16.mxu0 %vm439_vm3, %v510_v2  ;;  %v521_v17 = vpack.c.bf16 %v499_v13, %v498_v5  ;;  %v481_v18 = vld [vmem:[#allocation2 + $0x48] sm:$0xff]  ;;  %v417_v19 = vmax.f32 %v385_v6, 0.0  ;;  %v800_v5 = vld [vmem:[#allocation2 + $0x11] sm:$0xff]  ;;  %v801_v6 = vld [vmem:[#allocation2 + $0x19] sm:$0xff] }
  0x43   : > { %449 = vst.msk [vmem:[#allocation2 + $0x64] sm:$0xff] %vm439_vm3, %v416_v7  ;;  %v418_v20 = vmax.f32 %v386_v9, 0.0  ;;  %v404_v21 = vadd.f32 %v5220_v11, %v365_v0  ;;  %4754 = vmatprep.mubr.msk.bf16.mxu1 %vm439_vm3, %v520_v12  ;;  %v512_v22 = vpack.c.bf16 %v481_v18, %v480_v14  ;;  %v349_v25 = vmul.f32 %v5213_v8, %v310_v58  ;;  %v799_v61 = vld [vmem:[#allocation2 + $0x9] sm:$0xff]  ;;  %v802_v9 = vld [vmem:[#allocation2 + $0x21] sm:$0xff]  ;;  %v5393_v18 = vld [vmem:[%s6155_s3 + $0x14] sm:$0xf] }
  0x44   : > { %v434_v23 = vmax.f32 %v402_v15, 0.0  ;;  %v435_v24 = vmax.f32 %v403_v16, 0.0  ;;  %4735 = vmatmul.mubr.msk.bf16.gmra.mxu0 %vm439_vm3, %v511_v10  ;;  %450 = vst.msk [vmem:[#allocation2 + $0x6e] sm:$0xff] %vm439_vm3, %v417_v19  ;;  %v387_v27 = vadd.f32 %v5220_v11, %v348_v1  ;;  %v350_v29 = vmul.f32 %v5213_v8, %v311_v28  ;;  %v482_v30 = vld [vmem:[#allocation2 + $0x50] sm:$0xff]  ;;  %v1196_v2 = vld [vmem:[#allocation2 + $0x2] sm:$0xff]  ;;  %v1199_v16 = vld [vmem:[#allocation2 + $0x1a] sm:$0xff] }
  0x45   : > { %451 = vst.msk [vmem:[#allocation2 + $0x76] sm:$0xff] %vm439_vm3, %v418_v20  ;;  %v436_v26 = vmax.f32 %v404_v21, 0.0  ;;  %4738 = vmatprep.mubr.msk.bf16.mxu0 %vm439_vm3, %v512_v22  ;;  %v483_v31 = vld [vmem:[#allocation2 + $0x58] sm:$0xff]  ;;  %v388_v32 = vadd.f32 %v5220_v11, %v349_v25  ;;  %v834_v63 = vpack.c.bf16 %v799_v61, %v798_v60  ;;  %v1197_v3 = vld [vmem:[#allocation2 + $0xa] sm:$0xff]  ;;  %v835_v12 = vpack.c.bf16 %v801_v6, %v800_v5  ;;  %v1200_v28 = vld [vmem:[#allocation2 + $0x22] sm:$0xff] }
  0x46   : > { %467 = vst.msk [vmem:[#allocation2 + $0x106] sm:$0xff] %vm439_vm3, %v434_v23  ;;  %468 = vst.msk [vmem:[#allocation2 + $0x110] sm:$0xff] %vm439_vm3, %v435_v24  ;;  %v500_v33 = vld [vmem:[#allocation2 + $0xe0] sm:$0xff]  ;;  %v501_v34 = vld [vmem:[#allocation2 + $0xe8] sm:$0xff]  ;;  %v419_v35 = vmax.f32 %v387_v27, 0.0  ;;  %v389_v36 = vadd.f32 %v5220_v11, %v350_v29  ;;  %v513_v39 = vpack.c.bf16 %v483_v31, %v482_v30  ;;  %v1232_v7 = vpack.c.bf16 %v1197_v3, %v1196_v2 }
  0x47   : > { %469 = vst.msk [vmem:[#allocation2 + $0x118] sm:$0xff] %vm439_vm3, %v436_v26  ;;  %4755 = vmatmul.mubr.msk.bf16.gmra.mxu1 %vm439_vm3, %v521_v17  ;;  %v522_v37 = vpack.c.bf16 %v501_v34, %v500_v33  ;;  %v420_v38 = vmax.f32 %v388_v32, 0.0  ;;  %v502_v42 = vld [vmem:[#allocation2 + $0xf0] sm:$0xff]  ;;  %v503_v43 = vld [vmem:[#allocation2 + $0xf8] sm:$0xff]  ;;  %v1705_v14 = vsel %vm581_vm2, %v5336_v41, 0  ;;  %v806_v22 = vld [vmem:[#allocation2 + $0x41] sm:$0xff] }
  0x48   : > { %452 = vst.msk [vmem:[#allocation2 + $0x80] sm:$0xff] %vm439_vm3, %v419_v35  ;;  %v421_v44 = vmax.f32 %v389_v36, 0.0  ;;  %v523_v46 = vpack.c.bf16 %v503_v43, %v502_v42  ;;  %v803_v10 = vld [vmem:[#allocation2 + $0x29] sm:$0xff]  ;;  %v1198_v15 = vld [vmem:[#allocation2 + $0x12] sm:$0xff]  ;;  %v2103_v24 = vsel %vm581_vm2, %v5319_v40, 0  ;;  %v1203_v30 = vld [vmem:[#allocation2 + $0x3a] sm:$0xff] }
  0x49   : > { %4758 = vmatprep.mubr.msk.bf16.mxu1 %vm439_vm3, %v522_v37  ;;  %453 = vst.msk [vmem:[#allocation2 + $0x88] sm:$0xff] %vm439_vm3, %v420_v38  ;;  %v836_v13 = vpack.c.bf16 %v803_v10, %v802_v9  ;;  %v1201_v17 = vld [vmem:[#allocation2 + $0x2a] sm:$0xff]  ;;  %v5397_v19 = vpack.c.bf16 %v1199_v16, %v1198_v15  ;;  %v805_v41 = vld [vmem:[#allocation2 + $0x39] sm:$0xff]  ;;  %v1204_v31 = vld [vmem:[#allocation2 + $0x42] sm:$0xff] }
  0x4a   : > { %v484_v45 = vld [vmem:[#allocation2 + $0x60] sm:$0xff]  ;;  %454 = vst.msk [vmem:[#allocation2 + $0x92] sm:$0xff] %vm439_vm3, %v421_v44  ;;  %v804_v20 = vld [vmem:[#allocation2 + $0x31] sm:$0xff]  ;;  %v5399_v21 = vpack.c.bf16 %v1201_v17, %v1200_v28  ;;  %v807_v23 = vld [vmem:[#allocation2 + $0x49] sm:$0xff] }
  0x4b   : > { %v485_v47 = vld [vmem:[#allocation2 + $0x68] sm:$0xff]  ;;  %v837_v25 = vpack.c.bf16 %v805_v41, %v804_v20  ;;  %v5408_v26 = vld [vmem:[%s6155_s3 + $0x18] sm:$0xf]  ;;  %v838_v27 = vpack.c.bf16 %v807_v23, %v806_v22  ;;  %v327_v40 = vld [vmem:[%s5146_s27 + $0xf0] sm:$0xff] }
  0x4c   : > { %4739 = vmatmul.mubr.msk.bf16.gmra.mxu0 %vm439_vm3, %v513_v39  ;;  %v514_v48 = vpack.c.bf16 %v485_v47, %v484_v45  ;;  %v486_v51 = vld [vmem:[#allocation2 + $0x70] sm:$0xff]  ;;  %v487_v52 = vld [vmem:[#allocation2 + $0x78] sm:$0xff]  ;;  %v366_v34 = vmul.f32 %v5213_v8, %v327_v40  ;;  %v810_v42 = vld [vmem:[#allocation2 + $0x61] sm:$0xff] }
  0x4d   : > { %v504_v49 = vld [vmem:[#allocation2 + $0x100] sm:$0xff]  ;;  %v505_v50 = vld [vmem:[#allocation2 + $0x108] sm:$0xff]  ;;  %v515_v55 = vpack.c.bf16 %v487_v52, %v486_v51  ;;  %v506_v56 = vld [vmem:[#allocation2 + $0x110] sm:$0xff] }
  0x4e   : > { %v524_v53 = vpack.c.bf16 %v505_v50, %v504_v49  ;;  %4742 = vmatprep.mubr.msk.bf16.mxu0 %vm439_vm3, %v514_v48  ;;  %v507_v57 = vld [vmem:[#allocation2 + $0x118] sm:$0xff]  ;;  %v1205_v32 = vld [vmem:[#allocation2 + $0x4a] sm:$0xff]  ;;  %v405_v44 = vadd.f32 %v5220_v11, %v366_v34  ;;  %v1208_v51 = vld [vmem:[#allocation2 + $0x62] sm:$0xff] }
  0x4f   : > { %4759 = vmatmul.mubr.msk.bf16.gmra.mxu1 %vm439_vm3, %v523_v46  ;;  %v488_v54 = vld [vmem:[#allocation2 + $0x80] sm:$0xff]  ;;  %v525_v62 = vpack.c.bf16 %v507_v57, %v506_v56  ;;  %v1202_v29 = vld [vmem:[#allocation2 + $0x32] sm:$0xff]  ;;  %v5424_v39 = vpack.c.bf16 %v1205_v32, %v1204_v31  ;;  %v811_v43 = vld [vmem:[#allocation2 + $0x69] sm:$0xff] }
  0x50   : > { %4762 = vmatprep.mubr.msk.bf16.mxu1 %vm439_vm3, %v524_v53  ;;  %v489_v58 = vld [vmem:[#allocation2 + $0x88] sm:$0xff]  ;;  %v328_v33 = vld [vmem:[%s5146_s27 + $0xf8] sm:$0xff]  ;;  %v5422_v36 = vpack.c.bf16 %v1203_v30, %v1202_v29  ;;  %v437_v47 = vmax.f32 %v405_v44, 0.0 }
  0x51   : > { %v516_v59 = vpack.c.bf16 %v489_v58, %v488_v54  ;;  %v490_v0 = vld [vmem:[#allocation2 + $0x90] sm:$0xff]  ;;  %v491_v1 = vld [vmem:[#allocation2 + $0x98] sm:$0xff]  ;;  %v367_v35 = vmul.f32 %v5213_v8, %v328_v33  ;;  %v840_v8 = vpack.c.bf16 %v811_v43, %v810_v42  ;;  %v814_v56 = vld [vmem:[#allocation2 + $0x81] sm:$0xff] }
  0x52   : > { %v517_v4 = vpack.c.bf16 %v491_v1, %v490_v0  ;;  %v808_v37 = vld [vmem:[#allocation2 + $0x51] sm:$0xff]  ;;  %v809_v38 = vld [vmem:[#allocation2 + $0x59] sm:$0xff]  ;;  %470 = vst.msk [vmem:[#allocation2 + $0x122] sm:$0xff] %vm439_vm3, %v437_v47  ;;  %v815_v57 = vld [vmem:[#allocation2 + $0x89] sm:$0xff] }
  0x53   : > { %v406_v45 = vadd.f32 %v5220_v11, %v367_v35  ;;  %v839_v46 = vpack.c.bf16 %v809_v38, %v808_v37  ;;  %v1206_v49 = vld [vmem:[#allocation2 + $0x52] sm:$0xff]  ;;  %v1207_v50 = vld [vmem:[#allocation2 + $0x5a] sm:$0xff]  ;;  %v1209_v52 = vld [vmem:[#allocation2 + $0x6a] sm:$0xff] }
  0x54   : > { %4743 = vmatmul.mubr.msk.bf16.gmra.mxu0 %vm439_vm3, %v515_v55  ;;  %v5436_v11 = vpack.c.bf16 %v1207_v50, %v1206_v49  ;;  %v812_v53 = vld [vmem:[#allocation2 + $0x71] sm:$0xff]  ;;  %v813_v54 = vld [vmem:[#allocation2 + $0x79] sm:$0xff]  ;;  %v5438_v55 = vpack.c.bf16 %v1209_v52, %v1208_v51  ;;  %v819_v5 = vld [vmem:[#allocation2 + $0xa9] sm:$0xff] }
  0x55   : > { %4746 = vmatprep.mubr.msk.bf16.mxu0 %vm439_vm3, %v516_v59  ;;  %v438_v48 = vmax.f32 %v406_v45, 0.0  ;;  %v841_v58 = vpack.c.bf16 %v813_v54, %v812_v53  ;;  %v842_v59 = vpack.c.bf16 %v815_v57, %v814_v56  ;;  %v1210_v60 = vld [vmem:[#allocation2 + $0x72] sm:$0xff]  ;;  %v1211_v61 = vld [vmem:[#allocation2 + $0x7a] sm:$0xff]  ;;  %v823_v20 = vld [vmem:[#allocation2 + $0xc9] sm:$0xff] }
  0x56   : > { %v5446_v0 = vpack.c.bf16 %v1211_v61, %v1210_v60  ;;  %v816_v1 = vld [vmem:[#allocation2 + $0x91] sm:$0xff]  ;;  %v817_v2 = vld [vmem:[#allocation2 + $0x99] sm:$0xff]  ;;  %v822_v17 = vld [vmem:[#allocation2 + $0xc1] sm:$0xff] }
  0x57   : > { %4763 = vmatmul.mubr.msk.bf16.gmra.mxu1 %vm439_vm3, %v525_v62  ;;  %471 = vst.msk [vmem:[#allocation2 + $0x12a] sm:$0xff] %vm439_vm3, %v438_v48  ;;  %v1212_v62 = vld [vmem:[#allocation2 + $0x82] sm:$0xff]  ;;  %v843_v6 = vpack.c.bf16 %v817_v2, %v816_v1  ;;  %v1214_v9 = vld [vmem:[#allocation2 + $0x92] sm:$0xff]  ;;  %v1215_v10 = vld [vmem:[#allocation2 + $0x9a] sm:$0xff]  ;;  %v846_v22 = vpack.c.bf16 %v823_v20, %v822_v17 }
  0x58   : > { %4768 = vmatprep.mubr.msk.bf16.mxu1 %vm439_vm3, %v834_v63  ;;  %v1213_v63 = vld [vmem:[#allocation2 + $0x8a] sm:$0xff]  ;;  %v821_v16 = vld [vmem:[#allocation2 + $0xb9] sm:$0xff]  ;;  %v826_v40 = vld [vmem:[#allocation2 + $0xe1] sm:$0xff] }
  0x59   : > { %v5448_v3 = vpack.c.bf16 %v1213_v63, %v1212_v62  ;;  %v820_v15 = vld [vmem:[#allocation2 + $0xb1] sm:$0xff]  ;;  %v825_v31 = vld [vmem:[#allocation2 + $0xd9] sm:$0xff]  ;;  %v827_v33 = vld [vmem:[#allocation2 + $0xe9] sm:$0xff] }
  0x5a   : > { %v845_v41 = vpack.c.bf16 %v821_v16, %v820_v15  ;;  %v1218_v23 = vld [vmem:[#allocation2 + $0xb2] sm:$0xff]  ;;  %v848_v35 = vpack.c.bf16 %v827_v33, %v826_v40  ;;  %v1223_v38 = vld [vmem:[#allocation2 + $0xda] sm:$0xff]  ;;  %v1224_v42 = vld [vmem:[#allocation2 + $0xe2] sm:$0xff] }
  0x5b   : > { %v824_v30 = vld [vmem:[#allocation2 + $0xd1] sm:$0xff]  ;;  %v830_v48 = vld [vmem:[#allocation2 + $0x101] sm:$0xff] }
  0x5c   : > { %4747 = vmatmul.mubr.msk.bf16.gmra.mxu0 %vm439_vm3, %v517_v4  ;;  %v818_v4 = vld [vmem:[#allocation2 + $0xa1] sm:$0xff]  ;;  %v847_v34 = vpack.c.bf16 %v825_v31, %v824_v30  ;;  %v1222_v37 = vld [vmem:[#allocation2 + $0xd2] sm:$0xff]  ;;  %v1225_v43 = vld [vmem:[#allocation2 + $0xea] sm:$0xff] }
  0x5d   : > { %4806 = vmatprep.mubr.msk.bf16.mxu0 %vm439_vm3, %v1232_v7  ;;  %v844_v7 = vpack.c.bf16 %v819_v5, %v818_v4  ;;  %v5476_v44 = vpack.c.bf16 %v1223_v38, %v1222_v37  ;;  %v828_v45 = vld [vmem:[#allocation2 + $0xf1] sm:$0xff]  ;;  %v5478_v47 = vpack.c.bf16 %v1225_v43, %v1224_v42  ;;  %v1227_v52 = vld [vmem:[#allocation2 + $0xfa] sm:$0xff]  ;;  %v1228_v53 = vld [vmem:[#allocation2 + $0x102] sm:$0xff]  ;;  %v2501_v5 = vsel %vm581_vm2, %v5393_v18, 0 }
  0x5e   : > { %v1226_v51 = vld [vmem:[#allocation2 + $0xf2] sm:$0xff]  ;;  %v1229_v54 = vld [vmem:[#allocation2 + $0x10a] sm:$0xff]  ;;  %v1231_v62 = vld [vmem:[#allocation2 + $0x11a] sm:$0xff] }
  0x5f   : > { %4769 = vmatmul.mubr.msk.bf16.vlgmr.msra.gmra.mxu1 %vm439_vm3, %v835_v12  ;;  %v1216_v12 = vld [vmem:[#allocation2 + $0xa2] sm:$0xff]  ;;  %v5486_v56 = vpack.c.bf16 %v1227_v52, %v1226_v51  ;;  %v832_v57 = vld [vmem:[#allocation2 + $0x111] sm:$0xff] }
  0x60   : > { %4843 = vmatpush3.bf16.msra.mxu1 %v1705_v14  ;;  %4772 = vmatprep.mubr.msk.bf16.mxu1 %vm439_vm3, %v836_v13  ;;  %v1217_v13 = vld [vmem:[#allocation2 + $0xaa] sm:$0xff]  ;;  %v5456_v14 = vpack.c.bf16 %v1215_v10, %v1214_v9  ;;  %v1230_v61 = vld [vmem:[#allocation2 + $0x112] sm:$0xff]  ;;  %v1993_v1 = vld [vmem:[#allocation2 + $0x1b] sm:$0xff] }
  0x61   : > { %5078 = vmatprep.subr.msk.bf16.mxu1 %vm581_vm2, %v5393_v18  ;;  %v5458_v28 = vpack.c.bf16 %v1217_v13, %v1216_v12  ;;  %v1992_v63 = vld [vmem:[#allocation2 + $0x13] sm:$0xff]  ;;  %v5495_v2 = vpack.c.bf16 %v1231_v62, %v1230_v61  ;;  %v1997_v10 = vld [vmem:[#allocation2 + $0x3b] sm:$0xff]  ;;  %v2899_v13 = vsel %vm581_vm2, %v5408_v26, 0  ;;  %v2011_v33 = vld [vmem:[#allocation2 + $0xab] sm:$0xff] }
  0x62   : > { %v2028_v4 = vpack.c.bf16 %v1993_v1, %v1992_v63  ;;  %v1996_v9 = vld [vmem:[#allocation2 + $0x33] sm:$0xff]  ;;  %v5507_v12 = vld [vmem:[%s6155_s3 + $0x1c] sm:$0xf]  ;;  %v5520_v15 = vld [vmem:[%s6155_s3 + $0x20] sm:$0xf] }
  0x63   : > { %v2030_v18 = vpack.c.bf16 %v1997_v10, %v1996_v9  ;;  %v2000_v16 = vld [vmem:[#allocation2 + $0x53] sm:$0xff]  ;;  %v2001_v17 = vld [vmem:[#allocation2 + $0x5b] sm:$0xff]  ;;  %v2015_v38 = vld [vmem:[#allocation2 + $0xcb] sm:$0xff]  ;;  %v3297_v9 = vsel %vm581_vm2, %v5507_v12, 0 }
  0x64   : > { %4807 = vmatmul.mubr.msk.bf16.vlgmr.msra.gmra.mxu0 %vm439_vm3, %v5397_v19  ;;  %v2032_v20 = vpack.c.bf16 %v2001_v17, %v2000_v16  ;;  %v2008_v30 = vld [vmem:[#allocation2 + $0x93] sm:$0xff]  ;;  %v2009_v31 = vld [vmem:[#allocation2 + $0x9b] sm:$0xff]  ;;  %v2026_v62 = vld [vmem:[#allocation2 + $0x123] sm:$0xff] }
  0x65   : > { %4881 = vmatpush3.bf16.msra.mxu0 %v2103_v24  ;;  %4810 = vmatprep.mubr.msk.bf16.mxu0 %vm439_vm3, %v5399_v21  ;;  %v1219_v24 = vld [vmem:[#allocation2 + $0xba] sm:$0xff]  ;;  %v2036_v40 = vpack.c.bf16 %v2009_v31, %v2008_v30  ;;  %v2027_v63 = vld [vmem:[#allocation2 + $0x12b] sm:$0xff] }
  0x66   : > { %5079 = vmatprep.subr.msk.bf16.mxu0 %vm581_vm2, %v5408_v26  ;;  %v5466_v29 = vpack.c.bf16 %v1219_v24, %v1218_v23  ;;  %v2004_v23 = vld [vmem:[#allocation2 + $0x73] sm:$0xff]  ;;  %v2005_v24 = vld [vmem:[#allocation2 + $0x7b] sm:$0xff]  ;;  %v2392_v1 = vld [vmem:[#allocation2 + $0x24] sm:$0xff] }
  0x67   : > { %4773 = vmatmul.mubr.msk.bf16.gmra.mxu1 %vm439_vm3, %v837_v25  ;;  %v1220_v25 = vld [vmem:[#allocation2 + $0xc2] sm:$0xff]  ;;  %v2016_v42 = vld [vmem:[#allocation2 + $0xd3] sm:$0xff] }
  0x68   : > { %4776 = vmatprep.mubr.msk.bf16.mxu1 %vm439_vm3, %v838_v27  ;;  %v1221_v27 = vld [vmem:[#allocation2 + $0xca] sm:$0xff]  ;;  %v2017_v43 = vld [vmem:[#allocation2 + $0xdb] sm:$0xff]  ;;  %v2024_v51 = vld [vmem:[#allocation2 + $0x113] sm:$0xff] }
  0x69   : > { %v5468_v32 = vpack.c.bf16 %v1221_v27, %v1220_v25  ;;  %v2034_v25 = vpack.c.bf16 %v2005_v24, %v2004_v23  ;;  %v2007_v27 = vld [vmem:[#allocation2 + $0x8b] sm:$0xff]  ;;  %v2025_v52 = vld [vmem:[#allocation2 + $0x11b] sm:$0xff] }
  0x6a   : > { %v2396_v10 = vld [vmem:[#allocation2 + $0x44] sm:$0xff]  ;;  %v2401_v17 = vld [vmem:[#allocation2 + $0x6c] sm:$0xff]  ;;  %v2406_v30 = vld [vmem:[#allocation2 + $0x94] sm:$0xff] }
  0x6b   : > { %v2407_v31 = vld [vmem:[#allocation2 + $0x9c] sm:$0xff] }
  0x6c   : > { %4811 = vmatmul.mubr.msk.bf16.gmra.mxu0 %vm439_vm3, %v5422_v36 }
  0x6d   : > { %4814 = vmatprep.mubr.msk.bf16.mxu0 %vm439_vm3, %v5424_v39 }
  0x6f   : > { %4777 = vmatmul.mubr.msk.bf16.gmra.mxu1 %vm439_vm3, %v839_v46  ;;  %v829_v46 = vld [vmem:[#allocation2 + $0xf9] sm:$0xff] }
  0x70   : > { %4780 = vmatprep.mubr.msk.bf16.mxu1 %vm439_vm3, %v840_v8  ;;  %v831_v8 = vld [vmem:[#allocation2 + $0x109] sm:$0xff]  ;;  %v849_v49 = vpack.c.bf16 %v829_v46, %v828_v45  ;;  %v2040_v45 = vpack.c.bf16 %v2017_v43, %v2016_v42 }
  0x71   : > { %v850_v50 = vpack.c.bf16 %v831_v8, %v830_v48  ;;  %v2019_v46 = vld [vmem:[#allocation2 + $0xeb] sm:$0xff]  ;;  %v2020_v48 = vld [vmem:[#allocation2 + $0xf3] sm:$0xff]  ;;  %v2021_v8 = vld [vmem:[#allocation2 + $0xfb] sm:$0xff] }
  0x72   : > { %v2409_v42 = vld [vmem:[#allocation2 + $0xac] sm:$0xff] }
  0x74   : > { %4815 = vmatmul.mubr.msk.bf16.gmra.mxu0 %vm439_vm3, %v5436_v11 }
  0x75   : > { %4818 = vmatprep.mubr.msk.bf16.mxu0 %vm439_vm3, %v5438_v55 }
  0x77   : > { %4781 = vmatmul.mubr.msk.bf16.gmra.mxu1 %vm439_vm3, %v841_v58  ;;  %v833_v58 = vld [vmem:[#allocation2 + $0x119] sm:$0xff] }
  0x78   : > { %4784 = vmatprep.mubr.msk.bf16.mxu1 %vm439_vm3, %v842_v59  ;;  %v5488_v59 = vpack.c.bf16 %v1229_v54, %v1228_v53  ;;  %v851_v60 = vpack.c.bf16 %v833_v58, %v832_v57  ;;  %v1628_v53 = vld [vmem:[#allocation2 + $0x122] sm:$0xff]  ;;  %v1629_v54 = vld [vmem:[#allocation2 + $0x12a] sm:$0xff]  ;;  %v2390_v57 = vld [vmem:[#allocation2 + $0x14] sm:$0xff] }
  0x79   : > { %v2391_v58 = vld [vmem:[#allocation2 + $0x1c] sm:$0xff] }
  0x7a   : > { %v2426_v61 = vpack.c.bf16 %v2391_v58, %v2390_v57 }
  0x7c   : > { %4819 = vmatmul.mubr.msk.bf16.gmra.mxu0 %vm439_vm3, %v5446_v0 }
  0x7d   : > { %4822 = vmatprep.mubr.msk.bf16.mxu0 %vm439_vm3, %v5448_v3 }
  0x7f   : > { %4785 = vmatmul.mubr.msk.bf16.gmra.mxu1 %vm439_vm3, %v843_v6  ;;  %v1994_v6 = vld [vmem:[#allocation2 + $0x23] sm:$0xff] }
  0x80   : > { %4788 = vmatprep.mubr.msk.bf16.mxu1 %vm439_vm3, %v844_v7  ;;  %v1995_v7 = vld [vmem:[#allocation2 + $0x2b] sm:$0xff] }
  0x84   : > { %4823 = vmatmul.mubr.msk.bf16.gmra.mxu0 %vm439_vm3, %v5456_v14 }
  0x85   : > { %4826 = vmatprep.mubr.msk.bf16.mxu0 %vm439_vm3, %v5458_v28 }
  0x87   : > { %4789 = vmatmul.mubr.msk.bf16.gmra.mxu1 %vm439_vm3, %v845_v41  ;;  %v2002_v41 = vld [vmem:[#allocation2 + $0x63] sm:$0xff] }
  0x88   : > { %4792 = vmatprep.mubr.msk.bf16.mxu1 %vm439_vm3, %v846_v22  ;;  %v2003_v22 = vld [vmem:[#allocation2 + $0x6b] sm:$0xff] }
  0x8c   : > { %4827 = vmatmul.mubr.msk.bf16.gmra.mxu0 %vm439_vm3, %v5466_v29 }
  0x8d   : > { %4830 = vmatprep.mubr.msk.bf16.mxu0 %vm439_vm3, %v5468_v32 }
  0x8f   : > { %4793 = vmatmul.mubr.msk.bf16.gmra.mxu1 %vm439_vm3, %v847_v34  ;;  %v2012_v34 = vld [vmem:[#allocation2 + $0xb3] sm:$0xff] }
  0x90   : > { %4796 = vmatprep.mubr.msk.bf16.mxu1 %vm439_vm3, %v848_v35  ;;  %v2013_v35 = vld [vmem:[#allocation2 + $0xbb] sm:$0xff] }
  0x91   : > { %v2038_v37 = vpack.c.bf16 %v2013_v35, %v2012_v34  ;;  %v2434_v34 = vpack.c.bf16 %v2407_v31, %v2406_v30 }
  0x94   : > { %4831 = vmatmul.mubr.msk.bf16.gmra.mxu0 %vm439_vm3, %v5476_v44 }
  0x95   : > { %4834 = vmatprep.mubr.msk.bf16.mxu0 %vm439_vm3, %v5478_v47 }
  0x97   : > { %4797 = vmatmul.mubr.msk.bf16.gmra.mxu1 %vm439_vm3, %v849_v49  ;;  %v2042_v49 = vpack.c.bf16 %v2021_v8, %v2020_v48 }
  0x98   : > { %4800 = vmatprep.mubr.msk.bf16.mxu1 %vm439_vm3, %v850_v50  ;;  %v2023_v50 = vld [vmem:[#allocation2 + $0x10b] sm:$0xff] }
  0x9c   : > { %4835 = vmatmul.mubr.msk.bf16.gmra.mxu0 %vm439_vm3, %v5486_v56 }
  0x9d   : > { %4838 = vmatprep.mubr.msk.bf16.mxu0 %vm439_vm3, %v5488_v59 }
  0x9f   : > { %4801 = vmatmul.mubr.msk.bf16.gmra.mxu1 %vm439_vm3, %v851_v60  ;;  %v1647_v60 = vpack.c.bf16 %v1629_v54, %v1628_v53  ;;  %v2414_v54 = vld [vmem:[#allocation2 + $0xd4] sm:$0xff] }
  0xa0   : > { %4844 = vmatprep.mubr.msk.bf16.mxu1 %vm439_vm3, %v5397_v19  ;;  %v2029_v19 = vpack.c.bf16 %v1995_v7, %v1994_v6 }
  0xa4   : > { %4839 = vmatmul.mubr.msk.bf16.gmra.mxu0 %vm439_vm3, %v5495_v2 }
  0xa5   : > { %4882 = vmatprep.mubr.msk.bf16.mxu0 %vm439_vm3, %v2028_v4  ;;  %v2394_v4 = vld [vmem:[#allocation2 + $0x34] sm:$0xff] }
  0xa7   : > { %4845 = vmatmul.mubr.msk.bf16.vlgmr.msra.gmra.mxu1 %vm439_vm3, %v5399_v21  ;;  %v1998_v21 = vld [vmem:[#allocation2 + $0x43] sm:$0xff] }
  0xa8   : > { %4919 = vmatpush3.bf16.msra.mxu1 %v2501_v5  ;;  %4848 = vmatprep.mubr.msk.bf16.mxu1 %vm439_vm3, %v5422_v36  ;;  %v1999_v36 = vld [vmem:[#allocation2 + $0x4b] sm:$0xff]  ;;  %v2395_v5 = vld [vmem:[#allocation2 + $0x3c] sm:$0xff] }
  0xa9   : > { %5080 = vmatprep.subr.msk.bf16.mxu1 %vm581_vm2, %v5507_v12  ;;  %v2031_v26 = vpack.c.bf16 %v1999_v36, %v1998_v21  ;;  %v2428_v7 = vpack.c.bf16 %v2395_v5, %v2394_v4  ;;  %v3695_v21 = vsel %vm581_vm2, %v5520_v15, 0  ;;  %v2400_v12 = vld [vmem:[#allocation2 + $0x64] sm:$0xff]  ;;  %v2417_v5 = vld [vmem:[#allocation2 + $0xec] sm:$0xff] }
  0xaa   : > { %v2416_v4 = vld [vmem:[#allocation2 + $0xe4] sm:$0xff] }
  0xac   : > { %4883 = vmatmul.mubr.msk.bf16.vlgmr.msra.gmra.mxu0 %vm439_vm3, %v2029_v19  ;;  %v2397_v19 = vld [vmem:[#allocation2 + $0x4c] sm:$0xff] }
  0xad   : > { %4957 = vmatpush3.bf16.msra.mxu0 %v2899_v13  ;;  %4886 = vmatprep.mubr.msk.bf16.mxu0 %vm439_vm3, %v2030_v18  ;;  %v2398_v18 = vld [vmem:[#allocation2 + $0x54] sm:$0xff]  ;;  %v2399_v13 = vld [vmem:[#allocation2 + $0x5c] sm:$0xff]  ;;  %v2429_v36 = vpack.c.bf16 %v2397_v19, %v2396_v10 }
  0xae   : > { %5081 = vmatprep.subr.msk.bf16.mxu0 %vm581_vm2, %v5520_v15  ;;  %v2430_v16 = vpack.c.bf16 %v2399_v13, %v2398_v18  ;;  %v2439_v18 = vpack.c.bf16 %v2417_v5, %v2416_v4  ;;  %v3584_v4 = vld [vmem:[#allocation2 + $0x26] sm:$0xff]  ;;  %v3585_v5 = vld [vmem:[#allocation2 + $0x2e] sm:$0xff] }
  0xaf   : > { %4849 = vmatmul.mubr.msk.bf16.gmra.mxu1 %vm439_vm3, %v5424_v39  ;;  %v2033_v39 = vpack.c.bf16 %v2003_v22, %v2002_v41  ;;  %v2431_v41 = vpack.c.bf16 %v2401_v17, %v2400_v12 }
  0xb0   : > { %4852 = vmatprep.mubr.msk.bf16.mxu1 %vm439_vm3, %v5436_v11  ;;  %v2006_v11 = vld [vmem:[#allocation2 + $0x83] sm:$0xff] }
  0xb4   : > { %4887 = vmatmul.mubr.msk.bf16.gmra.mxu0 %vm439_vm3, %v2031_v26  ;;  %v2402_v26 = vld [vmem:[#allocation2 + $0x74] sm:$0xff] }
  0xb5   : > { %4890 = vmatprep.mubr.msk.bf16.mxu0 %vm439_vm3, %v2032_v20  ;;  %v2403_v20 = vld [vmem:[#allocation2 + $0x7c] sm:$0xff] }
  0xb6   : > { %v2432_v15 = vpack.c.bf16 %v2403_v20, %v2402_v26 }
  0xb7   : > { %4853 = vmatmul.mubr.msk.bf16.gmra.mxu1 %vm439_vm3, %v5438_v55  ;;  %v2035_v55 = vpack.c.bf16 %v2007_v27, %v2006_v11  ;;  %v2405_v11 = vld [vmem:[#allocation2 + $0x8c] sm:$0xff] }
  0xb8   : > { %4856 = vmatprep.mubr.msk.bf16.mxu1 %vm439_vm3, %v5446_v0  ;;  %v2010_v0 = vld [vmem:[#allocation2 + $0xa3] sm:$0xff] }
  0xbc   : > { %4891 = vmatmul.mubr.msk.bf16.gmra.mxu0 %vm439_vm3, %v2033_v39 }
  0xbd   : > { %4894 = vmatprep.mubr.msk.bf16.mxu0 %vm439_vm3, %v2034_v25  ;;  %v2404_v25 = vld [vmem:[#allocation2 + $0x84] sm:$0xff] }
  0xbf   : > { %4857 = vmatmul.mubr.msk.bf16.gmra.mxu1 %vm439_vm3, %v5448_v3  ;;  %v2037_v3 = vpack.c.bf16 %v2011_v33, %v2010_v0  ;;  %v2433_v0 = vpack.c.bf16 %v2405_v11, %v2404_v25 }
  0xc0   : > { %4860 = vmatprep.mubr.msk.bf16.mxu1 %vm439_vm3, %v5456_v14  ;;  %v2014_v14 = vld [vmem:[#allocation2 + $0xc3] sm:$0xff] }
  0xc4   : > { %4895 = vmatmul.mubr.msk.bf16.gmra.mxu0 %vm439_vm3, %v2035_v55 }
  0xc5   : > { %4898 = vmatprep.mubr.msk.bf16.mxu0 %vm439_vm3, %v2036_v40 }
  0xc7   : > { %4861 = vmatmul.mubr.msk.bf16.gmra.mxu1 %vm439_vm3, %v5458_v28  ;;  %v2039_v28 = vpack.c.bf16 %v2015_v38, %v2014_v14  ;;  %v2408_v38 = vld [vmem:[#allocation2 + $0xa4] sm:$0xff] }
  0xc8   : > { %4864 = vmatprep.mubr.msk.bf16.mxu1 %vm439_vm3, %v5466_v29  ;;  %v2018_v29 = vld [vmem:[#allocation2 + $0xe3] sm:$0xff]  ;;  %v2435_v48 = vpack.c.bf16 %v2409_v42, %v2408_v38 }
  0xcc   : > { %4899 = vmatmul.mubr.msk.bf16.gmra.mxu0 %vm439_vm3, %v2037_v3 }
  0xcd   : > { %4902 = vmatprep.mubr.msk.bf16.mxu0 %vm439_vm3, %v2038_v37 }
  0xcf   : > { %4865 = vmatmul.mubr.msk.bf16.gmra.mxu1 %vm439_vm3, %v5468_v32  ;;  %v2041_v32 = vpack.c.bf16 %v2019_v46, %v2018_v29 }
  0xd0   : > { %4868 = vmatprep.mubr.msk.bf16.mxu1 %vm439_vm3, %v5476_v44  ;;  %v2022_v44 = vld [vmem:[#allocation2 + $0x103] sm:$0xff] }
  0xd4   : > { %4903 = vmatmul.mubr.msk.bf16.gmra.mxu0 %vm439_vm3, %v2039_v28  ;;  %v2410_v28 = vld [vmem:[#allocation2 + $0xb4] sm:$0xff] }
  0xd5   : > { %4906 = vmatprep.mubr.msk.bf16.mxu0 %vm439_vm3, %v2040_v45  ;;  %v2411_v45 = vld [vmem:[#allocation2 + $0xbc] sm:$0xff] }
  0xd7   : > { %4869 = vmatmul.mubr.msk.bf16.gmra.mxu1 %vm439_vm3, %v5478_v47  ;;  %v2043_v47 = vpack.c.bf16 %v2023_v50, %v2022_v44 }
  0xd8   : > { %4872 = vmatprep.mubr.msk.bf16.mxu1 %vm439_vm3, %v5486_v56  ;;  %v2044_v56 = vpack.c.bf16 %v2025_v52, %v2024_v51  ;;  %v2412_v52 = vld [vmem:[#allocation2 + $0xc4] sm:$0xff] }
  0xdc   : > { %4907 = vmatmul.mubr.msk.bf16.gmra.mxu0 %vm439_vm3, %v2041_v32  ;;  %v2436_v32 = vpack.c.bf16 %v2411_v45, %v2410_v28  ;;  %v2425_v28 = vld [vmem:[#allocation2 + $0x12c] sm:$0xff] }
  0xdd   : > { %4910 = vmatprep.mubr.msk.bf16.mxu0 %vm439_vm3, %v2042_v49  ;;  %v3186_v45 = vld [vmem:[#allocation2 + $0x25] sm:$0xff] }
  0xdf   : > { %4873 = vmatmul.mubr.msk.bf16.gmra.mxu1 %vm439_vm3, %v5488_v59  ;;  %v2045_v59 = vpack.c.bf16 %v2027_v63, %v2026_v62 }
  0xe0   : > { %4876 = vmatprep.mubr.msk.bf16.mxu1 %vm439_vm3, %v5495_v2  ;;  %v2393_v2 = vld [vmem:[#allocation2 + $0x2c] sm:$0xff] }
  0xe1   : > { %v2427_v6 = vpack.c.bf16 %v2393_v2, %v2392_v1 }
  0xe4   : > { %4911 = vmatmul.mubr.msk.bf16.gmra.mxu0 %vm439_vm3, %v2043_v47  ;;  %v2413_v47 = vld [vmem:[#allocation2 + $0xcc] sm:$0xff] }
  0xe5   : > { %4914 = vmatprep.mubr.msk.bf16.mxu0 %vm439_vm3, %v2044_v56  ;;  %v2415_v56 = vld [vmem:[#allocation2 + $0xdc] sm:$0xff] }
  0xe6   : > { %v2438_v62 = vpack.c.bf16 %v2415_v56, %v2414_v54 }
  0xe7   : > { %4877 = vmatmul.mubr.msk.bf16.gmra.mxu1 %vm439_vm3, %v1647_v60  ;;  %v2437_v60 = vpack.c.bf16 %v2413_v47, %v2412_v52 }
  0xe8   : > { %4920 = vmatprep.mubr.msk.bf16.mxu1 %vm439_vm3, %v2426_v61 }
  0xec   : > { %4915 = vmatmul.mubr.msk.bf16.gmra.mxu0 %vm439_vm3, %v2045_v59 }
  0xed   : > { %4958 = vmatprep.mubr.msk.bf16.mxu0 %vm439_vm3, %v2427_v6 }
  0xef   : > { %4921 = vmatmul.mubr.msk.bf16.vlgmr.msra.gmra.mxu1 %vm439_vm3, %v2427_v6 }
  0xf0   : > { %4995 = vmatpush3.bf16.msra.mxu1 %v3297_v9  ;;  %4924 = vmatprep.mubr.msk.bf16.mxu1 %vm439_vm3, %v2428_v7  ;;  %v2419_v9 = vld [vmem:[#allocation2 + $0xfc] sm:$0xff] }
  0xf4   : > { %4959 = vmatmul.mubr.msk.bf16.vlgmr.msra.gmra.mxu0 %vm439_vm3, %v2428_v7  ;;  %v2418_v7 = vld [vmem:[#allocation2 + $0xf4] sm:$0xff] }
  0xf5   : > { %5033 = vmatpush3.bf16.msra.mxu0 %v3695_v21  ;;  %4962 = vmatprep.mubr.msk.bf16.mxu0 %vm439_vm3, %v2429_v36  ;;  %v2440_v21 = vpack.c.bf16 %v2419_v9, %v2418_v7 }
  0xf7   : > { %4925 = vmatmul.mubr.msk.bf16.gmra.mxu1 %vm439_vm3, %v2429_v36 }
  0xf8   : > { %4928 = vmatprep.mubr.msk.bf16.mxu1 %vm439_vm3, %v2430_v16 }
  0xfc   : > { %v4732_v22 = vpop.f32.mrf.mxu0  ;;  %4963 = vmatmul.mubr.msk.bf16.gmra.mxu0 %vm439_vm3, %v2430_v16 }
  0xfd   : > { %764 = vst.msk [vmem:[#allocation3 + $0x10] sm:$0xff] %vm439_vm3, %v4732_v22  ;;  %4966 = vmatprep.mubr.msk.bf16.mxu0 %vm439_vm3, %v2431_v41  ;;  %v2421_v22 = vld [vmem:[#allocation2 + $0x10c] sm:$0xff] }
  0xfe   : > { %v619_v23 = vpop.f32.mrf.mxu0 }
  0xff   : > { %v4752_v24 = vpop.f32.mrf.mxu1  ;;  %4929 = vmatmul.mubr.msk.bf16.gmra.mxu1 %vm439_vm3, %v2431_v41  ;;  %762 = vst.msk [vmem:[#allocation3] sm:$0xff] %vm439_vm3, %v619_v23  ;;  %v2420_v41 = vld [vmem:[#allocation2 + $0x104] sm:$0xff] }
 0x100   : > { %784 = vst.msk [vmem:[#allocation3 + $0xb0] sm:$0xff] %vm439_vm3, %v4752_v24  ;;  %v4733_v39 = vpop.f32.mrf.mxu0  ;;  %4932 = vmatprep.mubr.msk.bf16.mxu1 %vm439_vm3, %v2432_v15  ;;  %v2422_v24 = vld [vmem:[#allocation2 + $0x114] sm:$0xff]  ;;  %v2441_v31 = vpack.c.bf16 %v2421_v22, %v2420_v41 }
 0x101   : > { %v699_v27 = vpop.f32.mrf.mxu1  ;;  %765 = vst.msk [vmem:[#allocation3 + $0x18] sm:$0xff] %vm439_vm3, %v4733_v39  ;;  %v2423_v39 = vld [vmem:[#allocation2 + $0x11c] sm:$0xff]  ;;  %v3191_v41 = vld [vmem:[#allocation2 + $0x4d] sm:$0xff] }
 0x102   : > { %782 = vst.msk [vmem:[#allocation3 + $0xa0] sm:$0xff] %vm439_vm3, %v699_v27  ;;  %v622_v55 = vpop.f32.mrf.mxu0 }
 0x103   : > { %v4753_v40 = vpop.f32.mrf.mxu1  ;;  %763 = vst.msk [vmem:[#allocation3 + $0x8] sm:$0xff] %vm439_vm3, %v622_v55 }
 0x104   : > { %785 = vst.msk [vmem:[#allocation3 + $0xb8] sm:$0xff] %vm439_vm3, %v4753_v40  ;;  %v4736_v33 = vpop.f32.mrf.mxu0  ;;  %4967 = vmatmul.mubr.msk.bf16.gmra.mxu0 %vm439_vm3, %v2432_v15  ;;  %v1090_v17 = vld [vmem:[#allocation3 + $0x10] sm:$0xff] }
 0x105   : > { %v702_v35 = vpop.f32.mrf.mxu1  ;;  %768 = vst.msk [vmem:[#allocation3 + $0x30] sm:$0xff] %vm439_vm3, %v4736_v33  ;;  %4970 = vmatprep.mubr.msk.bf16.mxu0 %vm439_vm3, %v2433_v0 }
 0x106   : > { %783 = vst.msk [vmem:[#allocation3 + $0xa8] sm:$0xff] %vm439_vm3, %v702_v35  ;;  %v635_v3 = vpop.f32.mrf.mxu0  ;;  %v1088_v23 = vld [vmem:[#allocation3] sm:$0xff] }
 0x107   : > { %v4756_v37 = vpop.f32.mrf.mxu1  ;;  %4933 = vmatmul.mubr.msk.bf16.gmra.mxu1 %vm439_vm3, %v2433_v0  ;;  %766 = vst.msk [vmem:[#allocation3 + $0x20] sm:$0xff] %vm439_vm3, %v635_v3  ;;  %v2442_v0 = vpack.c.bf16 %v2423_v39, %v2422_v24 }
 0x108   : > { %788 = vst.msk [vmem:[#allocation3 + $0xd0] sm:$0xff] %vm439_vm3, %v4756_v37  ;;  %v4737_v14 = vpop.f32.mrf.mxu0  ;;  %4936 = vmatprep.mubr.msk.bf16.mxu1 %vm439_vm3, %v2434_v34  ;;  %v1091_v30 = vld [vmem:[#allocation3 + $0x18] sm:$0xff] }
 0x109   : > { %v715_v43 = vpop.f32.mrf.mxu1  ;;  %769 = vst.msk [vmem:[#allocation3 + $0x38] sm:$0xff] %vm439_vm3, %v4737_v14 }
 0x10a   : > { %786 = vst.msk [vmem:[#allocation3 + $0xc0] sm:$0xff] %vm439_vm3, %v715_v43  ;;  %v638_v29 = vpop.f32.mrf.mxu0  ;;  %v2424_v43 = vld [vmem:[#allocation2 + $0x124] sm:$0xff] }
 0x10b   : > { %v4757_v46 = vpop.f32.mrf.mxu1  ;;  %767 = vst.msk [vmem:[#allocation3 + $0x28] sm:$0xff] %vm439_vm3, %v638_v29  ;;  %v2443_v47 = vpack.c.bf16 %v2425_v28, %v2424_v43 }
 0x10c   : > { %789 = vst.msk [vmem:[#allocation3 + $0xd8] sm:$0xff] %vm439_vm3, %v4757_v46  ;;  %v4740_v8 = vpop.f32.mrf.mxu0  ;;  %4971 = vmatmul.mubr.msk.bf16.gmra.mxu0 %vm439_vm3, %v2434_v34  ;;  %v1089_v34 = vld [vmem:[#allocation3 + $0x8] sm:$0xff]  ;;  %v1094_v14 = vld [vmem:[#allocation3 + $0x30] sm:$0xff] }
 0x10d   : > { %v718_v49 = vpop.f32.mrf.mxu1  ;;  %772 = vst.msk [vmem:[#allocation3 + $0x50] sm:$0xff] %vm439_vm3, %v4740_v8  ;;  %4974 = vmatprep.mubr.msk.bf16.mxu0 %vm439_vm3, %v2435_v48  ;;  %v3187_v8 = vld [vmem:[#allocation2 + $0x2d] sm:$0xff] }
 0x10e   : > { %787 = vst.msk [vmem:[#allocation3 + $0xc8] sm:$0xff] %vm439_vm3, %v718_v49  ;;  %v651_v44 = vpop.f32.mrf.mxu0 }
 0x10f   : > { %v4760_v50 = vpop.f32.mrf.mxu1  ;;  %4937 = vmatmul.mubr.msk.bf16.gmra.mxu1 %vm439_vm3, %v2435_v48  ;;  %770 = vst.msk [vmem:[#allocation3 + $0x40] sm:$0xff] %vm439_vm3, %v651_v44  ;;  %v1092_v48 = vld [vmem:[#allocation3 + $0x20] sm:$0xff] }
 0x110   : > { %792 = vst.msk [vmem:[#allocation3 + $0xf0] sm:$0xff] %vm439_vm3, %v4760_v50  ;;  %v4741_v51 = vpop.f32.mrf.mxu0  ;;  %4940 = vmatprep.mubr.msk.bf16.mxu1 %vm439_vm3, %v2436_v32  ;;  %v1095_v52 = vld [vmem:[#allocation3 + $0x38] sm:$0xff] }
 0x111   : > { %v731_v53 = vpop.f32.mrf.mxu1  ;;  %773 = vst.msk [vmem:[#allocation3 + $0x58] sm:$0xff] %vm439_vm3, %v4741_v51 }
 0x112   : > { %790 = vst.msk [vmem:[#allocation3 + $0xe0] sm:$0xff] %vm439_vm3, %v731_v53  ;;  %v654_v57 = vpop.f32.mrf.mxu0 }
 0x113   : > { %v4761_v58 = vpop.f32.mrf.mxu1  ;;  %771 = vst.msk [vmem:[#allocation3 + $0x48] sm:$0xff] %vm439_vm3, %v654_v57  ;;  %v2822_v57 = vld [vmem:[#allocation2 + $0x134] sm:$0xff] }
 0x114   : > { %793 = vst.msk [vmem:[#allocation3 + $0xf8] sm:$0xff] %vm439_vm3, %v4761_v58  ;;  %v4744_v61 = vpop.f32.mrf.mxu0  ;;  %4975 = vmatmul.mubr.msk.bf16.gmra.mxu0 %vm439_vm3, %v2436_v32  ;;  %v3222_v58 = vpack.c.bf16 %v3187_v8, %v3186_v45  ;;  %v1098_v9 = vld [vmem:[#allocation3 + $0x50] sm:$0xff] }
 0x115   : > { %v734_v63 = vpop.f32.mrf.mxu1  ;;  %776 = vst.msk [vmem:[#allocation3 + $0x70] sm:$0xff] %vm439_vm3, %v4744_v61  ;;  %4978 = vmatprep.mubr.msk.bf16.mxu0 %vm439_vm3, %v2437_v60 }
 0x116   : > { %791 = vst.msk [vmem:[#allocation3 + $0xe8] sm:$0xff] %vm439_vm3, %v734_v63  ;;  %v667_v59 = vpop.f32.mrf.mxu0  ;;  %v2823_v63 = vld [vmem:[#allocation2 + $0x13c] sm:$0xff] }
 0x117   : > { %v4764_v1 = vpop.f32.mrf.mxu1  ;;  %4941 = vmatmul.mubr.msk.bf16.gmra.mxu1 %vm439_vm3, %v2437_v60  ;;  %774 = vst.msk [vmem:[#allocation3 + $0x60] sm:$0xff] %vm439_vm3, %v667_v59 }
 0x118   : > { %796 = vst.msk [vmem:[#allocation3 + $0x110] sm:$0xff] %vm439_vm3, %v4764_v1  ;;  %v4745_v2 = vpop.f32.mrf.mxu0  ;;  %4944 = vmatprep.mubr.msk.bf16.mxu1 %vm439_vm3, %v2438_v62 }
 0x119   : > { %v747_v6 = vpop.f32.mrf.mxu1  ;;  %777 = vst.msk [vmem:[#allocation3 + $0x78] sm:$0xff] %vm439_vm3, %v4745_v2 }
 0x11a   : > { %794 = vst.msk [vmem:[#allocation3 + $0x100] sm:$0xff] %vm439_vm3, %v747_v6  ;;  %v670_v10 = vpop.f32.mrf.mxu0 }
 0x11b   : > { %v4765_v19 = vpop.f32.mrf.mxu1  ;;  %775 = vst.msk [vmem:[#allocation3 + $0x68] sm:$0xff] %vm439_vm3, %v670_v10 }
 0x11c   : > { %797 = vst.msk [vmem:[#allocation3 + $0x118] sm:$0xff] %vm439_vm3, %v4765_v19  ;;  %v4748_v13 = vpop.f32.mrf.mxu0  ;;  %4979 = vmatmul.mubr.msk.bf16.gmra.mxu0 %vm439_vm3, %v2438_v62  ;;  %v1093_v62 = vld [vmem:[#allocation3 + $0x28] sm:$0xff]  ;;  %v1102_v45 = vld [vmem:[#allocation3 + $0x70] sm:$0xff] }
 0x11d   : > { %v750_v36 = vpop.f32.mrf.mxu1  ;;  %780 = vst.msk [vmem:[#allocation3 + $0x90] sm:$0xff] %vm439_vm3, %v4748_v13  ;;  %4982 = vmatprep.mubr.msk.bf16.mxu0 %vm439_vm3, %v2439_v18  ;;  %v2841_v13 = vpack.c.bf16 %v2823_v63, %v2822_v57 }
 0x11e   : > { %795 = vst.msk [vmem:[#allocation3 + $0x108] sm:$0xff] %vm439_vm3, %v750_v36  ;;  %v683_v16 = vpop.f32.mrf.mxu0  ;;  %v3189_v36 = vld [vmem:[#allocation2 + $0x3d] sm:$0xff] }
 0x11f   : > { %v4770_v12 = vpop.f32.mrf.mxu1  ;;  %4945 = vmatmul.mubr.msk.bf16.gmra.mxu1 %vm439_vm3, %v2439_v18  ;;  %778 = vst.msk [vmem:[#allocation3 + $0x80] sm:$0xff] %vm439_vm3, %v683_v16  ;;  %v3190_v16 = vld [vmem:[#allocation2 + $0x45] sm:$0xff] }
 0x120   : > { %v1126_v26 = vadd.f32 %v4770_v12, %v1090_v17  ;;  %v4749_v20 = vpop.f32.mrf.mxu0  ;;  %4948 = vmatprep.mubr.msk.bf16.mxu1 %vm439_vm3, %v2440_v21 }
 0x121   : > { %v945_v15 = vpop.f32.mrf.mxu1  ;;  %781 = vst.msk [vmem:[#allocation3 + $0x98] sm:$0xff] %vm439_vm3, %v4749_v20  ;;  %v3620_v20 = vpack.c.bf16 %v3585_v5, %v3584_v4  ;;  %v3590_v4 = vld [vmem:[#allocation2 + $0x56] sm:$0xff] }
 0x122   : > { %1162 = vst.msk [vmem:[#allocation3 + $0x10] sm:$0xff] %vm439_vm3, %v1126_v26  ;;  %v1124_v25 = vadd.f32 %v1088_v23, %v945_v15  ;;  %v686_v11 = vpop.f32.mrf.mxu0  ;;  %v1096_v26 = vld [vmem:[#allocation3 + $0x40] sm:$0xff] }
 0x123   : > { %v4771_v27 = vpop.f32.mrf.mxu1  ;;  %779 = vst.msk [vmem:[#allocation3 + $0x88] sm:$0xff] %vm439_vm3, %v686_v11 }
 0x124   : > { %1160 = vst.msk [vmem:[#allocation3] sm:$0xff] %vm439_vm3, %v1124_v25  ;;  %v1127_v55 = vadd.f32 %v4771_v27, %v1091_v30  ;;  %v4808_v40 = vpop.f32.mrf.mxu0  ;;  %4983 = vmatmul.mubr.msk.bf16.gmra.mxu0 %vm439_vm3, %v2440_v21  ;;  %v3188_v21 = vld [vmem:[#allocation2 + $0x35] sm:$0xff]  ;;  %v1099_v25 = vld [vmem:[#allocation3 + $0x58] sm:$0xff] }
 0x125   : > { %v948_v33 = vpop.f32.mrf.mxu1  ;;  %4986 = vmatprep.mubr.msk.bf16.mxu0 %vm439_vm3, %v2441_v31  ;;  %v3223_v11 = vpack.c.bf16 %v3189_v36, %v3188_v21  ;;  %v3593_v21 = vld [vmem:[#allocation2 + $0x6e] sm:$0xff] }
 0x126   : > { %1163 = vst.msk [vmem:[#allocation3 + $0x18] sm:$0xff] %vm439_vm3, %v1127_v55  ;;  %v1125_v35 = vadd.f32 %v1089_v34, %v948_v33  ;;  %v1343_v3 = vpop.f32.mrf.mxu0  ;;  %v3224_v55 = vpack.c.bf16 %v3191_v41, %v3190_v16  ;;  %v1097_v34 = vld [vmem:[#allocation3 + $0x48] sm:$0xff] }
 0x127   : > { %v4774_v37 = vpop.f32.mrf.mxu1  ;;  %4949 = vmatmul.mubr.msk.bf16.gmra.mxu1 %vm439_vm3, %v2441_v31 }
 0x128   : > { %1161 = vst.msk [vmem:[#allocation3 + $0x8] sm:$0xff] %vm439_vm3, %v1125_v35  ;;  %v1130_v38 = vadd.f32 %v4774_v37, %v1094_v14  ;;  %v4809_v42 = vpop.f32.mrf.mxu0  ;;  %4952 = vmatprep.mubr.msk.bf16.mxu1 %vm439_vm3, %v2442_v0  ;;  %v3587_v35 = vld [vmem:[#allocation2 + $0x3e] sm:$0xff] }
 0x129   : > { %v1488_v29 = vld [vmem:[#allocation3 + $0x10] sm:$0xff]  ;;  %v961_v46 = vpop.f32.mrf.mxu1 }
 0x12a   : > { %v1524_v32 = vadd.f32 %v4808_v40, %v1488_v29  ;;  %1166 = vst.msk [vmem:[#allocation3 + $0x30] sm:$0xff] %vm439_vm3, %v1130_v38  ;;  %v1128_v49 = vadd.f32 %v1092_v48, %v961_v46  ;;  %v1346_v44 = vpop.f32.mrf.mxu0  ;;  %v3586_v40 = vld [vmem:[#allocation2 + $0x36] sm:$0xff]  ;;  %v3588_v38 = vld [vmem:[#allocation2 + $0x46] sm:$0xff] }
 0x12b   : > { %v1486_v50 = vld [vmem:[#allocation3] sm:$0xff]  ;;  %v4775_v51 = vpop.f32.mrf.mxu1  ;;  %v3621_v8 = vpack.c.bf16 %v3587_v35, %v3586_v40 }
 0x12c   : > { %1560 = vst.msk [vmem:[#allocation3 + $0x10] sm:$0xff] %vm439_vm3, %v1524_v32  ;;  %v1522_v53 = vadd.f32 %v1486_v50, %v1343_v3  ;;  %1164 = vst.msk [vmem:[#allocation3 + $0x20] sm:$0xff] %vm439_vm3, %v1128_v49  ;;  %v1131_v54 = vadd.f32 %v4775_v51, %v1095_v52  ;;  %v4812_v56 = vpop.f32.mrf.mxu0  ;;  %4987 = vmatmul.mubr.msk.bf16.gmra.mxu0 %vm439_vm3, %v2442_v0  ;;  %v3192_v32 = vld [vmem:[#allocation2 + $0x55] sm:$0xff]  ;;  %v3193_v49 = vld [vmem:[#allocation2 + $0x5d] sm:$0xff] }
 0x12d   : > { %v1489_v60 = vld [vmem:[#allocation3 + $0x18] sm:$0xff]  ;;  %v964_v61 = vpop.f32.mrf.mxu1  ;;  %4990 = vmatprep.mubr.msk.bf16.mxu0 %vm439_vm3, %v2443_v47  ;;  %v1100_v52 = vld [vmem:[#allocation3 + $0x60] sm:$0xff] }
 0x12e   : > { %1558 = vst.msk [vmem:[#allocation3] sm:$0xff] %vm439_vm3, %v1522_v53  ;;  %v1525_v59 = vadd.f32 %v4809_v42, %v1489_v60  ;;  %1167 = vst.msk [vmem:[#allocation3 + $0x38] sm:$0xff] %vm439_vm3, %v1131_v54  ;;  %v1129_v1 = vadd.f32 %v1093_v62, %v964_v61  ;;  %v1359_v2 = vpop.f32.mrf.mxu0  ;;  %v3589_v42 = vld [vmem:[#allocation2 + $0x4e] sm:$0xff]  ;;  %v1103_v61 = vld [vmem:[#allocation3 + $0x78] sm:$0xff]  ;;  %v3225_v62 = vpack.c.bf16 %v3193_v49, %v3192_v32 }
 0x12f   : > { %v1487_v6 = vld [vmem:[#allocation3 + $0x8] sm:$0xff]  ;;  %v4778_v7 = vpop.f32.mrf.mxu1  ;;  %4953 = vmatmul.mubr.msk.bf16.gmra.mxu1 %vm439_vm3, %v2443_v47  ;;  %v3622_v47 = vpack.c.bf16 %v3589_v42, %v3588_v38 }
 0x130   : > { %1561 = vst.msk [vmem:[#allocation3 + $0x18] sm:$0xff] %vm439_vm3, %v1525_v59  ;;  %v1523_v10 = vadd.f32 %v1487_v6, %v1346_v44  ;;  %1165 = vst.msk [vmem:[#allocation3 + $0x28] sm:$0xff] %vm439_vm3, %v1129_v1  ;;  %v1134_v19 = vadd.f32 %v4778_v7, %v1098_v9  ;;  %v4813_v18 = vpop.f32.mrf.mxu0  ;;  %4996 = vmatprep.mubr.msk.bf16.mxu1 %vm439_vm3, %v3222_v58  ;;  %v3194_v44 = vld [vmem:[#allocation2 + $0x65] sm:$0xff]  ;;  %v3195_v53 = vld [vmem:[#allocation2 + $0x6d] sm:$0xff] }
 0x131   : > { %v1492_v12 = vld [vmem:[#allocation3 + $0x30] sm:$0xff]  ;;  %v977_v17 = vpop.f32.mrf.mxu1  ;;  %v1101_v7 = vld [vmem:[#allocation3 + $0x68] sm:$0xff] }
 0x132   : > { %1559 = vst.msk [vmem:[#allocation3 + $0x8] sm:$0xff] %vm439_vm3, %v1523_v10  ;;  %v1528_v22 = vadd.f32 %v4812_v56, %v1492_v12  ;;  %1170 = vst.msk [vmem:[#allocation3 + $0x50] sm:$0xff] %vm439_vm3, %v1134_v19  ;;  %v1132_v15 = vadd.f32 %v1096_v26, %v977_v17  ;;  %v1362_v23 = vpop.f32.mrf.mxu0  ;;  %v3591_v9 = vld [vmem:[#allocation2 + $0x5e] sm:$0xff]  ;;  %v3594_v38 = vld [vmem:[#allocation2 + $0x76] sm:$0xff] }
 0x133   : > { %v1490_v24 = vld [vmem:[#allocation3 + $0x20] sm:$0xff]  ;;  %v4779_v39 = vpop.f32.mrf.mxu1  ;;  %v1106_v12 = vld [vmem:[#allocation3 + $0x90] sm:$0xff]  ;;  %v3623_v41 = vpack.c.bf16 %v3591_v9, %v3590_v4 }
 0x134   : > { %1564 = vst.msk [vmem:[#allocation3 + $0x30] sm:$0xff] %vm439_vm3, %v1528_v22  ;;  %v1526_v27 = vadd.f32 %v1490_v24, %v1359_v2  ;;  %1168 = vst.msk [vmem:[#allocation3 + $0x40] sm:$0xff] %vm439_vm3, %v1132_v15  ;;  %v1135_v30 = vadd.f32 %v4779_v39, %v1099_v25  ;;  %v4816_v31 = vpop.f32.mrf.mxu0  ;;  %4991 = vmatmul.mubr.msk.bf16.gmra.mxu0 %vm439_vm3, %v2841_v13  ;;  %v3226_v2 = vpack.c.bf16 %v3195_v53, %v3194_v44  ;;  %v3592_v13 = vld [vmem:[#allocation2 + $0x66] sm:$0xff]  ;;  %v3196_v22 = vld [vmem:[#allocation2 + $0x75] sm:$0xff] }
 0x135   : > { %v1493_v0 = vld [vmem:[#allocation3 + $0x38] sm:$0xff]  ;;  %v980_v33 = vpop.f32.mrf.mxu1  ;;  %5034 = vmatprep.mubr.msk.bf16.mxu0 %vm439_vm3, %v3620_v20  ;;  %v1104_v25 = vld [vmem:[#allocation3 + $0x80] sm:$0xff] }
 0x136   : > { %1562 = vst.msk [vmem:[#allocation3 + $0x20] sm:$0xff] %vm439_vm3, %v1526_v27  ;;  %v1529_v3 = vadd.f32 %v4813_v18, %v1493_v0  ;;  %1171 = vst.msk [vmem:[#allocation3 + $0x58] sm:$0xff] %vm439_vm3, %v1135_v30  ;;  %v1133_v37 = vadd.f32 %v1097_v34, %v980_v33  ;;  %v1375_v14 = vpop.f32.mrf.mxu0  ;;  %v3197_v15 = vld [vmem:[#allocation2 + $0x7d] sm:$0xff]  ;;  %v3199_v27 = vld [vmem:[#allocation2 + $0x8d] sm:$0xff] }
 0x137   : > { %v1491_v43 = vld [vmem:[#allocation3 + $0x28] sm:$0xff]  ;;  %v4782_v28 = vpop.f32.mrf.mxu1  ;;  %4997 = vmatmul.mubr.msk.bf16.vlgmr.msra.gmra.mxu1 %vm439_vm3, %v3223_v11  ;;  %v3624_v11 = vpack.c.bf16 %v3593_v21, %v3592_v13  ;;  %v1107_v33 = vld [vmem:[#allocation3 + $0x98] sm:$0xff]  ;;  %v3227_v34 = vpack.c.bf16 %v3197_v15, %v3196_v22 }
 0x138   : > { %1565 = vst.msk [vmem:[#allocation3 + $0x38] sm:$0xff] %vm439_vm3, %v1529_v3  ;;  %v1527_v29 = vadd.f32 %v1491_v43, %v1362_v23  ;;  %1169 = vst.msk [vmem:[#allocation3 + $0x48] sm:$0xff] %vm439_vm3, %v1133_v37  ;;  %v1138_v46 = vadd.f32 %v4782_v28, %v1102_v45  ;;  %v4817_v48 = vpop.f32.mrf.mxu0  ;;  %5000 = vmatprep.mubr.msk.bf16.mxu1 %vm439_vm3, %v3224_v55  ;;  %v3198_v23 = vld [vmem:[#allocation2 + $0x85] sm:$0xff]  ;;  %v1105_v28 = vld [vmem:[#allocation3 + $0x88] sm:$0xff] }
 0x139   : > { %v1496_v50 = vld [vmem:[#allocation3 + $0x50] sm:$0xff]  ;;  %v993_v51 = vpop.f32.mrf.mxu1  ;;  %v3597_v32 = vld [vmem:[#allocation2 + $0x8e] sm:$0xff] }
 0x13a   : > { %1563 = vst.msk [vmem:[#allocation3 + $0x28] sm:$0xff] %vm439_vm3, %v1527_v29  ;;  %v1532_v54 = vadd.f32 %v4816_v31, %v1496_v50  ;;  %1174 = vst.msk [vmem:[#allocation3 + $0x70] sm:$0xff] %vm439_vm3, %v1138_v46  ;;  %v1136_v56 = vadd.f32 %v1100_v52, %v993_v51  ;;  %v1378_v57 = vpop.f32.mrf.mxu0  ;;  %v3595_v45 = vld [vmem:[#allocation2 + $0x7e] sm:$0xff]  ;;  %v3598_v13 = vld [vmem:[#allocation2 + $0x96] sm:$0xff] }
 0x13b   : > { %v1494_v58 = vld [vmem:[#allocation3 + $0x40] sm:$0xff]  ;;  %v4783_v60 = vpop.f32.mrf.mxu1  ;;  %v1110_v50 = vld [vmem:[#allocation3 + $0xb0] sm:$0xff]  ;;  %v3625_v53 = vpack.c.bf16 %v3595_v45, %v3594_v38 }
 0x13c   : > { %1568 = vst.msk [vmem:[#allocation3 + $0x50] sm:$0xff] %vm439_vm3, %v1532_v54  ;;  %v1530_v63 = vadd.f32 %v1494_v58, %v1375_v14  ;;  %1172 = vst.msk [vmem:[#allocation3 + $0x60] sm:$0xff] %vm439_vm3, %v1136_v56  ;;  %v1139_v59 = vadd.f32 %v4783_v60, %v1103_v61  ;;  %v4820_v1 = vpop.f32.mrf.mxu0  ;;  %5035 = vmatmul.mubr.msk.bf16.vlgmr.msra.gmra.mxu0 %vm439_vm3, %v3621_v8  ;;  %v3228_v14 = vpack.c.bf16 %v3199_v27, %v3198_v23  ;;  %v3596_v8 = vld [vmem:[#allocation2 + $0x86] sm:$0xff]  ;;  %v3200_v54 = vld [vmem:[#allocation2 + $0x95] sm:$0xff] }
 0x13d   : > { %v1497_v5 = vld [vmem:[#allocation3 + $0x58] sm:$0xff]  ;;  %v996_v6 = vpop.f32.mrf.mxu1  ;;  %5038 = vmatprep.mubr.msk.bf16.mxu0 %vm439_vm3, %v3622_v47  ;;  %v1108_v61 = vld [vmem:[#allocation3 + $0xa0] sm:$0xff] }
 0x13e   : > { %1566 = vst.msk [vmem:[#allocation3 + $0x40] sm:$0xff] %vm439_vm3, %v1530_v63  ;;  %v1533_v10 = vadd.f32 %v4817_v48, %v1497_v5  ;;  %1175 = vst.msk [vmem:[#allocation3 + $0x78] sm:$0xff] %vm439_vm3, %v1139_v59  ;;  %v1137_v19 = vadd.f32 %v1101_v7, %v996_v6  ;;  %v1391_v18 = vpop.f32.mrf.mxu0  ;;  %v3201_v56 = vld [vmem:[#allocation2 + $0x9d] sm:$0xff]  ;;  %v3203_v63 = vld [vmem:[#allocation2 + $0xad] sm:$0xff] }
 0x13f   : > { %v1495_v36 = vld [vmem:[#allocation3 + $0x48] sm:$0xff]  ;;  %v4786_v16 = vpop.f32.mrf.mxu1  ;;  %5001 = vmatmul.mubr.msk.bf16.gmra.mxu1 %vm439_vm3, %v3225_v62  ;;  %v3626_v62 = vpack.c.bf16 %v3597_v32, %v3596_v8  ;;  %v1111_v6 = vld [vmem:[#allocation3 + $0xb8] sm:$0xff]  ;;  %v3229_v7 = vpack.c.bf16 %v3201_v56, %v3200_v54 }
 0x140   : > { %1569 = vst.msk [vmem:[#allocation3 + $0x58] sm:$0xff] %vm439_vm3, %v1533_v10  ;;  %v1531_v17 = vadd.f32 %v1495_v36, %v1378_v57  ;;  %1173 = vst.msk [vmem:[#allocation3 + $0x68] sm:$0xff] %vm439_vm3, %v1137_v19  ;;  %v1142_v26 = vadd.f32 %v4786_v16, %v1106_v12  ;;  %v4821_v20 = vpop.f32.mrf.mxu0  ;;  %5004 = vmatprep.mubr.msk.bf16.mxu1 %vm439_vm3, %v3226_v2  ;;  %v3202_v57 = vld [vmem:[#allocation2 + $0xa5] sm:$0xff]  ;;  %v1109_v16 = vld [vmem:[#allocation3 + $0xa8] sm:$0xff] }
 0x141   : > { %v1500_v24 = vld [vmem:[#allocation3 + $0x70] sm:$0xff]  ;;  %v1009_v39 = vpop.f32.mrf.mxu1  ;;  %v3601_v22 = vld [vmem:[#allocation2 + $0xae] sm:$0xff] }
 0x142   : > { %1567 = vst.msk [vmem:[#allocation3 + $0x48] sm:$0xff] %vm439_vm3, %v1531_v17  ;;  %v1536_v30 = vadd.f32 %v4820_v1, %v1500_v24  ;;  %1178 = vst.msk [vmem:[#allocation3 + $0x90] sm:$0xff] %vm439_vm3, %v1142_v26  ;;  %v1140_v31 = vadd.f32 %v1104_v25, %v1009_v39  ;;  %v1394_v55 = vpop.f32.mrf.mxu0  ;;  %v3599_v12 = vld [vmem:[#allocation2 + $0x9e] sm:$0xff]  ;;  %v3602_v8 = vld [vmem:[#allocation2 + $0xb6] sm:$0xff] }
 0x143   : > { %v1498_v40 = vld [vmem:[#allocation3 + $0x60] sm:$0xff]  ;;  %v4787_v0 = vpop.f32.mrf.mxu1  ;;  %v1114_v24 = vld [vmem:[#allocation3 + $0xd0] sm:$0xff]  ;;  %v3627_v27 = vpack.c.bf16 %v3599_v12, %v3598_v13 }
 0x144   : > { %1572 = vst.msk [vmem:[#allocation3 + $0x70] sm:$0xff] %vm439_vm3, %v1536_v30  ;;  %v1534_v35 = vadd.f32 %v1498_v40, %v1391_v18  ;;  %1176 = vst.msk [vmem:[#allocation3 + $0x80] sm:$0xff] %vm439_vm3, %v1140_v31  ;;  %v1143_v3 = vadd.f32 %v4787_v0, %v1107_v33  ;;  %v4824_v37 = vpop.f32.mrf.mxu0  ;;  %5039 = vmatmul.mubr.msk.bf16.gmra.mxu0 %vm439_vm3, %v3623_v41  ;;  %v3230_v18 = vpack.c.bf16 %v3203_v63, %v3202_v57  ;;  %v3600_v41 = vld [vmem:[#allocation2 + $0xa6] sm:$0xff]  ;;  %v3204_v30 = vld [vmem:[#allocation2 + $0xb5] sm:$0xff] }
 0x145   : > { %v1501_v42 = vld [vmem:[#allocation3 + $0x78] sm:$0xff]  ;;  %v1012_v43 = vpop.f32.mrf.mxu1  ;;  %5042 = vmatprep.mubr.msk.bf16.mxu0 %vm439_vm3, %v3624_v11  ;;  %v1112_v33 = vld [vmem:[#allocation3 + $0xc0] sm:$0xff] }
 0x146   : > { %1570 = vst.msk [vmem:[#allocation3 + $0x60] sm:$0xff] %vm439_vm3, %v1534_v35  ;;  %v1537_v29 = vadd.f32 %v4821_v20, %v1501_v42  ;;  %1179 = vst.msk [vmem:[#allocation3 + $0x98] sm:$0xff] %vm439_vm3, %v1143_v3  ;;  %v1141_v46 = vadd.f32 %v1105_v28, %v1012_v43  ;;  %v1407_v48 = vpop.f32.mrf.mxu0  ;;  %v3205_v31 = vld [vmem:[#allocation2 + $0xbd] sm:$0xff]  ;;  %v3207_v35 = vld [vmem:[#allocation2 + $0xcd] sm:$0xff] }
 0x147   : > { %v1499_v49 = vld [vmem:[#allocation3 + $0x68] sm:$0xff]  ;;  %v4790_v44 = vpop.f32.mrf.mxu1  ;;  %5005 = vmatmul.mubr.msk.bf16.gmra.mxu1 %vm439_vm3, %v3227_v34  ;;  %v3628_v34 = vpack.c.bf16 %v3601_v22, %v3600_v41  ;;  %v1115_v43 = vld [vmem:[#allocation3 + $0xd8] sm:$0xff]  ;;  %v3231_v28 = vpack.c.bf16 %v3205_v31, %v3204_v30 }
 0x148   : > { %1573 = vst.msk [vmem:[#allocation3 + $0x78] sm:$0xff] %vm439_vm3, %v1537_v29  ;;  %v1535_v51 = vadd.f32 %v1499_v49, %v1394_v55  ;;  %1177 = vst.msk [vmem:[#allocation3 + $0x88] sm:$0xff] %vm439_vm3, %v1141_v46  ;;  %v1146_v52 = vadd.f32 %v4790_v44, %v1110_v50  ;;  %v4825_v47 = vpop.f32.mrf.mxu0  ;;  %5008 = vmatprep.mubr.msk.bf16.mxu1 %vm439_vm3, %v3228_v14  ;;  %v3206_v55 = vld [vmem:[#allocation2 + $0xc5] sm:$0xff]  ;;  %v1113_v44 = vld [vmem:[#allocation3 + $0xc8] sm:$0xff] }
 0x149   : > { %v1504_v58 = vld [vmem:[#allocation3 + $0x90] sm:$0xff]  ;;  %v1025_v60 = vpop.f32.mrf.mxu1  ;;  %v3605_v54 = vld [vmem:[#allocation2 + $0xce] sm:$0xff] }
 0x14a   : > { %1571 = vst.msk [vmem:[#allocation3 + $0x68] sm:$0xff] %vm439_vm3, %v1535_v51  ;;  %v1540_v59 = vadd.f32 %v4824_v37, %v1504_v58  ;;  %1182 = vst.msk [vmem:[#allocation3 + $0xb0] sm:$0xff] %vm439_vm3, %v1146_v52  ;;  %v1144_v1 = vadd.f32 %v1108_v61, %v1025_v60  ;;  %v1410_v2 = vpop.f32.mrf.mxu0  ;;  %v3603_v50 = vld [vmem:[#allocation2 + $0xbe] sm:$0xff]  ;;  %v3606_v41 = vld [vmem:[#allocation2 + $0xd6] sm:$0xff] }
 0x14b   : > { %v1502_v4 = vld [vmem:[#allocation3 + $0x80] sm:$0xff]  ;;  %v4791_v5 = vpop.f32.mrf.mxu1  ;;  %v1118_v58 = vld [vmem:[#allocation3 + $0xf0] sm:$0xff]  ;;  %v3629_v63 = vpack.c.bf16 %v3603_v50, %v3602_v8 }
 0x14c   : > { %1576 = vst.msk [vmem:[#allocation3 + $0x90] sm:$0xff] %vm439_vm3, %v1540_v59  ;;  %v1538_v9 = vadd.f32 %v1502_v4, %v1407_v48  ;;  %1180 = vst.msk [vmem:[#allocation3 + $0xa0] sm:$0xff] %vm439_vm3, %v1144_v1  ;;  %v1147_v10 = vadd.f32 %v4791_v5, %v1111_v6  ;;  %v4828_v19 = vpop.f32.mrf.mxu0  ;;  %5043 = vmatmul.mubr.msk.bf16.gmra.mxu0 %vm439_vm3, %v3625_v53  ;;  %v3232_v48 = vpack.c.bf16 %v3207_v35, %v3206_v55  ;;  %v3604_v53 = vld [vmem:[#allocation2 + $0xc6] sm:$0xff]  ;;  %v3208_v59 = vld [vmem:[#allocation2 + $0xd5] sm:$0xff] }
 0x14d   : > { %v1505_v21 = vld [vmem:[#allocation3 + $0x98] sm:$0xff]  ;;  %v1028_v36 = vpop.f32.mrf.mxu1  ;;  %5046 = vmatprep.mubr.msk.bf16.mxu0 %vm439_vm3, %v3626_v62  ;;  %v1116_v6 = vld [vmem:[#allocation3 + $0xe0] sm:$0xff] }
 0x14e   : > { %1574 = vst.msk [vmem:[#allocation3 + $0x80] sm:$0xff] %vm439_vm3, %v1538_v9  ;;  %v1541_v17 = vadd.f32 %v4825_v47, %v1505_v21  ;;  %1183 = vst.msk [vmem:[#allocation3 + $0xb8] sm:$0xff] %vm439_vm3, %v1147_v10  ;;  %v1145_v26 = vadd.f32 %v1109_v16, %v1028_v36  ;;  %v1423_v20 = vpop.f32.mrf.mxu0  ;;  %v3209_v1 = vld [vmem:[#allocation2 + $0xdd] sm:$0xff]  ;;  %v3211_v9 = vld [vmem:[#allocation2 + $0xed] sm:$0xff] }
 0x14f   : > { %v1503_v15 = vld [vmem:[#allocation3 + $0x88] sm:$0xff]  ;;  %v4794_v23 = vpop.f32.mrf.mxu1  ;;  %5009 = vmatmul.mubr.msk.bf16.gmra.mxu1 %vm439_vm3, %v3229_v7  ;;  %v3630_v7 = vpack.c.bf16 %v3605_v54, %v3604_v53  ;;  %v1119_v36 = vld [vmem:[#allocation3 + $0xf8] sm:$0xff]  ;;  %v3233_v16 = vpack.c.bf16 %v3209_v1, %v3208_v59 }
 0x150   : > { %1577 = vst.msk [vmem:[#allocation3 + $0x98] sm:$0xff] %vm439_vm3, %v1541_v17  ;;  %v1539_v39 = vadd.f32 %v1503_v15, %v1410_v2  ;;  %1181 = vst.msk [vmem:[#allocation3 + $0xa8] sm:$0xff] %vm439_vm3, %v1145_v26  ;;  %v1150_v25 = vadd.f32 %v4794_v23, %v1114_v24  ;;  %v4829_v11 = vpop.f32.mrf.mxu0  ;;  %5012 = vmatprep.mubr.msk.bf16.mxu1 %vm439_vm3, %v3230_v18  ;;  %v3210_v2 = vld [vmem:[#allocation2 + $0xe5] sm:$0xff]  ;;  %v1117_v23 = vld [vmem:[#allocation3 + $0xe8] sm:$0xff] }
 0x151   : > { %v1508_v40 = vld [vmem:[#allocation3 + $0xb0] sm:$0xff]  ;;  %v1041_v0 = vpop.f32.mrf.mxu1  ;;  %v3609_v30 = vld [vmem:[#allocation2 + $0xee] sm:$0xff] }
 0x152   : > { %1575 = vst.msk [vmem:[#allocation3 + $0x88] sm:$0xff] %vm439_vm3, %v1539_v39  ;;  %v1544_v3 = vadd.f32 %v4828_v19, %v1508_v40  ;;  %1186 = vst.msk [vmem:[#allocation3 + $0xd0] sm:$0xff] %vm439_vm3, %v1150_v25  ;;  %v1148_v37 = vadd.f32 %v1112_v33, %v1041_v0  ;;  %v1426_v14 = vpop.f32.mrf.mxu0  ;;  %v3607_v24 = vld [vmem:[#allocation2 + $0xde] sm:$0xff]  ;;  %v3610_v53 = vld [vmem:[#allocation2 + $0xf6] sm:$0xff] }
 0x153   : > { %v1506_v38 = vld [vmem:[#allocation3 + $0xa0] sm:$0xff]  ;;  %v4795_v42 = vpop.f32.mrf.mxu1  ;;  %v1122_v40 = vld [vmem:[#allocation3 + $0x110] sm:$0xff]  ;;  %v3631_v35 = vpack.c.bf16 %v3607_v24, %v3606_v41 }
 0x154   : > { %1580 = vst.msk [vmem:[#allocation3 + $0xb0] sm:$0xff] %vm439_vm3, %v1544_v3  ;;  %v1542_v45 = vadd.f32 %v1506_v38, %v1423_v20  ;;  %1184 = vst.msk [vmem:[#allocation3 + $0xc0] sm:$0xff] %vm439_vm3, %v1148_v37  ;;  %v1151_v29 = vadd.f32 %v4795_v42, %v1115_v43  ;;  %v4832_v46 = vpop.f32.mrf.mxu0  ;;  %5047 = vmatmul.mubr.msk.bf16.gmra.mxu0 %vm439_vm3, %v3627_v27  ;;  %v3234_v20 = vpack.c.bf16 %v3211_v9, %v3210_v2  ;;  %v3608_v27 = vld [vmem:[#allocation2 + $0xe6] sm:$0xff]  ;;  %v3212_v3 = vld [vmem:[#allocation2 + $0xf5] sm:$0xff] }
 0x155   : > { %v1509_v32 = vld [vmem:[#allocation3 + $0xb8] sm:$0xff]  ;;  %v1044_v49 = vpop.f32.mrf.mxu1  ;;  %5050 = vmatprep.mubr.msk.bf16.mxu0 %vm439_vm3, %v3628_v34  ;;  %v1120_v43 = vld [vmem:[#allocation3 + $0x100] sm:$0xff] }
 0x156   : > { %1578 = vst.msk [vmem:[#allocation3 + $0xa0] sm:$0xff] %vm439_vm3, %v1542_v45  ;;  %v1545_v51 = vadd.f32 %v4829_v11, %v1509_v32  ;;  %1187 = vst.msk [vmem:[#allocation3 + $0xd8] sm:$0xff] %vm439_vm3, %v1151_v29  ;;  %v1149_v52 = vadd.f32 %v1113_v44, %v1044_v49  ;;  %v1439_v47 = vpop.f32.mrf.mxu0  ;;  %v3213_v37 = vld [vmem:[#allocation2 + $0xfd] sm:$0xff]  ;;  %v3215_v45 = vld [vmem:[#allocation2 + $0x10d] sm:$0xff] }
 0x157   : > { %v1507_v56 = vld [vmem:[#allocation3 + $0xa8] sm:$0xff]  ;;  %v4798_v57 = vpop.f32.mrf.mxu1  ;;  %5013 = vmatmul.mubr.msk.bf16.gmra.mxu1 %vm439_vm3, %v3231_v28  ;;  %v3632_v28 = vpack.c.bf16 %v3609_v30, %v3608_v27  ;;  %v1123_v49 = vld [vmem:[#allocation3 + $0x118] sm:$0xff]  ;;  %v3235_v44 = vpack.c.bf16 %v3213_v37, %v3212_v3 }
 0x158   : > { %1581 = vst.msk [vmem:[#allocation3 + $0xb8] sm:$0xff] %vm439_vm3, %v1545_v51  ;;  %v1543_v60 = vadd.f32 %v1507_v56, %v1426_v14  ;;  %1185 = vst.msk [vmem:[#allocation3 + $0xc8] sm:$0xff] %vm439_vm3, %v1149_v52  ;;  %v1154_v61 = vadd.f32 %v4798_v57, %v1118_v58  ;;  %v4833_v62 = vpop.f32.mrf.mxu0  ;;  %5016 = vmatprep.mubr.msk.bf16.mxu1 %vm439_vm3, %v3232_v48  ;;  %v3214_v14 = vld [vmem:[#allocation2 + $0x105] sm:$0xff]  ;;  %v1121_v57 = vld [vmem:[#allocation3 + $0x108] sm:$0xff] }
 0x159   : > { %v1512_v4 = vld [vmem:[#allocation3 + $0xd0] sm:$0xff]  ;;  %v1057_v5 = vpop.f32.mrf.mxu1  ;;  %v3613_v59 = vld [vmem:[#allocation2 + $0x10e] sm:$0xff] }
 0x15a   : > { %1579 = vst.msk [vmem:[#allocation3 + $0xa8] sm:$0xff] %vm439_vm3, %v1543_v60  ;;  %v1548_v10 = vadd.f32 %v4832_v46, %v1512_v4  ;;  %1190 = vst.msk [vmem:[#allocation3 + $0xf0] sm:$0xff] %vm439_vm3, %v1154_v61  ;;  %v1152_v19 = vadd.f32 %v1116_v6, %v1057_v5  ;;  %v1442_v18 = vpop.f32.mrf.mxu0  ;;  %v3611_v58 = vld [vmem:[#allocation2 + $0xfe] sm:$0xff]  ;;  %v3614_v27 = vld [vmem:[#allocation2 + $0x116] sm:$0xff] }
 0x15b   : > { %v1510_v13 = vld [vmem:[#allocation3 + $0xc0] sm:$0xff]  ;;  %v4799_v21 = vpop.f32.mrf.mxu1  ;;  %v1886_v4 = vld [vmem:[#allocation3 + $0x10] sm:$0xff]  ;;  %v3633_v9 = vpack.c.bf16 %v3611_v58, %v3610_v53  ;;  %v1891_v53 = vld [vmem:[#allocation3 + $0x38] sm:$0xff] }
 0x15c   : > { %1584 = vst.msk [vmem:[#allocation3 + $0xd0] sm:$0xff] %vm439_vm3, %v1548_v10  ;;  %v1546_v12 = vadd.f32 %v1510_v13, %v1439_v47  ;;  %1188 = vst.msk [vmem:[#allocation3 + $0xe0] sm:$0xff] %vm439_vm3, %v1152_v19  ;;  %v1155_v17 = vadd.f32 %v4799_v21, %v1119_v36  ;;  %v4836_v26 = vpop.f32.mrf.mxu0  ;;  %5051 = vmatmul.mubr.msk.bf16.gmra.mxu0 %vm439_vm3, %v3629_v63  ;;  %v3236_v47 = vpack.c.bf16 %v3215_v45, %v3214_v14  ;;  %v3612_v63 = vld [vmem:[#allocation2 + $0x106] sm:$0xff]  ;;  %v3216_v10 = vld [vmem:[#allocation2 + $0x115] sm:$0xff] }
 0x15d   : > { %v1513_v22 = vld [vmem:[#allocation3 + $0xd8] sm:$0xff]  ;;  %v1060_v15 = vpop.f32.mrf.mxu1  ;;  %5054 = vmatprep.mubr.msk.bf16.mxu0 %vm439_vm3, %v3630_v7  ;;  %v1884_v36 = vld [vmem:[#allocation3] sm:$0xff] }
 0x15e   : > { %1582 = vst.msk [vmem:[#allocation3 + $0xc0] sm:$0xff] %vm439_vm3, %v1546_v12  ;;  %v1549_v39 = vadd.f32 %v4833_v62, %v1513_v22  ;;  %1191 = vst.msk [vmem:[#allocation3 + $0xf8] sm:$0xff] %vm439_vm3, %v1155_v17  ;;  %v1153_v25 = vadd.f32 %v1117_v23, %v1060_v15  ;;  %v1455_v11 = vpop.f32.mrf.mxu0  ;;  %v3217_v19 = vld [vmem:[#allocation2 + $0x11d] sm:$0xff]  ;;  %v3219_v12 = vld [vmem:[#allocation2 + $0x12d] sm:$0xff] }
 0x15f   : > { %v1511_v31 = vld [vmem:[#allocation3 + $0xc8] sm:$0xff]  ;;  %v4802_v55 = vpop.f32.mrf.mxu1  ;;  %5017 = vmatmul.mubr.msk.bf16.gmra.mxu1 %vm439_vm3, %v3233_v16  ;;  %v3634_v16 = vpack.c.bf16 %v3613_v59, %v3612_v63  ;;  %v1887_v15 = vld [vmem:[#allocation3 + $0x18] sm:$0xff]  ;;  %v3237_v23 = vpack.c.bf16 %v3217_v19, %v3216_v10 }
 0x160   : > { %1585 = vst.msk [vmem:[#allocation3 + $0xd8] sm:$0xff] %vm439_vm3, %v1549_v39  ;;  %v1547_v0 = vadd.f32 %v1511_v31, %v1442_v18  ;;  %1189 = vst.msk [vmem:[#allocation3 + $0xe8] sm:$0xff] %vm439_vm3, %v1153_v25  ;;  %v1158_v33 = vadd.f32 %v4802_v55, %v1122_v40  ;;  %v4837_v34 = vpop.f32.mrf.mxu0  ;;  %5020 = vmatprep.mubr.msk.bf16.mxu1 %vm439_vm3, %v3234_v20  ;;  %v3218_v18 = vld [vmem:[#allocation2 + $0x125] sm:$0xff]  ;;  %v1885_v55 = vld [vmem:[#allocation3 + $0x8] sm:$0xff] }
 0x161   : > { %v1516_v38 = vld [vmem:[#allocation3 + $0xf0] sm:$0xff]  ;;  %v1073_v42 = vpop.f32.mrf.mxu1  ;;  %v3617_v3 = vld [vmem:[#allocation2 + $0x12e] sm:$0xff] }
 0x162   : > { %1583 = vst.msk [vmem:[#allocation3 + $0xc8] sm:$0xff] %vm439_vm3, %v1547_v0  ;;  %v1552_v29 = vadd.f32 %v4836_v26, %v1516_v38  ;;  %1194 = vst.msk [vmem:[#allocation3 + $0x110] sm:$0xff] %vm439_vm3, %v1158_v33  ;;  %v1156_v46 = vadd.f32 %v1120_v43, %v1073_v42  ;;  %v1458_v48 = vpop.f32.mrf.mxu0  ;;  %v3615_v40 = vld [vmem:[#allocation2 + $0x11e] sm:$0xff]  ;;  %v1889_v63 = vld [vmem:[#allocation3 + $0x28] sm:$0xff] }
 0x163   : > { %v1514_v8 = vld [vmem:[#allocation3 + $0xe0] sm:$0xff]  ;;  %v4803_v32 = vpop.f32.mrf.mxu1  ;;  %v1890_v38 = vld [vmem:[#allocation3 + $0x30] sm:$0xff]  ;;  %v3635_v45 = vpack.c.bf16 %v3615_v40, %v3614_v27 }
 0x164   : > { %1588 = vst.msk [vmem:[#allocation3 + $0xf0] sm:$0xff] %vm439_vm3, %v1552_v29  ;;  %v1550_v50 = vadd.f32 %v1514_v8, %v1455_v11  ;;  %1192 = vst.msk [vmem:[#allocation3 + $0x100] sm:$0xff] %vm439_vm3, %v1156_v46  ;;  %v1159_v51 = vadd.f32 %v4803_v32, %v1123_v49  ;;  %v4840_v52 = vpop.f32.mrf.mxu0  ;;  %5055 = vmatmul.mubr.msk.bf16.gmra.mxu0 %vm439_vm3, %v3631_v35  ;;  %v3238_v11 = vpack.c.bf16 %v3219_v12, %v3218_v18  ;;  %v3616_v35 = vld [vmem:[#allocation2 + $0x126] sm:$0xff]  ;;  %v3220_v29 = vld [vmem:[#allocation2 + $0x135] sm:$0xff] }
 0x165   : > { %v1517_v54 = vld [vmem:[#allocation3 + $0xf8] sm:$0xff]  ;;  %v1076_v56 = vpop.f32.mrf.mxu1  ;;  %5058 = vmatprep.mubr.msk.bf16.mxu0 %vm439_vm3, %v3632_v28  ;;  %v1888_v32 = vld [vmem:[#allocation3 + $0x20] sm:$0xff]  ;;  %v3636_v49 = vpack.c.bf16 %v3617_v3, %v3616_v35  ;;  %v1898_v40 = vld [vmem:[#allocation3 + $0x70] sm:$0xff] }
 0x166   : > { %1586 = vst.msk [vmem:[#allocation3 + $0xe0] sm:$0xff] %vm439_vm3, %v1550_v50  ;;  %v1553_v60 = vadd.f32 %v4837_v34, %v1517_v54  ;;  %1195 = vst.msk [vmem:[#allocation3 + $0x118] sm:$0xff] %vm439_vm3, %v1159_v51  ;;  %v1157_v61 = vadd.f32 %v1121_v57, %v1076_v56  ;;  %v1471_v62 = vpop.f32.mrf.mxu0  ;;  %v3221_v46 = vld [vmem:[#allocation2 + $0x13d] sm:$0xff] }
 0x167   : > { %v1515_v1 = vld [vmem:[#allocation3 + $0xe8] sm:$0xff]  ;;  %v4846_v2 = vpop.f32.mrf.mxu1  ;;  %5021 = vmatmul.mubr.msk.bf16.gmra.mxu1 %vm439_vm3, %v3235_v44  ;;  %v3239_v54 = vpack.c.bf16 %v3221_v46, %v3220_v29  ;;  %v3619_v59 = vld [vmem:[#allocation2 + $0x13e] sm:$0xff] }
 0x168   : > { %1589 = vst.msk [vmem:[#allocation3 + $0xf8] sm:$0xff] %vm439_vm3, %v1553_v60  ;;  %v1551_v5 = vadd.f32 %v1515_v1, %v1458_v48  ;;  %1193 = vst.msk [vmem:[#allocation3 + $0x108] sm:$0xff] %vm439_vm3, %v1157_v61  ;;  %v1922_v6 = vadd.f32 %v4846_v2, %v1886_v4  ;;  %v4841_v7 = vpop.f32.mrf.mxu0  ;;  %5024 = vmatprep.mubr.msk.bf16.mxu1 %vm439_vm3, %v3236_v47  ;;  %v3618_v60 = vld [vmem:[#allocation2 + $0x136] sm:$0xff] }
 0x169   : > { %v1520_v13 = vld [vmem:[#allocation3 + $0x110] sm:$0xff]  ;;  %v1741_v21 = vpop.f32.mrf.mxu1  ;;  %v3637_v18 = vpack.c.bf16 %v3619_v59, %v3618_v60 }
 0x16a   : > { %1587 = vst.msk [vmem:[#allocation3 + $0xe8] sm:$0xff] %vm439_vm3, %v1551_v5  ;;  %v1556_v17 = vadd.f32 %v4840_v52, %v1520_v13  ;;  %1958 = vst.msk [vmem:[#allocation3 + $0x10] sm:$0xff] %vm439_vm3, %v1922_v6  ;;  %v1920_v26 = vadd.f32 %v1884_v36, %v1741_v21  ;;  %v1474_v20 = vpop.f32.mrf.mxu0  ;;  %v1892_v36 = vld [vmem:[#allocation3 + $0x40] sm:$0xff] }
 0x16b   : > { %v1518_v41 = vld [vmem:[#allocation3 + $0x100] sm:$0xff]  ;;  %v4847_v22 = vpop.f32.mrf.mxu1 }
 0x16c   : > { %1592 = vst.msk [vmem:[#allocation3 + $0x110] sm:$0xff] %vm439_vm3, %v1556_v17  ;;  %v1554_v24 = vadd.f32 %v1518_v41, %v1471_v62  ;;  %1956 = vst.msk [vmem:[#allocation3] sm:$0xff] %vm439_vm3, %v1920_v26  ;;  %v1923_v39 = vadd.f32 %v4847_v22, %v1887_v15  ;;  %v4884_v25 = vpop.f32.mrf.mxu0  ;;  %5059 = vmatmul.mubr.msk.bf16.gmra.mxu0 %vm439_vm3, %v3633_v9  ;;  %v1895_v41 = vld [vmem:[#allocation3 + $0x58] sm:$0xff] }
 0x16d   : > { %v1521_v30 = vld [vmem:[#allocation3 + $0x118] sm:$0xff]  ;;  %v1744_v31 = vpop.f32.mrf.mxu1  ;;  %5062 = vmatprep.mubr.msk.bf16.mxu0 %vm439_vm3, %v3634_v16 }
 0x16e   : > { %1590 = vst.msk [vmem:[#allocation3 + $0x100] sm:$0xff] %vm439_vm3, %v1554_v24  ;;  %v1557_v0 = vadd.f32 %v4841_v7, %v1521_v30  ;;  %1959 = vst.msk [vmem:[#allocation3 + $0x18] sm:$0xff] %vm439_vm3, %v1923_v39  ;;  %v1921_v33 = vadd.f32 %v1885_v55, %v1744_v31  ;;  %v2139_v34 = vpop.f32.mrf.mxu0  ;;  %v1894_v7 = vld [vmem:[#allocation3 + $0x50] sm:$0xff] }
 0x16f   : > { %v1519_v37 = vld [vmem:[#allocation3 + $0x108] sm:$0xff]  ;;  %v4850_v14 = vpop.f32.mrf.mxu1  ;;  %5025 = vmatmul.mubr.msk.bf16.gmra.mxu1 %vm439_vm3, %v3237_v23 }
 0x170   : > { %1593 = vst.msk [vmem:[#allocation3 + $0x118] sm:$0xff] %vm439_vm3, %v1557_v0  ;;  %v1555_v42 = vadd.f32 %v1519_v37, %v1474_v20  ;;  %1957 = vst.msk [vmem:[#allocation3 + $0x8] sm:$0xff] %vm439_vm3, %v1921_v33  ;;  %v1926_v43 = vadd.f32 %v4850_v14, %v1890_v38  ;;  %v4885_v28 = vpop.f32.mrf.mxu0  ;;  %5028 = vmatprep.mubr.msk.bf16.mxu1 %vm439_vm3, %v3238_v11  ;;  %v1896_v37 = vld [vmem:[#allocation3 + $0x60] sm:$0xff] }
 0x171   : > { %v2284_v48 = vld [vmem:[#allocation3 + $0x10] sm:$0xff]  ;;  %v1757_v8 = vpop.f32.mrf.mxu1 }
 0x172   : > { %1591 = vst.msk [vmem:[#allocation3 + $0x108] sm:$0xff] %vm439_vm3, %v1555_v42  ;;  %v2320_v44 = vadd.f32 %v4884_v25, %v2284_v48  ;;  %1962 = vst.msk [vmem:[#allocation3 + $0x30] sm:$0xff] %vm439_vm3, %v1926_v43  ;;  %v1924_v50 = vadd.f32 %v1888_v32, %v1757_v8  ;;  %v2142_v51 = vpop.f32.mrf.mxu0  ;;  %v1893_v25 = vld [vmem:[#allocation3 + $0x48] sm:$0xff] }
 0x173   : > { %v2282_v52 = vld [vmem:[#allocation3] sm:$0xff]  ;;  %v4851_v47 = vpop.f32.mrf.mxu1 }
 0x174   : > { %2356 = vst.msk [vmem:[#allocation3 + $0x10] sm:$0xff] %vm439_vm3, %v2320_v44  ;;  %v2318_v56 = vadd.f32 %v2282_v52, %v2139_v34  ;;  %1960 = vst.msk [vmem:[#allocation3 + $0x20] sm:$0xff] %vm439_vm3, %v1924_v50  ;;  %v1927_v57 = vadd.f32 %v4851_v47, %v1891_v53  ;;  %v4888_v58 = vpop.f32.mrf.mxu0  ;;  %5063 = vmatmul.mubr.msk.bf16.gmra.mxu0 %vm439_vm3, %v3635_v45  ;;  %v1899_v45 = vld [vmem:[#allocation3 + $0x78] sm:$0xff]  ;;  %v1902_v53 = vld [vmem:[#allocation3 + $0x90] sm:$0xff] }
 0x175   : > { %v2285_v61 = vld [vmem:[#allocation3 + $0x18] sm:$0xff]  ;;  %v1760_v62 = vpop.f32.mrf.mxu1  ;;  %5066 = vmatprep.mubr.msk.bf16.mxu0 %vm439_vm3, %v3636_v49  ;;  %v1897_v49 = vld [vmem:[#allocation3 + $0x68] sm:$0xff] }
 0x176   : > { %2354 = vst.msk [vmem:[#allocation3] sm:$0xff] %vm439_vm3, %v2318_v56  ;;  %v2321_v1 = vadd.f32 %v4885_v28, %v2285_v61  ;;  %1963 = vst.msk [vmem:[#allocation3 + $0x38] sm:$0xff] %vm439_vm3, %v1927_v57  ;;  %v1925_v2 = vadd.f32 %v1889_v63, %v1760_v62  ;;  %v2155_v4 = vpop.f32.mrf.mxu0  ;;  %v1900_v61 = vld [vmem:[#allocation3 + $0x80] sm:$0xff] }
 0x177   : > { %v2283_v5 = vld [vmem:[#allocation3 + $0x8] sm:$0xff]  ;;  %v4854_v6 = vpop.f32.mrf.mxu1  ;;  %5029 = vmatmul.mubr.msk.bf16.gmra.mxu1 %vm439_vm3, %v3239_v54 }
 0x178   : > { %2357 = vst.msk [vmem:[#allocation3 + $0x18] sm:$0xff] %vm439_vm3, %v2321_v1  ;;  %v2319_v9 = vadd.f32 %v2283_v5, %v2142_v51  ;;  %1961 = vst.msk [vmem:[#allocation3 + $0x28] sm:$0xff] %vm439_vm3, %v1925_v2  ;;  %v1930_v10 = vadd.f32 %v4854_v6, %v1894_v7  ;;  %v4889_v19 = vpop.f32.mrf.mxu0 }
 0x179   : > { %v2288_v13 = vld [vmem:[#allocation3 + $0x30] sm:$0xff]  ;;  %v1773_v21 = vpop.f32.mrf.mxu1 }
 0x17a   : > { %2355 = vst.msk [vmem:[#allocation3 + $0x8] sm:$0xff] %vm439_vm3, %v2319_v9  ;;  %v2324_v16 = vadd.f32 %v4888_v58, %v2288_v13  ;;  %1966 = vst.msk [vmem:[#allocation3 + $0x50] sm:$0xff] %vm439_vm3, %v1930_v10  ;;  %v1928_v12 = vadd.f32 %v1892_v36, %v1773_v21  ;;  %v2158_v17 = vpop.f32.mrf.mxu0 }
 0x17b   : > { %v2286_v26 = vld [vmem:[#allocation3 + $0x20] sm:$0xff]  ;;  %v4855_v20 = vpop.f32.mrf.mxu1 }
 0x17c   : > { %2360 = vst.msk [vmem:[#allocation3 + $0x30] sm:$0xff] %vm439_vm3, %v2324_v16  ;;  %v2322_v22 = vadd.f32 %v2286_v26, %v2155_v4  ;;  %1964 = vst.msk [vmem:[#allocation3 + $0x40] sm:$0xff] %vm439_vm3, %v1928_v12  ;;  %v1931_v15 = vadd.f32 %v4855_v20, %v1895_v41  ;;  %v4892_v23 = vpop.f32.mrf.mxu0  ;;  %5067 = vmatmul.mubr.msk.bf16.gmra.mxu0 %vm439_vm3, %v3637_v18  ;;  %v1903_v4 = vld [vmem:[#allocation3 + $0x98] sm:$0xff]  ;;  %v1906_v12 = vld [vmem:[#allocation3 + $0xb0] sm:$0xff] }
 0x17d   : > { %v2289_v24 = vld [vmem:[#allocation3 + $0x38] sm:$0xff]  ;;  %v1776_v39 = vpop.f32.mrf.mxu1 }
 0x17e   : > { %2358 = vst.msk [vmem:[#allocation3 + $0x20] sm:$0xff] %vm439_vm3, %v2322_v22  ;;  %v2325_v11 = vadd.f32 %v4889_v19, %v2289_v24  ;;  %1967 = vst.msk [vmem:[#allocation3 + $0x58] sm:$0xff] %vm439_vm3, %v1931_v15  ;;  %v1929_v27 = vadd.f32 %v1893_v25, %v1776_v39  ;;  %v2171_v30 = vpop.f32.mrf.mxu0  ;;  %v1901_v19 = vld [vmem:[#allocation3 + $0x88] sm:$0xff]  ;;  %v1904_v15 = vld [vmem:[#allocation3 + $0xa0] sm:$0xff] }
 0x17f   : > { %v2287_v31 = vld [vmem:[#allocation3 + $0x28] sm:$0xff]  ;;  %v4858_v55 = vpop.f32.mrf.mxu1 }
 0x180   : > { %2361 = vst.msk [vmem:[#allocation3 + $0x38] sm:$0xff] %vm439_vm3, %v2325_v11  ;;  %v2323_v0 = vadd.f32 %v2287_v31, %v2158_v17  ;;  %1965 = vst.msk [vmem:[#allocation3 + $0x48] sm:$0xff] %vm439_vm3, %v1929_v27  ;;  %v1934_v33 = vadd.f32 %v4858_v55, %v1898_v40  ;;  %v4893_v34 = vpop.f32.mrf.mxu0  ;;  %v1907_v27 = vld [vmem:[#allocation3 + $0xb8] sm:$0xff] }
 0x181   : > { %v2292_v35 = vld [vmem:[#allocation3 + $0x50] sm:$0xff]  ;;  %v1789_v3 = vpop.f32.mrf.mxu1 }
 0x182   : > { %2359 = vst.msk [vmem:[#allocation3 + $0x28] sm:$0xff] %vm439_vm3, %v2323_v0  ;;  %v2328_v14 = vadd.f32 %v4892_v23, %v2292_v35  ;;  %1970 = vst.msk [vmem:[#allocation3 + $0x70] sm:$0xff] %vm439_vm3, %v1934_v33  ;;  %v1932_v38 = vadd.f32 %v1896_v37, %v1789_v3  ;;  %v2174_v42 = vpop.f32.mrf.mxu0  ;;  %v1905_v33 = vld [vmem:[#allocation3 + $0xa8] sm:$0xff] }
 0x183   : > { %v2290_v43 = vld [vmem:[#allocation3 + $0x40] sm:$0xff]  ;;  %v4859_v28 = vpop.f32.mrf.mxu1 }
 0x184   : > { %2364 = vst.msk [vmem:[#allocation3 + $0x50] sm:$0xff] %vm439_vm3, %v2328_v14  ;;  %v2326_v29 = vadd.f32 %v2290_v43, %v2171_v30  ;;  %1968 = vst.msk [vmem:[#allocation3 + $0x60] sm:$0xff] %vm439_vm3, %v1932_v38  ;;  %v1935_v46 = vadd.f32 %v4859_v28, %v1899_v45  ;;  %v4896_v48 = vpop.f32.mrf.mxu0  ;;  %v1910_v38 = vld [vmem:[#allocation3 + $0xd0] sm:$0xff] }
 0x185   : > { %v2293_v8 = vld [vmem:[#allocation3 + $0x58] sm:$0xff]  ;;  %v1792_v32 = vpop.f32.mrf.mxu1 }
 0x186   : > { %2362 = vst.msk [vmem:[#allocation3 + $0x40] sm:$0xff] %vm439_vm3, %v2326_v29  ;;  %v2329_v44 = vadd.f32 %v4893_v34, %v2293_v8  ;;  %1971 = vst.msk [vmem:[#allocation3 + $0x78] sm:$0xff] %vm439_vm3, %v1935_v46  ;;  %v1933_v50 = vadd.f32 %v1897_v49, %v1792_v32  ;;  %v2187_v51 = vpop.f32.mrf.mxu0  ;;  %v1908_v46 = vld [vmem:[#allocation3 + $0xc0] sm:$0xff] }
 0x187   : > { %v2291_v52 = vld [vmem:[#allocation3 + $0x48] sm:$0xff]  ;;  %v4862_v47 = vpop.f32.mrf.mxu1 }
 0x188   : > { %2365 = vst.msk [vmem:[#allocation3 + $0x58] sm:$0xff] %vm439_vm3, %v2329_v44  ;;  %v2327_v54 = vadd.f32 %v2291_v52, %v2174_v42  ;;  %1969 = vst.msk [vmem:[#allocation3 + $0x68] sm:$0xff] %vm439_vm3, %v1933_v50  ;;  %v1938_v56 = vadd.f32 %v4862_v47, %v1902_v53  ;;  %v4897_v57 = vpop.f32.mrf.mxu0  ;;  %v1911_v50 = vld [vmem:[#allocation3 + $0xd8] sm:$0xff] }
 0x189   : > { %v2296_v58 = vld [vmem:[#allocation3 + $0x70] sm:$0xff]  ;;  %v1805_v60 = vpop.f32.mrf.mxu1 }
 0x18a   : > { %2363 = vst.msk [vmem:[#allocation3 + $0x48] sm:$0xff] %vm439_vm3, %v2327_v54  ;;  %v2332_v62 = vadd.f32 %v4896_v48, %v2296_v58  ;;  %1974 = vst.msk [vmem:[#allocation3 + $0x90] sm:$0xff] %vm439_vm3, %v1938_v56  ;;  %v1936_v63 = vadd.f32 %v1900_v61, %v1805_v60  ;;  %v2190_v59 = vpop.f32.mrf.mxu0  ;;  %v1909_v56 = vld [vmem:[#allocation3 + $0xc8] sm:$0xff] }
 0x18b   : > { %v2294_v1 = vld [vmem:[#allocation3 + $0x60] sm:$0xff]  ;;  %v4863_v2 = vpop.f32.mrf.mxu1 }
 0x18c   : > { %2368 = vst.msk [vmem:[#allocation3 + $0x70] sm:$0xff] %vm439_vm3, %v2332_v62  ;;  %v2330_v5 = vadd.f32 %v2294_v1, %v2187_v51  ;;  %1972 = vst.msk [vmem:[#allocation3 + $0x80] sm:$0xff] %vm439_vm3, %v1936_v63  ;;  %v1939_v6 = vadd.f32 %v4863_v2, %v1903_v4  ;;  %v4900_v7 = vpop.f32.mrf.mxu0  ;;  %v1914_v63 = vld [vmem:[#allocation3 + $0xf0] sm:$0xff] }
 0x18d   : > { %v2297_v9 = vld [vmem:[#allocation3 + $0x78] sm:$0xff]  ;;  %v1808_v10 = vpop.f32.mrf.mxu1 }
 0x18e   : > { %2366 = vst.msk [vmem:[#allocation3 + $0x60] sm:$0xff] %vm439_vm3, %v2330_v5  ;;  %v2333_v18 = vadd.f32 %v4897_v57, %v2297_v9  ;;  %1975 = vst.msk [vmem:[#allocation3 + $0x98] sm:$0xff] %vm439_vm3, %v1939_v6  ;;  %v1937_v13 = vadd.f32 %v1901_v19, %v1808_v10  ;;  %v2203_v21 = vpop.f32.mrf.mxu0  ;;  %v1912_v6 = vld [vmem:[#allocation3 + $0xe0] sm:$0xff] }
 0x18f   : > { %v2295_v36 = vld [vmem:[#allocation3 + $0x68] sm:$0xff]  ;;  %v4866_v16 = vpop.f32.mrf.mxu1 }
 0x190   : > { %2369 = vst.msk [vmem:[#allocation3 + $0x78] sm:$0xff] %vm439_vm3, %v2333_v18  ;;  %v2331_v17 = vadd.f32 %v2295_v36, %v2190_v59  ;;  %1973 = vst.msk [vmem:[#allocation3 + $0x88] sm:$0xff] %vm439_vm3, %v1937_v13  ;;  %v1942_v26 = vadd.f32 %v4866_v16, %v1906_v12  ;;  %v4901_v20 = vpop.f32.mrf.mxu0  ;;  %v1915_v13 = vld [vmem:[#allocation3 + $0xf8] sm:$0xff] }
 0x191   : > { %v2300_v41 = vld [vmem:[#allocation3 + $0x90] sm:$0xff]  ;;  %v1821_v22 = vpop.f32.mrf.mxu1 }
 0x192   : > { %2367 = vst.msk [vmem:[#allocation3 + $0x68] sm:$0xff] %vm439_vm3, %v2331_v17  ;;  %v2336_v23 = vadd.f32 %v4900_v7, %v2300_v41  ;;  %1978 = vst.msk [vmem:[#allocation3 + $0xb0] sm:$0xff] %vm439_vm3, %v1942_v26  ;;  %v1940_v24 = vadd.f32 %v1904_v15, %v1821_v22  ;;  %v2206_v39 = vpop.f32.mrf.mxu0  ;;  %v1913_v26 = vld [vmem:[#allocation3 + $0xe8] sm:$0xff] }
 0x193   : > { %v2298_v25 = vld [vmem:[#allocation3 + $0x80] sm:$0xff]  ;;  %v4867_v11 = vpop.f32.mrf.mxu1 }
 0x194   : > { %2372 = vst.msk [vmem:[#allocation3 + $0x90] sm:$0xff] %vm439_vm3, %v2336_v23  ;;  %v2334_v30 = vadd.f32 %v2298_v25, %v2203_v21  ;;  %1976 = vst.msk [vmem:[#allocation3 + $0xa0] sm:$0xff] %vm439_vm3, %v1940_v24  ;;  %v1943_v31 = vadd.f32 %v4867_v11, %v1907_v27  ;;  %v4904_v55 = vpop.f32.mrf.mxu0  ;;  %v1918_v24 = vld [vmem:[#allocation3 + $0x110] sm:$0xff] }
 0x195   : > { %v2301_v40 = vld [vmem:[#allocation3 + $0x98] sm:$0xff]  ;;  %v1824_v0 = vpop.f32.mrf.mxu1 }
 0x196   : > { %2370 = vst.msk [vmem:[#allocation3 + $0x80] sm:$0xff] %vm439_vm3, %v2334_v30  ;;  %v2337_v34 = vadd.f32 %v4901_v20, %v2301_v40  ;;  %1979 = vst.msk [vmem:[#allocation3 + $0xb8] sm:$0xff] %vm439_vm3, %v1943_v31  ;;  %v1941_v35 = vadd.f32 %v1905_v33, %v1824_v0  ;;  %v2219_v3 = vpop.f32.mrf.mxu0  ;;  %v1916_v31 = vld [vmem:[#allocation3 + $0x100] sm:$0xff] }
 0x197   : > { %v2299_v37 = vld [vmem:[#allocation3 + $0x88] sm:$0xff]  ;;  %v4870_v14 = vpop.f32.mrf.mxu1 }
 0x198   : > { %2373 = vst.msk [vmem:[#allocation3 + $0x98] sm:$0xff] %vm439_vm3, %v2337_v34  ;;  %v2335_v42 = vadd.f32 %v2299_v37, %v2206_v39  ;;  %1977 = vst.msk [vmem:[#allocation3 + $0xa8] sm:$0xff] %vm439_vm3, %v1941_v35  ;;  %v1946_v43 = vadd.f32 %v4870_v14, %v1910_v38  ;;  %v4905_v28 = vpop.f32.mrf.mxu0  ;;  %v1919_v35 = vld [vmem:[#allocation3 + $0x118] sm:$0xff] }
 0x199   : > { %v2304_v45 = vld [vmem:[#allocation3 + $0xb0] sm:$0xff]  ;;  %v1837_v29 = vpop.f32.mrf.mxu1 }
 0x19a   : > { %2371 = vst.msk [vmem:[#allocation3 + $0x88] sm:$0xff] %vm439_vm3, %v2335_v42  ;;  %v2340_v48 = vadd.f32 %v4904_v55, %v2304_v45  ;;  %1982 = vst.msk [vmem:[#allocation3 + $0xd0] sm:$0xff] %vm439_vm3, %v1946_v43  ;;  %v1944_v8 = vadd.f32 %v1908_v46, %v1837_v29  ;;  %v2222_v32 = vpop.f32.mrf.mxu0  ;;  %v1917_v43 = vld [vmem:[#allocation3 + $0x108] sm:$0xff] }
 0x19b   : > { %v2302_v49 = vld [vmem:[#allocation3 + $0xa0] sm:$0xff]  ;;  %v4871_v44 = vpop.f32.mrf.mxu1 }
 0x19c   : > { %2376 = vst.msk [vmem:[#allocation3 + $0xb0] sm:$0xff] %vm439_vm3, %v2340_v48  ;;  %v2338_v51 = vadd.f32 %v2302_v49, %v2219_v3  ;;  %1980 = vst.msk [vmem:[#allocation3 + $0xc0] sm:$0xff] %vm439_vm3, %v1944_v8  ;;  %v1947_v52 = vadd.f32 %v4871_v44, %v1911_v50  ;;  %v4908_v47 = vpop.f32.mrf.mxu0  ;;  %v2682_v8 = vld [vmem:[#allocation3 + $0x10] sm:$0xff] }
 0x19d   : > { %v2305_v53 = vld [vmem:[#allocation3 + $0xb8] sm:$0xff]  ;;  %v1840_v54 = vpop.f32.mrf.mxu1 }
 0x19e   : > { %2374 = vst.msk [vmem:[#allocation3 + $0xa0] sm:$0xff] %vm439_vm3, %v2338_v51  ;;  %v2341_v57 = vadd.f32 %v4905_v28, %v2305_v53  ;;  %1983 = vst.msk [vmem:[#allocation3 + $0xd8] sm:$0xff] %vm439_vm3, %v1947_v52  ;;  %v1945_v58 = vadd.f32 %v1909_v56, %v1840_v54  ;;  %v2235_v60 = vpop.f32.mrf.mxu0  ;;  %v2680_v52 = vld [vmem:[#allocation3] sm:$0xff] }
 0x19f   : > { %v2303_v61 = vld [vmem:[#allocation3 + $0xa8] sm:$0xff]  ;;  %v4874_v62 = vpop.f32.mrf.mxu1 }
 0x1a0   : > { %2377 = vst.msk [vmem:[#allocation3 + $0xb8] sm:$0xff] %vm439_vm3, %v2341_v57  ;;  %v2339_v59 = vadd.f32 %v2303_v61, %v2222_v32  ;;  %1981 = vst.msk [vmem:[#allocation3 + $0xc8] sm:$0xff] %vm439_vm3, %v1945_v58  ;;  %v1950_v1 = vadd.f32 %v4874_v62, %v1914_v63  ;;  %v4909_v2 = vpop.f32.mrf.mxu0  ;;  %v2683_v58 = vld [vmem:[#allocation3 + $0x18] sm:$0xff] }
 0x1a1   : > { %v2308_v4 = vld [vmem:[#allocation3 + $0xd0] sm:$0xff]  ;;  %v1853_v5 = vpop.f32.mrf.mxu1 }
 0x1a2   : > { %2375 = vst.msk [vmem:[#allocation3 + $0xa8] sm:$0xff] %vm439_vm3, %v2339_v59  ;;  %v2344_v7 = vadd.f32 %v4908_v47, %v2308_v4  ;;  %1986 = vst.msk [vmem:[#allocation3 + $0xf0] sm:$0xff] %vm439_vm3, %v1950_v1  ;;  %v1948_v9 = vadd.f32 %v1912_v6, %v1853_v5  ;;  %v2238_v10 = vpop.f32.mrf.mxu0  ;;  %v2681_v1 = vld [vmem:[#allocation3 + $0x8] sm:$0xff] }
 0x1a3   : > { %v2306_v19 = vld [vmem:[#allocation3 + $0xc0] sm:$0xff]  ;;  %v4875_v18 = vpop.f32.mrf.mxu1 }
 0x1a4   : > { %2380 = vst.msk [vmem:[#allocation3 + $0xd0] sm:$0xff] %vm439_vm3, %v2344_v7  ;;  %v2342_v21 = vadd.f32 %v2306_v19, %v2235_v60  ;;  %1984 = vst.msk [vmem:[#allocation3 + $0xe0] sm:$0xff] %vm439_vm3, %v1948_v9  ;;  %v1951_v36 = vadd.f32 %v4875_v18, %v1915_v13  ;;  %v4912_v16 = vpop.f32.mrf.mxu0  ;;  %v2686_v9 = vld [vmem:[#allocation3 + $0x30] sm:$0xff] }
 0x1a5   : > { %v2309_v12 = vld [vmem:[#allocation3 + $0xd8] sm:$0xff]  ;;  %v1856_v17 = vpop.f32.mrf.mxu1 }
 0x1a6   : > { %2378 = vst.msk [vmem:[#allocation3 + $0xc0] sm:$0xff] %vm439_vm3, %v2342_v21  ;;  %v2345_v20 = vadd.f32 %v4909_v2, %v2309_v12  ;;  %1987 = vst.msk [vmem:[#allocation3 + $0xf8] sm:$0xff] %vm439_vm3, %v1951_v36  ;;  %v1949_v41 = vadd.f32 %v1913_v26, %v1856_v17  ;;  %v2251_v22 = vpop.f32.mrf.mxu0  ;;  %v2684_v36 = vld [vmem:[#allocation3 + $0x20] sm:$0xff] }
 0x1a7   : > { %v2307_v15 = vld [vmem:[#allocation3 + $0xc8] sm:$0xff]  ;;  %v4878_v23 = vpop.f32.mrf.mxu1 }
 0x1a8   : > { %2381 = vst.msk [vmem:[#allocation3 + $0xd8] sm:$0xff] %vm439_vm3, %v2345_v20  ;;  %v2343_v39 = vadd.f32 %v2307_v15, %v2238_v10  ;;  %1985 = vst.msk [vmem:[#allocation3 + $0xe8] sm:$0xff] %vm439_vm3, %v1949_v41  ;;  %v1954_v25 = vadd.f32 %v4878_v23, %v1918_v24  ;;  %v4913_v11 = vpop.f32.mrf.mxu0  ;;  %v2687_v41 = vld [vmem:[#allocation3 + $0x38] sm:$0xff] }
 0x1a9   : > { %v2312_v27 = vld [vmem:[#allocation3 + $0xf0] sm:$0xff]  ;;  %v1869_v30 = vpop.f32.mrf.mxu1 }
 0x1aa   : > { %2379 = vst.msk [vmem:[#allocation3 + $0xc8] sm:$0xff] %vm439_vm3, %v2343_v39  ;;  %v2348_v55 = vadd.f32 %v4912_v16, %v2312_v27  ;;  %1990 = vst.msk [vmem:[#allocation3 + $0x110] sm:$0xff] %vm439_vm3, %v1954_v25  ;;  %v1952_v40 = vadd.f32 %v1916_v31, %v1869_v30  ;;  %v2254_v0 = vpop.f32.mrf.mxu0  ;;  %v2685_v25 = vld [vmem:[#allocation3 + $0x28] sm:$0xff] }
 0x1ab   : > { %v2310_v33 = vld [vmem:[#allocation3 + $0xe0] sm:$0xff]  ;;  %v4879_v34 = vpop.f32.mrf.mxu1 }
 0x1ac   : > { %2384 = vst.msk [vmem:[#allocation3 + $0xf0] sm:$0xff] %vm439_vm3, %v2348_v55  ;;  %v2346_v3 = vadd.f32 %v2310_v33, %v2251_v22  ;;  %1988 = vst.msk [vmem:[#allocation3 + $0x100] sm:$0xff] %vm439_vm3, %v1952_v40  ;;  %v1955_v37 = vadd.f32 %v4879_v34, %v1919_v35  ;;  %v4916_v14 = vpop.f32.mrf.mxu0  ;;  %v2690_v40 = vld [vmem:[#allocation3 + $0x50] sm:$0xff] }
 0x1ad   : > { %v2313_v38 = vld [vmem:[#allocation3 + $0xf8] sm:$0xff]  ;;  %v1872_v42 = vpop.f32.mrf.mxu1 }
 0x1ae   : > { %2382 = vst.msk [vmem:[#allocation3 + $0xe0] sm:$0xff] %vm439_vm3, %v2346_v3  ;;  %v2349_v28 = vadd.f32 %v4913_v11, %v2313_v38  ;;  %1991 = vst.msk [vmem:[#allocation3 + $0x118] sm:$0xff] %vm439_vm3, %v1955_v37  ;;  %v1953_v45 = vadd.f32 %v1917_v43, %v1872_v42  ;;  %v2267_v29 = vpop.f32.mrf.mxu0  ;;  %v2688_v37 = vld [vmem:[#allocation3 + $0x40] sm:$0xff] }
 0x1af   : > { %v2311_v46 = vld [vmem:[#allocation3 + $0xe8] sm:$0xff]  ;;  %v4922_v48 = vpop.f32.mrf.mxu1 }
 0x1b0   : > { %2385 = vst.msk [vmem:[#allocation3 + $0xf8] sm:$0xff] %vm439_vm3, %v2349_v28  ;;  %v2347_v32 = vadd.f32 %v2311_v46, %v2254_v0  ;;  %1989 = vst.msk [vmem:[#allocation3 + $0x108] sm:$0xff] %vm439_vm3, %v1953_v45  ;;  %v2718_v49 = vadd.f32 %v4922_v48, %v2682_v8  ;;  %v4917_v44 = vpop.f32.mrf.mxu0  ;;  %v2691_v45 = vld [vmem:[#allocation3 + $0x58] sm:$0xff] }
 0x1b1   : > { %v2316_v50 = vld [vmem:[#allocation3 + $0x110] sm:$0xff]  ;;  %v2537_v51 = vpop.f32.mrf.mxu1 }
 0x1b2   : > { %2383 = vst.msk [vmem:[#allocation3 + $0xe8] sm:$0xff] %vm439_vm3, %v2347_v32  ;;  %v2352_v47 = vadd.f32 %v4916_v14, %v2316_v50  ;;  %2754 = vst.msk [vmem:[#allocation3 + $0x10] sm:$0xff] %vm439_vm3, %v2718_v49  ;;  %v2716_v53 = vadd.f32 %v2680_v52, %v2537_v51  ;;  %v2270_v54 = vpop.f32.mrf.mxu0  ;;  %v2689_v49 = vld [vmem:[#allocation3 + $0x48] sm:$0xff] }
 0x1b3   : > { %v2314_v56 = vld [vmem:[#allocation3 + $0x100] sm:$0xff]  ;;  %v4923_v57 = vpop.f32.mrf.mxu1 }
 0x1b4   : > { %2388 = vst.msk [vmem:[#allocation3 + $0x110] sm:$0xff] %vm439_vm3, %v2352_v47  ;;  %v2350_v60 = vadd.f32 %v2314_v56, %v2267_v29  ;;  %2752 = vst.msk [vmem:[#allocation3] sm:$0xff] %vm439_vm3, %v2716_v53  ;;  %v2719_v61 = vadd.f32 %v4923_v57, %v2683_v58  ;;  %v4960_v62 = vpop.f32.mrf.mxu0  ;;  %v2694_v53 = vld [vmem:[#allocation3 + $0x70] sm:$0xff] }
 0x1b5   : > { %v2317_v63 = vld [vmem:[#allocation3 + $0x118] sm:$0xff]  ;;  %v2540_v59 = vpop.f32.mrf.mxu1 }
 0x1b6   : > { %2386 = vst.msk [vmem:[#allocation3 + $0x100] sm:$0xff] %vm439_vm3, %v2350_v60  ;;  %v2353_v2 = vadd.f32 %v4917_v44, %v2317_v63  ;;  %2755 = vst.msk [vmem:[#allocation3 + $0x18] sm:$0xff] %vm439_vm3, %v2719_v61  ;;  %v2717_v4 = vadd.f32 %v2681_v1, %v2540_v59  ;;  %v2935_v5 = vpop.f32.mrf.mxu0  ;;  %v2692_v61 = vld [vmem:[#allocation3 + $0x60] sm:$0xff] }
 0x1b7   : > { %v2315_v6 = vld [vmem:[#allocation3 + $0x108] sm:$0xff]  ;;  %v4926_v7 = vpop.f32.mrf.mxu1 }
 0x1b8   : > { %2389 = vst.msk [vmem:[#allocation3 + $0x118] sm:$0xff] %vm439_vm3, %v2353_v2  ;;  %v2351_v10 = vadd.f32 %v2315_v6, %v2270_v54  ;;  %2753 = vst.msk [vmem:[#allocation3 + $0x8] sm:$0xff] %vm439_vm3, %v2717_v4  ;;  %v2722_v19 = vadd.f32 %v4926_v7, %v2686_v9  ;;  %v4961_v18 = vpop.f32.mrf.mxu0  ;;  %v2695_v4 = vld [vmem:[#allocation3 + $0x78] sm:$0xff] }
 0x1b9   : > { %v3080_v13 = vld [vmem:[#allocation3 + $0x10] sm:$0xff]  ;;  %v2553_v21 = vpop.f32.mrf.mxu1 }
 0x1ba   : > { %2387 = vst.msk [vmem:[#allocation3 + $0x108] sm:$0xff] %vm439_vm3, %v2351_v10  ;;  %v3116_v16 = vadd.f32 %v4960_v62, %v3080_v13  ;;  %2758 = vst.msk [vmem:[#allocation3 + $0x30] sm:$0xff] %vm439_vm3, %v2722_v19  ;;  %v2720_v12 = vadd.f32 %v2684_v36, %v2553_v21  ;;  %v2938_v17 = vpop.f32.mrf.mxu0  ;;  %v2693_v19 = vld [vmem:[#allocation3 + $0x68] sm:$0xff] }
 0x1bb   : > { %v3078_v26 = vld [vmem:[#allocation3] sm:$0xff]  ;;  %v4927_v20 = vpop.f32.mrf.mxu1 }
 0x1bc   : > { %3152 = vst.msk [vmem:[#allocation3 + $0x10] sm:$0xff] %vm439_vm3, %v3116_v16  ;;  %v3114_v22 = vadd.f32 %v3078_v26, %v2935_v5  ;;  %2756 = vst.msk [vmem:[#allocation3 + $0x20] sm:$0xff] %vm439_vm3, %v2720_v12  ;;  %v2723_v15 = vadd.f32 %v4927_v20, %v2687_v41  ;;  %v4964_v23 = vpop.f32.mrf.mxu0  ;;  %v2698_v12 = vld [vmem:[#allocation3 + $0x90] sm:$0xff] }
 0x1bd   : > { %v3081_v24 = vld [vmem:[#allocation3 + $0x18] sm:$0xff]  ;;  %v2556_v39 = vpop.f32.mrf.mxu1 }
 0x1be   : > { %3150 = vst.msk [vmem:[#allocation3] sm:$0xff] %vm439_vm3, %v3114_v22  ;;  %v3117_v11 = vadd.f32 %v4961_v18, %v3081_v24  ;;  %2759 = vst.msk [vmem:[#allocation3 + $0x38] sm:$0xff] %vm439_vm3, %v2723_v15  ;;  %v2721_v27 = vadd.f32 %v2685_v25, %v2556_v39  ;;  %v2951_v30 = vpop.f32.mrf.mxu0  ;;  %v2696_v15 = vld [vmem:[#allocation3 + $0x80] sm:$0xff] }
 0x1bf   : > { %v3079_v31 = vld [vmem:[#allocation3 + $0x8] sm:$0xff]  ;;  %v4930_v55 = vpop.f32.mrf.mxu1 }
 0x1c0   : > { %3153 = vst.msk [vmem:[#allocation3 + $0x18] sm:$0xff] %vm439_vm3, %v3117_v11  ;;  %v3115_v0 = vadd.f32 %v3079_v31, %v2938_v17  ;;  %2757 = vst.msk [vmem:[#allocation3 + $0x28] sm:$0xff] %vm439_vm3, %v2721_v27  ;;  %v2726_v33 = vadd.f32 %v4930_v55, %v2690_v40  ;;  %v4965_v34 = vpop.f32.mrf.mxu0  ;;  %v2699_v27 = vld [vmem:[#allocation3 + $0x98] sm:$0xff] }
 0x1c1   : > { %v3084_v35 = vld [vmem:[#allocation3 + $0x30] sm:$0xff]  ;;  %v2569_v3 = vpop.f32.mrf.mxu1 }
 0x1c2   : > { %3151 = vst.msk [vmem:[#allocation3 + $0x8] sm:$0xff] %vm439_vm3, %v3115_v0  ;;  %v3120_v14 = vadd.f32 %v4964_v23, %v3084_v35  ;;  %2762 = vst.msk [vmem:[#allocation3 + $0x50] sm:$0xff] %vm439_vm3, %v2726_v33  ;;  %v2724_v38 = vadd.f32 %v2688_v37, %v2569_v3  ;;  %v2954_v42 = vpop.f32.mrf.mxu0  ;;  %v2697_v33 = vld [vmem:[#allocation3 + $0x88] sm:$0xff] }
 0x1c3   : > { %v3082_v43 = vld [vmem:[#allocation3 + $0x20] sm:$0xff]  ;;  %v4931_v28 = vpop.f32.mrf.mxu1 }
 0x1c4   : > { %3156 = vst.msk [vmem:[#allocation3 + $0x30] sm:$0xff] %vm439_vm3, %v3120_v14  ;;  %v3118_v29 = vadd.f32 %v3082_v43, %v2951_v30  ;;  %2760 = vst.msk [vmem:[#allocation3 + $0x40] sm:$0xff] %vm439_vm3, %v2724_v38  ;;  %v2727_v46 = vadd.f32 %v4931_v28, %v2691_v45  ;;  %v4968_v48 = vpop.f32.mrf.mxu0  ;;  %v2702_v38 = vld [vmem:[#allocation3 + $0xb0] sm:$0xff] }
 0x1c5   : > { %v3085_v8 = vld [vmem:[#allocation3 + $0x38] sm:$0xff]  ;;  %v2572_v32 = vpop.f32.mrf.mxu1 }
 0x1c6   : > { %3154 = vst.msk [vmem:[#allocation3 + $0x20] sm:$0xff] %vm439_vm3, %v3118_v29  ;;  %v3121_v44 = vadd.f32 %v4965_v34, %v3085_v8  ;;  %2763 = vst.msk [vmem:[#allocation3 + $0x58] sm:$0xff] %vm439_vm3, %v2727_v46  ;;  %v2725_v50 = vadd.f32 %v2689_v49, %v2572_v32  ;;  %v2967_v51 = vpop.f32.mrf.mxu0  ;;  %v2700_v46 = vld [vmem:[#allocation3 + $0xa0] sm:$0xff] }
 0x1c7   : > { %v3083_v52 = vld [vmem:[#allocation3 + $0x28] sm:$0xff]  ;;  %v4934_v47 = vpop.f32.mrf.mxu1 }
 0x1c8   : > { %3157 = vst.msk [vmem:[#allocation3 + $0x38] sm:$0xff] %vm439_vm3, %v3121_v44  ;;  %v3119_v54 = vadd.f32 %v3083_v52, %v2954_v42  ;;  %2761 = vst.msk [vmem:[#allocation3 + $0x48] sm:$0xff] %vm439_vm3, %v2725_v50  ;;  %v2730_v56 = vadd.f32 %v4934_v47, %v2694_v53  ;;  %v4969_v57 = vpop.f32.mrf.mxu0  ;;  %v2703_v50 = vld [vmem:[#allocation3 + $0xb8] sm:$0xff] }
 0x1c9   : > { %v3088_v58 = vld [vmem:[#allocation3 + $0x50] sm:$0xff]  ;;  %v2585_v60 = vpop.f32.mrf.mxu1 }
 0x1ca   : > { %3155 = vst.msk [vmem:[#allocation3 + $0x28] sm:$0xff] %vm439_vm3, %v3119_v54  ;;  %v3124_v62 = vadd.f32 %v4968_v48, %v3088_v58  ;;  %2766 = vst.msk [vmem:[#allocation3 + $0x70] sm:$0xff] %vm439_vm3, %v2730_v56  ;;  %v2728_v63 = vadd.f32 %v2692_v61, %v2585_v60  ;;  %v2970_v59 = vpop.f32.mrf.mxu0  ;;  %v2701_v56 = vld [vmem:[#allocation3 + $0xa8] sm:$0xff] }
 0x1cb   : > { %v3086_v1 = vld [vmem:[#allocation3 + $0x40] sm:$0xff]  ;;  %v4935_v2 = vpop.f32.mrf.mxu1 }
 0x1cc   : > { %3160 = vst.msk [vmem:[#allocation3 + $0x50] sm:$0xff] %vm439_vm3, %v3124_v62  ;;  %v3122_v5 = vadd.f32 %v3086_v1, %v2967_v51  ;;  %2764 = vst.msk [vmem:[#allocation3 + $0x60] sm:$0xff] %vm439_vm3, %v2728_v63  ;;  %v2731_v6 = vadd.f32 %v4935_v2, %v2695_v4  ;;  %v4972_v7 = vpop.f32.mrf.mxu0  ;;  %v2706_v63 = vld [vmem:[#allocation3 + $0xd0] sm:$0xff] }
 0x1cd   : > { %v3089_v9 = vld [vmem:[#allocation3 + $0x58] sm:$0xff]  ;;  %v2588_v10 = vpop.f32.mrf.mxu1 }
 0x1ce   : > { %3158 = vst.msk [vmem:[#allocation3 + $0x40] sm:$0xff] %vm439_vm3, %v3122_v5  ;;  %v3125_v18 = vadd.f32 %v4969_v57, %v3089_v9  ;;  %2767 = vst.msk [vmem:[#allocation3 + $0x78] sm:$0xff] %vm439_vm3, %v2731_v6  ;;  %v2729_v13 = vadd.f32 %v2693_v19, %v2588_v10  ;;  %v2983_v21 = vpop.f32.mrf.mxu0  ;;  %v2704_v6 = vld [vmem:[#allocation3 + $0xc0] sm:$0xff] }
 0x1cf   : > { %v3087_v36 = vld [vmem:[#allocation3 + $0x48] sm:$0xff]  ;;  %v4938_v16 = vpop.f32.mrf.mxu1 }
 0x1d0   : > { %3161 = vst.msk [vmem:[#allocation3 + $0x58] sm:$0xff] %vm439_vm3, %v3125_v18  ;;  %v3123_v17 = vadd.f32 %v3087_v36, %v2970_v59  ;;  %2765 = vst.msk [vmem:[#allocation3 + $0x68] sm:$0xff] %vm439_vm3, %v2729_v13  ;;  %v2734_v26 = vadd.f32 %v4938_v16, %v2698_v12  ;;  %v4973_v20 = vpop.f32.mrf.mxu0  ;;  %v2707_v13 = vld [vmem:[#allocation3 + $0xd8] sm:$0xff] }
 0x1d1   : > { %v3092_v41 = vld [vmem:[#allocation3 + $0x70] sm:$0xff]  ;;  %v2601_v22 = vpop.f32.mrf.mxu1 }
 0x1d2   : > { %3159 = vst.msk [vmem:[#allocation3 + $0x48] sm:$0xff] %vm439_vm3, %v3123_v17  ;;  %v3128_v23 = vadd.f32 %v4972_v7, %v3092_v41  ;;  %2770 = vst.msk [vmem:[#allocation3 + $0x90] sm:$0xff] %vm439_vm3, %v2734_v26  ;;  %v2732_v24 = vadd.f32 %v2696_v15, %v2601_v22  ;;  %v2986_v39 = vpop.f32.mrf.mxu0  ;;  %v2705_v26 = vld [vmem:[#allocation3 + $0xc8] sm:$0xff] }
 0x1d3   : > { %v3090_v25 = vld [vmem:[#allocation3 + $0x60] sm:$0xff]  ;;  %v4939_v11 = vpop.f32.mrf.mxu1 }
 0x1d4   : > { %3164 = vst.msk [vmem:[#allocation3 + $0x70] sm:$0xff] %vm439_vm3, %v3128_v23  ;;  %v3126_v30 = vadd.f32 %v3090_v25, %v2983_v21  ;;  %2768 = vst.msk [vmem:[#allocation3 + $0x80] sm:$0xff] %vm439_vm3, %v2732_v24  ;;  %v2735_v31 = vadd.f32 %v4939_v11, %v2699_v27  ;;  %v4976_v55 = vpop.f32.mrf.mxu0  ;;  %v2710_v24 = vld [vmem:[#allocation3 + $0xf0] sm:$0xff] }
 0x1d5   : > { %v3093_v40 = vld [vmem:[#allocation3 + $0x78] sm:$0xff]  ;;  %v2604_v0 = vpop.f32.mrf.mxu1 }
 0x1d6   : > { %3162 = vst.msk [vmem:[#allocation3 + $0x60] sm:$0xff] %vm439_vm3, %v3126_v30  ;;  %v3129_v34 = vadd.f32 %v4973_v20, %v3093_v40  ;;  %2771 = vst.msk [vmem:[#allocation3 + $0x98] sm:$0xff] %vm439_vm3, %v2735_v31  ;;  %v2733_v35 = vadd.f32 %v2697_v33, %v2604_v0  ;;  %v2999_v3 = vpop.f32.mrf.mxu0  ;;  %v2708_v31 = vld [vmem:[#allocation3 + $0xe0] sm:$0xff] }
 0x1d7   : > { %v3091_v37 = vld [vmem:[#allocation3 + $0x68] sm:$0xff]  ;;  %v4942_v14 = vpop.f32.mrf.mxu1 }
 0x1d8   : > { %3165 = vst.msk [vmem:[#allocation3 + $0x78] sm:$0xff] %vm439_vm3, %v3129_v34  ;;  %v3127_v42 = vadd.f32 %v3091_v37, %v2986_v39  ;;  %2769 = vst.msk [vmem:[#allocation3 + $0x88] sm:$0xff] %vm439_vm3, %v2733_v35  ;;  %v2738_v43 = vadd.f32 %v4942_v14, %v2702_v38  ;;  %v4977_v28 = vpop.f32.mrf.mxu0  ;;  %v2711_v35 = vld [vmem:[#allocation3 + $0xf8] sm:$0xff] }
 0x1d9   : > { %v3096_v45 = vld [vmem:[#allocation3 + $0x90] sm:$0xff]  ;;  %v2617_v29 = vpop.f32.mrf.mxu1 }
 0x1da   : > { %3163 = vst.msk [vmem:[#allocation3 + $0x68] sm:$0xff] %vm439_vm3, %v3127_v42  ;;  %v3132_v48 = vadd.f32 %v4976_v55, %v3096_v45  ;;  %2774 = vst.msk [vmem:[#allocation3 + $0xb0] sm:$0xff] %vm439_vm3, %v2738_v43  ;;  %v2736_v8 = vadd.f32 %v2700_v46, %v2617_v29  ;;  %v3002_v32 = vpop.f32.mrf.mxu0  ;;  %v2709_v43 = vld [vmem:[#allocation3 + $0xe8] sm:$0xff] }
 0x1db   : > { %v3094_v49 = vld [vmem:[#allocation3 + $0x80] sm:$0xff]  ;;  %v4943_v44 = vpop.f32.mrf.mxu1 }
 0x1dc   : > { %3168 = vst.msk [vmem:[#allocation3 + $0x90] sm:$0xff] %vm439_vm3, %v3132_v48  ;;  %v3130_v51 = vadd.f32 %v3094_v49, %v2999_v3  ;;  %2772 = vst.msk [vmem:[#allocation3 + $0xa0] sm:$0xff] %vm439_vm3, %v2736_v8  ;;  %v2739_v52 = vadd.f32 %v4943_v44, %v2703_v50  ;;  %v4980_v47 = vpop.f32.mrf.mxu0  ;;  %v2714_v8 = vld [vmem:[#allocation3 + $0x110] sm:$0xff] }
 0x1dd   : > { %v3097_v53 = vld [vmem:[#allocation3 + $0x98] sm:$0xff]  ;;  %v2620_v54 = vpop.f32.mrf.mxu1 }
 0x1de   : > { %3166 = vst.msk [vmem:[#allocation3 + $0x80] sm:$0xff] %vm439_vm3, %v3130_v51  ;;  %v3133_v57 = vadd.f32 %v4977_v28, %v3097_v53  ;;  %2775 = vst.msk [vmem:[#allocation3 + $0xb8] sm:$0xff] %vm439_vm3, %v2739_v52  ;;  %v2737_v58 = vadd.f32 %v2701_v56, %v2620_v54  ;;  %v3015_v60 = vpop.f32.mrf.mxu0  ;;  %v2712_v52 = vld [vmem:[#allocation3 + $0x100] sm:$0xff] }
 0x1df   : > { %v3095_v61 = vld [vmem:[#allocation3 + $0x88] sm:$0xff]  ;;  %v4946_v62 = vpop.f32.mrf.mxu1 }
 0x1e0   : > { %3169 = vst.msk [vmem:[#allocation3 + $0x98] sm:$0xff] %vm439_vm3, %v3133_v57  ;;  %v3131_v59 = vadd.f32 %v3095_v61, %v3002_v32  ;;  %2773 = vst.msk [vmem:[#allocation3 + $0xa8] sm:$0xff] %vm439_vm3, %v2737_v58  ;;  %v2742_v1 = vadd.f32 %v4946_v62, %v2706_v63  ;;  %v4981_v2 = vpop.f32.mrf.mxu0  ;;  %v2715_v58 = vld [vmem:[#allocation3 + $0x118] sm:$0xff] }
 0x1e1   : > { %v3100_v4 = vld [vmem:[#allocation3 + $0xb0] sm:$0xff]  ;;  %v2633_v5 = vpop.f32.mrf.mxu1 }
 0x1e2   : > { %3167 = vst.msk [vmem:[#allocation3 + $0x88] sm:$0xff] %vm439_vm3, %v3131_v59  ;;  %v3136_v7 = vadd.f32 %v4980_v47, %v3100_v4  ;;  %2778 = vst.msk [vmem:[#allocation3 + $0xd0] sm:$0xff] %vm439_vm3, %v2742_v1  ;;  %v2740_v9 = vadd.f32 %v2704_v6, %v2633_v5  ;;  %v3018_v10 = vpop.f32.mrf.mxu0  ;;  %v2713_v1 = vld [vmem:[#allocation3 + $0x108] sm:$0xff] }
 0x1e3   : > { %v3098_v19 = vld [vmem:[#allocation3 + $0xa0] sm:$0xff]  ;;  %v4947_v18 = vpop.f32.mrf.mxu1 }
 0x1e4   : > { %3172 = vst.msk [vmem:[#allocation3 + $0xb0] sm:$0xff] %vm439_vm3, %v3136_v7  ;;  %v3134_v21 = vadd.f32 %v3098_v19, %v3015_v60  ;;  %2776 = vst.msk [vmem:[#allocation3 + $0xc0] sm:$0xff] %vm439_vm3, %v2740_v9  ;;  %v2743_v36 = vadd.f32 %v4947_v18, %v2707_v13  ;;  %v4984_v16 = vpop.f32.mrf.mxu0  ;;  %v3478_v9 = vld [vmem:[#allocation3 + $0x10] sm:$0xff] }
 0x1e5   : > { %v3101_v12 = vld [vmem:[#allocation3 + $0xb8] sm:$0xff]  ;;  %v2636_v17 = vpop.f32.mrf.mxu1 }
 0x1e6   : > { %3170 = vst.msk [vmem:[#allocation3 + $0xa0] sm:$0xff] %vm439_vm3, %v3134_v21  ;;  %v3137_v20 = vadd.f32 %v4981_v2, %v3101_v12  ;;  %2779 = vst.msk [vmem:[#allocation3 + $0xd8] sm:$0xff] %vm439_vm3, %v2743_v36  ;;  %v2741_v41 = vadd.f32 %v2705_v26, %v2636_v17  ;;  %v3031_v22 = vpop.f32.mrf.mxu0  ;;  %v3476_v36 = vld [vmem:[#allocation3] sm:$0xff] }
 0x1e7   : > { %v3099_v15 = vld [vmem:[#allocation3 + $0xa8] sm:$0xff]  ;;  %v4950_v23 = vpop.f32.mrf.mxu1 }
 0x1e8   : > { %3173 = vst.msk [vmem:[#allocation3 + $0xb8] sm:$0xff] %vm439_vm3, %v3137_v20  ;;  %v3135_v39 = vadd.f32 %v3099_v15, %v3018_v10  ;;  %2777 = vst.msk [vmem:[#allocation3 + $0xc8] sm:$0xff] %vm439_vm3, %v2741_v41  ;;  %v2746_v25 = vadd.f32 %v4950_v23, %v2710_v24  ;;  %v4985_v11 = vpop.f32.mrf.mxu0  ;;  %v3479_v41 = vld [vmem:[#allocation3 + $0x18] sm:$0xff] }
 0x1e9   : > { %v3104_v27 = vld [vmem:[#allocation3 + $0xd0] sm:$0xff]  ;;  %v2649_v30 = vpop.f32.mrf.mxu1 }
 0x1ea   : > { %3171 = vst.msk [vmem:[#allocation3 + $0xa8] sm:$0xff] %vm439_vm3, %v3135_v39  ;;  %v3140_v55 = vadd.f32 %v4984_v16, %v3104_v27  ;;  %2782 = vst.msk [vmem:[#allocation3 + $0xf0] sm:$0xff] %vm439_vm3, %v2746_v25  ;;  %v2744_v40 = vadd.f32 %v2708_v31, %v2649_v30  ;;  %v3034_v0 = vpop.f32.mrf.mxu0  ;;  %v3477_v25 = vld [vmem:[#allocation3 + $0x8] sm:$0xff] }
 0x1eb   : > { %v3102_v33 = vld [vmem:[#allocation3 + $0xc0] sm:$0xff]  ;;  %v4951_v34 = vpop.f32.mrf.mxu1 }
 0x1ec   : > { %3176 = vst.msk [vmem:[#allocation3 + $0xd0] sm:$0xff] %vm439_vm3, %v3140_v55  ;;  %v3138_v3 = vadd.f32 %v3102_v33, %v3031_v22  ;;  %2780 = vst.msk [vmem:[#allocation3 + $0xe0] sm:$0xff] %vm439_vm3, %v2744_v40  ;;  %v2747_v37 = vadd.f32 %v4951_v34, %v2711_v35  ;;  %v4988_v14 = vpop.f32.mrf.mxu0  ;;  %v3482_v40 = vld [vmem:[#allocation3 + $0x30] sm:$0xff] }
 0x1ed   : > { %v3105_v38 = vld [vmem:[#allocation3 + $0xd8] sm:$0xff]  ;;  %v2652_v42 = vpop.f32.mrf.mxu1 }
 0x1ee   : > { %3174 = vst.msk [vmem:[#allocation3 + $0xc0] sm:$0xff] %vm439_vm3, %v3138_v3  ;;  %v3141_v28 = vadd.f32 %v4985_v11, %v3105_v38  ;;  %2783 = vst.msk [vmem:[#allocation3 + $0xf8] sm:$0xff] %vm439_vm3, %v2747_v37  ;;  %v2745_v45 = vadd.f32 %v2709_v43, %v2652_v42  ;;  %v3047_v29 = vpop.f32.mrf.mxu0  ;;  %v3480_v37 = vld [vmem:[#allocation3 + $0x20] sm:$0xff] }
 0x1ef   : > { %v3103_v46 = vld [vmem:[#allocation3 + $0xc8] sm:$0xff]  ;;  %v4954_v48 = vpop.f32.mrf.mxu1 }
 0x1f0   : > { %3177 = vst.msk [vmem:[#allocation3 + $0xd8] sm:$0xff] %vm439_vm3, %v3141_v28  ;;  %v3139_v32 = vadd.f32 %v3103_v46, %v3034_v0  ;;  %2781 = vst.msk [vmem:[#allocation3 + $0xe8] sm:$0xff] %vm439_vm3, %v2745_v45  ;;  %v2750_v49 = vadd.f32 %v4954_v48, %v2714_v8  ;;  %v4989_v44 = vpop.f32.mrf.mxu0  ;;  %v3483_v45 = vld [vmem:[#allocation3 + $0x38] sm:$0xff] }
 0x1f1   : > { %v3108_v50 = vld [vmem:[#allocation3 + $0xf0] sm:$0xff]  ;;  %v2665_v51 = vpop.f32.mrf.mxu1 }
 0x1f2   : > { %3175 = vst.msk [vmem:[#allocation3 + $0xc8] sm:$0xff] %vm439_vm3, %v3139_v32  ;;  %v3144_v47 = vadd.f32 %v4988_v14, %v3108_v50  ;;  %2786 = vst.msk [vmem:[#allocation3 + $0x110] sm:$0xff] %vm439_vm3, %v2750_v49  ;;  %v2748_v53 = vadd.f32 %v2712_v52, %v2665_v51  ;;  %v3050_v54 = vpop.f32.mrf.mxu0  ;;  %v3481_v49 = vld [vmem:[#allocation3 + $0x28] sm:$0xff] }
 0x1f3   : > { %v3106_v56 = vld [vmem:[#allocation3 + $0xe0] sm:$0xff]  ;;  %v4955_v57 = vpop.f32.mrf.mxu1 }
 0x1f4   : > { %3180 = vst.msk [vmem:[#allocation3 + $0xf0] sm:$0xff] %vm439_vm3, %v3144_v47  ;;  %v3142_v60 = vadd.f32 %v3106_v56, %v3047_v29  ;;  %2784 = vst.msk [vmem:[#allocation3 + $0x100] sm:$0xff] %vm439_vm3, %v2748_v53  ;;  %v2751_v61 = vadd.f32 %v4955_v57, %v2715_v58  ;;  %v4992_v62 = vpop.f32.mrf.mxu0  ;;  %v3486_v53 = vld [vmem:[#allocation3 + $0x50] sm:$0xff] }
 0x1f5   : > { %v3109_v63 = vld [vmem:[#allocation3 + $0xf8] sm:$0xff]  ;;  %v2668_v59 = vpop.f32.mrf.mxu1 }
 0x1f6   : > { %3178 = vst.msk [vmem:[#allocation3 + $0xe0] sm:$0xff] %vm439_vm3, %v3142_v60  ;;  %v3145_v2 = vadd.f32 %v4989_v44, %v3109_v63  ;;  %2787 = vst.msk [vmem:[#allocation3 + $0x118] sm:$0xff] %vm439_vm3, %v2751_v61  ;;  %v2749_v4 = vadd.f32 %v2713_v1, %v2668_v59  ;;  %v3063_v5 = vpop.f32.mrf.mxu0  ;;  %v3484_v61 = vld [vmem:[#allocation3 + $0x40] sm:$0xff] }
 0x1f7   : > { %v3107_v6 = vld [vmem:[#allocation3 + $0xe8] sm:$0xff]  ;;  %v4998_v7 = vpop.f32.mrf.mxu1 }
 0x1f8   : > { %3181 = vst.msk [vmem:[#allocation3 + $0xf8] sm:$0xff] %vm439_vm3, %v3145_v2  ;;  %v3143_v10 = vadd.f32 %v3107_v6, %v3050_v54  ;;  %2785 = vst.msk [vmem:[#allocation3 + $0x108] sm:$0xff] %vm439_vm3, %v2749_v4  ;;  %v3514_v19 = vadd.f32 %v4998_v7, %v3478_v9  ;;  %v4993_v18 = vpop.f32.mrf.mxu0  ;;  %v3487_v4 = vld [vmem:[#allocation3 + $0x58] sm:$0xff] }
 0x1f9   : > { %v3112_v13 = vld [vmem:[#allocation3 + $0x110] sm:$0xff]  ;;  %v3333_v21 = vpop.f32.mrf.mxu1 }
 0x1fa   : > { %3179 = vst.msk [vmem:[#allocation3 + $0xe8] sm:$0xff] %vm439_vm3, %v3143_v10  ;;  %v3148_v16 = vadd.f32 %v4992_v62, %v3112_v13  ;;  %3550 = vst.msk [vmem:[#allocation3 + $0x10] sm:$0xff] %vm439_vm3, %v3514_v19  ;;  %v3512_v12 = vadd.f32 %v3476_v36, %v3333_v21  ;;  %v3066_v17 = vpop.f32.mrf.mxu0  ;;  %v3485_v19 = vld [vmem:[#allocation3 + $0x48] sm:$0xff] }
 0x1fb   : > { %v3110_v26 = vld [vmem:[#allocation3 + $0x100] sm:$0xff]  ;;  %v4999_v20 = vpop.f32.mrf.mxu1 }
 0x1fc   : > { %3184 = vst.msk [vmem:[#allocation3 + $0x110] sm:$0xff] %vm439_vm3, %v3148_v16  ;;  %v3146_v22 = vadd.f32 %v3110_v26, %v3063_v5  ;;  %3548 = vst.msk [vmem:[#allocation3] sm:$0xff] %vm439_vm3, %v3512_v12  ;;  %v3515_v15 = vadd.f32 %v4999_v20, %v3479_v41  ;;  %v5036_v23 = vpop.f32.mrf.mxu0  ;;  %v3488_v41 = vld [vmem:[#allocation3 + $0x60] sm:$0xff] }
 0x1fd   : > { %v3113_v24 = vld [vmem:[#allocation3 + $0x118] sm:$0xff]  ;;  %v3336_v39 = vpop.f32.mrf.mxu1 }
 0x1fe   : > { %3182 = vst.msk [vmem:[#allocation3 + $0x100] sm:$0xff] %vm439_vm3, %v3146_v22  ;;  %v3149_v11 = vadd.f32 %v4993_v18, %v3113_v24  ;;  %3551 = vst.msk [vmem:[#allocation3 + $0x18] sm:$0xff] %vm439_vm3, %v3515_v15  ;;  %v3513_v27 = vadd.f32 %v3477_v25, %v3336_v39  ;;  %v3731_v30 = vpop.f32.mrf.mxu0 }
 0x1ff   : > { %v3111_v31 = vld [vmem:[#allocation3 + $0x108] sm:$0xff]  ;;  %v5002_v55 = vpop.f32.mrf.mxu1 }
 0x200   : > { %3185 = vst.msk [vmem:[#allocation3 + $0x118] sm:$0xff] %vm439_vm3, %v3149_v11  ;;  %v3147_v0 = vadd.f32 %v3111_v31, %v3066_v17  ;;  %3549 = vst.msk [vmem:[#allocation3 + $0x8] sm:$0xff] %vm439_vm3, %v3513_v27  ;;  %v3518_v33 = vadd.f32 %v5002_v55, %v3482_v40  ;;  %v5037_v34 = vpop.f32.mrf.mxu0  ;;  %v3490_v17 = vld [vmem:[#allocation3 + $0x70] sm:$0xff]  ;;  %v3491_v55 = vld [vmem:[#allocation3 + $0x78] sm:$0xff] }
 0x201   : > { %v3876_v35 = vld [vmem:[#allocation3 + $0x10] sm:$0xff]  ;;  %v3349_v3 = vpop.f32.mrf.mxu1 }
 0x202   : > { %3183 = vst.msk [vmem:[#allocation3 + $0x108] sm:$0xff] %vm439_vm3, %v3147_v0  ;;  %v3912_v14 = vadd.f32 %v5036_v23, %v3876_v35  ;;  %3554 = vst.msk [vmem:[#allocation3 + $0x30] sm:$0xff] %vm439_vm3, %v3518_v33  ;;  %v3516_v38 = vadd.f32 %v3480_v37, %v3349_v3  ;;  %v3734_v42 = vpop.f32.mrf.mxu0  ;;  %v3489_v37 = vld [vmem:[#allocation3 + $0x68] sm:$0xff] }
 0x203   : > { %v3874_v43 = vld [vmem:[#allocation3] sm:$0xff]  ;;  %v5003_v28 = vpop.f32.mrf.mxu1 }
 0x204   : > { %3948 = vst.msk [vmem:[#allocation3 + $0x10] sm:$0xff] %vm439_vm3, %v3912_v14  ;;  %v3910_v29 = vadd.f32 %v3874_v43, %v3731_v30  ;;  %3552 = vst.msk [vmem:[#allocation3 + $0x20] sm:$0xff] %vm439_vm3, %v3516_v38  ;;  %v3519_v46 = vadd.f32 %v5003_v28, %v3483_v45  ;;  %v5040_v48 = vpop.f32.mrf.mxu0 }
 0x205   : > { %v3877_v8 = vld [vmem:[#allocation3 + $0x18] sm:$0xff]  ;;  %v3352_v32 = vpop.f32.mrf.mxu1 }
 0x206   : > { %3946 = vst.msk [vmem:[#allocation3] sm:$0xff] %vm439_vm3, %v3910_v29  ;;  %v3913_v44 = vadd.f32 %v5037_v34, %v3877_v8  ;;  %3555 = vst.msk [vmem:[#allocation3 + $0x38] sm:$0xff] %vm439_vm3, %v3519_v46  ;;  %v3517_v50 = vadd.f32 %v3481_v49, %v3352_v32  ;;  %v3747_v51 = vpop.f32.mrf.mxu0  ;;  %v3494_v29 = vld [vmem:[#allocation3 + $0x90] sm:$0xff] }
 0x207   : > { %v3875_v52 = vld [vmem:[#allocation3 + $0x8] sm:$0xff]  ;;  %v5006_v47 = vpop.f32.mrf.mxu1 }
 0x208   : > { %3949 = vst.msk [vmem:[#allocation3 + $0x18] sm:$0xff] %vm439_vm3, %v3913_v44  ;;  %v3911_v54 = vadd.f32 %v3875_v52, %v3734_v42  ;;  %3553 = vst.msk [vmem:[#allocation3 + $0x28] sm:$0xff] %vm439_vm3, %v3517_v50  ;;  %v3522_v56 = vadd.f32 %v5006_v47, %v3486_v53  ;;  %v5041_v57 = vpop.f32.mrf.mxu0 }
 0x209   : > { %v3880_v58 = vld [vmem:[#allocation3 + $0x30] sm:$0xff]  ;;  %v3365_v60 = vpop.f32.mrf.mxu1 }
 0x20a   : > { %3947 = vst.msk [vmem:[#allocation3 + $0x8] sm:$0xff] %vm439_vm3, %v3911_v54  ;;  %v3916_v62 = vadd.f32 %v5040_v48, %v3880_v58  ;;  %3558 = vst.msk [vmem:[#allocation3 + $0x50] sm:$0xff] %vm439_vm3, %v3522_v56  ;;  %v3520_v63 = vadd.f32 %v3484_v61, %v3365_v60  ;;  %v3750_v59 = vpop.f32.mrf.mxu0 }
 0x20b   : > { %v3878_v1 = vld [vmem:[#allocation3 + $0x20] sm:$0xff]  ;;  %v5007_v2 = vpop.f32.mrf.mxu1 }
 0x20c   : > { %3952 = vst.msk [vmem:[#allocation3 + $0x30] sm:$0xff] %vm439_vm3, %v3916_v62  ;;  %v3914_v5 = vadd.f32 %v3878_v1, %v3747_v51  ;;  %3556 = vst.msk [vmem:[#allocation3 + $0x40] sm:$0xff] %vm439_vm3, %v3520_v63  ;;  %v3523_v6 = vadd.f32 %v5007_v2, %v3487_v4  ;;  %v5044_v7 = vpop.f32.mrf.mxu0  ;;  %v3492_v51 = vld [vmem:[#allocation3 + $0x80] sm:$0xff]  ;;  %v3493_v1 = vld [vmem:[#allocation3 + $0x88] sm:$0xff] }
 0x20d   : > { %v3881_v9 = vld [vmem:[#allocation3 + $0x38] sm:$0xff]  ;;  %v3368_v10 = vpop.f32.mrf.mxu1 }
 0x20e   : > { %3950 = vst.msk [vmem:[#allocation3 + $0x20] sm:$0xff] %vm439_vm3, %v3914_v5  ;;  %v3917_v18 = vadd.f32 %v5041_v57, %v3881_v9  ;;  %3559 = vst.msk [vmem:[#allocation3 + $0x58] sm:$0xff] %vm439_vm3, %v3523_v6  ;;  %v3521_v13 = vadd.f32 %v3485_v19, %v3368_v10  ;;  %v3763_v21 = vpop.f32.mrf.mxu0  ;;  %v3495_v57 = vld [vmem:[#allocation3 + $0x98] sm:$0xff]  ;;  %v3498_v19 = vld [vmem:[#allocation3 + $0xb0] sm:$0xff] }
 0x20f   : > { %v3986_v36 = vld [vmem:[#allocation3 + $0x13] sm:$0xff]  ;;  %v3879_v16 = vld [vmem:[#allocation3 + $0x28] sm:$0xff]  ;;  %v5010_v12 = vpop.f32.mrf.mxu1 }
 0x210   : > { %4523 = vst.msk [vmem:[%s5151_s30 + $0x10] sm:$0xff] %vm439_vm3, %v3986_v36  ;;  %3953 = vst.msk [vmem:[#allocation3 + $0x38] sm:$0xff] %vm439_vm3, %v3917_v18  ;;  %v3915_v26 = vadd.f32 %v3879_v16, %v3750_v59  ;;  %v3526_v20 = vadd.f32 %v5010_v12, %v3490_v17  ;;  %v5045_v22 = vpop.f32.mrf.mxu0  ;;  %v3496_v17 = vld [vmem:[#allocation3 + $0xa0] sm:$0xff] }
 0x211   : > { %3557 = vst.msk [vmem:[#allocation3 + $0x48] sm:$0xff] %vm439_vm3, %v3521_v13  ;;  %v3982_v15 = vld [vmem:[#allocation3 + $0x1] sm:$0xff]  ;;  %v3983_v23 = vld [vmem:[#allocation3 + $0x9] sm:$0xff]  ;;  %v3381_v39 = vpop.f32.mrf.mxu1 }
 0x212   : > { %v3884_v24 = vld [vmem:[#allocation3 + $0x50] sm:$0xff]  ;;  %3984 = vst.msk [vmem:[%s5151_s30] sm:$0xff] %vm439_vm3, %v3982_v15  ;;  %3985 = vst.msk [vmem:[%s5151_s30 + $0x8] sm:$0xff] %vm439_vm3, %v3983_v23  ;;  %v3524_v11 = vadd.f32 %v3488_v41, %v3381_v39  ;;  %v3766_v27 = vpop.f32.mrf.mxu0 }
 0x213   : > { %3951 = vst.msk [vmem:[#allocation3 + $0x28] sm:$0xff] %vm439_vm3, %v3915_v26  ;;  %v3920_v25 = vadd.f32 %v5044_v7, %v3884_v24  ;;  %3562 = vst.msk [vmem:[#allocation3 + $0x70] sm:$0xff] %vm439_vm3, %v3526_v20  ;;  %v3882_v30 = vld [vmem:[#allocation3 + $0x40] sm:$0xff]  ;;  %v5011_v31 = vpop.f32.mrf.mxu1 }
 0x214   : > { %v3918_v40 = vadd.f32 %v3882_v30, %v3763_v21  ;;  %3560 = vst.msk [vmem:[#allocation3 + $0x60] sm:$0xff] %vm439_vm3, %v3524_v11  ;;  %v3527_v0 = vadd.f32 %v5011_v31, %v3491_v55  ;;  %v5048_v33 = vpop.f32.mrf.mxu0  ;;  %v3497_v31 = vld [vmem:[#allocation3 + $0xa8] sm:$0xff] }
 0x215   : > { %3956 = vst.msk [vmem:[#allocation3 + $0x50] sm:$0xff] %vm439_vm3, %v3920_v25  ;;  %v3987_v34 = vld [vmem:[#allocation3 + $0x1b] sm:$0xff]  ;;  %v3384_v3 = vpop.f32.mrf.mxu1 }
 0x216   : > { %v3885_v35 = vld [vmem:[#allocation3 + $0x58] sm:$0xff]  ;;  %4524 = vst.msk [vmem:[%s5151_s30 + $0x18] sm:$0xff] %vm439_vm3, %v3987_v34  ;;  %3954 = vst.msk [vmem:[#allocation3 + $0x40] sm:$0xff] %vm439_vm3, %v3918_v40  ;;  %v3525_v38 = vadd.f32 %v3489_v37, %v3384_v3  ;;  %v3779_v42 = vpop.f32.mrf.mxu0  ;;  %v3502_v37 = vld [vmem:[#allocation3 + $0xd0] sm:$0xff] }
 0x217   : > { %v3921_v14 = vadd.f32 %v5045_v22, %v3885_v35  ;;  %3563 = vst.msk [vmem:[#allocation3 + $0x78] sm:$0xff] %vm439_vm3, %v3527_v0  ;;  %v3996_v43 = vld [vmem:[#allocation3 + $0x37] sm:$0xff]  ;;  %v5014_v45 = vpop.f32.mrf.mxu1 }
 0x218   : > { %v3883_v28 = vld [vmem:[#allocation3 + $0x48] sm:$0xff]  ;;  %4527 = vst.msk [vmem:[%s5151_s30 + $0x30] sm:$0xff] %vm439_vm3, %v3996_v43  ;;  %3561 = vst.msk [vmem:[#allocation3 + $0x68] sm:$0xff] %vm439_vm3, %v3525_v38  ;;  %v3530_v48 = vadd.f32 %v5014_v45, %v3494_v29  ;;  %v5049_v8 = vpop.f32.mrf.mxu0  ;;  %v3499_v22 = vld [vmem:[#allocation3 + $0xb8] sm:$0xff] }
 0x219   : > { %3957 = vst.msk [vmem:[#allocation3 + $0x58] sm:$0xff] %vm439_vm3, %v3921_v14  ;;  %v3919_v46 = vadd.f32 %v3883_v28, %v3766_v27  ;;  %v3397_v49 = vpop.f32.mrf.mxu1  ;;  %v4061_v35 = vld [vmem:[%s5151_s30] sm:$0xff]  ;;  %v3500_v45 = vld [vmem:[#allocation3 + $0xc0] sm:$0xff]  ;;  %v4063_v29 = vld [vmem:[%s5151_s30 + $0x10] sm:$0xff] }
 0x21a   : > { %v3991_v32 = vld [vmem:[#allocation3 + $0x25] sm:$0xff]  ;;  %v3992_v44 = vld [vmem:[#allocation3 + $0x2d] sm:$0xff]  ;;  %3566 = vst.msk [vmem:[#allocation3 + $0x90] sm:$0xff] %vm439_vm3, %v3530_v48  ;;  %v3782_v52 = vpop.f32.mrf.mxu0  ;;  %v3528_v54 = vadd.f32 %v3492_v51, %v3397_v49 }
 0x21b   : > { %4525 = vst.msk [vmem:[%s5151_s30 + $0x20] sm:$0xff] %vm439_vm3, %v3991_v32  ;;  %3955 = vst.msk [vmem:[#allocation3 + $0x48] sm:$0xff] %vm439_vm3, %v3919_v46  ;;  %v3888_v50 = vld [vmem:[#allocation3 + $0x70] sm:$0xff]  ;;  %v3886_v53 = vld [vmem:[#allocation3 + $0x60] sm:$0xff]  ;;  %v5015_v56 = vpop.f32.mrf.mxu1  ;;  %v4169_v32 = vmul.f32 %v4061_v35, %v4061_v35 }
 0x21c   : > { %4526 = vst.msk [vmem:[%s5151_s30 + $0x28] sm:$0xff] %vm439_vm3, %v3992_v44  ;;  %v3924_v47 = vadd.f32 %v5048_v33, %v3888_v50  ;;  %v3922_v58 = vadd.f32 %v3886_v53, %v3779_v42  ;;  %v3531_v60 = vadd.f32 %v5015_v56, %v3495_v57  ;;  %v5052_v61 = vpop.f32.mrf.mxu0  ;;  %3564 = vst.msk [vmem:[#allocation3 + $0x80] sm:$0xff] %vm439_vm3, %v3528_v54  ;;  %v3503_v50 = vld [vmem:[#allocation3 + $0xd8] sm:$0xff] }
 0x21d   : > { %v3997_v62 = vld [vmem:[#allocation3 + $0x3f] sm:$0xff]  ;;  %v3400_v59 = vpop.f32.mrf.mxu1  ;;  %v4064_v51 = vld [vmem:[%s5151_s30 + $0x18] sm:$0xff]  ;;  %v4171_v54 = vmul.f32 %v4063_v29, %v4063_v29 }
 0x21e   : > { %3960 = vst.msk [vmem:[#allocation3 + $0x70] sm:$0xff] %vm439_vm3, %v3924_v47  ;;  %v3889_v63 = vld [vmem:[#allocation3 + $0x78] sm:$0xff]  ;;  %4528 = vst.msk [vmem:[%s5151_s30 + $0x38] sm:$0xff] %vm439_vm3, %v3997_v62  ;;  %v3529_v4 = vadd.f32 %v3493_v1, %v3400_v59  ;;  %v3795_v5 = vpop.f32.mrf.mxu0  ;;  %v4062_v62 = vld [vmem:[%s5151_s30 + $0x8] sm:$0xff] }
 0x21f   : > { %3958 = vst.msk [vmem:[#allocation3 + $0x60] sm:$0xff] %vm439_vm3, %v3922_v58  ;;  %v3925_v2 = vadd.f32 %v5049_v8, %v3889_v63  ;;  %3567 = vst.msk [vmem:[#allocation3 + $0x98] sm:$0xff] %vm439_vm3, %v3531_v60  ;;  %v3887_v7 = vld [vmem:[#allocation3 + $0x68] sm:$0xff]  ;;  %v5018_v9 = vpop.f32.mrf.mxu1 }
 0x220   : > { %v4002_v6 = vld [vmem:[#allocation3 + $0x51] sm:$0xff]  ;;  %v3923_v10 = vadd.f32 %v3887_v7, %v3782_v52  ;;  %3565 = vst.msk [vmem:[#allocation3 + $0x88] sm:$0xff] %vm439_vm3, %v3529_v4  ;;  %v5053_v18 = vpop.f32.mrf.mxu0  ;;  %v3534_v36 = vadd.f32 %v5018_v9, %v3498_v19  ;;  %v4094_v4 = vsel %vm439_vm3, %v4061_v35, 0.0  ;;  %v4095_v19 = vsel %vm439_vm3, %v4063_v29, 0.0 }
 0x221   : > { %4530 = vst.msk [vmem:[%s5151_s30 + $0x48] sm:$0xff] %vm439_vm3, %v4002_v6  ;;  %3961 = vst.msk [vmem:[#allocation3 + $0x78] sm:$0xff] %vm439_vm3, %v3925_v2  ;;  %v3892_v21 = vld [vmem:[#allocation3 + $0x90] sm:$0xff]  ;;  %v3413_v16 = vpop.f32.mrf.mxu1  ;;  %v4126_v6 = vsel %vm439_vm3, %v4064_v51, 0.0 }
 0x222   : > { %v4001_v13 = vld [vmem:[#allocation3 + $0x49] sm:$0xff]  ;;  %3959 = vst.msk [vmem:[#allocation3 + $0x68] sm:$0xff] %vm439_vm3, %v3923_v10  ;;  %v3928_v12 = vadd.f32 %v5052_v61, %v3892_v21  ;;  %v3798_v26 = vpop.f32.mrf.mxu0  ;;  %3570 = vst.msk [vmem:[#allocation3 + $0xb0] sm:$0xff] %vm439_vm3, %v3534_v36  ;;  %v3532_v20 = vadd.f32 %v3496_v17, %v3413_v16  ;;  %v4065_v56 = vld [vmem:[%s5151_s30 + $0x20] sm:$0xff]  ;;  %v4125_v17 = vsel %vm439_vm3, %v4062_v62, 0.0 }
 0x223   : > { %4529 = vst.msk [vmem:[%s5151_s30 + $0x40] sm:$0xff] %vm439_vm3, %v4001_v13  ;;  %v5019_v41 = vpop.f32.mrf.mxu1  ;;  %v3890_v15 = vld [vmem:[#allocation3 + $0x80] sm:$0xff]  ;;  %v3501_v61 = vld [vmem:[#allocation3 + $0xc8] sm:$0xff]  ;;  %v3506_v10 = vld [vmem:[#allocation3 + $0xf0] sm:$0xff]  ;;  %v4173_v13 = vmul.f32 %v4065_v56, %v4065_v56 }
 0x224   : > { %3964 = vst.msk [vmem:[#allocation3 + $0x90] sm:$0xff] %vm439_vm3, %v3928_v12  ;;  %v3535_v23 = vadd.f32 %v5019_v41, %v3499_v22  ;;  %v5056_v24 = vpop.f32.mrf.mxu0  ;;  %v3926_v25 = vadd.f32 %v3890_v15, %v3795_v5  ;;  %3568 = vst.msk [vmem:[#allocation3 + $0xa0] sm:$0xff] %vm439_vm3, %v3532_v20  ;;  %v4201_v5 = vsel %vm439_vm3, %v4169_v32, 0.0  ;;  %v4202_v12 = vsel %vm439_vm3, %v4171_v54, 0.0  ;;  %v3505_v32 = vld [vmem:[#allocation3 + $0xe8] sm:$0xff] }
 0x225   : > { %v3416_v27 = vpop.f32.mrf.mxu1  ;;  %v4096_v15 = vadd.f32 %v4095_v19, %v4094_v4 }
 0x226   : > { %v4006_v39 = vld [vmem:[#allocation3 + $0x5b] sm:$0xff]  ;;  %3571 = vst.msk [vmem:[#allocation3 + $0xb8] sm:$0xff] %vm439_vm3, %v3535_v23  ;;  %v3811_v55 = vpop.f32.mrf.mxu0  ;;  %3962 = vst.msk [vmem:[#allocation3 + $0x80] sm:$0xff] %vm439_vm3, %v3926_v25  ;;  %v3533_v33 = vadd.f32 %v3497_v31, %v3416_v27  ;;  %v4170_v23 = vmul.f32 %v4062_v62, %v4062_v62  ;;  %v4067_v25 = vld [vmem:[%s5151_s30 + $0x30] sm:$0xff]  ;;  %v4097_v31 = vsel %vm439_vm3, %v4065_v56, 0.0 }
 0x227   : > { %v3893_v11 = vld [vmem:[#allocation3 + $0x98] sm:$0xff]  ;;  %4531 = vst.msk [vmem:[%s5151_s30 + $0x50] sm:$0xff] %vm439_vm3, %v4006_v39  ;;  %v3891_v0 = vld [vmem:[#allocation3 + $0x88] sm:$0xff]  ;;  %v5022_v34 = vpop.f32.mrf.mxu1  ;;  %v4127_v39 = vadd.f32 %v4126_v6, %v4125_v17 }
 0x228   : > { %v3929_v30 = vadd.f32 %v5053_v18, %v3893_v11  ;;  %v4012_v40 = vld [vmem:[#allocation3 + $0x75] sm:$0xff]  ;;  %v3927_v3 = vadd.f32 %v3891_v0, %v3798_v26  ;;  %v5057_v14 = vpop.f32.mrf.mxu0  ;;  %3569 = vst.msk [vmem:[#allocation3 + $0xa8] sm:$0xff] %vm439_vm3, %v3533_v33  ;;  %v3538_v43 = vadd.f32 %v5022_v34, %v3502_v37  ;;  %v4066_v18 = vld [vmem:[%s5151_s30 + $0x28] sm:$0xff]  ;;  %v4172_v26 = vmul.f32 %v4064_v51, %v4064_v51 }
 0x229   : > { %4534 = vst.msk [vmem:[%s5151_s30 + $0x68] sm:$0xff] %vm439_vm3, %v4012_v40  ;;  %v4007_v38 = vld [vmem:[#allocation3 + $0x63] sm:$0xff]  ;;  %v4011_v42 = vld [vmem:[#allocation3 + $0x6d] sm:$0xff]  ;;  %v3429_v28 = vpop.f32.mrf.mxu1  ;;  %v4174_v40 = vmul.f32 %v4066_v18, %v4066_v18  ;;  %v4204_v37 = vsel %vm439_vm3, %v4173_v13, 0.0  ;;  %v4232_v56 = vsel %vm439_vm3, %v4170_v23, 0.0 }
 0x22a   : > { %3965 = vst.msk [vmem:[#allocation3 + $0x98] sm:$0xff] %vm439_vm3, %v3929_v30  ;;  %4532 = vst.msk [vmem:[%s5151_s30 + $0x58] sm:$0xff] %vm439_vm3, %v4007_v38  ;;  %v3896_v46 = vld [vmem:[#allocation3 + $0xb0] sm:$0xff]  ;;  %v3536_v48 = vadd.f32 %v3500_v45, %v3429_v28  ;;  %v3814_v8 = vpop.f32.mrf.mxu0  ;;  %v3504_v34 = vld [vmem:[#allocation3 + $0xe0] sm:$0xff]  ;;  %v4233_v28 = vsel %vm439_vm3, %v4172_v26, 0.0  ;;  %v4175_v45 = vmul.f32 %v4067_v25, %v4067_v25 }
 0x22b   : > { %4533 = vst.msk [vmem:[%s5151_s30 + $0x60] sm:$0xff] %vm439_vm3, %v4011_v42  ;;  %3963 = vst.msk [vmem:[#allocation3 + $0x88] sm:$0xff] %vm439_vm3, %v3927_v3  ;;  %v3932_v49 = vadd.f32 %v5056_v24, %v3896_v46  ;;  %v5023_v44 = vpop.f32.mrf.mxu1  ;;  %v3894_v52 = vld [vmem:[#allocation3 + $0xa0] sm:$0xff]  ;;  %v4203_v24 = vadd.f32 %v4202_v12, %v4201_v5  ;;  %v4068_v11 = vld [vmem:[%s5151_s30 + $0x38] sm:$0xff] }
 0x22c   : > { %3574 = vst.msk [vmem:[#allocation3 + $0xd0] sm:$0xff] %vm439_vm3, %v3538_v43  ;;  %3572 = vst.msk [vmem:[#allocation3 + $0xc0] sm:$0xff] %vm439_vm3, %v3536_v48  ;;  %v3539_v47 = vadd.f32 %v5023_v44, %v3503_v50  ;;  %v5060_v53 = vpop.f32.mrf.mxu0  ;;  %v3930_v57 = vadd.f32 %v3894_v52, %v3811_v55  ;;  %v4128_v55 = vsel %vm439_vm3, %v4066_v18, 0.0  ;;  %v3507_v3 = vld [vmem:[#allocation3 + $0xf8] sm:$0xff]  ;;  %v4130_v29 = vsel %vm439_vm3, %v4068_v11, 0.0  ;;  %v4070_v50 = vld [vmem:[%s5151_s30 + $0x48] sm:$0xff] }
 0x22d   : > { %3968 = vst.msk [vmem:[#allocation3 + $0xb0] sm:$0xff] %vm439_vm3, %v3932_v49  ;;  %v3897_v58 = vld [vmem:[#allocation3 + $0xb8] sm:$0xff]  ;;  %v3432_v60 = vpop.f32.mrf.mxu1  ;;  %v4176_v46 = vmul.f32 %v4068_v11, %v4068_v11  ;;  %v4098_v49 = vadd.f32 %v4097_v31, %v4096_v15  ;;  %v4129_v44 = vadd.f32 %v4128_v55, %v4127_v39  ;;  %v3510_v5 = vld [vmem:[#allocation3 + $0x110] sm:$0xff]  ;;  %v4132_v12 = vsel %vm439_vm3, %v4070_v50, 0.0 }
 0x22e   : > { %v4016_v63 = vld [vmem:[#allocation3 + $0x7f] sm:$0xff]  ;;  %v3933_v59 = vadd.f32 %v5057_v14, %v3897_v58  ;;  %3575 = vst.msk [vmem:[#allocation3 + $0xd8] sm:$0xff] %vm439_vm3, %v3539_v47  ;;  %v3537_v1 = vadd.f32 %v3501_v61, %v3432_v60  ;;  %v3827_v2 = vpop.f32.mrf.mxu0  ;;  %3966 = vst.msk [vmem:[#allocation3 + $0xa0] sm:$0xff] %vm439_vm3, %v3930_v57  ;;  %v4205_v57 = vadd.f32 %v4204_v37, %v4203_v24  ;;  %v4235_v58 = vsel %vm439_vm3, %v4174_v40, 0.0  ;;  %v4071_v19 = vld [vmem:[%s5151_s30 + $0x50] sm:$0xff] }
 0x22f   : > { %4535 = vst.msk [vmem:[%s5151_s30 + $0x70] sm:$0xff] %vm439_vm3, %v4016_v63  ;;  %v5026_v9 = vpop.f32.mrf.mxu1  ;;  %v3895_v21 = vld [vmem:[#allocation3 + $0xa8] sm:$0xff]  ;;  %v4069_v51 = vld [vmem:[%s5151_s30 + $0x40] sm:$0xff]  ;;  %v4234_v63 = vadd.f32 %v4233_v28, %v4232_v56  ;;  %v4179_v55 = vmul.f32 %v4071_v19, %v4071_v19 }
 0x230   : > { %3969 = vst.msk [vmem:[#allocation3 + $0xb8] sm:$0xff] %vm439_vm3, %v3933_v59  ;;  %3573 = vst.msk [vmem:[#allocation3 + $0xc8] sm:$0xff] %vm439_vm3, %v3537_v1  ;;  %v3542_v36 = vadd.f32 %v5026_v9, %v3506_v10  ;;  %v5061_v16 = vpop.f32.mrf.mxu0  ;;  %v3931_v41 = vadd.f32 %v3895_v21, %v3814_v8  ;;  %v4099_v59 = vsel %vm439_vm3, %v4067_v25, 0.0  ;;  %v4131_v1 = vadd.f32 %v4130_v29, %v4129_v44  ;;  %v4074_v40 = vld [vmem:[%s5151_s30 + $0x68] sm:$0xff] }
 0x231   : > { %v4021_v7 = vld [vmem:[#allocation3 + $0x91] sm:$0xff]  ;;  %v3445_v22 = vpop.f32.mrf.mxu1  ;;  %v4178_v9 = vmul.f32 %v4070_v50, %v4070_v50  ;;  %v4177_v10 = vmul.f32 %v4069_v51, %v4069_v51  ;;  %v4100_v17 = vadd.f32 %v4099_v59, %v4098_v49  ;;  %v4101_v31 = vsel %vm439_vm3, %v4069_v51, 0.0 }
 0x232   : > { %4537 = vst.msk [vmem:[%s5151_s30 + $0x80] sm:$0xff] %vm439_vm3, %v4021_v7  ;;  %v4017_v20 = vld [vmem:[#allocation3 + $0x87] sm:$0xff]  ;;  %3578 = vst.msk [vmem:[#allocation3 + $0xf0] sm:$0xff] %vm439_vm3, %v3542_v36  ;;  %v3830_v30 = vpop.f32.mrf.mxu0  ;;  %v3540_v38 = vadd.f32 %v3504_v34, %v3445_v22  ;;  %v4237_v7 = vsel %vm439_vm3, %v4176_v46, 0.0  ;;  %v4206_v36 = vsel %vm439_vm3, %v4175_v45, 0.0  ;;  %v4073_v23 = vld [vmem:[%s5151_s30 + $0x60] sm:$0xff]  ;;  %v4182_v49 = vmul.f32 %v4074_v40, %v4074_v40 }
 0x233   : > { %4536 = vst.msk [vmem:[%s5151_s30 + $0x78] sm:$0xff] %vm439_vm3, %v4017_v20  ;;  %v3900_v27 = vld [vmem:[#allocation3 + $0xd0] sm:$0xff]  ;;  %3967 = vst.msk [vmem:[#allocation3 + $0xa8] sm:$0xff] %vm439_vm3, %v3931_v41  ;;  %v3898_v33 = vld [vmem:[#allocation3 + $0xc0] sm:$0xff]  ;;  %v5027_v35 = vpop.f32.mrf.mxu1  ;;  %v4207_v15 = vadd.f32 %v4206_v36, %v4205_v57  ;;  %v4239_v37 = vsel %vm439_vm3, %v4178_v9, 0.0  ;;  %v4181_v29 = vmul.f32 %v4073_v23, %v4073_v23  ;;  %v4105_v59 = vsel %vm439_vm3, %v4073_v23, 0.0 }
 0x234   : > { %v3936_v0 = vadd.f32 %v5060_v53, %v3900_v27  ;;  %v3934_v14 = vadd.f32 %v3898_v33, %v3827_v2  ;;  %v3543_v42 = vadd.f32 %v5027_v35, %v3507_v3  ;;  %v5064_v43 = vpop.f32.mrf.mxu0  ;;  %3576 = vst.msk [vmem:[#allocation3 + $0xe0] sm:$0xff] %vm439_vm3, %v3540_v38  ;;  %v4072_v2 = vld [vmem:[%s5151_s30 + $0x58] sm:$0xff]  ;;  %v3508_v41 = vld [vmem:[#allocation3 + $0x100] sm:$0xff]  ;;  %v3511_v27 = vld [vmem:[#allocation3 + $0x118] sm:$0xff]  ;;  %v4133_v3 = vadd.f32 %v4132_v12, %v4131_v1 }
 0x235   : > { %v3901_v48 = vld [vmem:[#allocation3 + $0xd8] sm:$0xff]  ;;  %v3448_v8 = vpop.f32.mrf.mxu1  ;;  %v4180_v24 = vmul.f32 %v4072_v2, %v4072_v2  ;;  %v3509_v34 = vld [vmem:[#allocation3 + $0x108] sm:$0xff]  ;;  %v4103_v38 = vsel %vm439_vm3, %v4071_v19, 0.0  ;;  %v4134_v44 = vsel %vm439_vm3, %v4072_v2, 0.0  ;;  %v4212_v2 = vsel %vm439_vm3, %v4181_v29, 0.0 }
 0x236   : > { %3972 = vst.msk [vmem:[#allocation3 + $0xd0] sm:$0xff] %vm439_vm3, %v3936_v0  ;;  %v4022_v52 = vld [vmem:[#allocation3 + $0x99] sm:$0xff]  ;;  %3970 = vst.msk [vmem:[#allocation3 + $0xc0] sm:$0xff] %vm439_vm3, %v3934_v14  ;;  %v3937_v47 = vadd.f32 %v5061_v16, %v3901_v48  ;;  %v3541_v53 = vadd.f32 %v3505_v32, %v3448_v8  ;;  %v6010_v54 = vpop.f32.mrf.mxu0  ;;  %v4236_v16 = vadd.f32 %v4235_v58, %v4234_v63  ;;  %v4075_v0 = vld [vmem:[%s5151_s30 + $0x70] sm:$0xff]  ;;  %v4208_v14 = vsel %vm439_vm3, %v4177_v10, 0.0 }
 0x237   : > { %3579 = vst.msk [vmem:[#allocation3 + $0xf8] sm:$0xff] %vm439_vm3, %v3543_v42  ;;  %4538 = vst.msk [vmem:[%s5151_s30 + $0x88] sm:$0xff] %vm439_vm3, %v4022_v52  ;;  %v4031_v60 = vld [vmem:[#allocation3 + $0xb5] sm:$0xff]  ;;  %v3899_v61 = vld [vmem:[#allocation3 + $0xc8] sm:$0xff]  ;;  %v5030_v62 = vpop.f32.mrf.mxu1  ;;  %v4102_v32 = vadd.f32 %v4101_v31, %v4100_v17  ;;  %v4241_v50 = vsel %vm439_vm3, %v4180_v24, 0.0  ;;  %v4183_v56 = vmul.f32 %v4075_v0, %v4075_v0  ;;  %v4209_v58 = vadd.f32 %v4208_v14, %v4207_v15 }
 0x238   : > { %4541 = vst.msk [vmem:[%s5151_s30 + $0xa0] sm:$0xff] %vm439_vm3, %v4031_v60  ;;  %3973 = vst.msk [vmem:[#allocation3 + $0xd8] sm:$0xff] %vm439_vm3, %v3937_v47  ;;  %v3935_v4 = vadd.f32 %v3899_v61, %v3830_v30  ;;  %v5065_v6 = vpop.f32.mrf.mxu0  ;;  %v3546_v13 = vadd.f32 %v5030_v62, %v3510_v5  ;;  %v4238_v30 = vadd.f32 %v4237_v7, %v4236_v16  ;;  %v4136_v9 = vsel %vm439_vm3, %v4074_v40, 0.0 }
 0x239   : > { %3577 = vst.msk [vmem:[#allocation3 + $0xe8] sm:$0xff] %vm439_vm3, %v3541_v53  ;;  %v3904_v18 = vld [vmem:[#allocation3 + $0xf0] sm:$0xff]  ;;  %v3461_v21 = vpop.f32.mrf.mxu1  ;;  %v4210_v53 = vsel %vm439_vm3, %v4179_v55, 0.0  ;;  %v4104_v60 = vadd.f32 %v4103_v38, %v4102_v32  ;;  %v4077_v61 = vld [vmem:[%s5151_s30 + $0x80] sm:$0xff]  ;;  %v4135_v1 = vadd.f32 %v4134_v44, %v4133_v3  ;;  %v4243_v10 = vsel %vm439_vm3, %v4182_v49, 0.0 }
 0x23a   : > { %v4026_v26 = vld [vmem:[#allocation3 + $0xa3] sm:$0xff]  ;;  %v4027_v20 = vld [vmem:[#allocation3 + $0xab] sm:$0xff]  ;;  %3971 = vst.msk [vmem:[#allocation3 + $0xc8] sm:$0xff] %vm439_vm3, %v3935_v4  ;;  %v3846_v22 = vpop.f32.mrf.mxu0  ;;  %v3940_v39 = vadd.f32 %v5064_v43, %v3904_v18  ;;  %3582 = vst.msk [vmem:[#allocation3 + $0x110] sm:$0xff] %vm439_vm3, %v3546_v13  ;;  %v3544_v25 = vadd.f32 %v3508_v41, %v3461_v21  ;;  %v4240_v47 = vadd.f32 %v4239_v37, %v4238_v30  ;;  %v4107_v21 = vsel %vm439_vm3, %v4075_v0, 0.0 }
 0x23b   : > { %4539 = vst.msk [vmem:[%s5151_s30 + $0x90] sm:$0xff] %vm439_vm3, %v4026_v26  ;;  %4540 = vst.msk [vmem:[%s5151_s30 + $0x98] sm:$0xff] %vm439_vm3, %v4027_v20  ;;  %v5031_v11 = vpop.f32.mrf.mxu1  ;;  %v3902_v43 = vld [vmem:[#allocation3 + $0xe0] sm:$0xff]  ;;  %v4211_v7 = vadd.f32 %v4210_v53, %v4209_v58  ;;  %v4214_v36 = vsel %vm439_vm3, %v4183_v56, 0.0  ;;  %v4185_v16 = vmul.f32 %v4077_v61, %v4077_v61  ;;  %v4106_v26 = vadd.f32 %v4105_v59, %v4104_v60 }
 0x23c   : > { %v3547_v33 = vadd.f32 %v5031_v11, %v3511_v27  ;;  %v5068_v35 = vpop.f32.mrf.mxu0  ;;  %3976 = vst.msk [vmem:[#allocation3 + $0xf0] sm:$0xff] %vm439_vm3, %v3940_v39  ;;  %3580 = vst.msk [vmem:[#allocation3 + $0x100] sm:$0xff] %vm439_vm3, %v3544_v25  ;;  %v3938_v46 = vadd.f32 %v3902_v43, %v6010_v54  ;;  %v4076_v54 = vld [vmem:[%s5151_s30 + $0x78] sm:$0xff]  ;;  %v4242_v4 = vadd.f32 %v4241_v50, %v4240_v47  ;;  %v4109_v3 = vsel %vm439_vm3, %v4077_v61, 0.0 }
 0x23d   : > { %v4032_v42 = vld [vmem:[#allocation3 + $0xbd] sm:$0xff]  ;;  %v3464_v45 = vpop.f32.mrf.mxu1  ;;  %v4184_v19 = vmul.f32 %v4076_v54, %v4076_v54  ;;  %v4213_v20 = vadd.f32 %v4212_v2, %v4211_v7  ;;  %v4137_v24 = vadd.f32 %v4136_v9, %v4135_v1  ;;  %v4138_v39 = vsel %vm439_vm3, %v4076_v54, 0.0 }
 0x23e   : > { %v3905_v28 = vld [vmem:[#allocation3 + $0xf8] sm:$0xff]  ;;  %4542 = vst.msk [vmem:[%s5151_s30 + $0xa8] sm:$0xff] %vm439_vm3, %v4032_v42  ;;  %3583 = vst.msk [vmem:[#allocation3 + $0x118] sm:$0xff] %vm439_vm3, %v3547_v33  ;;  %v3545_v8 = vadd.f32 %v3509_v34, %v3464_v45  ;;  %v3859_v52 = vpop.f32.mrf.mxu0  ;;  %v4078_v5 = vld [vmem:[%s5151_s30 + $0x88] sm:$0xff]  ;;  %v4244_v25 = vadd.f32 %v4243_v10, %v4242_v4  ;;  %v4108_v30 = vadd.f32 %v4107_v21, %v4106_v26  ;;  %v4216_v37 = vsel %vm439_vm3, %v4185_v16, 0.0 }
 0x23f   : > { %v3941_v48 = vadd.f32 %v5065_v6, %v3905_v28  ;;  %3974 = vst.msk [vmem:[#allocation3 + $0xe0] sm:$0xff] %vm439_vm3, %v3938_v46  ;;  %v4186_v41 = vmul.f32 %v4078_v5, %v4078_v5  ;;  %v4215_v31 = vadd.f32 %v4214_v36, %v4213_v20  ;;  %v4245_v55 = vsel %vm439_vm3, %v4184_v19, 0.0  ;;  %v4081_v14 = vld [vmem:[%s5151_s30 + $0xa0] sm:$0xff] }
 0x240   : > { %v3903_v51 = vld [vmem:[#allocation3 + $0xe8] sm:$0xff]  ;;  %3581 = vst.msk [vmem:[#allocation3 + $0x108] sm:$0xff] %vm439_vm3, %v3545_v8  ;;  %v5069_v13 = vpop.f32.mrf.mxu0  ;;  %v4139_v43 = vadd.f32 %v4138_v39, %v4137_v24  ;;  %v4140_v28 = vsel %vm439_vm3, %v4078_v5, 0.0  ;;  %v4246_v46 = vadd.f32 %v4245_v55, %v4244_v25  ;;  %v4110_v50 = vadd.f32 %v4109_v3, %v4108_v30 }
 0x241   : > { %3977 = vst.msk [vmem:[#allocation3 + $0xf8] sm:$0xff] %vm439_vm3, %v3941_v48  ;;  %v3939_v57 = vadd.f32 %v3903_v51, %v3846_v22  ;;  %v4036_v62 = vld [vmem:[#allocation3 + $0xc7] sm:$0xff]  ;;  %v4037_v63 = vld [vmem:[#allocation3 + $0xcf] sm:$0xff]  ;;  %v4247_v45 = vsel %vm439_vm3, %v4186_v41, 0.0  ;;  %v4217_v51 = vadd.f32 %v4216_v37, %v4215_v31  ;;  %v4113_v4 = vsel %vm439_vm3, %v4081_v14, 0.0 }
 0x242   : > { %4543 = vst.msk [vmem:[%s5151_s30 + $0xb0] sm:$0xff] %vm439_vm3, %v4036_v62  ;;  %4544 = vst.msk [vmem:[%s5151_s30 + $0xb8] sm:$0xff] %vm439_vm3, %v4037_v63  ;;  %v3908_v6 = vld [vmem:[#allocation3 + $0x110] sm:$0xff]  ;;  %v4079_v18 = vld [vmem:[%s5151_s30 + $0x90] sm:$0xff]  ;;  %v3862_v34 = vpop.f32.mrf.mxu0  ;;  %v4141_v56 = vadd.f32 %v4140_v28, %v4139_v43  ;;  %v4248_v54 = vadd.f32 %v4247_v45, %v4246_v46 }
 0x243   : > { %3975 = vst.msk [vmem:[#allocation3 + $0xe8] sm:$0xff] %vm439_vm3, %v3939_v57  ;;  %v3944_v12 = vadd.f32 %v5068_v35, %v3908_v6  ;;  %v3906_v17 = vld [vmem:[#allocation3 + $0x100] sm:$0xff]  ;;  %v4080_v22 = vld [vmem:[%s5151_s30 + $0x98] sm:$0xff]  ;;  %v4187_v11 = vmul.f32 %v4079_v18, %v4079_v18  ;;  %v4111_v48 = vsel %vm439_vm3, %v4079_v18, 0.0 }
 0x244   : > { %v3942_v15 = vadd.f32 %v3906_v17, %v3859_v52  ;;  %v4188_v38 = vmul.f32 %v4080_v22, %v4080_v22  ;;  %v4189_v52 = vmul.f32 %v4081_v14, %v4081_v14  ;;  %v4142_v47 = vsel %vm439_vm3, %v4080_v22, 0.0 }
 0x245   : > { %v3909_v23 = vld [vmem:[#allocation3 + $0x118] sm:$0xff]  ;;  %v4082_v27 = vld [vmem:[%s5151_s30 + $0xa8] sm:$0xff]  ;;  %3980 = vst.msk [vmem:[#allocation3 + $0x110] sm:$0xff] %vm439_vm3, %v3944_v12  ;;  %v4218_v8 = vsel %vm439_vm3, %v4187_v11, 0.0  ;;  %v4112_v58 = vadd.f32 %v4111_v48, %v4110_v50  ;;  %v4143_v63 = vadd.f32 %v4142_v47, %v4141_v56 }
 0x246   : > { %v4041_v40 = vld [vmem:[#allocation3 + $0xd9] sm:$0xff]  ;;  %3978 = vst.msk [vmem:[#allocation3 + $0x100] sm:$0xff] %vm439_vm3, %v3942_v15  ;;  %v3945_v33 = vadd.f32 %v5069_v13, %v3909_v23  ;;  %v4190_v32 = vmul.f32 %v4082_v27, %v4082_v27  ;;  %v4249_v57 = vsel %vm439_vm3, %v4188_v38, 0.0  ;;  %v4219_v60 = vadd.f32 %v4218_v8, %v4217_v51 }
 0x247   : > { %v3907_v35 = vld [vmem:[#allocation3 + $0x108] sm:$0xff]  ;;  %4545 = vst.msk [vmem:[%s5151_s30 + $0xc0] sm:$0xff] %vm439_vm3, %v4041_v40  ;;  %v4144_v61 = vsel %vm439_vm3, %v4082_v27, 0.0  ;;  %v4220_v5 = vsel %vm439_vm3, %v4189_v52, 0.0  ;;  %v4250_v6 = vadd.f32 %v4249_v57, %v4248_v54  ;;  %v4114_v16 = vadd.f32 %v4113_v4, %v4112_v58 }
 0x248   : > { %v4047_v0 = vld [vmem:[#allocation3 + $0xf3] sm:$0xff]  ;;  %v3943_v42 = vadd.f32 %v3907_v35, %v3862_v34  ;;  %3981 = vst.msk [vmem:[#allocation3 + $0x118] sm:$0xff] %vm439_vm3, %v3945_v33  ;;  %v4251_v59 = vsel %vm439_vm3, %v4190_v32, 0.0  ;;  %v4145_v9 = vadd.f32 %v4144_v61, %v4143_v63  ;;  %v4221_v12 = vadd.f32 %v4220_v5, %v4219_v60 }
 0x249   : > { %4548 = vst.msk [vmem:[%s5151_s30 + $0xd8] sm:$0xff] %vm439_vm3, %v4047_v0  ;;  %v4083_v49 = vld [vmem:[%s5151_s30 + $0xb0] sm:$0xff]  ;;  %v4084_v53 = vld [vmem:[%s5151_s30 + $0xb8] sm:$0xff]  ;;  %v4252_v36 = vadd.f32 %v4251_v59, %v4250_v6 }
 0x24a   : > { %v4042_v29 = vld [vmem:[#allocation3 + $0xe1] sm:$0xff]  ;;  %v4046_v44 = vld [vmem:[#allocation3 + $0xeb] sm:$0xff]  ;;  %3979 = vst.msk [vmem:[#allocation3 + $0x108] sm:$0xff] %vm439_vm3, %v3943_v42  ;;  %v4191_v62 = vmul.f32 %v4083_v49, %v4083_v49  ;;  %v4192_v1 = vmul.f32 %v4084_v53, %v4084_v53  ;;  %v4115_v10 = vsel %vm439_vm3, %v4083_v49, 0.0  ;;  %v4146_v19 = vsel %vm439_vm3, %v4084_v53, 0.0 }
 0x24b   : > { %4546 = vst.msk [vmem:[%s5151_s30 + $0xc8] sm:$0xff] %vm439_vm3, %v4042_v29  ;;  %4547 = vst.msk [vmem:[%s5151_s30 + $0xd0] sm:$0xff] %vm439_vm3, %v4046_v44  ;;  %v4116_v25 = vadd.f32 %v4115_v10, %v4114_v16  ;;  %v4147_v11 = vadd.f32 %v4146_v19, %v4145_v9 }
 0x24c   : > { %v4222_v17 = vsel %vm439_vm3, %v4191_v62, 0.0  ;;  %v4253_v22 = vsel %vm439_vm3, %v4192_v1, 0.0 }
 0x24d   : > { %v4051_v2 = vld [vmem:[#allocation3 + $0xfd] sm:$0xff]  ;;  %v4223_v31 = vadd.f32 %v4222_v17, %v4221_v12  ;;  %v4254_v33 = vadd.f32 %v4253_v22, %v4252_v36  ;;  %v4093_v22 = vld [vmem:[%s6157_s5] sm:$0x1] }
 0x24e   : > { %v4085_v7 = vld [vmem:[%s5151_s30 + $0xc0] sm:$0xff]  ;;  %4549 = vst.msk [vmem:[%s5151_s30 + $0xe0] sm:$0xff] %vm439_vm3, %v4051_v2 }
 0x24f   : > { %v4193_v18 = vmul.f32 %v4085_v7, %v4085_v7  ;;  %v4057_v21 = vld [vmem:[#allocation3 + $0x117] sm:$0xff]  ;;  %v4117_v15 = vsel %vm439_vm3, %v4085_v7, 0.0 }
 0x250   : > { %v4088_v13 = vld [vmem:[%s5151_s30 + $0xd8] sm:$0xff]  ;;  %4552 = vst.msk [vmem:[%s5151_s30 + $0xf8] sm:$0xff] %vm439_vm3, %v4057_v21  ;;  %v4118_v34 = vadd.f32 %v4117_v15, %v4116_v25 }
 0x251   : > { %v4052_v20 = vld [vmem:[#allocation3 + $0x105] sm:$0xff]  ;;  %v4056_v41 = vld [vmem:[#allocation3 + $0x10f] sm:$0xff]  ;;  %v4224_v27 = vsel %vm439_vm3, %v4193_v18, 0.0  ;;  %v4196_v55 = vmul.f32 %v4088_v13, %v4088_v13  ;;  %v4150_v45 = vsel %vm439_vm3, %v4088_v13, 0.0 }
 0x252   : > { %v4086_v26 = vld [vmem:[%s5151_s30 + $0xc8] sm:$0xff]  ;;  %v4087_v23 = vld [vmem:[%s5151_s30 + $0xd0] sm:$0xff]  ;;  %4550 = vst.msk [vmem:[%s5151_s30 + $0xe8] sm:$0xff] %vm439_vm3, %v4052_v20  ;;  %4551 = vst.msk [vmem:[%s5151_s30 + $0xf0] sm:$0xff] %vm439_vm3, %v4056_v41  ;;  %v4225_v3 = vadd.f32 %v4224_v27, %v4223_v31 }
 0x253   : > { %v4148_v24 = vsel %vm439_vm3, %v4086_v26, 0.0  ;;  %v4194_v39 = vmul.f32 %v4086_v26, %v4086_v26  ;;  %v4195_v30 = vmul.f32 %v4087_v23, %v4087_v23  ;;  %v4119_v40 = vsel %vm439_vm3, %v4087_v23, 0.0 }
 0x254   : > { %v4149_v35 = vadd.f32 %v4148_v24, %v4147_v11  ;;  %v4120_v38 = vadd.f32 %v4119_v40, %v4118_v34  ;;  %v4257_v29 = vsel %vm439_vm3, %v4196_v55, 0.0  ;;  %v4168_v24 = vld [vmem:[%s6158_s6] sm:$0x1] }
 0x255   : > { %v4255_v0 = vsel %vm439_vm3, %v4194_v39, 0.0  ;;  %v4226_v37 = vsel %vm439_vm3, %v4195_v30, 0.0  ;;  %v4089_v14 = vld [vmem:[%s5151_s30 + $0xe0] sm:$0xff] }
 0x256   : > { %v4256_v42 = vadd.f32 %v4255_v0, %v4254_v33  ;;  %v4121_v43 = vsel %vm439_vm3, %v4089_v14, 0.0  ;;  %v4197_v28 = vmul.f32 %v4089_v14, %v4089_v14  ;;  %v4227_v48 = vadd.f32 %v4226_v37, %v4225_v3 }
 0x257   : > { %v4092_v46 = vld [vmem:[%s5151_s30 + $0xf8] sm:$0xff]  ;;  %v4122_v8 = vadd.f32 %v4121_v43, %v4120_v38  ;;  %v4151_v50 = vadd.f32 %v4150_v45, %v4149_v35 }
 0x258   : > { %v4228_v32 = vsel %vm439_vm3, %v4197_v28, 0.0  ;;  %v4200_v51 = vmul.f32 %v4092_v46, %v4092_v46  ;;  %v4258_v58 = vadd.f32 %v4257_v29, %v4256_v42  ;;  %v4154_v61 = vsel %vm439_vm3, %v4092_v46, 0.0 }
 0x259   : > { %v4090_v49 = vld [vmem:[%s5151_s30 + $0xe8] sm:$0xff]  ;;  %v4091_v44 = vld [vmem:[%s5151_s30 + $0xf0] sm:$0xff]  ;;  %v4229_v60 = vadd.f32 %v4228_v32, %v4227_v48 }
 0x25a   : > { %v4123_v52 = vsel %vm439_vm3, %v4091_v44, 0.0  ;;  %v4152_v47 = vsel %vm439_vm3, %v4090_v49, 0.0  ;;  %v4198_v53 = vmul.f32 %v4090_v49, %v4090_v49  ;;  %v4199_v57 = vmul.f32 %v4091_v44, %v4091_v44 }
 0x25b   : > { %v4124_v56 = vadd.f32 %v4123_v52, %v4122_v8  ;;  %v4153_v54 = vadd.f32 %v4152_v47, %v4151_v50  ;;  %v4261_v2 = vsel %vm439_vm3, %v4200_v51, 0.0 }
 0x25c   : > { %v4259_v62 = vsel %vm439_vm3, %v4198_v53, 0.0  ;;  %v4230_v59 = vsel %vm439_vm3, %v4199_v57, 0.0 }
 0x25d   : > { %v4155_v63 = vadd.f32 %v4154_v61, %v4153_v54  ;;  %v4260_v1 = vadd.f32 %v4259_v62, %v4258_v58  ;;  %v4231_v4 = vadd.f32 %v4230_v59, %v4229_v60  ;;  %v4156_v5 = vsel %vm439_vm3, %v4124_v56, 0.0 }
 0x25f   : > { %v4157_v6 = vsel %vm439_vm3, %v4155_v63, 0.0  ;;  %v4262_v7 = vadd.f32 %v4261_v2, %v4260_v1  ;;  %v4263_v10 = vsel %vm439_vm3, %v4231_v4, 0.0 }
 0x260   : > { %v4158_v9 = vadd.f32 %v4157_v6, %v4156_v5 }
 0x261   : > { %v4264_v19 = vsel %vm439_vm3, %v4262_v7, 0.0 }
 0x262   : > { %v4159_v18 = vrot.slane %v4158_v9, 4  ;;  %v4265_v13 = vadd.f32 %v4264_v19, %v4263_v10 }
 0x264   : > { %v4160_v21 = vadd.f32 %v4159_v18, %v4158_v9  ;;  %v4266_v36 = vrot.slane %v4265_v13, 4 }
 0x266   : > { %v4161_v16 = vrot.slane %v4160_v21, 2  ;;  %v4267_v12 = vadd.f32 %v4266_v36, %v4265_v13 }
 0x268   : > { %v4162_v17 = vadd.f32 %v4161_v16, %v4160_v21  ;;  %v4268_v26 = vrot.slane %v4267_v12, 2 }
 0x26a   : > { %v4163_v20 = vrot.slane %v4162_v17, 1  ;;  %v4269_v41 = vadd.f32 %v4268_v26, %v4267_v12 }
 0x26c   : > { %v4164_v15 = vadd.f32 %v4163_v20, %v4162_v17  ;;  %v4270_v23 = vrot.slane %v4269_v41, 1 }
 0x26e   : > { %v4165_v39 = vadd.f32 %v4164_v15, %v4093_v22  ;;  %v4271_v25 = vadd.f32 %v4270_v23, %v4269_v41 }
 0x270   : > { %4167 = vst.msk [vmem:[%s6157_s5] sm:$0x1] %vm4166_vm4, %v4165_v39  ;;  %v4272_v11 = vadd.f32 %v4271_v25, %v4168_v24 }
 0x272   : > { %4273 = vst.msk [vmem:[%s6158_s6] sm:$0x1] %vm4166_vm4, %v4272_v11 }
 0x273 PF: > { %s17_s21 = sadd.s32 1, %s5097_s21  }
 0x274   : > { %p14_p5 = scmp.ge.s32.totalorder %s17_s21, 4  }
 0x276   :  { %16 = sbr.rel (!%p14_p5) target bundleno = 1 (0x1), region = 109 }

</bundles_post_ra>
